<compile_context>
chip_gen: v7x
topology: tpu7x:2x2x1
jax: 0.10.0
libtpu: 0.0.40
codegen_flags: <defaults>
</compile_context>

<pallas_src>
import jax
import jax.numpy as jnp
from jax.experimental import pallas as pl
from jax.experimental.pallas import tpu as pltpu

_TAPS_3x3 = tuple((dy, dx) for dy in range(3) for dx in range(3))
_TAPS_2x2 = tuple((dy, dx) for dy in range(2) for dx in range(2))
_VMEM_LIMIT = 32 * 1024 * 1024  # safe scoped-VMEM request on v5e/v6e/v7x


# ----------------------------- Pallas kernels ------------------------------

def _accum_taps(load, w_ref, b_ref, offsets, m_out):
    """relu( sum_t load(off_t) @ w[t] + bias ), f32 accumulation on the MXU."""
    cout = w_ref.shape[-1]
    acc = jnp.zeros((m_out, cout), jnp.float32)
    for t, off in enumerate(offsets):
        acc = acc + jnp.dot(load(off), w_ref[t, :, :],
                            preferred_element_type=jnp.float32)
    return jnp.maximum(acc + b_ref[:, :], 0.0)


def _make_stem_kernel(wp, hs, off2, off3):
    """Fused stem: conv3x3/s2 -> conv3x3/s1 -> conv3x3/s1 (BN folded, ReLU)."""
    m_out = hs * wp

    def kernel(x_ref, mask_ref, w0_ref, b0_ref, w1_ref, b1_ref, w2_ref, b2_ref,
               o_ref, s1_ref, s2_ref):
        mask = mask_ref[:, :]                                   # (m_out, 1) f32

        # stem[0]: stride-2 conv as 2x2 taps over the padded space-to-depth view.
        y = _accum_taps(lambda o: x_ref[0, pl.ds(o, m_out), :],
                        w0_ref, b0_ref, off2, m_out) * mask
        s1_ref[...] = jnp.zeros_like(s1_ref)
        s1_ref[pl.ds(wp + 1, m_out), :] = y.astype(s1_ref.dtype)

        # stem[1]: stride-1 3x3 conv read from the zero-padded VMEM scratch.
        y = _accum_taps(lambda o: s1_ref[pl.ds(o, m_out), :],
                        w1_ref, b1_ref, off3, m_out) * mask
        s2_ref[...] = jnp.zeros_like(s2_ref)
        s2_ref[pl.ds(wp + 1, m_out), :] = y.astype(s2_ref.dtype)

        # stem[2]: stride-1 3x3 conv; garbage columns are dropped host-side.
        y = _accum_taps(lambda o: s2_ref[pl.ds(o, m_out), :],
                        w2_ref, b2_ref, off3, m_out)
        o_ref[0, :, :] = y.astype(o_ref.dtype)

    return kernel


def fused_stem(x0flat, mask, params, *, hs, ws, c):
    """stem[0..2] in one pallas_call; returns the flat (n, hs*(ws+2), c) output."""
    n, m_in, c0 = x0flat.shape
    wp = ws + 2
    m_out = hs * wp
    m_scr = (hs + 3) * wp                 # room for the shifted-slab overshoot
    off2 = tuple(dy * wp + dx for dy, dx in _TAPS_2x2)
    off3 = tuple(dy * wp + dx for dy, dx in _TAPS_3x3)
    (w0, b0), (w1, b1), (w2, b2) = (params["stem0"], params["stem1"],
                                    params["stem2"])

    def wspec(shape):
        return pl.BlockSpec(shape, lambda i: (0,) * len(shape))

    return pl.pallas_call(
        _make_stem_kernel(wp, hs, off2, off3),
        out_shape=jax.ShapeDtypeStruct((n, m_out, c), jnp.bfloat16),
        grid=(n,),
        in_specs=[pl.BlockSpec((1, m_in, c0), lambda i: (i, 0, 0)),
                  wspec(mask.shape),
                  wspec(w0.shape), wspec((1, c)),
                  wspec(w1.shape), wspec((1, c)),
                  wspec(w2.shape), wspec((1, c))],
        out_specs=pl.BlockSpec((1, m_out, c), lambda i: (i, 0, 0)),
        scratch_shapes=[pltpu.VMEM((m_scr, c), jnp.bfloat16),
                        pltpu.VMEM((m_scr, c), jnp.bfloat16)],
        compiler_params=pltpu.CompilerParams(
            dimension_semantics=("parallel",),
            vmem_limit_bytes=_VMEM_LIMIT),
    )(x0flat, mask,
      w0, b0.reshape(1, c), w1, b1.reshape(1, c), w2, b2.reshape(1, c))


def _make_flat_conv_kernel(offsets, m_out, has_proj):
    def kernel(*refs):
        if has_proj:
            x_ref, w_ref, b_ref, pw_ref, pb_ref, o_ref = refs
        else:
            x_ref, w_ref, b_ref, o_ref = refs
        y = _accum_taps(lambda o: x_ref[0, pl.ds(o, m_out), :],
                        w_ref, b_ref, offsets, m_out)
        if has_proj:
            y = jnp.dot(y.astype(pw_ref.dtype), pw_ref[:, :],
                        preferred_element_type=jnp.float32) + pb_ref[:, :]
        o_ref[0, :, :] = y.astype(o_ref.dtype)
    return kernel


def flat_conv(xflat, w, b, *, hs, ws, taps, proj=None, out_dtype=jnp.bfloat16):
    """Conv (BN folded, ReLU) on a flattened padded activation; optional 1x1 proj."""
    n, m_in, cin = xflat.shape
    n_taps, _, cout = w.shape
    wp = ws + 2
    m_out = hs * wp
    offsets = tuple(dy * wp + dx for dy, dx in taps)

    inputs = [xflat, w, b.reshape(1, cout)]
    in_specs = [pl.BlockSpec((1, m_in, cin), lambda i: (i, 0, 0)),
                pl.BlockSpec(w.shape, lambda i: (0, 0, 0)),
                pl.BlockSpec((1, cout), lambda i: (0, 0))]
    c_final = cout
    if proj is not None:
        pw, pb = proj
        c_final = pw.shape[-1]
        inputs += [pw, pb.reshape(1, c_final)]
        in_specs += [pl.BlockSpec(pw.shape, lambda i: (0, 0)),
                     pl.BlockSpec((1, c_final), lambda i: (0, 0))]

    return pl.pallas_call(
        _make_flat_conv_kernel(offsets, m_out, proj is not None),
        out_shape=jax.ShapeDtypeStruct((n, m_out, c_final), out_dtype),
        grid=(n,),
        in_specs=in_specs,
        out_specs=pl.BlockSpec((1, m_out, c_final), lambda i: (i, 0, 0)),
        compiler_params=pltpu.CompilerParams(
            dimension_semantics=("parallel",),
            vmem_limit_bytes=_VMEM_LIMIT),
    )(*inputs)


def _make_pool_kernel(ho):
    def kernel(t_ref, o_ref):
        # t_ref: (3, 2*ho+2, Wo, C) -- three W-shifted taps; o_ref: (1, ho, Wo, C)
        out = None
        for dx in range(3):
            v = t_ref[dx]                                  # (2*ho+2, Wo, C)
            v = v.reshape(ho + 1, 2, *v.shape[1:])         # split major dim only
            even, odd = v[:, 0], v[:, 1]
            m = jnp.maximum(jnp.maximum(even[:ho], odd[:ho]), even[1:ho + 1])
            out = m if out is None else jnp.maximum(out, m)
        o_ref[0] = out
    return kernel


def maxpool_3x3_s2(x):
    """3x3 / stride-2 / pad-1 max-pool on NHWC (post-ReLU input, so 0-pad == -inf)."""
    n, h, w, c = x.shape
    ho, wo = h // 2, w // 2
    xw = jnp.pad(x, ((0, 0), (0, 0), (1, 1), (0, 0)))
    taps = jnp.stack([xw[:, :, dx:dx + 2 * wo:2, :] for dx in range(3)], axis=1)
    taps = jnp.pad(taps, ((0, 0), (0, 0), (1, 1), (0, 0), (0, 0)))
    taps = taps.reshape(n * 3, h + 2, wo, c)
    return pl.pallas_call(
        _make_pool_kernel(ho),
        out_shape=jax.ShapeDtypeStruct((n, ho, wo, c), x.dtype),
        grid=(n,),
        in_specs=[pl.BlockSpec((3, h + 2, wo, c), lambda i: (i, 0, 0, 0))],
        out_specs=pl.BlockSpec((1, ho, wo, c), lambda i: (i, 0, 0, 0)),
        compiler_params=pltpu.CompilerParams(
            dimension_semantics=("parallel",),
            vmem_limit_bytes=_VMEM_LIMIT),
    )(taps)


# ------------------------------- host glue ----------------------------------

def _space_to_depth2(x):
    # (N, H, W, C) -> (N, H/2, W/2, 4C); channel order (p, q) sub-pixel major.
    n, h, w, c = x.shape
    x = x.reshape(n, h // 2, 2, w // 2, 2, c)
    x = jnp.transpose(x, (0, 1, 3, 2, 4, 5))
    return x.reshape(n, h // 2, w // 2, 4 * c)


def _flatten_pad_s2d(x):
    """space-to-depth, zero-pad one cell on every side, flatten the rows."""
    y = _space_to_depth2(x)
    n, hs, ws, c4 = y.shape
    y = jnp.pad(y, ((0, 0), (1, 1), (1, 1), (0, 0)))
    return y.reshape(n, (hs + 2) * (ws + 2), c4), hs, ws


def _unflatten_valid(yflat, hs, ws):
    n, _, c = yflat.shape
    return yflat.reshape(n, hs, ws + 2, c)[:, :, :ws, :]


def _col_mask(hs, ws):
    # 1.0 on valid columns of the flat (hs, ws+2) grid, 0.0 on garbage columns.
    wp = ws + 2
    col = jnp.arange(hs * wp, dtype=jnp.int32) % wp
    return (col < ws).astype(jnp.float32).reshape(hs * wp, 1)


# ------------------------- parameter preparation ----------------------------

def _taps_stride1(w_oihw):
    # (Cout, Cin, 3, 3) -> (9, Cin, Cout), taps ordered (kh, kw).
    return jnp.stack([w_oihw[:, :, kh, kw].T
                      for kh in range(3) for kw in range(3)], axis=0)


def _taps_stride2_s2d(w_oihw):
    # (Cout, Cin, 3, 3) -> (4, 4*Cin, Cout): 2x2 taps over the space-to-depth
    # input (rows ordered (p, q) sub-pixel major, Cin minor).
    cout, cin = w_oihw.shape[:2]
    taps = []
    for di in range(2):
        for dj in range(2):
            m = jnp.zeros((4 * cin, cout), jnp.float32)
            for p in range(2):
                for q in range(2):
                    kh, kw = 2 * di + p - 1, 2 * dj + q - 1
                    if 0 <= kh < 3 and 0 <= kw < 3:
                        m = m.at[(2 * p + q) * cin:(2 * p + q + 1) * cin, :].set(
                            w_oihw[:, :, kh, kw].T)
            taps.append(m)
    return jnp.stack(taps, axis=0)


def _fold_bn(taps, gamma, beta, mean, var, eps=1e-5):
    # Inference-mode BN folded into the conv: y = conv(x)*scale + bias.
    scale = gamma / jnp.sqrt(var + eps)
    bias = beta - mean * scale
    w = (taps * scale[None, None, :]).astype(jnp.bfloat16)
    return w, bias.astype(jnp.float32)


def make_params(key, inplanes, prior_dim):
    ks = jax.random.split(key, 12)

    def conv_w(k, cout, cin):
        return jax.random.normal(k, (cout, cin, 3, 3), jnp.float32) * 0.05

    def bn_stats(k, c):
        k1, k2, k3, k4 = jax.random.split(k, 4)
        gamma = 1.0 + 0.1 * jax.random.normal(k1, (c,), jnp.float32)
        beta = 0.1 * jax.random.normal(k2, (c,), jnp.float32)
        mean = 0.1 * jax.random.normal(k3, (c,), jnp.float32)
        var = 1.0 + 0.1 * jax.random.uniform(k4, (c,), jnp.float32)
        return gamma, beta, mean, var

    params = {
        "stem0": _fold_bn(_taps_stride2_s2d(conv_w(ks[0], inplanes, 1)),
                          *bn_stats(ks[1], inplanes)),
        "stem1": _fold_bn(_taps_stride1(conv_w(ks[2], inplanes, inplanes)),
                          *bn_stats(ks[3], inplanes)),
        "stem2": _fold_bn(_taps_stride1(conv_w(ks[4], inplanes, inplanes)),
                          *bn_stats(ks[5], inplanes)),
        "conv2": _fold_bn(_taps_stride2_s2d(conv_w(ks[6], 2 * inplanes, inplanes)),
                          *bn_stats(ks[7], 2 * inplanes)),
        "conv3": _fold_bn(_taps_stride2_s2d(conv_w(ks[8], 4 * inplanes, 2 * inplanes)),
                          *bn_stats(ks[9], 4 * inplanes)),
    }
    if prior_dim == 4 * inplanes:
        params["fc"] = None  # nn.Identity
    else:
        fw = jax.random.normal(ks[10], (prior_dim, 4 * inplanes), jnp.float32) * 0.05
        fb = 0.05 * jax.random.normal(ks[11], (prior_dim,), jnp.float32)
        params["fc"] = (fw.T.astype(jnp.bfloat16), fb.astype(jnp.float32))
    return params


# ------------------------------ forward pass --------------------------------

def prior_extraction_forward(x_nchw, params):
    # x: (N, 1, H, W) NCHW -> NHWC; bf16 activations between layers.
    x = jnp.transpose(x_nchw.astype(jnp.float32), (0, 2, 3, 1)).astype(jnp.bfloat16)
    n = x.shape[0]
    c = params["stem1"][0].shape[-1]              # = inplanes

    # stem[0..2]: conv/s2 + conv/s1 + conv/s1 (BN + ReLU), one fused kernel.
    x0, hs, ws = _flatten_pad_s2d(x)
    y = fused_stem(x0, _col_mask(hs, ws), params, hs=hs, ws=ws, c=c)
    x = _unflatten_valid(y, hs, ws)               # (N, H/2, W/2, C)

    # stem max-pool 3x3 / s2 / pad 1.
    x = maxpool_3x3_s2(x)                         # (N, H/4, W/4, C)

    # conv2: 3x3/s2 conv + BN + ReLU.
    w, b = params["conv2"]
    x2, h2, w2 = _flatten_pad_s2d(x)
    y = flat_conv(x2, w, b, hs=h2, ws=w2, taps=_TAPS_2x2)
    x = _unflatten_valid(y, h2, w2)               # (N, H/8, W/8, 2C)

    # conv3: 3x3/s2 conv + BN + ReLU, 1x1 fc (+bias) fused into the epilogue.
    w, b = params["conv3"]
    x3, h3, w3 = _flatten_pad_s2d(x)
    y = flat_conv(x3, w, b, hs=h3, ws=w3, taps=_TAPS_2x2,
                  proj=params["fc"], out_dtype=jnp.float32)
    y = _unflatten_valid(y, h3, w3)               # (N, H/16, W/16, prior_dim)

    # torch: view(bs, dim, -1).transpose(1, 2)  ==  NHWC spatial flatten.
    return y.reshape(n, h3 * w3, y.shape[-1])


# ---------------------------------- main -------------------------------------

if __name__ == "__main__":
    inplanes, prior_dim = 16, 32
    key = jax.random.PRNGKey(0)
    kp, kx = jax.random.split(key)
    params = make_params(kp, inplanes, prior_dim)

    # (batch=2, channels=1, 32, 32) — the module's first conv has in_channels=1.
    x = jax.random.normal(kx, (2, 1, 32, 32), jnp.float32)

    fwd = jax.jit(prior_extraction_forward)
    out = jax.block_until_ready(fwd(x, params))

    # 32 -> 16 (stem s2) -> 16 -> 16 -> 8 (pool) -> 4 (conv2) -> 2 (conv3)
    assert out.shape == (2, 4, prior_dim), out.shape
    assert out.dtype == jnp.float32
    print("KERNEL_OK")
</pallas_src>

<mosaic_0001>
module attributes {stable_mosaic.version = 11 : i64} {
  func.func @kernel(%arg0: i32, %arg1: memref<1x324x4xbf16, #tpu.memory_space<vmem>>, %arg2: memref<288x1xf32, #tpu.memory_space<vmem>>, %arg3: memref<4x4x16xbf16, #tpu.memory_space<vmem>>, %arg4: memref<1x16xf32, #tpu.memory_space<vmem>>, %arg5: memref<9x16x16xbf16, #tpu.memory_space<vmem>>, %arg6: memref<1x16xf32, #tpu.memory_space<vmem>>, %arg7: memref<9x16x16xbf16, #tpu.memory_space<vmem>>, %arg8: memref<1x16xf32, #tpu.memory_space<vmem>>, %arg9: memref<1x288x16xbf16, #tpu.memory_space<vmem>>, %arg10: memref<342x16xbf16, #tpu.memory_space<vmem>>, %arg11: memref<342x16xbf16, #tpu.memory_space<vmem>>) attributes {dimension_semantics = [#tpu.dimension_semantics<parallel>], iteration_bounds = array<i64: 2>, scalar_prefetch = 0 : i64, scratch_operands = 2 : i64, tpu.core_type = #tpu.core_type<tc>, window_params = [{transform_indices = @transform_0, window_bounds = array<i64: 1, 324, 4>}, {pipeline_mode = #tpu.pipeline_mode<synchronous>, transform_indices = @transform_1, window_bounds = array<i64: 288, 1>}, {pipeline_mode = #tpu.pipeline_mode<synchronous>, transform_indices = @transform_2, window_bounds = array<i64: 4, 4, 16>}, {pipeline_mode = #tpu.pipeline_mode<synchronous>, transform_indices = @transform_3, window_bounds = array<i64: 1, 16>}, {pipeline_mode = #tpu.pipeline_mode<synchronous>, transform_indices = @transform_4, window_bounds = array<i64: 9, 16, 16>}, {pipeline_mode = #tpu.pipeline_mode<synchronous>, transform_indices = @transform_5, window_bounds = array<i64: 1, 16>}, {pipeline_mode = #tpu.pipeline_mode<synchronous>, transform_indices = @transform_6, window_bounds = array<i64: 9, 16, 16>}, {pipeline_mode = #tpu.pipeline_mode<synchronous>, transform_indices = @transform_7, window_bounds = array<i64: 1, 16>}, {transform_indices = @transform_8, window_bounds = array<i64: 1, 288, 16>}]} {
    %c0 = arith.constant 0 : index
    %c0_0 = arith.constant 0 : index
    %0 = vector.load %arg2[%c0, %c0_0] : memref<288x1xf32, #tpu.memory_space<vmem>>, vector<288x1xf32>
    %cst = arith.constant 0.000000e+00 : f32
    %1 = vector.broadcast %cst : f32 to vector<288x16xf32>
    %c0_1 = arith.constant 0 : index
    %c0_2 = arith.constant 0 : index
    %c0_3 = arith.constant 0 : index
    %2 = vector.load %arg1[%c0_1, %c0_2, %c0_3] : memref<1x324x4xbf16, #tpu.memory_space<vmem>>, vector<1x288x4xbf16>
    %3 = vector.shape_cast %2 : vector<1x288x4xbf16> to vector<288x4xbf16>
    %c0_4 = arith.constant 0 : index
    %c0_5 = arith.constant 0 : index
    %c0_6 = arith.constant 0 : index
    %4 = vector.load %arg3[%c0_4, %c0_5, %c0_6] : memref<4x4x16xbf16, #tpu.memory_space<vmem>>, vector<1x4x16xbf16>
    %5 = vector.shape_cast %4 : vector<1x4x16xbf16> to vector<4x16xbf16>
    %cst_7 = arith.constant dense<0.000000e+00> : vector<288x16xf32>
    %6 = tpu.matmul %3, %5, %cst_7 {dimension_numbers = #tpu.dot_dimension_numbers<[1], [0], [0], [1], [0, 0, 1, 1], [], []>} : vector<288x4xbf16>, vector<4x16xbf16>, vector<288x16xf32> -> vector<288x16xf32>
    %7 = arith.addf %1, %6 : vector<288x16xf32>
    %c0_8 = arith.constant 0 : index
    %c1 = arith.constant 1 : index
    %c0_9 = arith.constant 0 : index
    %8 = vector.load %arg1[%c0_8, %c1, %c0_9] : memref<1x324x4xbf16, #tpu.memory_space<vmem>>, vector<1x288x4xbf16>
    %9 = vector.shape_cast %8 : vector<1x288x4xbf16> to vector<288x4xbf16>
    %c1_10 = arith.constant 1 : index
    %c0_11 = arith.constant 0 : index
    %c0_12 = arith.constant 0 : index
    %10 = vector.load %arg3[%c1_10, %c0_11, %c0_12] : memref<4x4x16xbf16, #tpu.memory_space<vmem>>, vector<1x4x16xbf16>
    %11 = vector.shape_cast %10 : vector<1x4x16xbf16> to vector<4x16xbf16>
    %cst_13 = arith.constant dense<0.000000e+00> : vector<288x16xf32>
    %12 = tpu.matmul %9, %11, %cst_13 {dimension_numbers = #tpu.dot_dimension_numbers<[1], [0], [0], [1], [0, 0, 1, 1], [], []>} : vector<288x4xbf16>, vector<4x16xbf16>, vector<288x16xf32> -> vector<288x16xf32>
    %13 = arith.addf %7, %12 : vector<288x16xf32>
    %c0_14 = arith.constant 0 : index
    %c18 = arith.constant 18 : index
    %c0_15 = arith.constant 0 : index
    %14 = vector.load %arg1[%c0_14, %c18, %c0_15] : memref<1x324x4xbf16, #tpu.memory_space<vmem>>, vector<1x288x4xbf16>
    %15 = vector.shape_cast %14 : vector<1x288x4xbf16> to vector<288x4xbf16>
    %c2 = arith.constant 2 : index
    %c0_16 = arith.constant 0 : index
    %c0_17 = arith.constant 0 : index
    %16 = vector.load %arg3[%c2, %c0_16, %c0_17] : memref<4x4x16xbf16, #tpu.memory_space<vmem>>, vector<1x4x16xbf16>
    %17 = vector.shape_cast %16 : vector<1x4x16xbf16> to vector<4x16xbf16>
    %cst_18 = arith.constant dense<0.000000e+00> : vector<288x16xf32>
    %18 = tpu.matmul %15, %17, %cst_18 {dimension_numbers = #tpu.dot_dimension_numbers<[1], [0], [0], [1], [0, 0, 1, 1], [], []>} : vector<288x4xbf16>, vector<4x16xbf16>, vector<288x16xf32> -> vector<288x16xf32>
    %19 = arith.addf %13, %18 : vector<288x16xf32>
    %c0_19 = arith.constant 0 : index
    %c19 = arith.constant 19 : index
    %c0_20 = arith.constant 0 : index
    %20 = vector.load %arg1[%c0_19, %c19, %c0_20] : memref<1x324x4xbf16, #tpu.memory_space<vmem>>, vector<1x288x4xbf16>
    %21 = vector.shape_cast %20 : vector<1x288x4xbf16> to vector<288x4xbf16>
    %c3 = arith.constant 3 : index
    %c0_21 = arith.constant 0 : index
    %c0_22 = arith.constant 0 : index
    %22 = vector.load %arg3[%c3, %c0_21, %c0_22] : memref<4x4x16xbf16, #tpu.memory_space<vmem>>, vector<1x4x16xbf16>
    %23 = vector.shape_cast %22 : vector<1x4x16xbf16> to vector<4x16xbf16>
    %cst_23 = arith.constant dense<0.000000e+00> : vector<288x16xf32>
    %24 = tpu.matmul %21, %23, %cst_23 {dimension_numbers = #tpu.dot_dimension_numbers<[1], [0], [0], [1], [0, 0, 1, 1], [], []>} : vector<288x4xbf16>, vector<4x16xbf16>, vector<288x16xf32> -> vector<288x16xf32>
    %25 = arith.addf %19, %24 : vector<288x16xf32>
    %c0_24 = arith.constant 0 : index
    %c0_25 = arith.constant 0 : index
    %26 = vector.load %arg4[%c0_24, %c0_25] : memref<1x16xf32, #tpu.memory_space<vmem>>, vector<1x16xf32>
    %27 = vector.broadcast %26 : vector<1x16xf32> to vector<288x16xf32>
    %28 = arith.addf %25, %27 : vector<288x16xf32>
    %cst_26 = arith.constant 0.000000e+00 : f32
    %29 = vector.broadcast %cst_26 : f32 to vector<288x16xf32>
    %30 = arith.maximumf %28, %29 : vector<288x16xf32>
    %31 = vector.broadcast %0 : vector<288x1xf32> to vector<288x16xf32>
    %32 = arith.mulf %30, %31 : vector<288x16xf32>
    %cst_27 = arith.constant 0.000000e+00 : bf16
    %33 = vector.broadcast %cst_27 : bf16 to vector<342x16xbf16>
    %c0_28 = arith.constant 0 : index
    %c0_29 = arith.constant 0 : index
    %34 = vector.load %arg10[%c0_28, %c0_29] : memref<342x16xbf16, #tpu.memory_space<vmem>>, vector<342x16xbf16>
    tpu.vector_store %arg10[%c0_28, %c0_29], %33 {strides = array<i32>} : memref<342x16xbf16, #tpu.memory_space<vmem>>, vector<342x16xbf16>,
    %35 = arith.truncf %32 : vector<288x16xf32> to vector<288x16xbf16>
    %c19_30 = arith.constant 19 : index
    %c0_31 = arith.constant 0 : index
    %36 = vector.load %arg10[%c19_30, %c0_31] : memref<342x16xbf16, #tpu.memory_space<vmem>>, vector<288x16xbf16>
    tpu.vector_store %arg10[%c19_30, %c0_31], %35 {strides = array<i32>} : memref<342x16xbf16, #tpu.memory_space<vmem>>, vector<288x16xbf16>,
    %cst_32 = arith.constant 0.000000e+00 : f32
    %37 = vector.broadcast %cst_32 : f32 to vector<288x16xf32>
    %c0_33 = arith.constant 0 : index
    %c0_34 = arith.constant 0 : index
    %38 = vector.load %arg10[%c0_33, %c0_34] : memref<342x16xbf16, #tpu.memory_space<vmem>>, vector<288x16xbf16>
    %c0_35 = arith.constant 0 : index
    %c0_36 = arith.constant 0 : index
    %c0_37 = arith.constant 0 : index
    %39 = vector.load %arg5[%c0_35, %c0_36, %c0_37] : memref<9x16x16xbf16, #tpu.memory_space<vmem>>, vector<1x16x16xbf16>
    %40 = vector.shape_cast %39 : vector<1x16x16xbf16> to vector<16x16xbf16>
    %cst_38 = arith.constant dense<0.000000e+00> : vector<288x16xf32>
    %41 = tpu.matmul %38, %40, %cst_38 {dimension_numbers = #tpu.dot_dimension_numbers<[1], [0], [0], [1], [0, 0, 1, 1], [], []>} : vector<288x16xbf16>, vector<16x16xbf16>, vector<288x16xf32> -> vector<288x16xf32>
    %42 = arith.addf %37, %41 : vector<288x16xf32>
    %c1_39 = arith.constant 1 : index
    %c0_40 = arith.constant 0 : index
    %43 = vector.load %arg10[%c1_39, %c0_40] : memref<342x16xbf16, #tpu.memory_space<vmem>>, vector<288x16xbf16>
    %c1_41 = arith.constant 1 : index
    %c0_42 = arith.constant 0 : index
    %c0_43 = arith.constant 0 : index
    %44 = vector.load %arg5[%c1_41, %c0_42, %c0_43] : memref<9x16x16xbf16, #tpu.memory_space<vmem>>, vector<1x16x16xbf16>
    %45 = vector.shape_cast %44 : vector<1x16x16xbf16> to vector<16x16xbf16>
    %cst_44 = arith.constant dense<0.000000e+00> : vector<288x16xf32>
    %46 = tpu.matmul %43, %45, %cst_44 {dimension_numbers = #tpu.dot_dimension_numbers<[1], [0], [0], [1], [0, 0, 1, 1], [], []>} : vector<288x16xbf16>, vector<16x16xbf16>, vector<288x16xf32> -> vector<288x16xf32>
    %47 = arith.addf %42, %46 : vector<288x16xf32>
    %c2_45 = arith.constant 2 : index
    %c0_46 = arith.constant 0 : index
    %48 = vector.load %arg10[%c2_45, %c0_46] : memref<342x16xbf16, #tpu.memory_space<vmem>>, vector<288x16xbf16>
    %c2_47 = arith.constant 2 : index
    %c0_48 = arith.constant 0 : index
    %c0_49 = arith.constant 0 : index
    %49 = vector.load %arg5[%c2_47, %c0_48, %c0_49] : memref<9x16x16xbf16, #tpu.memory_space<vmem>>, vector<1x16x16xbf16>
    %50 = vector.shape_cast %49 : vector<1x16x16xbf16> to vector<16x16xbf16>
    %cst_50 = arith.constant dense<0.000000e+00> : vector<288x16xf32>
    %51 = tpu.matmul %48, %50, %cst_50 {dimension_numbers = #tpu.dot_dimension_numbers<[1], [0], [0], [1], [0, 0, 1, 1], [], []>} : vector<288x16xbf16>, vector<16x16xbf16>, vector<288x16xf32> -> vector<288x16xf32>
    %52 = arith.addf %47, %51 : vector<288x16xf32>
    %c18_51 = arith.constant 18 : index
    %c0_52 = arith.constant 0 : index
    %53 = vector.load %arg10[%c18_51, %c0_52] : memref<342x16xbf16, #tpu.memory_space<vmem>>, vector<288x16xbf16>
    %c3_53 = arith.constant 3 : index
    %c0_54 = arith.constant 0 : index
    %c0_55 = arith.constant 0 : index
    %54 = vector.load %arg5[%c3_53, %c0_54, %c0_55] : memref<9x16x16xbf16, #tpu.memory_space<vmem>>, vector<1x16x16xbf16>
    %55 = vector.shape_cast %54 : vector<1x16x16xbf16> to vector<16x16xbf16>
    %cst_56 = arith.constant dense<0.000000e+00> : vector<288x16xf32>
    %56 = tpu.matmul %53, %55, %cst_56 {dimension_numbers = #tpu.dot_dimension_numbers<[1], [0], [0], [1], [0, 0, 1, 1], [], []>} : vector<288x16xbf16>, vector<16x16xbf16>, vector<288x16xf32> -> vector<288x16xf32>
    %57 = arith.addf %52, %56 : vector<288x16xf32>
    %c19_57 = arith.constant 19 : index
    %c0_58 = arith.constant 0 : index
    %58 = vector.load %arg10[%c19_57, %c0_58] : memref<342x16xbf16, #tpu.memory_space<vmem>>, vector<288x16xbf16>
    %c4 = arith.constant 4 : index
    %c0_59 = arith.constant 0 : index
    %c0_60 = arith.constant 0 : index
    %59 = vector.load %arg5[%c4, %c0_59, %c0_60] : memref<9x16x16xbf16, #tpu.memory_space<vmem>>, vector<1x16x16xbf16>
    %60 = vector.shape_cast %59 : vector<1x16x16xbf16> to vector<16x16xbf16>
    %cst_61 = arith.constant dense<0.000000e+00> : vector<288x16xf32>
    %61 = tpu.matmul %58, %60, %cst_61 {dimension_numbers = #tpu.dot_dimension_numbers<[1], [0], [0], [1], [0, 0, 1, 1], [], []>} : vector<288x16xbf16>, vector<16x16xbf16>, vector<288x16xf32> -> vector<288x16xf32>
    %62 = arith.addf %57, %61 : vector<288x16xf32>
    %c20 = arith.constant 20 : index
    %c0_62 = arith.constant 0 : index
    %63 = vector.load %arg10[%c20, %c0_62] : memref<342x16xbf16, #tpu.memory_space<vmem>>, vector<288x16xbf16>
    %c5 = arith.constant 5 : index
    %c0_63 = arith.constant 0 : index
    %c0_64 = arith.constant 0 : index
    %64 = vector.load %arg5[%c5, %c0_63, %c0_64] : memref<9x16x16xbf16, #tpu.memory_space<vmem>>, vector<1x16x16xbf16>
    %65 = vector.shape_cast %64 : vector<1x16x16xbf16> to vector<16x16xbf16>
    %cst_65 = arith.constant dense<0.000000e+00> : vector<288x16xf32>
    %66 = tpu.matmul %63, %65, %cst_65 {dimension_numbers = #tpu.dot_dimension_numbers<[1], [0], [0], [1], [0, 0, 1, 1], [], []>} : vector<288x16xbf16>, vector<16x16xbf16>, vector<288x16xf32> -> vector<288x16xf32>
    %67 = arith.addf %62, %66 : vector<288x16xf32>
    %c36 = arith.constant 36 : index
    %c0_66 = arith.constant 0 : index
    %68 = vector.load %arg10[%c36, %c0_66] : memref<342x16xbf16, #tpu.memory_space<vmem>>, vector<288x16xbf16>
    %c6 = arith.constant 6 : index
    %c0_67 = arith.constant 0 : index
    %c0_68 = arith.constant 0 : index
    %69 = vector.load %arg5[%c6, %c0_67, %c0_68] : memref<9x16x16xbf16, #tpu.memory_space<vmem>>, vector<1x16x16xbf16>
    %70 = vector.shape_cast %69 : vector<1x16x16xbf16> to vector<16x16xbf16>
    %cst_69 = arith.constant dense<0.000000e+00> : vector<288x16xf32>
    %71 = tpu.matmul %68, %70, %cst_69 {dimension_numbers = #tpu.dot_dimension_numbers<[1], [0], [0], [1], [0, 0, 1, 1], [], []>} : vector<288x16xbf16>, vector<16x16xbf16>, vector<288x16xf32> -> vector<288x16xf32>
    %72 = arith.addf %67, %71 : vector<288x16xf32>
    %c37 = arith.constant 37 : index
    %c0_70 = arith.constant 0 : index
    %73 = vector.load %arg10[%c37, %c0_70] : memref<342x16xbf16, #tpu.memory_space<vmem>>, vector<288x16xbf16>
    %c7 = arith.constant 7 : index
    %c0_71 = arith.constant 0 : index
    %c0_72 = arith.constant 0 : index
    %74 = vector.load %arg5[%c7, %c0_71, %c0_72] : memref<9x16x16xbf16, #tpu.memory_space<vmem>>, vector<1x16x16xbf16>
    %75 = vector.shape_cast %74 : vector<1x16x16xbf16> to vector<16x16xbf16>
    %cst_73 = arith.constant dense<0.000000e+00> : vector<288x16xf32>
    %76 = tpu.matmul %73, %75, %cst_73 {dimension_numbers = #tpu.dot_dimension_numbers<[1], [0], [0], [1], [0, 0, 1, 1], [], []>} : vector<288x16xbf16>, vector<16x16xbf16>, vector<288x16xf32> -> vector<288x16xf32>
    %77 = arith.addf %72, %76 : vector<288x16xf32>
    %c38 = arith.constant 38 : index
    %c0_74 = arith.constant 0 : index
    %78 = vector.load %arg10[%c38, %c0_74] : memref<342x16xbf16, #tpu.memory_space<vmem>>, vector<288x16xbf16>
    %c8 = arith.constant 8 : index
    %c0_75 = arith.constant 0 : index
    %c0_76 = arith.constant 0 : index
    %79 = vector.load %arg5[%c8, %c0_75, %c0_76] : memref<9x16x16xbf16, #tpu.memory_space<vmem>>, vector<1x16x16xbf16>
    %80 = vector.shape_cast %79 : vector<1x16x16xbf16> to vector<16x16xbf16>
    %cst_77 = arith.constant dense<0.000000e+00> : vector<288x16xf32>
    %81 = tpu.matmul %78, %80, %cst_77 {dimension_numbers = #tpu.dot_dimension_numbers<[1], [0], [0], [1], [0, 0, 1, 1], [], []>} : vector<288x16xbf16>, vector<16x16xbf16>, vector<288x16xf32> -> vector<288x16xf32>
    %82 = arith.addf %77, %81 : vector<288x16xf32>
    %c0_78 = arith.constant 0 : index
    %c0_79 = arith.constant 0 : index
    %83 = vector.load %arg6[%c0_78, %c0_79] : memref<1x16xf32, #tpu.memory_space<vmem>>, vector<1x16xf32>
    %84 = vector.broadcast %83 : vector<1x16xf32> to vector<288x16xf32>
    %85 = arith.addf %82, %84 : vector<288x16xf32>
    %cst_80 = arith.constant 0.000000e+00 : f32
    %86 = vector.broadcast %cst_80 : f32 to vector<288x16xf32>
    %87 = arith.maximumf %85, %86 : vector<288x16xf32>
    %88 = vector.broadcast %0 : vector<288x1xf32> to vector<288x16xf32>
    %89 = arith.mulf %87, %88 : vector<288x16xf32>
    %cst_81 = arith.constant 0.000000e+00 : bf16
    %90 = vector.broadcast %cst_81 : bf16 to vector<342x16xbf16>
    %c0_82 = arith.constant 0 : index
    %c0_83 = arith.constant 0 : index
    %91 = vector.load %arg11[%c0_82, %c0_83] : memref<342x16xbf16, #tpu.memory_space<vmem>>, vector<342x16xbf16>
    tpu.vector_store %arg11[%c0_82, %c0_83], %90 {strides = array<i32>} : memref<342x16xbf16, #tpu.memory_space<vmem>>, vector<342x16xbf16>,
    %92 = arith.truncf %89 : vector<288x16xf32> to vector<288x16xbf16>
    %c19_84 = arith.constant 19 : index
    %c0_85 = arith.constant 0 : index
    %93 = vector.load %arg11[%c19_84, %c0_85] : memref<342x16xbf16, #tpu.memory_space<vmem>>, vector<288x16xbf16>
    tpu.vector_store %arg11[%c19_84, %c0_85], %92 {strides = array<i32>} : memref<342x16xbf16, #tpu.memory_space<vmem>>, vector<288x16xbf16>,
    %cst_86 = arith.constant 0.000000e+00 : f32
    %94 = vector.broadcast %cst_86 : f32 to vector<288x16xf32>
    %c0_87 = arith.constant 0 : index
    %c0_88 = arith.constant 0 : index
    %95 = vector.load %arg11[%c0_87, %c0_88] : memref<342x16xbf16, #tpu.memory_space<vmem>>, vector<288x16xbf16>
    %c0_89 = arith.constant 0 : index
    %c0_90 = arith.constant 0 : index
    %c0_91 = arith.constant 0 : index
    %96 = vector.load %arg7[%c0_89, %c0_90, %c0_91] : memref<9x16x16xbf16, #tpu.memory_space<vmem>>, vector<1x16x16xbf16>
    %97 = vector.shape_cast %96 : vector<1x16x16xbf16> to vector<16x16xbf16>
    %cst_92 = arith.constant dense<0.000000e+00> : vector<288x16xf32>
    %98 = tpu.matmul %95, %97, %cst_92 {dimension_numbers = #tpu.dot_dimension_numbers<[1], [0], [0], [1], [0, 0, 1, 1], [], []>} : vector<288x16xbf16>, vector<16x16xbf16>, vector<288x16xf32> -> vector<288x16xf32>
    %99 = arith.addf %94, %98 : vector<288x16xf32>
    %c1_93 = arith.constant 1 : index
    %c0_94 = arith.constant 0 : index
    %100 = vector.load %arg11[%c1_93, %c0_94] : memref<342x16xbf16, #tpu.memory_space<vmem>>, vector<288x16xbf16>
    %c1_95 = arith.constant 1 : index
    %c0_96 = arith.constant 0 : index
    %c0_97 = arith.constant 0 : index
    %101 = vector.load %arg7[%c1_95, %c0_96, %c0_97] : memref<9x16x16xbf16, #tpu.memory_space<vmem>>, vector<1x16x16xbf16>
    %102 = vector.shape_cast %101 : vector<1x16x16xbf16> to vector<16x16xbf16>
    %cst_98 = arith.constant dense<0.000000e+00> : vector<288x16xf32>
    %103 = tpu.matmul %100, %102, %cst_98 {dimension_numbers = #tpu.dot_dimension_numbers<[1], [0], [0], [1], [0, 0, 1, 1], [], []>} : vector<288x16xbf16>, vector<16x16xbf16>, vector<288x16xf32> -> vector<288x16xf32>
    %104 = arith.addf %99, %103 : vector<288x16xf32>
    %c2_99 = arith.constant 2 : index
    %c0_100 = arith.constant 0 : index
    %105 = vector.load %arg11[%c2_99, %c0_100] : memref<342x16xbf16, #tpu.memory_space<vmem>>, vector<288x16xbf16>
    %c2_101 = arith.constant 2 : index
    %c0_102 = arith.constant 0 : index
    %c0_103 = arith.constant 0 : index
    %106 = vector.load %arg7[%c2_101, %c0_102, %c0_103] : memref<9x16x16xbf16, #tpu.memory_space<vmem>>, vector<1x16x16xbf16>
    %107 = vector.shape_cast %106 : vector<1x16x16xbf16> to vector<16x16xbf16>
    %cst_104 = arith.constant dense<0.000000e+00> : vector<288x16xf32>
    %108 = tpu.matmul %105, %107, %cst_104 {dimension_numbers = #tpu.dot_dimension_numbers<[1], [0], [0], [1], [0, 0, 1, 1], [], []>} : vector<288x16xbf16>, vector<16x16xbf16>, vector<288x16xf32> -> vector<288x16xf32>
    %109 = arith.addf %104, %108 : vector<288x16xf32>
    %c18_105 = arith.constant 18 : index
    %c0_106 = arith.constant 0 : index
    %110 = vector.load %arg11[%c18_105, %c0_106] : memref<342x16xbf16, #tpu.memory_space<vmem>>, vector<288x16xbf16>
    %c3_107 = arith.constant 3 : index
    %c0_108 = arith.constant 0 : index
    %c0_109 = arith.constant 0 : index
    %111 = vector.load %arg7[%c3_107, %c0_108, %c0_109] : memref<9x16x16xbf16, #tpu.memory_space<vmem>>, vector<1x16x16xbf16>
    %112 = vector.shape_cast %111 : vector<1x16x16xbf16> to vector<16x16xbf16>
    %cst_110 = arith.constant dense<0.000000e+00> : vector<288x16xf32>
    %113 = tpu.matmul %110, %112, %cst_110 {dimension_numbers = #tpu.dot_dimension_numbers<[1], [0], [0], [1], [0, 0, 1, 1], [], []>} : vector<288x16xbf16>, vector<16x16xbf16>, vector<288x16xf32> -> vector<288x16xf32>
    %114 = arith.addf %109, %113 : vector<288x16xf32>
    %c19_111 = arith.constant 19 : index
    %c0_112 = arith.constant 0 : index
    %115 = vector.load %arg11[%c19_111, %c0_112] : memref<342x16xbf16, #tpu.memory_space<vmem>>, vector<288x16xbf16>
    %c4_113 = arith.constant 4 : index
    %c0_114 = arith.constant 0 : index
    %c0_115 = arith.constant 0 : index
    %116 = vector.load %arg7[%c4_113, %c0_114, %c0_115] : memref<9x16x16xbf16, #tpu.memory_space<vmem>>, vector<1x16x16xbf16>
    %117 = vector.shape_cast %116 : vector<1x16x16xbf16> to vector<16x16xbf16>
    %cst_116 = arith.constant dense<0.000000e+00> : vector<288x16xf32>
    %118 = tpu.matmul %115, %117, %cst_116 {dimension_numbers = #tpu.dot_dimension_numbers<[1], [0], [0], [1], [0, 0, 1, 1], [], []>} : vector<288x16xbf16>, vector<16x16xbf16>, vector<288x16xf32> -> vector<288x16xf32>
    %119 = arith.addf %114, %118 : vector<288x16xf32>
    %c20_117 = arith.constant 20 : index
    %c0_118 = arith.constant 0 : index
    %120 = vector.load %arg11[%c20_117, %c0_118] : memref<342x16xbf16, #tpu.memory_space<vmem>>, vector<288x16xbf16>
    %c5_119 = arith.constant 5 : index
    %c0_120 = arith.constant 0 : index
    %c0_121 = arith.constant 0 : index
    %121 = vector.load %arg7[%c5_119, %c0_120, %c0_121] : memref<9x16x16xbf16, #tpu.memory_space<vmem>>, vector<1x16x16xbf16>
    %122 = vector.shape_cast %121 : vector<1x16x16xbf16> to vector<16x16xbf16>
    %cst_122 = arith.constant dense<0.000000e+00> : vector<288x16xf32>
    %123 = tpu.matmul %120, %122, %cst_122 {dimension_numbers = #tpu.dot_dimension_numbers<[1], [0], [0], [1], [0, 0, 1, 1], [], []>} : vector<288x16xbf16>, vector<16x16xbf16>, vector<288x16xf32> -> vector<288x16xf32>
    %124 = arith.addf %119, %123 : vector<288x16xf32>
    %c36_123 = arith.constant 36 : index
    %c0_124 = arith.constant 0 : index
    %125 = vector.load %arg11[%c36_123, %c0_124] : memref<342x16xbf16, #tpu.memory_space<vmem>>, vector<288x16xbf16>
    %c6_125 = arith.constant 6 : index
    %c0_126 = arith.constant 0 : index
    %c0_127 = arith.constant 0 : index
    %126 = vector.load %arg7[%c6_125, %c0_126, %c0_127] : memref<9x16x16xbf16, #tpu.memory_space<vmem>>, vector<1x16x16xbf16>
    %127 = vector.shape_cast %126 : vector<1x16x16xbf16> to vector<16x16xbf16>
    %cst_128 = arith.constant dense<0.000000e+00> : vector<288x16xf32>
    %128 = tpu.matmul %125, %127, %cst_128 {dimension_numbers = #tpu.dot_dimension_numbers<[1], [0], [0], [1], [0, 0, 1, 1], [], []>} : vector<288x16xbf16>, vector<16x16xbf16>, vector<288x16xf32> -> vector<288x16xf32>
    %129 = arith.addf %124, %128 : vector<288x16xf32>
    %c37_129 = arith.constant 37 : index
    %c0_130 = arith.constant 0 : index
    %130 = vector.load %arg11[%c37_129, %c0_130] : memref<342x16xbf16, #tpu.memory_space<vmem>>, vector<288x16xbf16>
    %c7_131 = arith.constant 7 : index
    %c0_132 = arith.constant 0 : index
    %c0_133 = arith.constant 0 : index
    %131 = vector.load %arg7[%c7_131, %c0_132, %c0_133] : memref<9x16x16xbf16, #tpu.memory_space<vmem>>, vector<1x16x16xbf16>
    %132 = vector.shape_cast %131 : vector<1x16x16xbf16> to vector<16x16xbf16>
    %cst_134 = arith.constant dense<0.000000e+00> : vector<288x16xf32>
    %133 = tpu.matmul %130, %132, %cst_134 {dimension_numbers = #tpu.dot_dimension_numbers<[1], [0], [0], [1], [0, 0, 1, 1], [], []>} : vector<288x16xbf16>, vector<16x16xbf16>, vector<288x16xf32> -> vector<288x16xf32>
    %134 = arith.addf %129, %133 : vector<288x16xf32>
    %c38_135 = arith.constant 38 : index
    %c0_136 = arith.constant 0 : index
    %135 = vector.load %arg11[%c38_135, %c0_136] : memref<342x16xbf16, #tpu.memory_space<vmem>>, vector<288x16xbf16>
    %c8_137 = arith.constant 8 : index
    %c0_138 = arith.constant 0 : index
    %c0_139 = arith.constant 0 : index
    %136 = vector.load %arg7[%c8_137, %c0_138, %c0_139] : memref<9x16x16xbf16, #tpu.memory_space<vmem>>, vector<1x16x16xbf16>
    %137 = vector.shape_cast %136 : vector<1x16x16xbf16> to vector<16x16xbf16>
    %cst_140 = arith.constant dense<0.000000e+00> : vector<288x16xf32>
    %138 = tpu.matmul %135, %137, %cst_140 {dimension_numbers = #tpu.dot_dimension_numbers<[1], [0], [0], [1], [0, 0, 1, 1], [], []>} : vector<288x16xbf16>, vector<16x16xbf16>, vector<288x16xf32> -> vector<288x16xf32>
    %139 = arith.addf %134, %138 : vector<288x16xf32>
    %c0_141 = arith.constant 0 : index
    %c0_142 = arith.constant 0 : index
    %140 = vector.load %arg8[%c0_141, %c0_142] : memref<1x16xf32, #tpu.memory_space<vmem>>, vector<1x16xf32>
    %141 = vector.broadcast %140 : vector<1x16xf32> to vector<288x16xf32>
    %142 = arith.addf %139, %141 : vector<288x16xf32>
    %cst_143 = arith.constant 0.000000e+00 : f32
    %143 = vector.broadcast %cst_143 : f32 to vector<288x16xf32>
    %144 = arith.maximumf %142, %143 : vector<288x16xf32>
    %145 = arith.truncf %144 : vector<288x16xf32> to vector<288x16xbf16>
    %c0_144 = arith.constant 0 : index
    %c0_145 = arith.constant 0 : index
    %c0_146 = arith.constant 0 : index
    %146 = vector.load %arg9[%c0_144, %c0_145, %c0_146] : memref<1x288x16xbf16, #tpu.memory_space<vmem>>, vector<1x288x16xbf16>
    %147 = vector.shape_cast %146 : vector<1x288x16xbf16> to vector<288x16xbf16>
    %148 = vector.shape_cast %145 : vector<288x16xbf16> to vector<1x288x16xbf16>
    tpu.vector_store %arg9[%c0_144, %c0_145, %c0_146], %148 {strides = array<i32>} : memref<1x288x16xbf16, #tpu.memory_space<vmem>>, vector<1x288x16xbf16>,
    return
  }
  func.func @transform_0(%arg0: i32) -> (i32, i32, i32) {
    %c0_i32 = arith.constant 0 : i32
    %c0_i32_0 = arith.constant 0 : i32
    %c0_i32_1 = arith.constant 0 : i32
    return %arg0, %c0_i32, %c0_i32_0 : i32, i32, i32
  }
  func.func @transform_1(%arg0: i32) -> (i32, i32) {
    %c0_i32 = arith.constant 0 : i32
    %c0_i32_0 = arith.constant 0 : i32
    %c0_i32_1 = arith.constant 0 : i32
    return %c0_i32, %c0_i32_0 : i32, i32
  }
  func.func @transform_2(%arg0: i32) -> (i32, i32, i32) {
    %c0_i32 = arith.constant 0 : i32
    %c0_i32_0 = arith.constant 0 : i32
    %c0_i32_1 = arith.constant 0 : i32
    %c0_i32_2 = arith.constant 0 : i32
    return %c0_i32, %c0_i32_0, %c0_i32_1 : i32, i32, i32
  }
  func.func @transform_3(%arg0: i32) -> (i32, i32) {
    %c0_i32 = arith.constant 0 : i32
    %c0_i32_0 = arith.constant 0 : i32
    %c0_i32_1 = arith.constant 0 : i32
    return %c0_i32, %c0_i32_0 : i32, i32
  }
  func.func @transform_4(%arg0: i32) -> (i32, i32, i32) {
    %c0_i32 = arith.constant 0 : i32
    %c0_i32_0 = arith.constant 0 : i32
    %c0_i32_1 = arith.constant 0 : i32
    %c0_i32_2 = arith.constant 0 : i32
    return %c0_i32, %c0_i32_0, %c0_i32_1 : i32, i32, i32
  }
  func.func @transform_5(%arg0: i32) -> (i32, i32) {
    %c0_i32 = arith.constant 0 : i32
    %c0_i32_0 = arith.constant 0 : i32
    %c0_i32_1 = arith.constant 0 : i32
    return %c0_i32, %c0_i32_0 : i32, i32
  }
  func.func @transform_6(%arg0: i32) -> (i32, i32, i32) {
    %c0_i32 = arith.constant 0 : i32
    %c0_i32_0 = arith.constant 0 : i32
    %c0_i32_1 = arith.constant 0 : i32
    %c0_i32_2 = arith.constant 0 : i32
    return %c0_i32, %c0_i32_0, %c0_i32_1 : i32, i32, i32
  }
  func.func @transform_7(%arg0: i32) -> (i32, i32) {
    %c0_i32 = arith.constant 0 : i32
    %c0_i32_0 = arith.constant 0 : i32
    %c0_i32_1 = arith.constant 0 : i32
    return %c0_i32, %c0_i32_0 : i32, i32
  }
  func.func @transform_8(%arg0: i32) -> (i32, i32, i32) {
    %c0_i32 = arith.constant 0 : i32
    %c0_i32_0 = arith.constant 0 : i32
    %c0_i32_1 = arith.constant 0 : i32
    return %arg0, %c0_i32, %c0_i32_0 : i32, i32, i32
  }
}

module attributes {stable_mosaic.version = 11 : i64} {
  func.func @kernel(%arg0: i32, %arg1: memref<3x18x8x16xbf16, #tpu.memory_space<vmem>>, %arg2: memref<1x8x8x16xbf16, #tpu.memory_space<vmem>>) attributes {dimension_semantics = [#tpu.dimension_semantics<parallel>], iteration_bounds = array<i64: 2>, scalar_prefetch = 0 : i64, scratch_operands = 0 : i64, tpu.core_type = #tpu.core_type<tc>, window_params = [{transform_indices = @transform_0, window_bounds = array<i64: 3, 18, 8, 16>}, {transform_indices = @transform_1, window_bounds = array<i64: 1, 8, 8, 16>}]} {
    %c0 = arith.constant 0 : index
    %c0_0 = arith.constant 0 : index
    %c0_1 = arith.constant 0 : index
    %c0_2 = arith.constant 0 : index
    %0 = vector.load %arg1[%c0, %c0_0, %c0_1, %c0_2] : memref<3x18x8x16xbf16, #tpu.memory_space<vmem>>, vector<1x18x8x16xbf16>
    %1 = vector.shape_cast %0 : vector<1x18x8x16xbf16> to vector<18x8x16xbf16>
    %2 = vector.shape_cast %1 : vector<18x8x16xbf16> to vector<9x2x8x16xbf16>
    %3 = vector.extract_strided_slice %2 {offsets = [0, 0, 0, 0], sizes = [9, 1, 8, 16], strides = [1, 1, 1, 1]} : vector<9x2x8x16xbf16> to vector<9x1x8x16xbf16>
    %4 = vector.shape_cast %3 : vector<9x1x8x16xbf16> to vector<9x8x16xbf16>
    %5 = vector.extract_strided_slice %2 {offsets = [0, 1, 0, 0], sizes = [9, 1, 8, 16], strides = [1, 1, 1, 1]} : vector<9x2x8x16xbf16> to vector<9x1x8x16xbf16>
    %6 = vector.shape_cast %5 : vector<9x1x8x16xbf16> to vector<9x8x16xbf16>
    %7 = vector.extract_strided_slice %4 {offsets = [0, 0, 0], sizes = [8, 8, 16], strides = [1, 1, 1]} : vector<9x8x16xbf16> to vector<8x8x16xbf16>
    %8 = vector.extract_strided_slice %6 {offsets = [0, 0, 0], sizes = [8, 8, 16], strides = [1, 1, 1]} : vector<9x8x16xbf16> to vector<8x8x16xbf16>
    %9 = arith.maximumf %7, %8 : vector<8x8x16xbf16>
    %10 = vector.extract_strided_slice %4 {offsets = [1, 0, 0], sizes = [8, 8, 16], strides = [1, 1, 1]} : vector<9x8x16xbf16> to vector<8x8x16xbf16>
    %11 = arith.maximumf %9, %10 : vector<8x8x16xbf16>
    %c1 = arith.constant 1 : index
    %c0_3 = arith.constant 0 : index
    %c0_4 = arith.constant 0 : index
    %c0_5 = arith.constant 0 : index
    %12 = vector.load %arg1[%c1, %c0_3, %c0_4, %c0_5] : memref<3x18x8x16xbf16, #tpu.memory_space<vmem>>, vector<1x18x8x16xbf16>
    %13 = vector.shape_cast %12 : vector<1x18x8x16xbf16> to vector<18x8x16xbf16>
    %14 = vector.shape_cast %13 : vector<18x8x16xbf16> to vector<9x2x8x16xbf16>
    %15 = vector.extract_strided_slice %14 {offsets = [0, 0, 0, 0], sizes = [9, 1, 8, 16], strides = [1, 1, 1, 1]} : vector<9x2x8x16xbf16> to vector<9x1x8x16xbf16>
    %16 = vector.shape_cast %15 : vector<9x1x8x16xbf16> to vector<9x8x16xbf16>
    %17 = vector.extract_strided_slice %14 {offsets = [0, 1, 0, 0], sizes = [9, 1, 8, 16], strides = [1, 1, 1, 1]} : vector<9x2x8x16xbf16> to vector<9x1x8x16xbf16>
    %18 = vector.shape_cast %17 : vector<9x1x8x16xbf16> to vector<9x8x16xbf16>
    %19 = vector.extract_strided_slice %16 {offsets = [0, 0, 0], sizes = [8, 8, 16], strides = [1, 1, 1]} : vector<9x8x16xbf16> to vector<8x8x16xbf16>
    %20 = vector.extract_strided_slice %18 {offsets = [0, 0, 0], sizes = [8, 8, 16], strides = [1, 1, 1]} : vector<9x8x16xbf16> to vector<8x8x16xbf16>
    %21 = arith.maximumf %19, %20 : vector<8x8x16xbf16>
    %22 = vector.extract_strided_slice %16 {offsets = [1, 0, 0], sizes = [8, 8, 16], strides = [1, 1, 1]} : vector<9x8x16xbf16> to vector<8x8x16xbf16>
    %23 = arith.maximumf %21, %22 : vector<8x8x16xbf16>
    %24 = arith.maximumf %11, %23 : vector<8x8x16xbf16>
    %c2 = arith.constant 2 : index
    %c0_6 = arith.constant 0 : index
    %c0_7 = arith.constant 0 : index
    %c0_8 = arith.constant 0 : index
    %25 = vector.load %arg1[%c2, %c0_6, %c0_7, %c0_8] : memref<3x18x8x16xbf16, #tpu.memory_space<vmem>>, vector<1x18x8x16xbf16>
    %26 = vector.shape_cast %25 : vector<1x18x8x16xbf16> to vector<18x8x16xbf16>
    %27 = vector.shape_cast %26 : vector<18x8x16xbf16> to vector<9x2x8x16xbf16>
    %28 = vector.extract_strided_slice %27 {offsets = [0, 0, 0, 0], sizes = [9, 1, 8, 16], strides = [1, 1, 1, 1]} : vector<9x2x8x16xbf16> to vector<9x1x8x16xbf16>
    %29 = vector.shape_cast %28 : vector<9x1x8x16xbf16> to vector<9x8x16xbf16>
    %30 = vector.extract_strided_slice %27 {offsets = [0, 1, 0, 0], sizes = [9, 1, 8, 16], strides = [1, 1, 1, 1]} : vector<9x2x8x16xbf16> to vector<9x1x8x16xbf16>
    %31 = vector.shape_cast %30 : vector<9x1x8x16xbf16> to vector<9x8x16xbf16>
    %32 = vector.extract_strided_slice %29 {offsets = [0, 0, 0], sizes = [8, 8, 16], strides = [1, 1, 1]} : vector<9x8x16xbf16> to vector<8x8x16xbf16>
    %33 = vector.extract_strided_slice %31 {offsets = [0, 0, 0], sizes = [8, 8, 16], strides = [1, 1, 1]} : vector<9x8x16xbf16> to vector<8x8x16xbf16>
    %34 = arith.maximumf %32, %33 : vector<8x8x16xbf16>
    %35 = vector.extract_strided_slice %29 {offsets = [1, 0, 0], sizes = [8, 8, 16], strides = [1, 1, 1]} : vector<9x8x16xbf16> to vector<8x8x16xbf16>
    %36 = arith.maximumf %34, %35 : vector<8x8x16xbf16>
    %37 = arith.maximumf %24, %36 : vector<8x8x16xbf16>
    %c0_9 = arith.constant 0 : index
    %c0_10 = arith.constant 0 : index
    %c0_11 = arith.constant 0 : index
    %c0_12 = arith.constant 0 : index
    %38 = vector.load %arg2[%c0_9, %c0_10, %c0_11, %c0_12] : memref<1x8x8x16xbf16, #tpu.memory_space<vmem>>, vector<1x8x8x16xbf16>
    %39 = vector.shape_cast %38 : vector<1x8x8x16xbf16> to vector<8x8x16xbf16>
    %40 = vector.shape_cast %37 : vector<8x8x16xbf16> to vector<1x8x8x16xbf16>
    tpu.vector_store %arg2[%c0_9, %c0_10, %c0_11, %c0_12], %40 {strides = array<i32>} : memref<1x8x8x16xbf16, #tpu.memory_space<vmem>>, vector<1x8x8x16xbf16>,
    return
  }
  func.func @transform_0(%arg0: i32) -> (i32, i32, i32, i32) {
    %c0_i32 = arith.constant 0 : i32
    %c0_i32_0 = arith.constant 0 : i32
    %c0_i32_1 = arith.constant 0 : i32
    %c0_i32_2 = arith.constant 0 : i32
    return %arg0, %c0_i32, %c0_i32_0, %c0_i32_1 : i32, i32, i32, i32
  }
  func.func @transform_1(%arg0: i32) -> (i32, i32, i32, i32) {
    %c0_i32 = arith.constant 0 : i32
    %c0_i32_0 = arith.constant 0 : i32
    %c0_i32_1 = arith.constant 0 : i32
    %c0_i32_2 = arith.constant 0 : i32
    return %arg0, %c0_i32, %c0_i32_0, %c0_i32_1 : i32, i32, i32, i32
  }
}

module attributes {stable_mosaic.version = 11 : i64} {
  func.func @kernel(%arg0: i32, %arg1: memref<1x36x64xbf16, #tpu.memory_space<vmem>>, %arg2: memref<4x64x32xbf16, #tpu.memory_space<vmem>>, %arg3: memref<1x32xf32, #tpu.memory_space<vmem>>, %arg4: memref<1x24x32xbf16, #tpu.memory_space<vmem>>) attributes {dimension_semantics = [#tpu.dimension_semantics<parallel>], iteration_bounds = array<i64: 2>, scalar_prefetch = 0 : i64, scratch_operands = 0 : i64, tpu.core_type = #tpu.core_type<tc>, window_params = [{transform_indices = @transform_0, window_bounds = array<i64: 1, 36, 64>}, {pipeline_mode = #tpu.pipeline_mode<synchronous>, transform_indices = @transform_1, window_bounds = array<i64: 4, 64, 32>}, {pipeline_mode = #tpu.pipeline_mode<synchronous>, transform_indices = @transform_2, window_bounds = array<i64: 1, 32>}, {transform_indices = @transform_3, window_bounds = array<i64: 1, 24, 32>}]} {
    %cst = arith.constant 0.000000e+00 : f32
    %0 = vector.broadcast %cst : f32 to vector<24x32xf32>
    %c0 = arith.constant 0 : index
    %c0_0 = arith.constant 0 : index
    %c0_1 = arith.constant 0 : index
    %1 = vector.load %arg1[%c0, %c0_0, %c0_1] : memref<1x36x64xbf16, #tpu.memory_space<vmem>>, vector<1x24x64xbf16>
    %2 = vector.shape_cast %1 : vector<1x24x64xbf16> to vector<24x64xbf16>
    %c0_2 = arith.constant 0 : index
    %c0_3 = arith.constant 0 : index
    %c0_4 = arith.constant 0 : index
    %3 = vector.load %arg2[%c0_2, %c0_3, %c0_4] : memref<4x64x32xbf16, #tpu.memory_space<vmem>>, vector<1x64x32xbf16>
    %4 = vector.shape_cast %3 : vector<1x64x32xbf16> to vector<64x32xbf16>
    %cst_5 = arith.constant dense<0.000000e+00> : vector<24x32xf32>
    %5 = tpu.matmul %2, %4, %cst_5 {dimension_numbers = #tpu.dot_dimension_numbers<[1], [0], [0], [1], [0, 0, 1, 1], [], []>} : vector<24x64xbf16>, vector<64x32xbf16>, vector<24x32xf32> -> vector<24x32xf32>
    %6 = arith.addf %0, %5 : vector<24x32xf32>
    %c0_6 = arith.constant 0 : index
    %c1 = arith.constant 1 : index
    %c0_7 = arith.constant 0 : index
    %7 = vector.load %arg1[%c0_6, %c1, %c0_7] : memref<1x36x64xbf16, #tpu.memory_space<vmem>>, vector<1x24x64xbf16>
    %8 = vector.shape_cast %7 : vector<1x24x64xbf16> to vector<24x64xbf16>
    %c1_8 = arith.constant 1 : index
    %c0_9 = arith.constant 0 : index
    %c0_10 = arith.constant 0 : index
    %9 = vector.load %arg2[%c1_8, %c0_9, %c0_10] : memref<4x64x32xbf16, #tpu.memory_space<vmem>>, vector<1x64x32xbf16>
    %10 = vector.shape_cast %9 : vector<1x64x32xbf16> to vector<64x32xbf16>
    %cst_11 = arith.constant dense<0.000000e+00> : vector<24x32xf32>
    %11 = tpu.matmul %8, %10, %cst_11 {dimension_numbers = #tpu.dot_dimension_numbers<[1], [0], [0], [1], [0, 0, 1, 1], [], []>} : vector<24x64xbf16>, vector<64x32xbf16>, vector<24x32xf32> -> vector<24x32xf32>
    %12 = arith.addf %6, %11 : vector<24x32xf32>
    %c0_12 = arith.constant 0 : index
    %c6 = arith.constant 6 : index
    %c0_13 = arith.constant 0 : index
    %13 = vector.load %arg1[%c0_12, %c6, %c0_13] : memref<1x36x64xbf16, #tpu.memory_space<vmem>>, vector<1x24x64xbf16>
    %14 = vector.shape_cast %13 : vector<1x24x64xbf16> to vector<24x64xbf16>
    %c2 = arith.constant 2 : index
    %c0_14 = arith.constant 0 : index
    %c0_15 = arith.constant 0 : index
    %15 = vector.load %arg2[%c2, %c0_14, %c0_15] : memref<4x64x32xbf16, #tpu.memory_space<vmem>>, vector<1x64x32xbf16>
    %16 = vector.shape_cast %15 : vector<1x64x32xbf16> to vector<64x32xbf16>
    %cst_16 = arith.constant dense<0.000000e+00> : vector<24x32xf32>
    %17 = tpu.matmul %14, %16, %cst_16 {dimension_numbers = #tpu.dot_dimension_numbers<[1], [0], [0], [1], [0, 0, 1, 1], [], []>} : vector<24x64xbf16>, vector<64x32xbf16>, vector<24x32xf32> -> vector<24x32xf32>
    %18 = arith.addf %12, %17 : vector<24x32xf32>
    %c0_17 = arith.constant 0 : index
    %c7 = arith.constant 7 : index
    %c0_18 = arith.constant 0 : index
    %19 = vector.load %arg1[%c0_17, %c7, %c0_18] : memref<1x36x64xbf16, #tpu.memory_space<vmem>>, vector<1x24x64xbf16>
    %20 = vector.shape_cast %19 : vector<1x24x64xbf16> to vector<24x64xbf16>
    %c3 = arith.constant 3 : index
    %c0_19 = arith.constant 0 : index
    %c0_20 = arith.constant 0 : index
    %21 = vector.load %arg2[%c3, %c0_19, %c0_20] : memref<4x64x32xbf16, #tpu.memory_space<vmem>>, vector<1x64x32xbf16>
    %22 = vector.shape_cast %21 : vector<1x64x32xbf16> to vector<64x32xbf16>
    %cst_21 = arith.constant dense<0.000000e+00> : vector<24x32xf32>
    %23 = tpu.matmul %20, %22, %cst_21 {dimension_numbers = #tpu.dot_dimension_numbers<[1], [0], [0], [1], [0, 0, 1, 1], [], []>} : vector<24x64xbf16>, vector<64x32xbf16>, vector<24x32xf32> -> vector<24x32xf32>
    %24 = arith.addf %18, %23 : vector<24x32xf32>
    %c0_22 = arith.constant 0 : index
    %c0_23 = arith.constant 0 : index
    %25 = vector.load %arg3[%c0_22, %c0_23] : memref<1x32xf32, #tpu.memory_space<vmem>>, vector<1x32xf32>
    %26 = vector.broadcast %25 : vector<1x32xf32> to vector<24x32xf32>
    %27 = arith.addf %24, %26 : vector<24x32xf32>
    %cst_24 = arith.constant 0.000000e+00 : f32
    %28 = vector.broadcast %cst_24 : f32 to vector<24x32xf32>
    %29 = arith.maximumf %27, %28 : vector<24x32xf32>
    %30 = arith.truncf %29 : vector<24x32xf32> to vector<24x32xbf16>
    %c0_25 = arith.constant 0 : index
    %c0_26 = arith.constant 0 : index
    %c0_27 = arith.constant 0 : index
    %31 = vector.load %arg4[%c0_25, %c0_26, %c0_27] : memref<1x24x32xbf16, #tpu.memory_space<vmem>>, vector<1x24x32xbf16>
    %32 = vector.shape_cast %31 : vector<1x24x32xbf16> to vector<24x32xbf16>
    %33 = vector.shape_cast %30 : vector<24x32xbf16> to vector<1x24x32xbf16>
    tpu.vector_store %arg4[%c0_25, %c0_26, %c0_27], %33 {strides = array<i32>} : memref<1x24x32xbf16, #tpu.memory_space<vmem>>, vector<1x24x32xbf16>,
    return
  }
  func.func @transform_0(%arg0: i32) -> (i32, i32, i32) {
    %c0_i32 = arith.constant 0 : i32
    %c0_i32_0 = arith.constant 0 : i32
    %c0_i32_1 = arith.constant 0 : i32
    return %arg0, %c0_i32, %c0_i32_0 : i32, i32, i32
  }
  func.func @transform_1(%arg0: i32) -> (i32, i32, i32) {
    %c0_i32 = arith.constant 0 : i32
    %c0_i32_0 = arith.constant 0 : i32
    %c0_i32_1 = arith.constant 0 : i32
    %c0_i32_2 = arith.constant 0 : i32
    return %c0_i32, %c0_i32_0, %c0_i32_1 : i32, i32, i32
  }
  func.func @transform_2(%arg0: i32) -> (i32, i32) {
    %c0_i32 = arith.constant 0 : i32
    %c0_i32_0 = arith.constant 0 : i32
    %c0_i32_1 = arith.constant 0 : i32
    return %c0_i32, %c0_i32_0 : i32, i32
  }
  func.func @transform_3(%arg0: i32) -> (i32, i32, i32) {
    %c0_i32 = arith.constant 0 : i32
    %c0_i32_0 = arith.constant 0 : i32
    %c0_i32_1 = arith.constant 0 : i32
    return %arg0, %c0_i32, %c0_i32_0 : i32, i32, i32
  }
}

module attributes {stable_mosaic.version = 11 : i64} {
  func.func @kernel(%arg0: i32, %arg1: memref<1x16x128xbf16, #tpu.memory_space<vmem>>, %arg2: memref<4x128x64xbf16, #tpu.memory_space<vmem>>, %arg3: memref<1x64xf32, #tpu.memory_space<vmem>>, %arg4: memref<64x32xbf16, #tpu.memory_space<vmem>>, %arg5: memref<1x32xf32, #tpu.memory_space<vmem>>, %arg6: memref<1x8x32xf32, #tpu.memory_space<vmem>>) attributes {dimension_semantics = [#tpu.dimension_semantics<parallel>], iteration_bounds = array<i64: 2>, scalar_prefetch = 0 : i64, scratch_operands = 0 : i64, tpu.core_type = #tpu.core_type<tc>, window_params = [{transform_indices = @transform_0, window_bounds = array<i64: 1, 16, 128>}, {pipeline_mode = #tpu.pipeline_mode<synchronous>, transform_indices = @transform_1, window_bounds = array<i64: 4, 128, 64>}, {pipeline_mode = #tpu.pipeline_mode<synchronous>, transform_indices = @transform_2, window_bounds = array<i64: 1, 64>}, {pipeline_mode = #tpu.pipeline_mode<synchronous>, transform_indices = @transform_3, window_bounds = array<i64: 64, 32>}, {pipeline_mode = #tpu.pipeline_mode<synchronous>, transform_indices = @transform_4, window_bounds = array<i64: 1, 32>}, {transform_indices = @transform_5, window_bounds = array<i64: 1, 8, 32>}]} {
    %cst = arith.constant 0.000000e+00 : f32
    %0 = vector.broadcast %cst : f32 to vector<8x64xf32>
    %c0 = arith.constant 0 : index
    %c0_0 = arith.constant 0 : index
    %c0_1 = arith.constant 0 : index
    %1 = vector.load %arg1[%c0, %c0_0, %c0_1] : memref<1x16x128xbf16, #tpu.memory_space<vmem>>, vector<1x8x128xbf16>
    %2 = vector.shape_cast %1 : vector<1x8x128xbf16> to vector<8x128xbf16>
    %c0_2 = arith.constant 0 : index
    %c0_3 = arith.constant 0 : index
    %c0_4 = arith.constant 0 : index
    %3 = vector.load %arg2[%c0_2, %c0_3, %c0_4] : memref<4x128x64xbf16, #tpu.memory_space<vmem>>, vector<1x128x64xbf16>
    %4 = vector.shape_cast %3 : vector<1x128x64xbf16> to vector<128x64xbf16>
    %cst_5 = arith.constant dense<0.000000e+00> : vector<8x64xf32>
    %5 = tpu.matmul %2, %4, %cst_5 {dimension_numbers = #tpu.dot_dimension_numbers<[1], [0], [0], [1], [0, 0, 1, 1], [], []>} : vector<8x128xbf16>, vector<128x64xbf16>, vector<8x64xf32> -> vector<8x64xf32>
    %6 = arith.addf %0, %5 : vector<8x64xf32>
    %c0_6 = arith.constant 0 : index
    %c1 = arith.constant 1 : index
    %c0_7 = arith.constant 0 : index
    %7 = vector.load %arg1[%c0_6, %c1, %c0_7] : memref<1x16x128xbf16, #tpu.memory_space<vmem>>, vector<1x8x128xbf16>
    %8 = vector.shape_cast %7 : vector<1x8x128xbf16> to vector<8x128xbf16>
    %c1_8 = arith.constant 1 : index
    %c0_9 = arith.constant 0 : index
    %c0_10 = arith.constant 0 : index
    %9 = vector.load %arg2[%c1_8, %c0_9, %c0_10] : memref<4x128x64xbf16, #tpu.memory_space<vmem>>, vector<1x128x64xbf16>
    %10 = vector.shape_cast %9 : vector<1x128x64xbf16> to vector<128x64xbf16>
    %cst_11 = arith.constant dense<0.000000e+00> : vector<8x64xf32>
    %11 = tpu.matmul %8, %10, %cst_11 {dimension_numbers = #tpu.dot_dimension_numbers<[1], [0], [0], [1], [0, 0, 1, 1], [], []>} : vector<8x128xbf16>, vector<128x64xbf16>, vector<8x64xf32> -> vector<8x64xf32>
    %12 = arith.addf %6, %11 : vector<8x64xf32>
    %c0_12 = arith.constant 0 : index
    %c4 = arith.constant 4 : index
    %c0_13 = arith.constant 0 : index
    %13 = vector.load %arg1[%c0_12, %c4, %c0_13] : memref<1x16x128xbf16, #tpu.memory_space<vmem>>, vector<1x8x128xbf16>
    %14 = vector.shape_cast %13 : vector<1x8x128xbf16> to vector<8x128xbf16>
    %c2 = arith.constant 2 : index
    %c0_14 = arith.constant 0 : index
    %c0_15 = arith.constant 0 : index
    %15 = vector.load %arg2[%c2, %c0_14, %c0_15] : memref<4x128x64xbf16, #tpu.memory_space<vmem>>, vector<1x128x64xbf16>
    %16 = vector.shape_cast %15 : vector<1x128x64xbf16> to vector<128x64xbf16>
    %cst_16 = arith.constant dense<0.000000e+00> : vector<8x64xf32>
    %17 = tpu.matmul %14, %16, %cst_16 {dimension_numbers = #tpu.dot_dimension_numbers<[1], [0], [0], [1], [0, 0, 1, 1], [], []>} : vector<8x128xbf16>, vector<128x64xbf16>, vector<8x64xf32> -> vector<8x64xf32>
    %18 = arith.addf %12, %17 : vector<8x64xf32>
    %c0_17 = arith.constant 0 : index
    %c5 = arith.constant 5 : index
    %c0_18 = arith.constant 0 : index
    %19 = vector.load %arg1[%c0_17, %c5, %c0_18] : memref<1x16x128xbf16, #tpu.memory_space<vmem>>, vector<1x8x128xbf16>
    %20 = vector.shape_cast %19 : vector<1x8x128xbf16> to vector<8x128xbf16>
    %c3 = arith.constant 3 : index
    %c0_19 = arith.constant 0 : index
    %c0_20 = arith.constant 0 : index
    %21 = vector.load %arg2[%c3, %c0_19, %c0_20] : memref<4x128x64xbf16, #tpu.memory_space<vmem>>, vector<1x128x64xbf16>
    %22 = vector.shape_cast %21 : vector<1x128x64xbf16> to vector<128x64xbf16>
    %cst_21 = arith.constant dense<0.000000e+00> : vector<8x64xf32>
    %23 = tpu.matmul %20, %22, %cst_21 {dimension_numbers = #tpu.dot_dimension_numbers<[1], [0], [0], [1], [0, 0, 1, 1], [], []>} : vector<8x128xbf16>, vector<128x64xbf16>, vector<8x64xf32> -> vector<8x64xf32>
    %24 = arith.addf %18, %23 : vector<8x64xf32>
    %c0_22 = arith.constant 0 : index
    %c0_23 = arith.constant 0 : index
    %25 = vector.load %arg3[%c0_22, %c0_23] : memref<1x64xf32, #tpu.memory_space<vmem>>, vector<1x64xf32>
    %26 = vector.broadcast %25 : vector<1x64xf32> to vector<8x64xf32>
    %27 = arith.addf %24, %26 : vector<8x64xf32>
    %cst_24 = arith.constant 0.000000e+00 : f32
    %28 = vector.broadcast %cst_24 : f32 to vector<8x64xf32>
    %29 = arith.maximumf %27, %28 : vector<8x64xf32>
    %30 = arith.truncf %29 : vector<8x64xf32> to vector<8x64xbf16>
    %c0_25 = arith.constant 0 : index
    %c0_26 = arith.constant 0 : index
    %31 = vector.load %arg4[%c0_25, %c0_26] : memref<64x32xbf16, #tpu.memory_space<vmem>>, vector<64x32xbf16>
    %cst_27 = arith.constant dense<0.000000e+00> : vector<8x32xf32>
    %32 = tpu.matmul %30, %31, %cst_27 {dimension_numbers = #tpu.dot_dimension_numbers<[1], [0], [0], [1], [0, 0, 1, 1], [], []>} : vector<8x64xbf16>, vector<64x32xbf16>, vector<8x32xf32> -> vector<8x32xf32>
    %c0_28 = arith.constant 0 : index
    %c0_29 = arith.constant 0 : index
    %33 = vector.load %arg5[%c0_28, %c0_29] : memref<1x32xf32, #tpu.memory_space<vmem>>, vector<1x32xf32>
    %34 = vector.broadcast %33 : vector<1x32xf32> to vector<8x32xf32>
    %35 = arith.addf %32, %34 : vector<8x32xf32>
    %c0_30 = arith.constant 0 : index
    %c0_31 = arith.constant 0 : index
    %c0_32 = arith.constant 0 : index
    %36 = vector.load %arg6[%c0_30, %c0_31, %c0_32] : memref<1x8x32xf32, #tpu.memory_space<vmem>>, vector<1x8x32xf32>
    %37 = vector.shape_cast %36 : vector<1x8x32xf32> to vector<8x32xf32>
    %38 = vector.shape_cast %35 : vector<8x32xf32> to vector<1x8x32xf32>
    tpu.vector_store %arg6[%c0_30, %c0_31, %c0_32], %38 {strides = array<i32>} : memref<1x8x32xf32, #tpu.memory_space<vmem>>, vector<1x8x32xf32>,
    return
  }
  func.func @transform_0(%arg0: i32) -> (i32, i32, i32) {
    %c0_i32 = arith.constant 0 : i32
    %c0_i32_0 = arith.constant 0 : i32
    %c0_i32_1 = arith.constant 0 : i32
    return %arg0, %c0_i32, %c0_i32_0 : i32, i32, i32
  }
  func.func @transform_1(%arg0: i32) -> (i32, i32, i32) {
    %c0_i32 = arith.constant 0 : i32
    %c0_i32_0 = arith.constant 0 : i32
    %c0_i32_1 = arith.constant 0 : i32
    %c0_i32_2 = arith.constant 0 : i32
    return %c0_i32, %c0_i32_0, %c0_i32_1 : i32, i32, i32
  }
  func.func @transform_2(%arg0: i32) -> (i32, i32) {
    %c0_i32 = arith.constant 0 : i32
    %c0_i32_0 = arith.constant 0 : i32
    %c0_i32_1 = arith.constant 0 : i32
    return %c0_i32, %c0_i32_0 : i32, i32
  }
  func.func @transform_3(%arg0: i32) -> (i32, i32) {
    %c0_i32 = arith.constant 0 : i32
    %c0_i32_0 = arith.constant 0 : i32
    %c0_i32_1 = arith.constant 0 : i32
    return %c0_i32, %c0_i32_0 : i32, i32
  }
  func.func @transform_4(%arg0: i32) -> (i32, i32) {
    %c0_i32 = arith.constant 0 : i32
    %c0_i32_0 = arith.constant 0 : i32
    %c0_i32_1 = arith.constant 0 : i32
    return %c0_i32, %c0_i32_0 : i32, i32
  }
  func.func @transform_5(%arg0: i32) -> (i32, i32, i32) {
    %c0_i32 = arith.constant 0 : i32
    %c0_i32_0 = arith.constant 0 : i32
    %c0_i32_1 = arith.constant 0 : i32
    return %arg0, %c0_i32, %c0_i32_0 : i32, i32, i32
  }
}

</mosaic_0001>

<bundles_post_ra>
// kernel: prior_extraction_forward.5
= control target key start
LH: loop header
LB: loop body
LE: loop exit
PB: predicated region body
PF: predicated region fallthrough
CT: control target
= control target key end

     0   :  { %s375_s6 = smov 0   ;;  %s468_s0 = inlined_call_operand.vmem [shape: bf16[6,18,8,16], index: 0, kind: input, shape index: {}]   ;;  %s469_s1 = inlined_call_operand.vmem [shape: bf16[2,8,8,16], index: 1, kind: output, shape index: {}]  }
   0x1 LB: > { %s303_s7 = sadd.s32 4294967295, %s363_s6   ;;  %p307_p0 = scmp.ge.s32.totalorder %s363_s6, 1  ;;  %s363_s6 = sphi %s375_s6, %s11_s6  }
   0x2   : > { %p89_p1 = scmp.lt.s32.totalorder %s363_s6, 3 }
   0x4   : > { %p90_p2 = pnand %p307_p0, %p89_p1 }
   0x5   : > { %s110_s8 = smul.u32 (!%p90_p2), 3, %s303_s7  ;;  %p117_p3 = scmp.lt.s32.totalorder (!%p90_p2), %s303_s7, 1  ;;  %vm239_vm0 = vcmask (!%p90_p2), 125952  }
   0x6   : > { %93 = sbr.rel (%p90_p2) target bundleno = 43 (0x2b), region = 24 }
   0x7   : > { %p111_p4 = scmp.lt.s32.totalorder (!%p90_p2), %s110_s8, 5 }
   0xd   : > { %s471_s7 = smov (!%p117_p3, %s303_s7), 1  ;;  %s473_s8 = smov (!%p111_p4, %s110_s8), 5 }
   0xe   : > { %s348_s9 = smul.u32 72, %s473_s8  ;;  %s347_s13 = sshll.u32 %s471_s7, 5 }
   0xf   : > { %s417_s16 = scalar_lea.vmem %s469_s1, %s347_s13 }
  0x10   : > { %s388_s12 = scalar_lea.vmem %s468_s0, %s348_s9 }
  0x11   : > { %v122_v0 = vld [vmem:[%s388_s12] sm:$0xf]  ;;  %v123_v1 = vld [vmem:[%s388_s12 + $0x4] sm:$0xf]  ;;  %v124_v2 = vld [vmem:[%s388_s12 + $0x8] sm:$0xf] }
  0x12   : > { %v139_v3 = vmax.bf16 %v123_v1, %v122_v0  ;;  %v311_v4 = vld [vmem:[%s388_s12 + $0x48] sm:$0xf]  ;;  %v312_v5 = vld [vmem:[%s388_s12 + $0x4c] sm:$0xf]  ;;  %v313_v6 = vld [vmem:[%s388_s12 + $0x50] sm:$0xf] }
  0x13   : > { %v173_v7 = vmax.bf16 %v312_v5, %v311_v4  ;;  %v328_v8 = vld [vmem:[%s388_s12 + $0x90] sm:$0xf]  ;;  %v329_v9 = vld [vmem:[%s388_s12 + $0x94] sm:$0xf]  ;;  %v330_v10 = vld [vmem:[%s388_s12 + $0x98] sm:$0xf] }
  0x14   : > { %v147_v11 = vmax.bf16 %v139_v3, %v124_v2  ;;  %v215_v12 = vmax.bf16 %v329_v9, %v328_v8  ;;  %v125_v13 = vld [vmem:[%s388_s12 + $0xc] sm:$0xf]  ;;  %v126_v14 = vld [vmem:[%s388_s12 + $0x10] sm:$0xf]  ;;  %v314_v15 = vld [vmem:[%s388_s12 + $0x54] sm:$0xf] }
  0x15   : > { %v181_v16 = vmax.bf16 %v313_v6, %v173_v7  ;;  %v140_v17 = vmax.bf16 %v125_v13, %v124_v2  ;;  %v315_v18 = vld [vmem:[%s388_s12 + $0x58] sm:$0xf]  ;;  %v174_v19 = vmax.bf16 %v314_v15, %v313_v6  ;;  %v331_v20 = vld [vmem:[%s388_s12 + $0x9c] sm:$0xf]  ;;  %v332_v21 = vld [vmem:[%s388_s12 + $0xa0] sm:$0xf] }
  0x16   : > { %v223_v22 = vmax.bf16 %v330_v10, %v215_v12  ;;  %v216_v23 = vmax.bf16 %v331_v20, %v330_v10  ;;  %v127_v24 = vld [vmem:[%s388_s12 + $0x14] sm:$0xf]  ;;  %v128_v25 = vld [vmem:[%s388_s12 + $0x18] sm:$0xf]  ;;  %v316_v26 = vld [vmem:[%s388_s12 + $0x5c] sm:$0xf] }
  0x17   : > { %v189_v27 = vmax.bf16 %v181_v16, %v147_v11  ;;  %v148_v28 = vmax.bf16 %v140_v17, %v126_v14  ;;  %v182_v29 = vmax.bf16 %v315_v18, %v174_v19  ;;  %v141_v30 = vmax.bf16 %v127_v24, %v126_v14  ;;  %v317_v31 = vld [vmem:[%s388_s12 + $0x60] sm:$0xf]  ;;  %v333_v32 = vld [vmem:[%s388_s12 + $0xa4] sm:$0xf]  ;;  %v334_v33 = vld [vmem:[%s388_s12 + $0xa8] sm:$0xf] }
  0x18   : > { %v224_v34 = vmax.bf16 %v332_v21, %v216_v23  ;;  %v175_v35 = vmax.bf16 %v316_v26, %v315_v18  ;;  %v217_v36 = vmax.bf16 %v333_v32, %v332_v21  ;;  %v129_v37 = vld [vmem:[%s388_s12 + $0x1c] sm:$0xf]  ;;  %v130_v38 = vld [vmem:[%s388_s12 + $0x20] sm:$0xf]  ;;  %v318_v39 = vld [vmem:[%s388_s12 + $0x64] sm:$0xf] }
  0x19   : > { %v231_v40 = vmax.bf16 %v223_v22, %v189_v27  ;;  %v190_v41 = vmax.bf16 %v182_v29, %v148_v28  ;;  %v149_v42 = vmax.bf16 %v141_v30, %v128_v25  ;;  %v142_v43 = vmax.bf16 %v129_v37, %v128_v25  ;;  %v319_v44 = vld [vmem:[%s388_s12 + $0x68] sm:$0xf]  ;;  %v335_v45 = vld [vmem:[%s388_s12 + $0xac] sm:$0xf]  ;;  %v336_v46 = vld [vmem:[%s388_s12 + $0xb0] sm:$0xf] }
  0x1a   : > { %v183_v47 = vmax.bf16 %v317_v31, %v175_v35  ;;  %v225_v48 = vmax.bf16 %v334_v33, %v217_v36  ;;  %v176_v49 = vmax.bf16 %v318_v39, %v317_v31  ;;  %v218_v50 = vmax.bf16 %v335_v45, %v334_v33  ;;  %v131_v51 = vld [vmem:[%s388_s12 + $0x24] sm:$0xf]  ;;  %v132_v52 = vld [vmem:[%s388_s12 + $0x28] sm:$0xf]  ;;  %v320_v53 = vld [vmem:[%s388_s12 + $0x6c] sm:$0xf] }
  0x1b   : > { %240 = vst.msk [vmem:[%s417_s16] sm:$0xf] %vm239_vm0, %v231_v40  ;;  %v232_v54 = vmax.bf16 %v224_v34, %v190_v41  ;;  %v150_v55 = vmax.bf16 %v142_v43, %v130_v38  ;;  %v143_v56 = vmax.bf16 %v131_v51, %v130_v38  ;;  %v321_v57 = vld [vmem:[%s388_s12 + $0x70] sm:$0xf]  ;;  %v177_v58 = vmax.bf16 %v320_v53, %v319_v44  ;;  %v337_v59 = vld [vmem:[%s388_s12 + $0xb4] sm:$0xf] }
  0x1c   : > { %v338_v60 = vld [vmem:[%s388_s12 + $0xb8] sm:$0xf]  ;;  %v191_v61 = vmax.bf16 %v183_v47, %v149_v42  ;;  %v184_v62 = vmax.bf16 %v319_v44, %v176_v49  ;;  %v226_v63 = vmax.bf16 %v336_v46, %v218_v50  ;;  %v219_v0 = vmax.bf16 %v337_v59, %v336_v46  ;;  %v133_v1 = vld [vmem:[%s388_s12 + $0x2c] sm:$0xf]  ;;  %v134_v2 = vld [vmem:[%s388_s12 + $0x30] sm:$0xf] }
  0x1d   : > { %v322_v3 = vld [vmem:[%s388_s12 + $0x74] sm:$0xf]  ;;  %241 = vst.msk [vmem:[%s417_s16 + $0x4] sm:$0xf] %vm239_vm0, %v232_v54  ;;  %v151_v4 = vmax.bf16 %v143_v56, %v132_v52  ;;  %v185_v5 = vmax.bf16 %v321_v57, %v177_v58  ;;  %v144_v6 = vmax.bf16 %v133_v1, %v132_v52  ;;  %v323_v7 = vld [vmem:[%s388_s12 + $0x78] sm:$0xf] }
  0x1e   : > { %v178_v8 = vmax.bf16 %v322_v3, %v321_v57  ;;  %v339_v9 = vld [vmem:[%s388_s12 + $0xbc] sm:$0xf]  ;;  %v340_v10 = vld [vmem:[%s388_s12 + $0xc0] sm:$0xf]  ;;  %v233_v11 = vmax.bf16 %v225_v48, %v191_v61  ;;  %v192_v12 = vmax.bf16 %v184_v62, %v150_v55  ;;  %v227_v13 = vmax.bf16 %v338_v60, %v219_v0  ;;  %v135_v15 = vld [vmem:[%s388_s12 + $0x34] sm:$0xf] }
  0x1f   : > { %v220_v14 = vmax.bf16 %v339_v9, %v338_v60  ;;  %v136_v16 = vld [vmem:[%s388_s12 + $0x38] sm:$0xf]  ;;  %v324_v17 = vld [vmem:[%s388_s12 + $0x7c] sm:$0xf]  ;;  %v193_v18 = vmax.bf16 %v185_v5, %v151_v4  ;;  %v152_v19 = vmax.bf16 %v144_v6, %v134_v2  ;;  %v145_v21 = vmax.bf16 %v135_v15, %v134_v2  ;;  %v325_v22 = vld [vmem:[%s388_s12 + $0x80] sm:$0xf] }
  0x20   : > { %v186_v20 = vmax.bf16 %v323_v7, %v178_v8  ;;  %v341_v23 = vld [vmem:[%s388_s12 + $0xc4] sm:$0xf]  ;;  %v342_v24 = vld [vmem:[%s388_s12 + $0xc8] sm:$0xf]  ;;  %242 = vst.msk [vmem:[%s417_s16 + $0x8] sm:$0xf] %vm239_vm0, %v233_v11  ;;  %v234_v25 = vmax.bf16 %v226_v63, %v192_v12  ;;  %v179_v27 = vmax.bf16 %v324_v17, %v323_v7 }
  0x21   : > { %v228_v26 = vmax.bf16 %v340_v10, %v220_v14  ;;  %v221_v28 = vmax.bf16 %v341_v23, %v340_v10  ;;  %v137_v29 = vld [vmem:[%s388_s12 + $0x3c] sm:$0xf]  ;;  %v138_v30 = vld [vmem:[%s388_s12 + $0x40] sm:$0xf]  ;;  %v326_v31 = vld [vmem:[%s388_s12 + $0x84] sm:$0xf]  ;;  %v235_v32 = vmax.bf16 %v227_v13, %v193_v18  ;;  %v153_v34 = vmax.bf16 %v145_v21, %v136_v16 }
  0x22   : > { %v194_v33 = vmax.bf16 %v186_v20, %v152_v19  ;;  %v146_v35 = vmax.bf16 %v137_v29, %v136_v16  ;;  %v327_v36 = vld [vmem:[%s388_s12 + $0x88] sm:$0xf]  ;;  %v343_v37 = vld [vmem:[%s388_s12 + $0xcc] sm:$0xf]  ;;  %v344_v38 = vld [vmem:[%s388_s12 + $0xd0] sm:$0xf]  ;;  %v187_v39 = vmax.bf16 %v325_v22, %v179_v27  ;;  %v180_v41 = vmax.bf16 %v326_v31, %v325_v22 }
  0x23   : > { %243 = vst.msk [vmem:[%s417_s16 + $0xc] sm:$0xf] %vm239_vm0, %v234_v25  ;;  %v229_v40 = vmax.bf16 %v342_v24, %v221_v28  ;;  %v222_v42 = vmax.bf16 %v343_v37, %v342_v24  ;;  %244 = vst.msk [vmem:[%s417_s16 + $0x10] sm:$0xf] %vm239_vm0, %v235_v32 }
  0x24   : > { %v236_v43 = vmax.bf16 %v228_v26, %v194_v33  ;;  %v154_v44 = vmax.bf16 %v146_v35, %v138_v30  ;;  %v195_v45 = vmax.bf16 %v187_v39, %v153_v34  ;;  %v188_v46 = vmax.bf16 %v327_v36, %v180_v41 }
  0x25   : > { %v230_v47 = vmax.bf16 %v344_v38, %v222_v42 }
  0x26   : > { %245 = vst.msk [vmem:[%s417_s16 + $0x14] sm:$0xf] %vm239_vm0, %v236_v43  ;;  %v237_v48 = vmax.bf16 %v229_v40, %v195_v45  ;;  %v196_v49 = vmax.bf16 %v188_v46, %v154_v44 }
  0x28   : > { %246 = vst.msk [vmem:[%s417_s16 + $0x18] sm:$0xf] %vm239_vm0, %v237_v48  ;;  %v238_v50 = vmax.bf16 %v230_v47, %v196_v49 }
  0x2a   : > { %247 = vst.msk [vmem:[%s417_s16 + $0x1c] sm:$0xf] %vm239_vm0, %v238_v50 }
  0x2b PF: > { %s11_s6 = sadd.s32 1, %s363_s6  }
  0x2c   : > { %p8_p5 = scmp.ge.s32.totalorder %s11_s6, 4  }
  0x2e   :  { %10 = sbr.rel (!%p8_p5) target bundleno = 1 (0x1), region = 56 }

// kernel: prior_extraction_forward.6
= control target key start
LH: loop header
LB: loop body
LE: loop exit
PB: predicated region body
PF: predicated region fallthrough
CT: control target
= control target key end

     0   :  { %s877_s12 = smov 0   ;;  %s967_s0 = inlined_call_operand.vmem [shape: bf16[2,36,64], index: 0, kind: input, shape index: {}]   ;;  %s968_s1 = inlined_call_operand.vmem [shape: bf16[4,64,32], index: 1, kind: input, shape index: {}]   ;;  %s969_s2 = inlined_call_operand.vmem [shape: f32[1,32], index: 2, kind: input, shape index: {}]   ;;  %s970_s3 = inlined_call_operand.vmem [shape: bf16[2,24,32], index: 3, kind: output, shape index: {}]  }
   0x1 LB: > { %s675_s13 = sadd.s32 4294967295, %s855_s12   ;;  %p679_p0 = scmp.ge.s32.totalorder %s855_s12, 1  ;;  %s855_s12 = sphi %s877_s12, %s13_s12  }
   0x2   : > { %p137_p1 = scmp.lt.s32.totalorder %s855_s12, 3 }
   0x4   : > { %p138_p2 = pnand %p679_p0, %p137_p1 }
   0x5   : > { %v827_v0 = vld [vmem:[%s968_s1 + $0x20] sm:$0xff] (!%p138_p2)   ;;  %p161_p3 = scmp.lt.s32.totalorder (!%p138_p2), %s675_s13, 1  ;;  %v829_v2 = vld [vmem:[%s968_s1 + $0x28] sm:$0xff] (!%p138_p2)   ;;  %v831_v4 = vld [vmem:[%s968_s1 + $0x30] sm:$0xff] (!%p138_p2)   ;;  %vm243_vm0 = vcmask (!%p138_p2), 523264   ;;  %vm393_vm2 = vcmask (!%p138_p2), 1044480  }
   0x6   : > { %141 = sbr.rel (%p138_p2) target bundleno = 270 (0x10e), region = 32  ;;  %v828_v1 = vld [vmem:[%s968_s1] sm:$0xff] (!%p138_p2)   ;;  %769 = vmatprep.subr.bf16.mxu0 (!%p138_p2), %v827_v0  ;;  %v830_v3 = vld [vmem:[%s968_s1 + $0x8] sm:$0xff] (!%p138_p2)   ;;  %v832_v5 = vld [vmem:[%s968_s1 + $0x10] sm:$0xff] (!%p138_p2)   ;;  %vm203_vm1 = vsmask.f32 (!%p138_p2), 7424 }
   0x7   : > { %781 = vmatprep.subr.bf16.mxu1 (!%p138_p2), %v828_v1  ;;  %770 = vmatpush3.bf16.msra.mxu0 (!%p138_p2), %v827_v0  ;;  %v833_v6 = vld [vmem:[%s968_s1 + $0x38] sm:$0xff] (!%p138_p2)   ;;  %v838_v16 = vld [vmem:[%s968_s1 + $0x40] sm:$0xff] (!%p138_p2)   ;;  %v840_v25 = vld [vmem:[%s968_s1 + $0x48] sm:$0xff] (!%p138_p2)   ;;  %vm491_vm3 = vsmask.f32 (!%p138_p2), 4352  ;;  %vm616_vm4 = vcmask (!%p138_p2), 257024  }
   0x8   : > { %782 = vmatpush3.bf16.msra.mxu1 (!%p138_p2), %v828_v1  ;;  %771 = vmatprep.subr.bf16.mxu0 (!%p138_p2), %v829_v2  ;;  %v834_v10 = vld [vmem:[%s968_s1 + $0x18] sm:$0xff] (!%p138_p2)   ;;  %v839_v20 = vld [vmem:[%s968_s1 + $0x60] sm:$0xff] (!%p138_p2)   ;;  %v841_v27 = vld [vmem:[%s968_s1 + $0x68] sm:$0xff] (!%p138_p2)  }
   0x9   : > { %783 = vmatprep.subr.bf16.mxu1 (!%p138_p2), %v830_v3  ;;  %v842_v34 = vld [vmem:[%s968_s1 + $0x50] sm:$0xff] (!%p138_p2)   ;;  %v844_v47 = vld [vmem:[%s968_s1 + $0x58] sm:$0xff] (!%p138_p2)  }
   0xa   : > { %v843_v35 = vld [vmem:[%s968_s1 + $0x70] sm:$0xff] (!%p138_p2)   ;;  %v845_v48 = vld [vmem:[%s968_s1 + $0x78] sm:$0xff] (!%p138_p2)  }
   0xb   : > { %772 = vmatpush3.bf16.msra.mxu0 (!%p138_p2), %v829_v2 }
   0xc   : > { %784 = vmatpush3.bf16.msra.mxu1 (!%p138_p2), %v830_v3  ;;  %773 = vmatprep.subr.bf16.mxu0 (!%p138_p2), %v831_v4 }
   0xd   : > { %s972_s13 = smov (!%p161_p3, %s675_s13), 1  ;;  %785 = vmatprep.subr.bf16.mxu1 %v832_v5 }
   0xe   : > { %s817_s24 = smul.u32 20, %s972_s13 }
   0xf   : > { %774 = vmatpush3.bf16.msra.mxu0 %v831_v4  ;;  %v736_v4 = vld [vmem:[%s969_s2] ss:$0 sm:$0xff]  ;;  %s818_s27 = smul.u32 12, %s972_s13 }
  0x10   : > { %s909_s29 = scalar_lea.vmem %s967_s0, %s817_s24  ;;  %786 = vmatpush3.bf16.msra.mxu1 %v832_v5  ;;  %775 = vmatprep.subr.bf16.mxu0 %v833_v6 }
  0x11   : > { %v172_v7 = vld [vmem:[%s909_s29] sm:$0xf]  ;;  %v173_v8 = vld [vmem:[%s909_s29 + $0x4] sm:$0xf]  ;;  %v174_v9 = vld [vmem:[%s909_s29 + $0x8] sm:$0xf]  ;;  %787 = vmatprep.subr.bf16.mxu1 %v834_v10  ;;  %s170_s30 = scalar_lea.vmem %s970_s3, %s818_s27 }
  0x12   : > { %v183_v11 = vld [vmem:[%s909_s29 + $0xc] sm:$0x1]  ;;  %v690_v12 = vcombine.low %v172_v7, %v173_v8  ;;  %v698_v23 = vcombine.low %v174_v9, %v174_v9  ;;  %v376_v28 = vld [vmem:[%s909_s29] sm:$0x8] }
  0x13   : > { %v691_v13 = vcombine.low %v174_v9, %v183_v11  ;;  %776 = vmatpush3.bf16.msra.mxu0 %v833_v6  ;;  %v377_v29 = vld [vmem:[%s909_s29 + $0xc] sm:$0x7]  ;;  %v713_v31 = vcombine.low %v376_v28, %v173_v8 }
  0x14   : > { %v205_v14 = vshrl.u32 %v690_v12, 16  ;;  %v207_v15 = vshll.u32 %v690_v12, 16  ;;  %789 = vmatprep.mubr.msk.bf16.mxu1 %vm243_vm0, %v690_v12  ;;  %788 = vmatpush3.bf16.msra.mxu1 %v834_v10  ;;  %v478_v30 = vld [vmem:[%s909_s29 + $0xc] sm:$0xf]  ;;  %v714_v32 = vcombine.low %v174_v9, %v377_v29 }
  0x15   : > { %v212_v17 = vshll.u32 %v691_v13, 16  ;;  %v216_v18 = vshrl.u32 %v691_v13, 16  ;;  %793 = vmatprep.subr.bf16.mxu0 %v838_v16  ;;  %805 = vmatprep.subr.bf16.mxu1 %v839_v20  ;;  %v729_v33 = vcombine.low %v174_v9, %v478_v30  ;;  %v394_v36 = vrot.slane %v713_v31, 3 }
  0x16   : > { %v209_v19 = vrot.slane %v207_v15, 1  ;;  %v395_v37 = vrot.slane %v714_v32, 3  ;;  %v493_v38 = vshrl.u32 %v713_v31, 16  ;;  %v496_v39 = vshll.u32 %v713_v31, 16 }
  0x17   : > { %v214_v21 = vrot.slane %v212_v17, 1  ;;  %790 = vmatmul.mubr.msk.bf16.vlgmr.msra.gmra.mrb[0].mxu1 %vm243_vm0, %v698_v23  ;;  %v501_v40 = vshrl.u32 %v729_v33, 16  ;;  %v504_v41 = vshll.u32 %v729_v33, 16 }
  0x18   : > { %v210_v22 = vor.u32 %v209_v19, %v205_v14  ;;  %806 = vmatpush3.bf16.msra.mxu1 %v839_v20  ;;  %v396_v42 = vsel %vm393_vm2, %v394_v36, %v395_v37  ;;  %v495_v43 = vrot.slane %v493_v38, 3  ;;  %v498_v44 = vrot.slane %v496_v39, 4 }
  0x19   : > { %v218_v24 = vor.u32 %v216_v18, %v214_v21  ;;  %807 = vmatprep.subr.bf16.mxu1 %v841_v27  ;;  %v503_v45 = vrot.slane %v501_v40, 3  ;;  %v506_v46 = vrot.slane %v504_v41, 4 }
  0x1a   : > { %v215_v26 = vsel %vm203_vm1, %v210_v22, %v214_v21  ;;  %v499_v49 = vor.u32 %v498_v44, %v495_v43 }
  0x1b   : > { %777 = vmatprep.mubr.msk.bf16.mxu0 %vm243_vm0, %v215_v26  ;;  %v507_v50 = vor.u32 %v506_v46, %v503_v45 }
  0x1c   : > { %778 = vmatmul.mubr.msk.bf16.vlgmr.msra.gmra.mrb[0].mxu0 %vm243_vm0, %v218_v24  ;;  %808 = vmatpush3.bf16.msra.mxu1 %v841_v27 }
  0x1d   : > { %794 = vmatpush3.bf16.msra.mxu0 %v838_v16  ;;  %809 = vmatprep.subr.bf16.mxu1 %v843_v35  ;;  %v508_v51 = vsel %vm491_vm3, %v499_v49, %v507_v50 }
  0x1e   : > { %795 = vmatprep.subr.bf16.mxu0 %v840_v25  ;;  %801 = vmatprep.mubr.msk.bf16.mxu0 %vm243_vm0, %v396_v42 }
  0x1f   : > { %813 = vmatprep.mubr.msk.bf16.mxu1 %vm243_vm0, %v508_v51 }
  0x20   : > { %810 = vmatpush3.bf16.msra.mxu1 %v843_v35 }
  0x21   : > { %796 = vmatpush3.bf16.msra.mxu0 %v840_v25  ;;  %811 = vmatprep.subr.bf16.mxu1 %v845_v48 }
  0x22   : > { %797 = vmatprep.subr.bf16.mxu0 %v842_v34 }
  0x24   : > { %812 = vmatpush3.bf16.msra.mxu1 %v845_v48 }
  0x25   : > { %798 = vmatpush3.bf16.msra.mxu0 %v842_v34 }
  0x26   : > { %799 = vmatprep.subr.bf16.mxu0 %v844_v47 }
  0x27   : > { %814 = vmatmul.mubr.msk.bf16.vlgmr.msra.gmra.mrb[4].mxu1 %vm243_vm0, %v507_v50 }
  0x29   : > { %800 = vmatpush3.bf16.msra.mxu0 %v844_v47 }
  0x2c   : > { %802 = vmatmul.mubr.msk.bf16.vlgmr.msra.gmra.mrb[4].mxu0 %vm243_vm0, %v395_v37 }
  0xea   : > { %v791_v53 = vpop.f32.mrb[0].mxu1 }
  0xeb   : > { %v362_v56 = vpop.f32.mrb[1].mxu1 }
  0xec   : > { %v792_v59 = vpop.f32.mrb[2].mxu1 }
  0xed   : > { %v365_v61 = vpop.f32.mrb[3].mxu1 }
  0xef   : > { %v779_v52 = vpop.f32.mrb[0].mxu0 }
  0xf0   : > { %v371_v54 = vadd.f32 %v791_v53, %v779_v52  ;;  %v284_v55 = vpop.f32.mrb[1].mxu0 }
  0xf1   : > { %v363_v57 = vadd.f32 %v362_v56, %v284_v55  ;;  %v780_v58 = vpop.f32.mrb[2].mxu0 }
  0xf2   : > { %v287_v60 = vpop.f32.mrb[3].mxu0 }
  0xf3   : > { %v366_v62 = vadd.f32 %v365_v61, %v287_v60 }
  0xfa   : > { %v815_v0 = vpop.f32.mrb[4].mxu1 }
  0xfb   : > { %v573_v3 = vpop.f32.mrb[5].mxu1 }
  0xfc   : > { %v816_v7 = vpop.f32.mrb[6].mxu1 }
  0xfd   : > { %v576_v10 = vpop.f32.mrb[7].mxu1 }
  0xff   : > { %v803_v63 = vpop.f32.mrb[4].mxu0 }
 0x100   : > { %v477_v1 = vadd.f32 %v803_v63, %v371_v54  ;;  %v461_v2 = vpop.f32.mrb[5].mxu0 }
 0x101   : > { %v475_v5 = vadd.f32 %v461_v2, %v363_v57  ;;  %v804_v6 = vpop.f32.mrb[6].mxu0 }
 0x102   : > { %v589_v8 = vadd.f32 %v815_v0, %v477_v1  ;;  %v464_v9 = vpop.f32.mrb[7].mxu0 }
 0x103   : > { %v587_v11 = vadd.f32 %v573_v3, %v475_v5  ;;  %v476_v12 = vadd.f32 %v464_v9, %v366_v62 }
 0x104   : > { %v599_v13 = vadd.f32 %v736_v4, %v589_v8 }
 0x105   : > { %v597_v14 = vadd.f32 %v736_v4, %v587_v11  ;;  %v588_v15 = vadd.f32 %v576_v10, %v476_v12 }
 0x106   : > { %v602_v16 = vmax.f32 %v599_v13, 0.0 }
 0x107   : > { %v600_v17 = vmax.f32 %v597_v14, 0.0  ;;  %v598_v18 = vadd.f32 %v736_v4, %v588_v15 }
 0x108   : > { %v744_v19 = vpack.c.bf16 %v602_v16, %v602_v16 }
 0x109   : > { %v742_v20 = vpack.c.bf16 %v600_v17, %v600_v17  ;;  %v601_v21 = vmax.f32 %v598_v18, 0.0 }
 0x10a   : > { %619 = vst.msk [vmem:[%s170_s30 + $0x8] sm:$0xf] %vm616_vm4, %v744_v19 }
 0x10b   : > { %617 = vst.msk [vmem:[%s170_s30] sm:$0xf] %vm616_vm4, %v742_v20  ;;  %v743_v22 = vpack.c.bf16 %v601_v21, %v601_v21 }
 0x10d   : > { %618 = vst.msk [vmem:[%s170_s30 + $0x4] sm:$0xf] %vm616_vm4, %v743_v22 }
 0x10e PF: > { %s13_s12 = sadd.s32 1, %s855_s12  }
 0x10f   : > { %p10_p4 = scmp.ge.s32.totalorder %s13_s12, 4  }
 0x111   :  { %12 = sbr.rel (!%p10_p4) target bundleno = 1 (0x1), region = 65 }

// kernel: prior_extraction_forward.7
= control target key start
LH: loop header
LB: loop body
LE: loop exit
PB: predicated region body
PF: predicated region fallthrough
CT: control target
= control target key end

     0   :  { %s1154_s18 = smov 0   ;;  %s1345_s0 = inlined_call_operand.vmem [shape: bf16[2,16,128], index: 0, kind: input, shape index: {}]   ;;  %s1346_s1 = inlined_call_operand.vmem [shape: bf16[4,128,64], index: 1, kind: input, shape index: {}]   ;;  %s1347_s2 = inlined_call_operand.vmem [shape: f32[1,64], index: 2, kind: input, shape index: {}]   ;;  %s1348_s3 = inlined_call_operand.vmem [shape: bf16[64,32], index: 3, kind: input, shape index: {}]   ;;  %s1349_s4 = inlined_call_operand.vmem [shape: f32[1,32], index: 4, kind: input, shape index: {}]   ;;  %s1350_s5 = inlined_call_operand.vmem [shape: f32[2,8,32], index: 5, kind: output, shape index: {}]  }
   0x1 LB: > { %s831_s19 = sadd.s32 4294967295, %s1120_s18   ;;  %p835_p0 = scmp.ge.s32.totalorder %s1120_s18, 1  ;;  %s1120_s18 = sphi %s1154_s18, %s15_s18  }
   0x2   : > { %p187_p1 = scmp.lt.s32.totalorder %s1120_s18, 3 }
   0x4   : > { %p188_p2 = pnand %p835_p0, %p187_p1 }
   0x5   : > { %v1075_v0 = vld [vmem:[%s1346_s1 + $0x40] sm:$0xff] (!%p188_p2)   ;;  %v1122_v1 = vmov (!%p188_p2), 0.0   ;;  %v1077_v3 = vld [vmem:[%s1346_s1 + $0x48] sm:$0xff] (!%p188_p2)   ;;  %vm1123_vm0 = vmmov (!%p188_p2), 0   ;;  %p214_p3 = scmp.lt.s32.totalorder (!%p188_p2), %s831_s19, 1  ;;  %v1079_v5 = vld [vmem:[%s1346_s1 + $0x50] sm:$0xff] (!%p188_p2)  }
   0x6   : > { %191 = sbr.rel (%p188_p2) target bundleno = 507 (0x1fb), region = 40  ;;  %973 = vmatprep.subr.bf16.mxu0 (!%p188_p2), %v1122_v1  ;;  %993 = vmatprep.subr.bf16.mxu1 (!%p188_p2), %v1122_v1  ;;  %v1076_v2 = vld [vmem:[%s1346_s1] sm:$0xff] (!%p188_p2)   ;;  %v1078_v4 = vld [vmem:[%s1346_s1 + $0x8] sm:$0xff] (!%p188_p2)   ;;  %v1080_v6 = vld [vmem:[%s1346_s1 + $0x10] sm:$0xff] (!%p188_p2)   ;;  %vm732_vm1 = vcmask (!%p188_p2), 523264   ;;  %vm776_vm2 = vcmask (!%p188_p2), 261120  }
   0x7   : > { %974 = vmatpush3.bf16.msra.mxu0 (!%p188_p2), %v1075_v0  ;;  %989 = vmatprep.mubr.msk.bf16.mxu0 (!%p188_p2), %vm1123_vm0, %v1122_v1  ;;  %v1081_v7 = vld [vmem:[%s1346_s1 + $0x58] sm:$0xff] (!%p188_p2)   ;;  %v1083_v9 = vld [vmem:[%s1346_s1 + $0x60] sm:$0xff] (!%p188_p2)   ;;  %v1085_v12 = vld [vmem:[%s1346_s1 + $0x68] sm:$0xff] (!%p188_p2)  }
   0x8   : > { %994 = vmatpush3.bf16.msra.mxu1 (!%p188_p2), %v1076_v2  ;;  %975 = vmatprep.subr.bf16.mxu0 (!%p188_p2), %v1122_v1  ;;  %v1082_v8 = vld [vmem:[%s1346_s1 + $0x18] sm:$0xff] (!%p188_p2)   ;;  %v1084_v10 = vld [vmem:[%s1346_s1 + $0x20] sm:$0xff] (!%p188_p2)   ;;  %v1086_v13 = vld [vmem:[%s1346_s1 + $0x28] sm:$0xff] (!%p188_p2)  }
   0x9   : > { %995 = vmatprep.subr.bf16.mxu1 (!%p188_p2), %v1122_v1  ;;  %1009 = vmatprep.mubr.msk.bf16.mxu1 (!%p188_p2), %vm1123_vm0, %v1122_v1  ;;  %v1087_v15 = vld [vmem:[%s1346_s1 + $0x70] sm:$0xff] (!%p188_p2)   ;;  %v1089_v19 = vld [vmem:[%s1346_s1 + $0x78] sm:$0xff] (!%p188_p2)   ;;  %v1092_v23 = vld [vmem:[%s1346_s1 + $0x80] sm:$0xff] (!%p188_p2)  }
   0xa   : > { %v1088_v16 = vld [vmem:[%s1346_s1 + $0x30] sm:$0xff] (!%p188_p2)   ;;  %v1090_v20 = vld [vmem:[%s1346_s1 + $0x38] sm:$0xff] (!%p188_p2)   ;;  %v1093_v24 = vld [vmem:[%s1346_s1 + $0xc0] sm:$0xff] (!%p188_p2)  }
   0xb   : > { %976 = vmatpush3.bf16.msra.mxu0 (!%p188_p2), %v1077_v3  ;;  %v1094_v25 = vld [vmem:[%s1346_s1 + $0x88] sm:$0xff] (!%p188_p2)   ;;  %v1096_v27 = vld [vmem:[%s1346_s1 + $0x90] sm:$0xff] (!%p188_p2)   ;;  %v1098_v29 = vld [vmem:[%s1346_s1 + $0x98] sm:$0xff] (!%p188_p2)  }
   0xc   : > { %996 = vmatpush3.bf16.msra.mxu1 (!%p188_p2), %v1078_v4  ;;  %977 = vmatprep.subr.bf16.mxu0 (!%p188_p2), %v1122_v1  ;;  %v1095_v26 = vld [vmem:[%s1346_s1 + $0xc8] sm:$0xff] (!%p188_p2)   ;;  %v1097_v28 = vld [vmem:[%s1346_s1 + $0xd0] sm:$0xff] (!%p188_p2)   ;;  %v1099_v30 = vld [vmem:[%s1346_s1 + $0xd8] sm:$0xff] (!%p188_p2)  }
   0xd   : > { %s1352_s19 = smov (!%p214_p3, %s831_s19), 1  ;;  %997 = vmatprep.subr.bf16.mxu1 %v1122_v1  ;;  %v1100_v31 = vld [vmem:[%s1346_s1 + $0xa0] sm:$0xff]   ;;  %v1102_v35 = vld [vmem:[%s1346_s1 + $0xa8] sm:$0xff]   ;;  %v1104_v38 = vld [vmem:[%s1346_s1 + $0xb0] sm:$0xff]  }
   0xe   : > { %s931_s11 = sshll.u32 %s1352_s19, 3  ;;  %v1101_v32 = vld [vmem:[%s1346_s1 + $0xe0] sm:$0xff]   ;;  %v1103_v37 = vld [vmem:[%s1346_s1 + $0xe8] sm:$0xff]   ;;  %v1105_v42 = vld [vmem:[%s1346_s1 + $0xf0] sm:$0xff]  }
   0xf   : > { %978 = vmatpush3.bf16.msra.mxu0 %v1079_v5  ;;  %s1209_s16 = scalar_lea.vmem %s1345_s0, %s931_s11  ;;  %v1106_v44 = vld [vmem:[%s1346_s1 + $0xb8] sm:$0xff]   ;;  %v1110_v50 = vld [vmem:[%s1348_s3] sm:$0xff]   ;;  %v1111_v51 = vld [vmem:[%s1348_s3 + $0x8] sm:$0xff]   ;;  %s222_s12 = scalar_lea.vmem %s1350_s5, %s931_s11 }
  0x10   : > { %998 = vmatpush3.bf16.msra.mxu1 %v1080_v6  ;;  %979 = vmatprep.subr.bf16.mxu0 %v1122_v1  ;;  %v1091_v11 = vld [vmem:[%s1209_s16] sm:$0x1f]   ;;  %v1107_v47 = vld [vmem:[%s1346_s1 + $0xf8] sm:$0xff]   ;;  %v1112_v52 = vld [vmem:[%s1348_s3 + $0x10] sm:$0xff]  }
  0x11   : > { %999 = vmatprep.subr.bf16.mxu1 %v1122_v1  ;;  %v268_v14 = vshll.u32 %v1091_v11, 16  ;;  %v266_v17 = vshrl.u32 %v1091_v11, 16  ;;  %v224_v22 = vld [vmem:[%s1209_s16] sm:$0xf]  ;;  %v564_v34 = vld [vmem:[%s1209_s16 + $0x4] sm:$0x7] }
  0x12   : > { %v449_v33 = vld [vmem:[%s1209_s16] sm:$0xc]  ;;  %v450_v39 = vld [vmem:[%s1209_s16 + $0x4] sm:$0x3]  ;;  %v1113_v53 = vld [vmem:[%s1348_s3 + $0x18] sm:$0xff]  }
  0x13   : > { %980 = vmatpush3.bf16.msra.mxu0 %v1081_v7  ;;  %v270_v18 = vrot.slane %v268_v14, 1  ;;  %v913_v36 = vcombine.low %v449_v33, %v564_v34  ;;  %v888_v43 = vcombine.low %v449_v33, %v450_v39 }
  0x14   : > { %1000 = vmatpush3.bf16.msra.mxu1 %v1082_v8  ;;  %981 = vmatprep.subr.bf16.mxu0 %v1122_v1 }
  0x15   : > { %1001 = vmatprep.subr.bf16.mxu1 %v1122_v1  ;;  %v271_v21 = vor.u32 %v270_v18, %v266_v17  ;;  %v586_v40 = vshrl.u32 %v913_v36, 16  ;;  %v589_v41 = vshll.u32 %v913_v36, 16  ;;  %v473_v48 = vrot.slane %v888_v43, 2 }
  0x17   : > { %982 = vmatpush3.bf16.msra.mxu0 %v1083_v9  ;;  %v588_v45 = vrot.slane %v586_v40, 2  ;;  %v591_v46 = vrot.slane %v589_v41, 3 }
  0x18   : > { %1002 = vmatpush3.bf16.msra.mxu1 %v1084_v10  ;;  %983 = vmatprep.subr.bf16.mxu0 %v1122_v1 }
  0x19   : > { %1003 = vmatprep.subr.bf16.mxu1 %v1122_v1  ;;  %v592_v49 = vor.u32 %v591_v46, %v588_v45 }
  0x1b   : > { %984 = vmatpush3.bf16.msra.mxu0 %v1085_v12 }
  0x1c   : > { %1004 = vmatpush3.bf16.msra.mxu1 %v1086_v13  ;;  %985 = vmatprep.subr.bf16.mxu0 %v1122_v1  ;;  %v923_v13 = vld [vmem:[%s1349_s4] ss:$0 sm:$0xff] }
  0x1d   : > { %1005 = vmatprep.subr.bf16.mxu1 %v1122_v1 }
  0x1f   : > { %986 = vmatpush3.bf16.msra.mxu0 %v1087_v15 }
  0x20   : > { %1006 = vmatpush3.bf16.msra.mxu1 %v1088_v16  ;;  %987 = vmatprep.subr.bf16.mxu0 %v1122_v1 }
  0x21   : > { %1007 = vmatprep.subr.bf16.mxu1 %v1122_v1 }
  0x23   : > { %988 = vmatpush3.bf16.msra.mxu0 %v1089_v19 }
  0x24   : > { %1008 = vmatpush3.bf16.msra.mxu1 %v1090_v20  ;;  %1013 = vmatprep.subr.bf16.mxu0 %v1122_v1 }
  0x25   : > { %1033 = vmatprep.subr.bf16.mxu1 %v1122_v1 }
  0x26   : > { %990 = vmatmul.mubr.bf16.vlgmr.msra.gmra.mrb[0].mxu0 %v271_v21 }
  0x27   : > { %1010 = vmatmul.mubr.bf16.vlgmr.msra.gmra.mrb[0].mxu1 %v224_v22  ;;  %1014 = vmatpush3.bf16.msra.mxu0 %v1092_v23 }
  0x28   : > { %1034 = vmatpush3.bf16.msra.mxu1 %v1093_v24  ;;  %1015 = vmatprep.subr.bf16.mxu0 %v1122_v1 }
  0x29   : > { %1035 = vmatprep.subr.bf16.mxu1 %v1122_v1  ;;  %1029 = vmatprep.mubr.msk.bf16.mxu0 %vm1123_vm0, %v1122_v1 }
  0x2a   : > { %1049 = vmatprep.mubr.msk.bf16.mxu1 %vm1123_vm0, %v1122_v1 }
  0x2b   : > { %1016 = vmatpush3.bf16.msra.mxu0 %v1094_v25 }
  0x2c   : > { %1036 = vmatpush3.bf16.msra.mxu1 %v1095_v26  ;;  %1017 = vmatprep.subr.bf16.mxu0 %v1122_v1 }
  0x2d   : > { %1037 = vmatprep.subr.bf16.mxu1 %v1122_v1 }
  0x2f   : > { %1018 = vmatpush3.bf16.msra.mxu0 %v1096_v27 }
  0x30   : > { %1038 = vmatpush3.bf16.msra.mxu1 %v1097_v28  ;;  %1019 = vmatprep.subr.bf16.mxu0 %v1122_v1 }
  0x31   : > { %1039 = vmatprep.subr.bf16.mxu1 %v1122_v1 }
  0x33   : > { %1020 = vmatpush3.bf16.msra.mxu0 %v1098_v29 }
  0x34   : > { %1040 = vmatpush3.bf16.msra.mxu1 %v1099_v30  ;;  %1021 = vmatprep.subr.bf16.mxu0 %v1122_v1 }
  0x35   : > { %1041 = vmatprep.subr.bf16.mxu1 %v1122_v1 }
  0x37   : > { %1022 = vmatpush3.bf16.msra.mxu0 %v1100_v31 }
  0x38   : > { %1042 = vmatpush3.bf16.msra.mxu1 %v1101_v32  ;;  %1023 = vmatprep.subr.bf16.mxu0 %v1122_v1 }
  0x39   : > { %1043 = vmatprep.subr.bf16.mxu1 %v1122_v1 }
  0x3b   : > { %1024 = vmatpush3.bf16.msra.mxu0 %v1102_v35 }
  0x3c   : > { %1044 = vmatpush3.bf16.msra.mxu1 %v1103_v37  ;;  %1025 = vmatprep.subr.bf16.mxu0 %v1122_v1 }
  0x3d   : > { %1045 = vmatprep.subr.bf16.mxu1 %v1122_v1 }
  0x3f   : > { %1026 = vmatpush3.bf16.msra.mxu0 %v1104_v38 }
  0x40   : > { %1046 = vmatpush3.bf16.msra.mxu1 %v1105_v42  ;;  %1027 = vmatprep.subr.bf16.mxu0 %v1122_v1 }
  0x41   : > { %1047 = vmatprep.subr.bf16.mxu1 %v1122_v1 }
  0x43   : > { %1028 = vmatpush3.bf16.msra.mxu0 %v1106_v44 }
  0x44   : > { %1048 = vmatpush3.bf16.msra.mxu1 %v1107_v47  ;;  %1053 = vmatprep.subr.bf16.mxu0 %v1122_v1 }
  0x46   : > { %1030 = vmatmul.mubr.bf16.vlgmr.msra.gmra.mrb[4].mxu0 %v473_v48 }
  0x47   : > { %1050 = vmatmul.mubr.bf16.vlgmr.msra.gmra.mrb[4].mxu1 %v592_v49  ;;  %1061 = vmatprep.mubr.msk.bf16.mxu0 %vm1123_vm0, %v1122_v1 }
  0x48   : > { %1054 = vmatpush3.bf16.msra.mxu0 %v1110_v50 }
  0x49   : > { %1055 = vmatprep.subr.bf16.mxu0 %v1122_v1 }
  0x4c   : > { %1056 = vmatpush3.bf16.msra.mxu0 %v1111_v51 }
  0x4d   : > { %1057 = vmatprep.subr.bf16.mxu0 %v1122_v1 }
  0x50   : > { %1058 = vmatpush3.bf16.msra.mxu0 %v1112_v52 }
  0x51   : > { %1059 = vmatprep.subr.bf16.mxu0 %v1122_v1  ;;  %v922_v1 = vld [vmem:[%s1347_s2] ss:$0 sm:$0xff] }
  0x54   : > { %1060 = vmatpush3.bf16.msra.mxu0 %v1113_v53 }
  0xf9   : > { %v355_v54 = vpop.f32.mrb[0].mxu0 }
  0xfa   : > { %v443_v55 = vpop.f32.mrb[0].mxu1  ;;  %v991_v56 = vpop.f32.mrb[1].mxu0 }
  0xfb   : > { %v444_v57 = vadd.f32 %v443_v55, %v355_v54  ;;  %v1011_v58 = vpop.f32.mrb[1].mxu1  ;;  %v358_v59 = vpop.f32.mrb[2].mxu0 }
  0xfc   : > { %v446_v60 = vpop.f32.mrb[2].mxu1  ;;  %v992_v61 = vpop.f32.mrb[3].mxu0 }
  0xfd   : > { %v1012_v62 = vpop.f32.mrb[3].mxu1 }
 0x119   : > { %v557_v63 = vpop.f32.mrb[4].mxu0 }
 0x11a   : > { %v563_v0 = vadd.f32 %v557_v63, %v444_v57  ;;  %v676_v2 = vpop.f32.mrb[4].mxu1  ;;  %v1031_v3 = vpop.f32.mrb[5].mxu0 }
 0x11b   : > { %v1051_v4 = vpop.f32.mrb[5].mxu1  ;;  %v560_v5 = vpop.f32.mrb[6].mxu0 }
 0x11c   : > { %v682_v6 = vadd.f32 %v676_v2, %v563_v0  ;;  %v679_v7 = vpop.f32.mrb[6].mxu1  ;;  %v1032_v8 = vpop.f32.mrb[7].mxu0 }
 0x11d   : > { %v1052_v9 = vpop.f32.mrb[7].mxu1 }
 0x11e   : > { %v690_v10 = vadd.f32 %v922_v1, %v682_v6 }
 0x120   : > { %v691_v11 = vmax.f32 %v690_v10, 0.0 }
 0x122   : > { %v692_v12 = vpack.c.bf16 %v691_v11, %v691_v11 }
 0x124   : > { %1062 = vmatmul.mubr.msk.bf16.vlgmr.msra.gmra.mrb[8].mxu0 %vm732_vm1, %v692_v12 }
 0x1f7   : > { %v770_v14 = vpop.f32.mrb[8].mxu0 }
 0x1f8   : > { %v771_v15 = vadd.f32 %v923_v13, %v770_v14  ;;  %v1063_v16 = vpop.f32.mrb[9].mxu0 }
 0x1f9   : > { %v773_v17 = vpop.f32.mrb[10].mxu0 }
 0x1fa   : > { %777 = vst.msk [vmem:[%s222_s12] sm:$0xff] %vm776_vm2, %v771_v15  ;;  %v1064_v18 = vpop.f32.mrb[11].mxu0 }
 0x1fb PF: > { %s15_s18 = sadd.s32 1, %s1120_s18  }
 0x1fc   : > { %p12_p4 = scmp.ge.s32.totalorder %s15_s18, 4  }
 0x1fe   :  { %14 = sbr.rel (!%p12_p4) target bundleno = 1 (0x1), region = 73 }

// kernel: prior_extraction_forward.4
= control target key start
LH: loop header
LB: loop body
LE: loop exit
PB: predicated region body
PF: predicated region fallthrough
CT: control target
= control target key end

     0   :  { %s13882_s27 = smov 0   ;;  %s17327_s0 = inlined_call_operand.vmem [shape: bf16[2,324,4], index: 0, kind: input, shape index: {}]   ;;  %s17328_s1 = inlined_call_operand.vmem [shape: f32[288,1], index: 1, kind: input, shape index: {}]   ;;  %s17329_s2 = inlined_call_operand.vmem [shape: bf16[4,4,16], index: 2, kind: input, shape index: {}]   ;;  %s17330_s3 = inlined_call_operand.vmem [shape: f32[1,16], index: 3, kind: input, shape index: {}]   ;;  %s17331_s4 = inlined_call_operand.vmem [shape: bf16[9,16,16], index: 4, kind: input, shape index: {}]   ;;  %s17332_s5 = inlined_call_operand.vmem [shape: f32[1,16], index: 5, kind: input, shape index: {}]   ;;  %s17333_s6 = inlined_call_operand.vmem [shape: bf16[9,16,16], index: 6, kind: input, shape index: {}]   ;;  %s17334_s7 = inlined_call_operand.vmem [shape: f32[1,16], index: 7, kind: input, shape index: {}]   ;;  %s17335_s8 = inlined_call_operand.vmem [shape: bf16[2,288,16], index: 8, kind: output, shape index: {}]  }
   0x1 LB: > { %s10830_s28 = sadd.s32 4294967295, %s13834_s27   ;;  %p10834_p0 = scmp.ge.s32.totalorder %s13834_s27, 1  ;;  %s13834_s27 = sphi %s13882_s27, %s18_s27  }
   0x2   : > { %p262_p1 = scmp.lt.s32.totalorder %s13834_s27, 3 }
   0x4   : > { %p263_p2 = pnand %p10834_p0, %p262_p1 }
   0x6   : > { %266 = sbr.rel (%p263_p2) target bundleno = 2134 (0x856), region = 52 }
   0xd   : > { %vm680_vm0 = vcmask 1041408   ;;  %v10893_v0 = vld [vmem:[%s17329_s2 + $0x4] sm:$0x3]  ;;  %v10837_v1 = vld [vmem:[%s17329_s2 + $0x2] sm:$0x3]  ;;  %p296_p3 = scmp.lt.s32.totalorder %s10830_s28, 1 }
   0xe   : > { %13610 = vmatprep.subr.msk.bf16.mxu0 %vm680_vm0, %v10893_v0  ;;  %v1302_v2 = vsel %vm680_vm0, %v10893_v0, 0  ;;  %13608 = vmatprep.subr.msk.bf16.mxu1 %vm680_vm0, %v10837_v1  ;;  %v682_v3 = vsel %vm680_vm0, %v10837_v1, 0  ;;  %v379_v4 = vld [vmem:[%s17329_s2] sm:$0x3]  ;;  %v10931_v5 = vld [vmem:[%s17329_s2 + $0x6] sm:$0x3] }
   0xf   : > { %12165 = vmatpush3.bf16.msra.mxu0 %v1302_v2  ;;  %s17770_s28 = smov (!%p296_p3, %s10830_s28), 1  ;;  %12089 = vmatpush3.bf16.msra.mxu1 %v682_v3  ;;  %v307_v6 = vld [vmem:[%s17328_s1] sm:$0xff]  ;;  %v309_v7 = vld [vmem:[%s17328_s1 + $0x10] sm:$0xff]  ;;  %v17336_v8 = vmov 0   ;;  %vm625_vm1 = vcmask 31744   ;;  %v308_v9 = vld [vmem:[%s17328_s1 + $0x8] sm:$0xff] }
  0x10   : > { %13609 = vmatprep.subr.msk.bf16.mxu1 %vm680_vm0, %v379_v4  ;;  %13611 = vmatprep.subr.msk.bf16.mxu0 %vm680_vm0, %v10931_v5  ;;  %s13612_s19 = smul.u32 164, %s17770_s28  ;;  %v310_v10 = vld [vmem:[%s17328_s1 + $0x18] sm:$0xff]  ;;  %vm1209_vm2 = vcmask 1046528   ;;  %vm476_vm3 = vsmask.f32 7424  ;;  %v311_v13 = vld [vmem:[%s17328_s1 + $0x20] sm:$0xff] }
  0x11   : > { %13623 = vset.pattern.permute.xlu0 %v17336_v8  ;;  %13624 = vset.pattern.permute.xlu1 %v17336_v8  ;;  %v898_v15 = vsel %vm680_vm0, %v379_v4, 0  ;;  %v312_v16 = vld [vmem:[%s17328_s1 + $0x28] sm:$0xff]  ;;  %v1749_v23 = vsel %vm680_vm0, %v10931_v5, 0  ;;  %v313_v24 = vld [vmem:[%s17328_s1 + $0x30] sm:$0xff]  ;;  %v314_v30 = vld [vmem:[%s17328_s1 + $0x38] sm:$0xff]  ;;  %vm2259_vm5 = vcmask 125952  }
  0x12   : > { %2045 = vperm.xlu0 %13623, %v307_v6   ;;  %2055 = vperm.xlu1 %13624, %v309_v7   ;;  %s13922_s22 = scalar_lea.vmem %s17327_s0, %s13612_s19  ;;  %v315_v39 = vld [vmem:[%s17328_s1 + $0x40] sm:$0xff]  ;;  %v316_v49 = vld [vmem:[%s17328_s1 + $0x48] sm:$0xff]  ;;  %v317_v60 = vld [vmem:[%s17328_s1 + $0x50] sm:$0xff]  ;;  %vm1523_vm4 = vsmask.f32 6400  ;;  %vm2811_vm6 = vcmask 125953  }
  0x13   : > { %v13931_v11 = vld [vmem:[%s13922_s22 + $0x8] sm:$0xfe]   ;;  %v13934_v12 = vld [vmem:[%s13922_s22 + $0x10] sm:$0xff]   ;;  %v13940_v14 = vld [vmem:[%s13922_s22 + $0x18] sm:$0xff]   ;;  %vm2812_vm7 = vsmask.f32 7942 }
  0x14   : > { %v1210_v17 = vrot.slane %v13931_v11, 1  ;;  %v1211_v18 = vrot.slane %v13934_v12, 1  ;;  %v1213_v19 = vrot.slane %v13940_v14, 1  ;;  %v13950_v20 = vld [vmem:[%s13922_s22] sm:$0xff]   ;;  %v13954_v22 = vld [vmem:[%s13922_s22 + $0x8] sm:$0xff]   ;;  %v13965_v28 = vld [vmem:[%s13922_s22 + $0x10] sm:$0xff]  }
  0x15   : > { %v478_v26 = vshrl.u32 %v13950_v20, 16  ;;  %v480_v27 = vshll.u32 %v13950_v20, 16  ;;  %v13968_v29 = vld [vmem:[%s13922_s22 + $0x20] sm:$0xff]   ;;  %v485_v31 = vshll.u32 %v13954_v22, 16  ;;  %v489_v32 = vshrl.u32 %v13954_v22, 16  ;;  %v13979_v36 = vld [vmem:[%s13922_s22 + $0x28] sm:$0xff]   ;;  %vm14696_vm10 = vmand %vm2811_vm6, %vm2812_vm7 }
  0x16   : > { %2050 = vperm.xlu0 %13623, %v308_v9   ;;  %2060 = vperm.xlu1 %13624, %v310_v10   ;;  %v1212_v21 = vsel %vm1209_vm2, %v1210_v17, %v1211_v18  ;;  %v1214_v25 = vsel %vm1209_vm2, %v1211_v18, %v1213_v19  ;;  %v493_v34 = vshll.u32 %v13965_v28, 16  ;;  %v1215_v35 = vrot.slane %v13968_v29, 1  ;;  %v13982_v38 = vld [vmem:[%s13922_s22 + $0x18] sm:$0xff]   ;;  %v13993_v47 = vld [vmem:[%s13922_s22 + $0x20] sm:$0xff]   ;;  %v14002_v52 = vld [vmem:[%s13922_s22 + $0x30] sm:$0xff]   ;;  %s13613_s18 = smul.u32 144, %s17770_s28 }
  0x17   : > { %12166 = vmatprep.mubr.msk.bf16.mxu0 %vm625_vm1, %v1212_v21  ;;  %v482_v33 = vrot.slane %v480_v27, 1  ;;  %v487_v37 = vrot.slane %v485_v31, 1  ;;  %v1217_v43 = vrot.slane %v13979_v36, 1  ;;  %v497_v45 = vshrl.u32 %v13965_v28, 16  ;;  %v14009_v58 = vld [vmem:[%s13922_s22 + $0x38] sm:$0xff]   ;;  %v14012_v59 = vld [vmem:[%s13922_s22 + $0x28] sm:$0xff]  }
  0x18   : > { %12167 = vmatmul.mubr.msk.bf16.vlgmr.msra.gmra.mrb[0].mxu0 %vm625_vm1, %v1214_v25  ;;  %v495_v41 = vrot.slane %v493_v34, 1  ;;  %v1216_v42 = vsel %vm1209_vm2, %v1213_v19, %v1215_v35  ;;  %v501_v46 = vshll.u32 %v13982_v38, 16  ;;  %v505_v48 = vshrl.u32 %v13982_v38, 16  ;;  %v14027_v5 = vld [vmem:[%s13922_s22 + $0x30] sm:$0xff]   ;;  %v14031_v7 = vld [vmem:[%s13922_s22 + $0x40] sm:$0xff]   ;;  %v14041_v18 = vld [vmem:[%s13922_s22 + $0x38] sm:$0xff]   ;;  %s17217_s21 = scalar_lea.vmem %s17335_s8, %s13613_s18 }
  0x19   : > { %12203 = vmatpush3.bf16.msra.mxu0 %v1749_v23  ;;  %v483_v40 = vor.u32 %v482_v33, %v478_v26  ;;  %v491_v44 = vor.u32 %v489_v32, %v487_v37  ;;  %12170 = vmatprep.mubr.msk.bf16.mxu0 %vm625_vm1, %v1216_v42  ;;  %v1218_v51 = vsel %vm1209_vm2, %v1215_v35, %v1217_v43  ;;  %v1525_v53 = vshrl.u32 %v13931_v11, 16  ;;  %v14055_v32 = vld [vmem:[%s13922_s22 + $0x50] sm:$0xff]   ;;  %v14060_v34 = vld [vmem:[%s13922_s22 + $0x58] sm:$0xff]   ;;  %v14174_v8 = vld [vmem:[%s13922_s22 + $0x88] sm:$0xff]  }
  0x1a   : > { %2065 = vperm.xlu0 %13623, %v311_v13   ;;  %2070 = vperm.xlu1 %13624, %v312_v16   ;;  %v499_v55 = vor.u32 %v497_v45, %v495_v41  ;;  %v503_v56 = vrot.slane %v501_v46, 1  ;;  %v509_v57 = vshll.u32 %v13993_v47, 16  ;;  %v1219_v61 = vrot.slane %v14002_v52, 1  ;;  %v14037_v16 = vld [vmem:[%s13922_s22 + $0x48] sm:$0xff]   ;;  %v14073_v46 = vld [vmem:[%s13922_s22 + $0x50] sm:$0xff]  }
  0x1b   : > { %v488_v50 = vsel %vm476_vm3, %v483_v40, %v487_v37  ;;  %v496_v54 = vsel %vm476_vm3, %v491_v44, %v495_v41  ;;  %v513_v62 = vshrl.u32 %v13993_v47, 16  ;;  %v1221_v2 = vrot.slane %v14009_v58, 1  ;;  %v14069_v44 = vld [vmem:[%s13922_s22 + $0x48] sm:$0xff]  }
  0x1c   : > { %12090 = vmatprep.mubr.msk.bf16.mxu1 %vm625_vm1, %v488_v50  ;;  %v504_v63 = vsel %vm476_vm3, %v499_v55, %v503_v56  ;;  %v507_v0 = vor.u32 %v505_v48, %v503_v56  ;;  %v511_v1 = vrot.slane %v509_v57, 1  ;;  %v1220_v3 = vsel %vm1209_vm2, %v1217_v43, %v1219_v61  ;;  %v14080_v50 = vld [vmem:[%s13922_s22 + $0x68] sm:$0xff]   ;;  %v14088_v57 = vld [vmem:[%s13922_s22 + $0x58] sm:$0xff]  }
  0x1d   : > { %12091 = vmatmul.mubr.msk.bf16.vlgmr.msra.gmra.mrb[0].mxu1 %vm625_vm1, %v496_v54  ;;  %v517_v4 = vshll.u32 %v14012_v59, 16  ;;  %v521_v6 = vshrl.u32 %v14012_v59, 16  ;;  %v525_v13 = vshll.u32 %v14027_v5, 16  ;;  %v529_v19 = vshrl.u32 %v14027_v5, 16 }
  0x1e   : > { %2075 = vperm.xlu0 %13623, %v313_v24   ;;  %2080 = vperm.xlu1 %13624, %v314_v30   ;;  %v515_v9 = vor.u32 %v513_v62, %v511_v1  ;;  %v512_v17 = vsel %vm476_vm3, %v507_v0, %v511_v1  ;;  %v1222_v21 = vsel %vm1209_vm2, %v1219_v61, %v1221_v2  ;;  %v14047_v24 = vld [vmem:[%s13922_s22 + $0x40] sm:$0xff]   ;;  %v14049_v25 = vrot.slane %v1525_v53, 1 }
  0x1f   : > { %12127 = vmatpush3.bf16.msra.mxu1 %v898_v15  ;;  %12094 = vmatprep.mubr.msk.bf16.mxu1 %vm625_vm1, %v504_v63  ;;  %v519_v10 = vrot.slane %v517_v4, 1  ;;  %v1223_v15 = vrot.slane %v14031_v7, 1  ;;  %v527_v26 = vrot.slane %v525_v13, 1  ;;  %v1225_v30 = vrot.slane %v14037_v16, 1  ;;  %v14098_v4 = vld [vmem:[%s13922_s22 + $0x60] sm:$0xff]   ;;  %v14104_v13 = vld [vmem:[%s13922_s22 + $0x70] sm:$0xff]  }
  0x20   : > { %12171 = vmatmul.mubr.msk.bf16.gmra.mrb[4].mxu0 %vm625_vm1, %v1218_v51  ;;  %v533_v31 = vshll.u32 %v14041_v18, 16  ;;  %v541_v33 = vshll.u32 %v14047_v24, 16  ;;  %v537_v40 = vshrl.u32 %v14041_v18, 16  ;;  %v1227_v42 = vrot.slane %v14055_v32, 1 }
  0x21   : > { %12174 = vmatprep.mubr.msk.bf16.mxu0 %vm625_vm1, %v1220_v3  ;;  %v520_v23 = vsel %vm476_vm3, %v515_v9, %v519_v10  ;;  %v1224_v27 = vsel %vm1209_vm2, %v1221_v2, %v1223_v15  ;;  %v523_v35 = vor.u32 %v521_v6, %v519_v10  ;;  %v531_v37 = vor.u32 %v529_v19, %v527_v26 }
  0x22   : > { %2085 = vperm.xlu0 %13623, %v315_v39   ;;  %2090 = vperm.xlu1 %13624, %v316_v49   ;;  %v535_v39 = vrot.slane %v533_v31, 1  ;;  %v543_v41 = vrot.slane %v541_v33, 1  ;;  %v1229_v43 = vrot.slane %v14060_v34, 1  ;;  %v545_v45 = vshrl.u32 %v14047_v24, 16  ;;  %v14077_v49 = vld [vmem:[%s13922_s22 + $0x60] sm:$0xff]   ;;  %v14119_v33 = vld [vmem:[%s13922_s22 + $0x70] sm:$0xff]  }
  0x23   : > { %v549_v48 = vshll.u32 %v14069_v44, 16  ;;  %v528_v53 = vsel %vm476_vm3, %v523_v35, %v527_v26  ;;  %v1226_v54 = vsel %vm1209_vm2, %v1223_v15, %v1225_v30  ;;  %v557_v56 = vshll.u32 %v14073_v46, 16  ;;  %v14107_v15 = vld [vmem:[%s13922_s22 + $0x78] sm:$0xff]   ;;  %17401 = vst [vmem:[#allocation4_spill] sm:$0xff] %v14119_v33 }
  0x24   : > { %v536_v55 = vsel %vm476_vm3, %v531_v37, %v535_v39  ;;  %v553_v61 = vshrl.u32 %v14069_v44, 16  ;;  %v1231_v62 = vrot.slane %v14077_v49, 1  ;;  %v1233_v63 = vrot.slane %v14080_v50, 1 }
  0x25   : > { %12095 = vmatmul.mubr.msk.bf16.gmra.mrb[4].mxu1 %vm625_vm1, %v512_v17  ;;  %v1228_v0 = vsel %vm1209_vm2, %v1225_v30, %v1227_v42  ;;  %v561_v1 = vshrl.u32 %v14073_v46, 16  ;;  %v565_v2 = vshll.u32 %v14088_v57, 16  ;;  %v559_v3 = vrot.slane %v557_v56, 1 }
  0x26   : > { %2095 = vperm.xlu0 %13623, %v317_v60   ;;  %12098 = vmatprep.mubr.msk.bf16.mxu1 %vm625_vm1, %v520_v23  ;;  %v551_v60 = vrot.slane %v549_v48, 1  ;;  %v539_v6 = vor.u32 %v537_v40, %v535_v39  ;;  %v569_v10 = vshrl.u32 %v14088_v57, 16  ;;  %v547_v17 = vor.u32 %v545_v45, %v543_v41  ;;  %v14125_v45 = vld [vmem:[%s13922_s22 + $0x80] sm:$0xff]  }
  0x27   : > { %v567_v9 = vrot.slane %v565_v2, 1  ;;  %v573_v19 = vshll.u32 %v14098_v4, 16  ;;  %v1235_v23 = vrot.slane %v14104_v13, 1  ;;  %v1237_v26 = vrot.slane %v14107_v15, 1 }
  0x28   : > { %12175 = vmatmul.mubr.msk.bf16.gmra.mrb[8].mxu0 %vm625_vm1, %v1222_v21  ;;  %v14112_v21 = vld [vmem:[%s13922_s22 + $0x68] sm:$0xff]   ;;  %v577_v30 = vshrl.u32 %v14098_v4, 16  ;;  %v544_v35 = vsel %vm476_vm3, %v539_v6, %v543_v41  ;;  %v1230_v37 = vsel %vm1209_vm2, %v1227_v42, %v1229_v43  ;;  %v555_v39 = vor.u32 %v553_v61, %v551_v60  ;;  %v14136_v6 = vld [vmem:[%s13922_s22 + $0x78] sm:$0xff]  }
  0x29   : > { %12178 = vmatprep.mubr.msk.bf16.mxu0 %vm625_vm1, %v1224_v27  ;;  %v575_v27 = vrot.slane %v573_v19, 1  ;;  %v581_v31 = vshll.u32 %v14112_v21, 16  ;;  %v585_v40 = vshrl.u32 %v14112_v21, 16  ;;  %v552_v48 = vsel %vm476_vm3, %v547_v17, %v551_v60  ;;  %17402 = vst [vmem:[#allocation5_spill] sm:$0xff] %v14136_v6 }
  0x2a   : > { %v1232_v56 = vsel %vm1209_vm2, %v1229_v43, %v1231_v62  ;;  %v1239_v41 = vrot.slane %v14125_v45, 1  ;;  %v571_v42 = vor.u32 %v569_v10, %v567_v9  ;;  %v593_v60 = vshrl.u32 %v14119_v33, 16 }
  0x2b   : > { %v579_v61 = vor.u32 %v577_v30, %v575_v27  ;;  %v560_v43 = vsel %vm476_vm3, %v555_v39, %v559_v3  ;;  %v1234_v17 = vsel %vm1209_vm2, %v1231_v62, %v1233_v63  ;;  %v14148_v30 = vld [vmem:[%s13922_s22 + $0x90] sm:$0xff]   ;;  %vm2412_vm8 = vsmask.f32 1280 }
  0x2c   : > { %vm2413_vm9 = vsmask.f32 5392  ;;  %vm3146_vm12 = vcmask 130048   ;;  %vm2852_vm13 = vcmask 123904   ;;  %vm4814_vm15 = vcmask 1045504  }
  0x2d   : > { %12099 = vmatmul.mubr.msk.bf16.gmra.mrb[8].mxu1 %vm625_vm1, %v528_v53  ;;  %v563_v53 = vor.u32 %v561_v1, %v559_v3  ;;  %v14140_v1 = vld [vmem:[%s13922_s22 + $0x80] sm:$0xff]   ;;  %v14156_v3 = vsel %vm1209_vm2, %v1235_v23, %v1237_v26  ;;  %vm14704_vm11 = vmor %vm2412_vm8, %vm2413_vm9  ;;  %vm5575_vm0 = vsmask.f32 5376 }
  0x2e   : > { %12102 = vmatprep.mubr.msk.bf16.mxu1 %vm625_vm1, %v536_v55  ;;  %v589_v55 = vshll.u32 %v14119_v33, 16  ;;  %17403 = vst [vmem:[#allocation6_spill] sm:$0xff] %v14140_v1  ;;  %v605_v39 = vshll.u32 %v14140_v1, 16  ;;  %v609_v51 = vshrl.u32 %v14140_v1, 16  ;;  %vm15175_vm14 = vmand %vm2852_vm13, %vm2412_vm8 }
  0x30   : > { %12179 = vmatmul.mubr.msk.bf16.gmra.mrb[12].mxu0 %vm625_vm1, %v1226_v54  ;;  %v583_v54 = vrot.slane %v581_v31, 1  ;;  %v591_v2 = vrot.slane %v589_v55, 1  ;;  %v568_v31 = vsel %vm476_vm3, %v563_v53, %v567_v9  ;;  %v14161_v55 = vsel %vm476_vm3, %v571_v42, %v575_v27 }
  0x31   : > { %12182 = vmatprep.mubr.msk.bf16.mxu0 %vm625_vm1, %v1228_v0  ;;  %v14132_v0 = vld [vmem:[%s13922_s22 + $0x88] sm:$0xff]   ;;  %v17404_v27 = vshll.u32 %v13931_v11, 16 }
  0x32   : > { %v587_v19 = vor.u32 %v585_v40, %v583_v54  ;;  %v1241_v10 = vrot.slane %v14132_v0, 1  ;;  %v595_v62 = vor.u32 %v593_v60, %v591_v2  ;;  %v1243_v40 = vrot.slane %v14148_v30, 1 }
  0x33   : > { %v14164_v9 = vsel %vm476_vm3, %v579_v61, %v583_v54  ;;  %v607_v60 = vrot.slane %v605_v39, 1  ;;  %v1530_v42 = vrot.slane %v17404_v27, 2  ;;  %v613_v27 = vshll.u32 %v14174_v8, 16 }
  0x34   : > { %v14180_v54 = vsel %vm1209_vm2, %v1239_v41, %v1241_v10 }
  0x35   : > { %12103 = vmatmul.mubr.msk.bf16.gmra.mrb[12].mxu1 %vm625_vm1, %v544_v35  ;;  %v1236_v35 = vsel %vm1209_vm2, %v1233_v63, %v1235_v23  ;;  %v14167_v63 = vsel %vm1209_vm2, %v1237_v26, %v1239_v41  ;;  %v14171_v23 = vsel %vm476_vm3, %v587_v19, %v591_v2  ;;  %v14183_v26 = vsel %vm1209_vm2, %v1241_v10, %v1243_v40  ;;  %v318_v19 = vld [vmem:[%s17328_s1 + $0x58] sm:$0xff]  ;;  %v319_v41 = vld [vmem:[%s17328_s1 + $0x60] sm:$0xff] }
  0x36   : > { %12106 = vmatprep.mubr.msk.bf16.mxu1 %vm625_vm1, %v552_v48  ;;  %v601_v48 = vshrl.u32 %v14136_v6, 16  ;;  %v1533_v2 = vshrl.u32 %v13934_v12, 16  ;;  %v611_v11 = vor.u32 %v609_v51, %v607_v60  ;;  %2100 = vperm.xlu1 %13624, %v318_v19   ;;  %v617_v10 = vshrl.u32 %v14174_v8, 16  ;;  %v320_v51 = vld [vmem:[%s17328_s1 + $0x68] sm:$0xff] }
  0x37   : > { %2105 = vperm.xlu0 %13623, %v319_v41  }
  0x38   : > { %12183 = vmatmul.mubr.msk.bf16.gmra.mrb[16].mxu0 %vm625_vm1, %v1230_v37  ;;  %v597_v37 = vshll.u32 %v14136_v6, 16  ;;  %v1531_v6 = vor.u32 %v1530_v42, %v14049_v25  ;;  %v1535_v33 = vrot.slane %v1533_v2, 1  ;;  %v321_v25 = vld [vmem:[%s17328_s1 + $0x70] sm:$0xff] }
  0x39   : > { %12186 = vmatprep.mubr.msk.bf16.mxu0 %vm625_vm1, %v1232_v56  ;;  %v13660_v56 = vld [vmem:[%s13922_s22 + $0x98] ss:$0 sps:$4 sm:$0x11]  }
  0x3a   : > { %v599_v53 = vrot.slane %v597_v37, 1  ;;  %v13662_v37 = vld [vmem:[%s13922_s22 + $0x90] ss:$0 sps:$4 sm:$0x11]   ;;  %v1245_v1 = vrot.slane %v13660_v56, 1  ;;  %v1545_v56 = vshll.u32 %v13940_v14, 16  ;;  %2110 = vperm.xlu1 %13624, %v320_v51  }
  0x3b   : > { %2115 = vperm.xlu0 %13623, %v321_v25  }
  0x3c   : > { %v603_v61 = vor.u32 %v601_v48, %v599_v53  ;;  %v14191_v39 = vsel %vm476_vm3, %v595_v62, %v599_v53  ;;  %v621_v48 = vshll.u32 %v13662_v37, 16  ;;  %v615_v62 = vrot.slane %v613_v27, 1 }
  0x3d   : > { %12107 = vmatmul.mubr.msk.bf16.gmra.mrb[16].mxu1 %vm625_vm1, %v560_v43  ;;  %v1536_v53 = vshll.u32 %v13934_v12, 16  ;;  %v1542_v43 = vshrl.u32 %v13940_v14, 16  ;;  %v1560_v37 = vshrl.u32 %v13979_v36, 16  ;;  %v14219_v12 = vsel %vm1209_vm2, %v1243_v40, %v1245_v1 }
  0x3e   : > { %12110 = vmatprep.mubr.msk.bf16.mxu1 %vm625_vm1, %v568_v31  ;;  %v14213_v42 = vsel %vm476_vm3, %v603_v61, %v607_v60  ;;  %v1554_v31 = vshll.u32 %v13968_v29, 16  ;;  %v14221_v2 = vrot.slane %v621_v48, 1  ;;  %v14224_v27 = vsel %vm476_vm3, %v611_v11, %v615_v62  ;;  %v323_v11 = vld [vmem:[%s17328_s1 + $0x80] sm:$0xff] }
  0x3f   : > { %v1538_v14 = vrot.slane %v1536_v53, 2  ;;  %v1544_v19 = vrot.slane %v1542_v43, 1  ;;  %v1562_v1 = vrot.slane %v1560_v37, 1  ;;  %v1563_v40 = vshll.u32 %v13979_v36, 16  ;;  %2125 = vperm.xlu0 %13623, %v323_v11  }
  0x40   : > { %12187 = vmatmul.mubr.msk.bf16.gmra.mrb[20].mxu0 %vm625_vm1, %v1234_v17  ;;  %v1551_v17 = vshrl.u32 %v13968_v29, 16  ;;  %v1556_v61 = vrot.slane %v1554_v31, 2  ;;  %v322_v29 = vld [vmem:[%s17328_s1 + $0x78] sm:$0xff]  ;;  %v1569_v48 = vshrl.u32 %v14002_v52, 16  ;;  %v1572_v43 = vshll.u32 %v14002_v52, 16 }
  0x41   : > { %12190 = vmatprep.mubr.msk.bf16.mxu0 %vm625_vm1, %v1236_v35  ;;  %v1547_v35 = vrot.slane %v1545_v56, 2  ;;  %v14229_v41 = vor.u32 %v1538_v14, %v1535_v33  ;;  %v1578_v56 = vshrl.u32 %v14009_v58, 16  ;;  %v14240_v25 = vor.u32 %v617_v10, %v615_v62  ;;  %2120 = vperm.xlu1 %13624, %v322_v29   ;;  %v324_v10 = vld [vmem:[%s17328_s1 + $0x88] sm:$0xff] }
  0x42   : > { %v1553_v60 = vrot.slane %v1551_v17, 1  ;;  %v1565_v33 = vrot.slane %v1563_v40, 2  ;;  %v1571_v17 = vrot.slane %v1569_v48, 1  ;;  %v1581_v31 = vshll.u32 %v14009_v58, 16 }
  0x43   : > { %v14236_v51 = vor.u32 %v1547_v35, %v1544_v19  ;;  %v14247_v36 = vsel %vm1523_vm4, %v1531_v6, %v14229_v41  ;;  %v1574_v52 = vrot.slane %v1572_v43, 2  ;;  %v1580_v14 = vrot.slane %v1578_v56, 1  ;;  %v325_v19 = vld [vmem:[%s17328_s1 + $0x90] sm:$0xff]  ;;  %v327_v56 = vld [vmem:[%s17328_s1 + $0xa0] sm:$0xff] }
  0x44   : > { %v1557_v53 = vor.u32 %v1556_v61, %v1553_v60  ;;  %v1566_v58 = vor.u32 %v1565_v33, %v1562_v1  ;;  %v1583_v6 = vrot.slane %v1581_v31, 2  ;;  %v1590_v62 = vshll.u32 %v14031_v7, 16  ;;  %v326_v61 = vld [vmem:[%s17328_s1 + $0x98] sm:$0xff]  ;;  %2135 = vperm.xlu0 %13623, %v325_v19  }
  0x45   : > { %12111 = vmatmul.mubr.msk.bf16.gmra.mrb[20].mxu1 %vm625_vm1, %v14161_v55  ;;  %v1587_v55 = vshrl.u32 %v14031_v7, 16  ;;  %v1575_v35 = vor.u32 %v1574_v52, %v1571_v17  ;;  %v1596_v60 = vshrl.u32 %v14037_v16, 16  ;;  %v14276_v7 = vld [vmem:[%s17331_s4 + $0x8] sm:$0xff]   ;;  %2130 = vperm.xlu1 %13624, %v324_v10   ;;  %v1608_v17 = vshll.u32 %v14055_v32, 16 }
  0x46   : > { %v14251_v37 = vsel %vm1523_vm4, %v14236_v51, %v1557_v53  ;;  %12114 = vmatprep.mubr.msk.bf16.mxu1 %vm625_vm1, %v14164_v9  ;;  %v1605_v9 = vshrl.u32 %v14055_v32, 16  ;;  %v14279_v29 = vsel %vm1523_vm4, %v1557_v53, %v1566_v58  ;;  %v1592_v40 = vrot.slane %v1590_v62, 2  ;;  %12240 = vmatprep.subr.bf16.mxu1 %v14276_v7 }
  0x47   : > { %v1589_v1 = vrot.slane %v1587_v55, 1  ;;  %v1598_v48 = vrot.slane %v1596_v60, 1  ;;  %v1614_v31 = vshrl.u32 %v14060_v34, 16  ;;  %v1623_v10 = vshrl.u32 %v14077_v49, 16 }
  0x48   : > { %12191 = vmatmul.mubr.msk.bf16.gmra.mrb[24].mxu0 %vm625_vm1, %v14156_v3  ;;  %v1599_v3 = vshll.u32 %v14037_v16, 16  ;;  %v14282_v16 = vsel %vm1523_vm4, %v1566_v58, %v1575_v35  ;;  %v1607_v43 = vrot.slane %v1605_v9, 1  ;;  %v1626_v58 = vshll.u32 %v14077_v49, 16  ;;  %2145 = vperm.xlu0 %13623, %v327_v56   ;;  %v328_v49 = vld [vmem:[%s17328_s1 + $0xa8] sm:$0xff] }
  0x49   : > { %12194 = vmatprep.mubr.msk.bf16.mxu0 %vm625_vm1, %v14167_v63  ;;  %v1584_v63 = vor.u32 %v1583_v6, %v1580_v14  ;;  %v1593_v33 = vor.u32 %v1592_v40, %v1589_v1  ;;  %v1617_v14 = vshll.u32 %v14060_v34, 16  ;;  %v1610_v55 = vrot.slane %v1608_v17, 2  ;;  %2140 = vperm.xlu1 %13624, %v326_v61   ;;  %v13663_v56 = vld [vmem:[%s13922_s22 + $0x98] ss:$0 sps:$4 sm:$0x33]  }
  0x4a   : > { %v1601_v11 = vrot.slane %v1599_v3, 2  ;;  %v1616_v62 = vrot.slane %v1614_v31, 1  ;;  %v1632_v19 = vshrl.u32 %v14080_v50, 16  ;;  %v1625_v34 = vrot.slane %v1623_v10, 1 }
  0x4b   : > { %v14289_v53 = vsel %vm1523_vm4, %v1575_v35, %v1584_v63  ;;  %v14297_v6 = vsel %vm1523_vm4, %v1584_v63, %v1593_v33  ;;  %v1619_v35 = vrot.slane %v1617_v14, 2  ;;  %v1628_v60 = vrot.slane %v1626_v58, 2  ;;  %v329_v63 = vld [vmem:[%s17328_s1 + $0xb0] sm:$0xff]  ;;  %v331_v58 = vld [vmem:[%s17328_s1 + $0xc0] sm:$0xff] }
  0x4c   : > { %v1602_v52 = vor.u32 %v1601_v11, %v1598_v48  ;;  %v1611_v3 = vor.u32 %v1610_v55, %v1607_v43  ;;  %v1635_v9 = vshll.u32 %v14080_v50, 16  ;;  %v1641_v61 = vshrl.u32 %v14104_v13, 16  ;;  %2155 = vperm.xlu0 %13623, %v329_v63   ;;  %v333_v63 = vld [vmem:[%s17328_s1 + $0xd0] sm:$0xff] }
  0x4d   : > { %12115 = vmatmul.mubr.msk.bf16.gmra.mrb[24].mxu1 %vm625_vm1, %v14171_v23  ;;  %v1634_v23 = vrot.slane %v1632_v19, 1  ;;  %v1620_v1 = vor.u32 %v1619_v35, %v1616_v62  ;;  %v1629_v40 = vor.u32 %v1628_v60, %v1625_v34  ;;  %v1650_v48 = vshrl.u32 %v14107_v15, 16  ;;  %2150 = vperm.xlu1 %13624, %v328_v49   ;;  %v332_v34 = vld [vmem:[%s17328_s1 + $0xc8] sm:$0xff] }
  0x4e   : > { %v14303_v32 = vsel %vm1523_vm4, %v1593_v33, %v1602_v52  ;;  %12118 = vmatprep.mubr.msk.bf16.mxu1 %vm625_vm1, %v14191_v39  ;;  %v14322_v39 = vsel %vm1523_vm4, %v1602_v52, %v1611_v3  ;;  %v1637_v11 = vrot.slane %v1635_v9, 2  ;;  %v1643_v50 = vrot.slane %v1641_v61, 1  ;;  %v330_v33 = vld [vmem:[%s17328_s1 + $0xb8] sm:$0xff] }
  0x4f   : > { %v1653_v43 = vshll.u32 %v14107_v15, 16  ;;  %v1652_v31 = vrot.slane %v1650_v48, 1  ;;  %v1659_v10 = vshrl.u32 %v14125_v45, 16  ;;  %v1662_v15 = vshll.u32 %v14125_v45, 16 }
  0x50   : > { %12195 = vmatmul.mubr.msk.bf16.gmra.mrb[28].mxu0 %vm625_vm1, %v14180_v54  ;;  %v1644_v54 = vshll.u32 %v14104_v13, 16  ;;  %v14333_v13 = vsel %vm1523_vm4, %v1620_v1, %v1629_v40  ;;  %v1638_v52 = vor.u32 %v1637_v11, %v1634_v23  ;;  %v1668_v62 = vshrl.u32 %v14132_v0, 16  ;;  %2165 = vperm.xlu0 %13623, %v331_v58  }
  0x51   : > { %12198 = vmatprep.mubr.msk.bf16.mxu0 %vm625_vm1, %v14183_v26  ;;  %v14330_v26 = vsel %vm1523_vm4, %v1611_v3, %v1620_v1  ;;  %v1655_v14 = vrot.slane %v1653_v43, 2  ;;  %v1671_v19 = vshll.u32 %v14132_v0, 16  ;;  %v1677_v35 = vshrl.u32 %v14148_v30, 16  ;;  %2160 = vperm.xlu1 %13624, %v330_v33  }
  0x52   : > { %v1646_v17 = vrot.slane %v1644_v54, 2  ;;  %v14347_v60 = vsel %vm1523_vm4, %v1629_v40, %v1638_v52  ;;  %v1661_v45 = vrot.slane %v1659_v10, 1  ;;  %v1664_v3 = vrot.slane %v1662_v15, 2  ;;  %v336_v15 = vld [vmem:[%s17328_s1 + $0xe8] sm:$0xff] }
  0x53   : > { %v1656_v49 = vor.u32 %v1655_v14, %v1652_v31  ;;  %v1670_v0 = vrot.slane %v1668_v62, 1  ;;  %v1673_v9 = vrot.slane %v1671_v19, 2  ;;  %v1679_v61 = vrot.slane %v1677_v35, 1 }
  0x54   : > { %v1647_v55 = vor.u32 %v1646_v17, %v1643_v50  ;;  %v1680_v40 = vshll.u32 %v14148_v30, 16  ;;  %v1686_v54 = vshrl.u32 %v13663_v56, 16  ;;  %v1689_v11 = vshll.u32 %v13663_v56, 16  ;;  %v334_v50 = vld [vmem:[%s17328_s1 + $0xd8] sm:$0xff]  ;;  %2175 = vperm.xlu0 %13623, %v333_v63   ;;  %v335_v30 = vld [vmem:[%s17328_s1 + $0xe0] sm:$0xff] }
  0x55   : > { %12119 = vmatmul.mubr.msk.bf16.gmra.mrb[28].mxu1 %vm625_vm1, %v14213_v42  ;;  %v1665_v42 = vor.u32 %v1664_v3, %v1661_v45  ;;  %v1674_v48 = vor.u32 %v1673_v9, %v1670_v0  ;;  %2170 = vperm.xlu1 %13624, %v332_v34   ;;  %v1549_v31 = vsel %vm1523_vm4, %v14229_v41, %v14236_v51  ;;  %v338_v41 = vld [vmem:[%s17328_s1 + $0xf8] sm:$0xff]  ;;  %v339_v51 = vld [vmem:[%s17328_s1 + $0x100] sm:$0xff] }
  0x56   : > { %v14352_v23 = vsel %vm1523_vm4, %v1638_v52, %v1647_v55  ;;  %12122 = vmatprep.mubr.msk.bf16.mxu1 %vm625_vm1, %v14224_v27  ;;  %v14362_v1 = vsel %vm1523_vm4, %v1647_v55, %v1656_v49  ;;  %v1682_v43 = vrot.slane %v1680_v40, 2  ;;  %v1688_v27 = vrot.slane %v1686_v54, 1 }
  0x57   : > { %v1675_v33 = vsel %vm1523_vm4, %v1665_v42, %v1674_v48  ;;  %v1691_v17 = vrot.slane %v1689_v11, 2 }
  0x58   : > { %12199 = vmatmul.mubr.msk.bf16.gmra.mrb[32].mxu0 %vm625_vm1, %v14219_v12  ;;  %v1666_v12 = vsel %vm1523_vm4, %v1656_v49, %v1665_v42  ;;  %v1683_v56 = vor.u32 %v1682_v43, %v1679_v61  ;;  %2185 = vperm.xlu0 %13623, %v335_v30  }
  0x59   : > { %12204 = vmatprep.mubr.msk.bf16.mxu0 %vm625_vm1, %v14247_v36  ;;  %v624_v36 = vsel %vm476_vm3, %v14240_v25, %v14221_v2  ;;  %v1692_v52 = vor.u32 %v1691_v17, %v1688_v27  ;;  %2180 = vperm.xlu1 %13624, %v334_v50   ;;  %v337_v2 = vld [vmem:[%s17328_s1 + $0xf0] sm:$0xff] }
  0x5a   : > { %v1684_v14 = vsel %vm1523_vm4, %v1674_v48, %v1683_v56  ;;  %v341_v25 = vld [vmem:[%s17328_s1 + $0x110] sm:$0xff] }
  0x5b   : > { %v1693_v10 = vsel %vm1523_vm4, %v1683_v56, %v1692_v52 }
  0x5c   : > { %2195 = vperm.xlu0 %13623, %v337_v2  }
  0x5d   : > { %12123 = vmatmul.mubr.msk.bf16.gmra.mrb[32].mxu1 %vm625_vm1, %v624_v36  ;;  %2190 = vperm.xlu1 %13624, %v336_v15  }
  0x5e   : > { %12128 = vmatprep.mubr.msk.bf16.mxu1 %vm625_vm1, %v13950_v20  ;;  %v340_v20 = vld [vmem:[%s17328_s1 + $0x108] sm:$0xff] }
  0x60   : > { %12205 = vmatmul.mubr.msk.bf16.vlgmr.msra.gmra.mrb[0].mxu0 %vm625_vm1, %v1549_v31  ;;  %2205 = vperm.xlu0 %13623, %v339_v51  }
  0x61   : > { %12208 = vmatprep.mubr.msk.bf16.mxu0 %vm625_vm1, %v14251_v37  ;;  %2200 = vperm.xlu1 %13624, %v338_v41  }
  0x64   : > { %2215 = vperm.xlu0 %13623, %v341_v25  }
  0x65   : > { %12129 = vmatmul.mubr.msk.bf16.vlgmr.msra.gmra.mrb[0].mxu1 %vm625_vm1, %v13954_v22  ;;  %2210 = vperm.xlu1 %13624, %v340_v20   ;;  %v342_v22 = vld [vmem:[%s17328_s1 + $0x118] sm:$0xff] }
  0x66   : > { %12132 = vmatprep.mubr.msk.bf16.mxu1 %vm625_vm1, %v13965_v28  ;;  %12241 = vmatpush3.bf16.msra.mxu1 %v14276_v7  ;;  %v17405_v28 = vld [vmem:[#allocation4_spill] sm:$0xff] }
  0x68   : > { %12209 = vmatmul.mubr.msk.bf16.gmra.mrb[4].mxu0 %vm625_vm1, %v14279_v29 }
  0x69   : > { %12212 = vmatprep.mubr.msk.bf16.mxu0 %vm625_vm1, %v14282_v16  ;;  %2220 = vperm.xlu1 %13624, %v342_v22  }
  0x6d   : > { %12133 = vmatmul.mubr.msk.bf16.gmra.mrb[4].mxu1 %vm625_vm1, %v13982_v38  ;;  %v17406_v38 = vld [vmem:[#allocation5_spill] sm:$0xff] }
  0x6e   : > { %12136 = vmatprep.mubr.msk.bf16.mxu1 %vm625_vm1, %v13993_v47  ;;  %v17407_v47 = vld [vmem:[#allocation6_spill] sm:$0xff] }
  0x70   : > { %12213 = vmatmul.mubr.msk.bf16.gmra.mrb[8].mxu0 %vm625_vm1, %v14289_v53 }
  0x71   : > { %12216 = vmatprep.mubr.msk.bf16.mxu0 %vm625_vm1, %v14297_v6 }
  0x75   : > { %12137 = vmatmul.mubr.msk.bf16.gmra.mrb[8].mxu1 %vm625_vm1, %v14012_v59  ;;  %v17408_v59 = vmov 0  }
  0x76   : > { %12140 = vmatprep.mubr.msk.bf16.mxu1 %vm625_vm1, %v14027_v5  ;;  %2262 = vst.msk [vmem:[#allocation2 + $0x8] sm:$0xf] %vm2259_vm5, %v17408_v59  ;;  %2260 = vst.msk [vmem:[#allocation2] sm:$0xf] %vm2259_vm5, %v17408_v59 }
  0x77   : > { %2261 = vst.msk [vmem:[#allocation2 + $0x4] sm:$0xf] %vm2259_vm5, %v17408_v59  ;;  %2263 = vst.msk [vmem:[#allocation2 + $0xc] sm:$0xf] %vm2259_vm5, %v17408_v59 }
  0x78   : > { %12217 = vmatmul.mubr.msk.bf16.gmra.mrb[12].mxu0 %vm625_vm1, %v14303_v32  ;;  %2264 = vst.msk [vmem:[#allocation2 + $0x10] sm:$0xf] %vm2259_vm5, %v17408_v59  ;;  %2265 = vst.msk [vmem:[#allocation2 + $0x14] sm:$0xf] %vm2259_vm5, %v17408_v59 }
  0x79   : > { %12220 = vmatprep.mubr.msk.bf16.mxu0 %vm625_vm1, %v14322_v39  ;;  %2266 = vst.msk [vmem:[#allocation2 + $0x18] sm:$0xf] %vm2259_vm5, %v17408_v59  ;;  %2267 = vst.msk [vmem:[#allocation2 + $0x1c] sm:$0xf] %vm2259_vm5, %v17408_v59  ;;  %v14660_v39 = vld [vmem:[%s17330_s3] ss:$0 sm:$0xff] }
  0x7a   : > { %2268 = vst.msk [vmem:[#allocation2 + $0x20] sm:$0xf] %vm2259_vm5, %v17408_v59  ;;  %2269 = vst.msk [vmem:[#allocation2 + $0x24] sm:$0xf] %vm2259_vm5, %v17408_v59 }
  0x7b   : > { %2270 = vst.msk [vmem:[#allocation2 + $0x28] sm:$0xf] %vm2259_vm5, %v17408_v59  ;;  %2271 = vst.msk [vmem:[#allocation2 + $0x2c] sm:$0xf] %vm2259_vm5, %v17408_v59 }
  0x7c   : > { %2272 = vst.msk [vmem:[#allocation2 + $0x30] sm:$0xf] %vm2259_vm5, %v17408_v59  ;;  %2273 = vst.msk [vmem:[#allocation2 + $0x34] sm:$0xf] %vm2259_vm5, %v17408_v59 }
  0x7d   : > { %12141 = vmatmul.mubr.msk.bf16.gmra.mrb[12].mxu1 %vm625_vm1, %v14041_v18  ;;  %2274 = vst.msk [vmem:[#allocation2 + $0x38] sm:$0xf] %vm2259_vm5, %v17408_v59  ;;  %2275 = vst.msk [vmem:[#allocation2 + $0x3c] sm:$0xf] %vm2259_vm5, %v17408_v59  ;;  %v2857_v37 = vld [vmem:[#allocation2] sm:$0xf] }
  0x7e   : > { %12144 = vmatprep.mubr.msk.bf16.mxu1 %vm625_vm1, %v14047_v24  ;;  %2276 = vst.msk [vmem:[#allocation2 + $0x40] sm:$0xf] %vm2259_vm5, %v17408_v59  ;;  %2277 = vst.msk [vmem:[#allocation2 + $0x44] sm:$0xf] %vm2259_vm5, %v17408_v59  ;;  %v2858_v7 = vld [vmem:[#allocation2 + $0x4] sm:$0xf] }
  0x7f   : > { %2278 = vst.msk [vmem:[#allocation2 + $0x48] sm:$0xf] %vm2259_vm5, %v17408_v59  ;;  %2279 = vst.msk [vmem:[#allocation2 + $0x4c] sm:$0xf] %vm2259_vm5, %v17408_v59  ;;  %v14651_v16 = vcombine.low %v2857_v37, %v2858_v7 }
  0x80   : > { %12221 = vmatmul.mubr.msk.bf16.gmra.mrb[16].mxu0 %vm625_vm1, %v14330_v26  ;;  %2280 = vst.msk [vmem:[#allocation2 + $0x50] sm:$0xf] %vm2259_vm5, %v17408_v59  ;;  %2281 = vst.msk [vmem:[#allocation2 + $0x54] sm:$0xf] %vm2259_vm5, %v17408_v59 }
  0x81   : > { %12224 = vmatprep.mubr.msk.bf16.mxu0 %vm625_vm1, %v14333_v13  ;;  %2282 = vst.msk [vmem:[#allocation2 + $0x58] sm:$0xf] %vm2259_vm5, %v17408_v59  ;;  %2283 = vst.msk [vmem:[#allocation2 + $0x5c] sm:$0xf] %vm2259_vm5, %v17408_v59  ;;  %v2995_v35 = vshll.u32 %v14651_v16, 16  ;;  %v2993_v42 = vshrl.u32 %v14651_v16, 16 }
  0x82   : > { %2284 = vst.msk [vmem:[#allocation2 + $0x60] sm:$0xf] %vm2259_vm5, %v17408_v59  ;;  %2285 = vst.msk [vmem:[#allocation2 + $0x64] sm:$0xf] %vm2259_vm5, %v17408_v59 }
  0x83   : > { %2286 = vst.msk [vmem:[#allocation2 + $0x68] sm:$0xf] %vm2259_vm5, %v17408_v59  ;;  %2287 = vst.msk [vmem:[#allocation2 + $0x6c] sm:$0xf] %vm2259_vm5, %v17408_v59  ;;  %v2997_v40 = vrot.slane %v2995_v35, 1 }
  0x84   : > { %2288 = vst.msk [vmem:[#allocation2 + $0x70] sm:$0xf] %vm2259_vm5, %v17408_v59  ;;  %2289 = vst.msk [vmem:[#allocation2 + $0x74] sm:$0xf] %vm2259_vm5, %v17408_v59  ;;  %v2814_v35 = vld [vmem:[#allocation2 + $0x8] sm:$0xe] }
  0x85   : > { %12145 = vmatmul.mubr.msk.bf16.gmra.mrb[16].mxu1 %vm625_vm1, %v14069_v44  ;;  %2290 = vst.msk [vmem:[#allocation2 + $0x78] sm:$0xf] %vm2259_vm5, %v17408_v59  ;;  %2291 = vst.msk [vmem:[#allocation2 + $0x7c] sm:$0xf] %vm2259_vm5, %v17408_v59  ;;  %v14684_v2 = vor.u32 %v2997_v40, %v2993_v42 }
  0x86   : > { %12148 = vmatprep.mubr.msk.bf16.mxu1 %vm625_vm1, %v14073_v46  ;;  %2292 = vst.msk [vmem:[#allocation2 + $0x80] sm:$0xf] %vm2259_vm5, %v17408_v59  ;;  %2293 = vst.msk [vmem:[#allocation2 + $0x84] sm:$0xf] %vm2259_vm5, %v17408_v59 }
  0x87   : > { %2294 = vst.msk [vmem:[#allocation2 + $0x88] sm:$0xf] %vm2259_vm5, %v17408_v59  ;;  %2295 = vst.msk [vmem:[#allocation2 + $0x8c] sm:$0xf] %vm2259_vm5, %v17408_v59 }
  0x88   : > { %12225 = vmatmul.mubr.msk.bf16.gmra.mrb[20].mxu0 %vm625_vm1, %v14347_v60  ;;  %2296 = vst.msk [vmem:[#allocation2 + $0x90] sm:$0xf] %vm2259_vm5, %v17408_v59  ;;  %2297 = vst.msk [vmem:[#allocation2 + $0x94] sm:$0xf] %vm2259_vm5, %v17408_v59 }
  0x89   : > { %12228 = vmatprep.mubr.msk.bf16.mxu0 %vm625_vm1, %v14352_v23  ;;  %2298 = vst.msk [vmem:[#allocation2 + $0x98] sm:$0xf] %vm2259_vm5, %v17408_v59  ;;  %2299 = vst.msk [vmem:[#allocation2 + $0x9c] sm:$0xf] %vm2259_vm5, %v17408_v59 }
  0x8a   : > { %2300 = vst.msk [vmem:[#allocation2 + $0xa0] sm:$0xf] %vm2259_vm5, %v17408_v59  ;;  %6452 = vst.msk [vmem:[#allocation3] sm:$0xf] %vm2259_vm5, %v17408_v59 }
  0x8b   : > { %6453 = vst.msk [vmem:[#allocation3 + $0x4] sm:$0xf] %vm2259_vm5, %v17408_v59  ;;  %6454 = vst.msk [vmem:[#allocation3 + $0x8] sm:$0xf] %vm2259_vm5, %v17408_v59 }
  0x8c   : > { %6455 = vst.msk [vmem:[#allocation3 + $0xc] sm:$0xf] %vm2259_vm5, %v17408_v59  ;;  %6456 = vst.msk [vmem:[#allocation3 + $0x10] sm:$0xf] %vm2259_vm5, %v17408_v59 }
  0x8d   : > { %12149 = vmatmul.mubr.msk.bf16.gmra.mrb[20].mxu1 %vm625_vm1, %v14088_v57  ;;  %6457 = vst.msk [vmem:[#allocation3 + $0x14] sm:$0xf] %vm2259_vm5, %v17408_v59  ;;  %6458 = vst.msk [vmem:[#allocation3 + $0x18] sm:$0xf] %vm2259_vm5, %v17408_v59 }
  0x8e   : > { %12152 = vmatprep.mubr.msk.bf16.mxu1 %vm625_vm1, %v14098_v4  ;;  %6459 = vst.msk [vmem:[#allocation3 + $0x1c] sm:$0xf] %vm2259_vm5, %v17408_v59  ;;  %6460 = vst.msk [vmem:[#allocation3 + $0x20] sm:$0xf] %vm2259_vm5, %v17408_v59 }
  0x8f   : > { %6461 = vst.msk [vmem:[#allocation3 + $0x24] sm:$0xf] %vm2259_vm5, %v17408_v59  ;;  %6462 = vst.msk [vmem:[#allocation3 + $0x28] sm:$0xf] %vm2259_vm5, %v17408_v59 }
  0x90   : > { %12229 = vmatmul.mubr.msk.bf16.gmra.mrb[24].mxu0 %vm625_vm1, %v14362_v1  ;;  %6463 = vst.msk [vmem:[#allocation3 + $0x2c] sm:$0xf] %vm2259_vm5, %v17408_v59  ;;  %6464 = vst.msk [vmem:[#allocation3 + $0x30] sm:$0xf] %vm2259_vm5, %v17408_v59 }
  0x91   : > { %12232 = vmatprep.mubr.msk.bf16.mxu0 %vm625_vm1, %v1666_v12  ;;  %6465 = vst.msk [vmem:[#allocation3 + $0x34] sm:$0xf] %vm2259_vm5, %v17408_v59  ;;  %6466 = vst.msk [vmem:[#allocation3 + $0x38] sm:$0xf] %vm2259_vm5, %v17408_v59  ;;  %v14641_v5 = vpop.permute.xlu0 %2045  ;;  %v14643_v18 = vpop.permute.xlu1 %2055 }
  0x92   : > { %6467 = vst.msk [vmem:[#allocation3 + $0x3c] sm:$0xf] %vm2259_vm5, %v17408_v59  ;;  %6468 = vst.msk [vmem:[#allocation3 + $0x40] sm:$0xf] %vm2259_vm5, %v17408_v59 }
  0x93   : > { %6469 = vst.msk [vmem:[#allocation3 + $0x44] sm:$0xf] %vm2259_vm5, %v17408_v59  ;;  %6470 = vst.msk [vmem:[#allocation3 + $0x48] sm:$0xf] %vm2259_vm5, %v17408_v59 }
  0x94   : > { %6471 = vst.msk [vmem:[#allocation3 + $0x4c] sm:$0xf] %vm2259_vm5, %v17408_v59  ;;  %6472 = vst.msk [vmem:[#allocation3 + $0x50] sm:$0xf] %vm2259_vm5, %v17408_v59 }
  0x95   : > { %12153 = vmatmul.mubr.msk.bf16.gmra.mrb[24].mxu1 %vm625_vm1, %v14112_v21  ;;  %6473 = vst.msk [vmem:[#allocation3 + $0x54] sm:$0xf] %vm2259_vm5, %v17408_v59  ;;  %6474 = vst.msk [vmem:[#allocation3 + $0x58] sm:$0xf] %vm2259_vm5, %v17408_v59  ;;  %v14645_v24 = vpop.permute.xlu0 %2050  ;;  %v14647_v44 = vpop.permute.xlu1 %2060 }
  0x96   : > { %12156 = vmatprep.mubr.msk.bf16.mxu1 %vm625_vm1, %v17405_v28  ;;  %6475 = vst.msk [vmem:[#allocation3 + $0x5c] sm:$0xf] %vm2259_vm5, %v17408_v59  ;;  %6476 = vst.msk [vmem:[#allocation3 + $0x60] sm:$0xf] %vm2259_vm5, %v17408_v59 }
  0x97   : > { %6477 = vst.msk [vmem:[#allocation3 + $0x64] sm:$0xf] %vm2259_vm5, %v17408_v59  ;;  %6478 = vst.msk [vmem:[#allocation3 + $0x68] sm:$0xf] %vm2259_vm5, %v17408_v59 }
  0x98   : > { %12233 = vmatmul.mubr.msk.bf16.gmra.mrb[28].mxu0 %vm625_vm1, %v1675_v33  ;;  %6479 = vst.msk [vmem:[#allocation3 + $0x6c] sm:$0xf] %vm2259_vm5, %v17408_v59  ;;  %6480 = vst.msk [vmem:[#allocation3 + $0x70] sm:$0xf] %vm2259_vm5, %v17408_v59 }
  0x99   : > { %12236 = vmatprep.mubr.msk.bf16.mxu0 %vm625_vm1, %v1684_v14  ;;  %6481 = vst.msk [vmem:[#allocation3 + $0x74] sm:$0xf] %vm2259_vm5, %v17408_v59  ;;  %6482 = vst.msk [vmem:[#allocation3 + $0x78] sm:$0xf] %vm2259_vm5, %v17408_v59  ;;  %v14649_v57 = vpop.permute.xlu0 %2065  ;;  %v14653_v53 = vpop.permute.xlu1 %2070 }
  0x9a   : > { %6483 = vst.msk [vmem:[#allocation3 + $0x7c] sm:$0xf] %vm2259_vm5, %v17408_v59  ;;  %6484 = vst.msk [vmem:[#allocation3 + $0x80] sm:$0xf] %vm2259_vm5, %v17408_v59 }
  0x9b   : > { %6485 = vst.msk [vmem:[#allocation3 + $0x84] sm:$0xf] %vm2259_vm5, %v17408_v59  ;;  %6486 = vst.msk [vmem:[#allocation3 + $0x88] sm:$0xf] %vm2259_vm5, %v17408_v59 }
  0x9c   : > { %6487 = vst.msk [vmem:[#allocation3 + $0x8c] sm:$0xf] %vm2259_vm5, %v17408_v59  ;;  %6488 = vst.msk [vmem:[#allocation3 + $0x90] sm:$0xf] %vm2259_vm5, %v17408_v59 }
  0x9d   : > { %12157 = vmatmul.mubr.msk.bf16.gmra.mrb[28].mxu1 %vm625_vm1, %v17406_v38  ;;  %6489 = vst.msk [vmem:[#allocation3 + $0x94] sm:$0xf] %vm2259_vm5, %v17408_v59  ;;  %6490 = vst.msk [vmem:[#allocation3 + $0x98] sm:$0xf] %vm2259_vm5, %v17408_v59  ;;  %v14655_v6 = vpop.permute.xlu0 %2075  ;;  %v14672_v54 = vpop.permute.xlu1 %2080 }
  0x9e   : > { %12160 = vmatprep.mubr.msk.bf16.mxu1 %vm625_vm1, %v17407_v47  ;;  %6491 = vst.msk [vmem:[#allocation3 + $0x9c] sm:$0xf] %vm2259_vm5, %v17408_v59  ;;  %6492 = vst.msk [vmem:[#allocation3 + $0xa0] sm:$0xf] %vm2259_vm5, %v17408_v59 }
  0x9f   : > { %17409 = vst [vmem:[#allocation4_spill] sm:$0xff] %v14641_v5  ;;  %17410 = vst [vmem:[#allocation5_spill] sm:$0xff] %v14643_v18 }
  0xa0   : > { %12237 = vmatmul.mubr.msk.bf16.gmra.mrb[32].mxu0 %vm625_vm1, %v1693_v10  ;;  %17411 = vst [vmem:[#allocation6_spill] sm:$0xff] %v14645_v24  ;;  %17412 = vst [vmem:[#allocation7_spill] sm:$0xff] %v14647_v44 }
  0xa1   : > { %17413 = vst [vmem:[#allocation8_spill] sm:$0xff] %v14649_v57  ;;  %17414 = vst [vmem:[#allocation9_spill] sm:$0xff] %v14653_v53  ;;  %v14675_v50 = vpop.permute.xlu0 %2085 }
  0xa2   : > { %17415 = vst [vmem:[#allocation10_spill] sm:$0xff] %v14655_v6  ;;  %17416 = vst [vmem:[#allocation11_spill] sm:$0xff] %v14672_v54 }
  0xa3   : > { %17417 = vst [vmem:[#allocation12_spill] sm:$0xff] %v14675_v50 }
  0xa5   : > { %12161 = vmatmul.mubr.msk.bf16.gmra.mrb[32].mxu1 %vm625_vm1, %v14174_v8  ;;  %v14638_v8 = vld [vmem:[%s17331_s4] sm:$0xff]   ;;  %vm6026_vm1 = vcmask 1044480  }
  0xa6   : > { %12278 = vmatprep.subr.bf16.mxu1 %v14638_v8 }
 0x133   : > { %v12206_v46 = vpop.f32.mrb[0].mxu0 }
 0x134   : > { %v1785_v4 = vpop.f32.mrb[1].mxu0 }
 0x135   : > { %v12207_v21 = vpop.f32.mrb[2].mxu0 }
 0x136   : > { %v1788_v29 = vpop.f32.mrb[3].mxu0 }
 0x138   : > { %v12130_v32 = vpop.f32.mrb[0].mxu1 }
 0x139   : > { %v12924_v26 = vadd.f32 %v12206_v46, %v12130_v32  ;;  %v934_v13 = vpop.f32.mrb[1].mxu1 }
 0x13a   : > { %v12925_v55 = vadd.f32 %v1785_v4, %v934_v13  ;;  %v12131_v62 = vpop.f32.mrb[2].mxu1 }
 0x13b   : > { %v12210_v58 = vpop.f32.mrb[4].mxu0  ;;  %v1973_v34 = vadd.f32 %v12924_v26, %v14660_v39  ;;  %v12926_v60 = vadd.f32 %v12207_v21, %v12131_v62  ;;  %v937_v49 = vpop.f32.mrb[3].mxu1 }
 0x13c   : > { %v1801_v19 = vpop.f32.mrb[5].mxu0  ;;  %v1971_v3 = vadd.f32 %v12925_v55, %v14660_v39  ;;  %v12927_v23 = vadd.f32 %v1788_v29, %v937_v49  ;;  %v14692_v55 = vpop.permute.xlu1 %2090 }
 0x13d   : > { %v14664_v45 = vpop.f32.mrb[6].mxu0  ;;  %v2009_v9 = vmax.f32 %v1973_v34, 0.0  ;;  %v1974_v61 = vadd.f32 %v12926_v60, %v14660_v39  ;;  %17418 = vst [vmem:[#allocation13_spill] sm:$0xff] %v14692_v55 }
 0x13e   : > { %v14667_v0 = vpop.f32.mrb[7].mxu0  ;;  %v2007_v63 = vmax.f32 %v1971_v3, 0.0  ;;  %v1972_v1 = vadd.f32 %v12927_v23, %v14660_v39  ;;  %v14700_v3 = vpop.permute.xlu0 %2095 }
 0x13f   : > { %v2225_v48 = vmul.f32 %v14643_v18, %v2009_v9  ;;  %v2010_v11 = vmax.f32 %v1974_v61, 0.0  ;;  %17422 = vst [vmem:[#allocation15_spill] sm:$0xff] %v14700_v3  ;;  %v17423_v9 = vmov 0 }
 0x140   : > { %v2223_v12 = vmul.f32 %v14641_v5, %v2007_v63  ;;  %v2008_v43 = vmax.f32 %v1972_v1, 0.0  ;;  %v12134_v27 = vpop.f32.mrb[4].mxu1  ;;  %v17424_v9 = vsel %vm14704_vm11, 4294967295, %v17423_v9 }
 0x141   : > { %v11564_v33 = vpack.c.bf16 %v2225_v48, %v2225_v48  ;;  %v2226_v17 = vmul.f32 %v14647_v44, %v2010_v11  ;;  %v12928_v30 = vadd.f32 %v12210_v58, %v12134_v27  ;;  %v950_v36 = vpop.f32.mrb[5].mxu1  ;;  %17425 = vst [vmem:[#allocation16_spill] sm:$0xff] %v17424_v9 }
 0x142   : > { %v11562_v31 = vpack.c.bf16 %v2223_v12, %v2223_v12  ;;  %v2224_v52 = vmul.f32 %v14645_v24, %v2008_v43  ;;  %v12929_v14 = vadd.f32 %v1801_v19, %v950_v36  ;;  %v12135_v10 = vpop.f32.mrb[6].mxu1  ;;  %v17419_v19 = vmov 0 }
 0x143   : > { %v14679_v56 = vpop.f32.mrb[8].mxu0  ;;  %v2435_v41 = vshrl.u32 %v11564_v33, 16  ;;  %v2438_v51 = vshll.u32 %v11564_v33, 16  ;;  %v11565_v20 = vpack.c.bf16 %v2226_v17, %v2226_v17  ;;  %v1977_v25 = vadd.f32 %v12928_v30, %v14660_v39  ;;  %v953_v22 = vpop.f32.mrb[7].mxu1 }
 0x144   : > { %v14682_v15 = vpop.f32.mrb[9].mxu0  ;;  %v2416_v38 = vshrl.u32 %v11562_v31, 16  ;;  %v2419_v47 = vshll.u32 %v11562_v31, 16  ;;  %v11563_v59 = vpack.c.bf16 %v2224_v52, %v2224_v52  ;;  %v1975_v46 = vadd.f32 %v12929_v14, %v14660_v39 }
 0x145   : > { %v14687_v28 = vpop.f32.mrb[10].mxu0  ;;  %v2437_v21 = vrot.slane %v2435_v41, 6  ;;  %v2440_v37 = vrot.slane %v2438_v51, 7  ;;  %v2445_v7 = vshrl.u32 %v11565_v20, 16  ;;  %v2448_v29 = vshll.u32 %v11565_v20, 16 }
 0x146   : > { %v14690_v4 = vpop.f32.mrb[11].mxu0  ;;  %v2418_v32 = vrot.slane %v2416_v38, 6  ;;  %v2421_v26 = vrot.slane %v2419_v47, 7  ;;  %v2425_v13 = vshrl.u32 %v11563_v59, 16  ;;  %v2428_v58 = vshll.u32 %v11563_v59, 16 }
 0x147   : > { %v2441_v62 = vor.u32 %v2440_v37, %v2437_v21  ;;  %v17420_v19 = vsel %vm14696_vm10, 4294967295, %v17419_v19  ;;  %v2447_v34 = vrot.slane %v2445_v7, 6  ;;  %v2450_v60 = vrot.slane %v2448_v29, 7 }
 0x148   : > { %17421 = vst [vmem:[#allocation14_spill] sm:$0xff] %v17420_v19  ;;  %v2013_v49 = vmax.f32 %v1977_v25, 0.0  ;;  %v2422_v23 = vor.u32 %v2421_v26, %v2418_v32  ;;  %v2427_v61 = vrot.slane %v2425_v13, 6  ;;  %v2430_v63 = vrot.slane %v2428_v58, 7  ;;  %v12138_v42 = vpop.f32.mrb[8].mxu1 }
 0x149   : > { %v2011_v1 = vmax.f32 %v1975_v46, 0.0  ;;  %v2443_v40 = vrot.slane %v2441_v62, 4  ;;  %v14708_v48 = vor.u32 %v2450_v60, %v2447_v34  ;;  %v12930_v12 = vadd.f32 %v14664_v45, %v12135_v10  ;;  %v966_v43 = vpop.f32.mrb[9].mxu1 }
 0x14a   : > { %v2229_v11 = vmul.f32 %v14655_v6, %v2013_v49  ;;  %v2423_v33 = vrot.slane %v2422_v23, 4  ;;  %v2815_v17 = vsel %vm14696_vm10, %v2422_v23, %v2814_v35  ;;  %v2431_v30 = vor.u32 %v2430_v63, %v2427_v61  ;;  %v12139_v31 = vpop.f32.mrb[10].mxu1  ;;  %v14737_v35 = vpop.permute.xlu1 %2100 }
 0x14b   : > { %v14712_v27 = vpop.f32.mrb[12].mxu0  ;;  %v2227_v36 = vmul.f32 %v14649_v57, %v2011_v1  ;;  %2816 = vst [vmem:[#allocation2 + $0x8] sm:$0xe] %v2815_v17  ;;  %v2452_v14 = vsel %vm14704_vm11, %v2443_v40, %v14708_v48  ;;  %v2453_v45 = vrot.slane %v14708_v48, 4  ;;  %v1978_v41 = vadd.f32 %v12930_v12, %v14660_v39  ;;  %v969_v51 = vpop.f32.mrb[11].mxu1  ;;  %17426 = vst [vmem:[#allocation17_spill] sm:$0xff] %v14737_v35 }
 0x14c   : > { %v14717_v52 = vpop.f32.mrb[13].mxu0  ;;  %v11568_v10 = vpack.c.bf16 %v2229_v11, %v2229_v11  ;;  %2819 = vst.msk [vmem:[#allocation2 + $0x14] sm:$0xf] %vm2259_vm5, %v2452_v14  ;;  %v2432_v25 = vsel %vm14704_vm11, %v2423_v33, %v2431_v30  ;;  %v2433_v38 = vrot.slane %v2431_v30, 4  ;;  %v12931_v59 = vadd.f32 %v14667_v0, %v953_v22  ;;  %v14742_v49 = vpop.permute.xlu0 %2105 }
 0x14d   : > { %v14724_v20 = vpop.f32.mrb[14].mxu0  ;;  %v11566_v47 = vpack.c.bf16 %v2227_v36, %v2227_v36  ;;  %2817 = vst.msk [vmem:[#allocation2 + $0xc] sm:$0xf] %vm2259_vm5, %v2432_v25  ;;  %v2014_v7 = vmax.f32 %v1978_v41, 0.0  ;;  %v12932_v29 = vadd.f32 %v14679_v56, %v12138_v42  ;;  %17427 = vst [vmem:[#allocation18_spill] sm:$0xff] %v14742_v49  ;;  %v12934_v48 = vadd.f32 %v14687_v28, %v12139_v31 }
 0x14e   : > { %v14730_v46 = vpop.f32.mrb[15].mxu0  ;;  %v2475_v21 = vshrl.u32 %v11568_v10, 16  ;;  %v2478_v37 = vshll.u32 %v11568_v10, 16  ;;  %v2442_v32 = vsel %vm14704_vm11, %v2433_v38, %v2441_v62  ;;  %v1976_v58 = vadd.f32 %v12931_v59, %v14660_v39 }
 0x14f   : > { %v2455_v26 = vshrl.u32 %v11566_v47, 16  ;;  %v2458_v13 = vshll.u32 %v11566_v47, 16  ;;  %2818 = vst.msk [vmem:[#allocation2 + $0x10] sm:$0xf] %vm2259_vm5, %v2442_v32  ;;  %v2230_v34 = vmul.f32 %v14672_v54, %v2014_v7  ;;  %v1981_v60 = vadd.f32 %v12932_v29, %v14660_v39 }
 0x150   : > { %v2477_v0 = vrot.slane %v2475_v21, 6  ;;  %v2480_v22 = vrot.slane %v2478_v37, 7  ;;  %v2012_v61 = vmax.f32 %v1976_v58, 0.0  ;;  %v12933_v62 = vadd.f32 %v14682_v15, %v966_v43  ;;  %v12142_v63 = vpop.f32.mrb[12].mxu1 }
 0x151   : > { %v2457_v56 = vrot.slane %v2455_v26, 6  ;;  %v2460_v23 = vrot.slane %v2458_v13, 7  ;;  %v11569_v42 = vpack.c.bf16 %v2230_v34, %v2230_v34  ;;  %v2017_v40 = vmax.f32 %v1981_v60, 0.0  ;;  %v982_v11 = vpop.f32.mrb[13].mxu1 }
 0x152   : > { %v14745_v1 = vor.u32 %v2480_v22, %v2477_v0  ;;  %v2228_v17 = vmul.f32 %v14653_v53, %v2012_v61  ;;  %v1979_v30 = vadd.f32 %v12933_v62, %v14660_v39  ;;  %v12935_v36 = vadd.f32 %v14690_v4, %v969_v51  ;;  %v14753_v14 = vpop.f32.mrb[14].mxu1  ;;  %v14771_v0 = vpop.permute.xlu1 %2110 }
 0x153   : > { %v14748_v12 = vpop.f32.mrb[16].mxu0  ;;  %v2461_v33 = vor.u32 %v2460_v23, %v2457_v56  ;;  %v2485_v10 = vshrl.u32 %v11569_v42, 16  ;;  %v2488_v41 = vshll.u32 %v11569_v42, 16  ;;  %v2233_v28 = vmul.f32 %v14700_v3, %v2017_v40  ;;  %v14759_v31 = vpop.f32.mrb[15].mxu1  ;;  %17428 = vst [vmem:[#allocation19_spill] sm:$0xff] %v14771_v0 }
 0x154   : > { %v14755_v15 = vpop.f32.mrb[17].mxu0  ;;  %v2483_v43 = vrot.slane %v14745_v1, 4  ;;  %v11567_v59 = vpack.c.bf16 %v2228_v17, %v2228_v17  ;;  %v2015_v4 = vmax.f32 %v1979_v30, 0.0  ;;  %v1982_v29 = vadd.f32 %v12934_v48, %v14660_v39  ;;  %v14773_v56 = vpop.permute.xlu0 %2115 }
 0x155   : > { %v14761_v25 = vpop.f32.mrb[18].mxu0  ;;  %v2462_v38 = vsel %vm14704_vm11, %v2453_v45, %v2461_v33  ;;  %v2463_v47 = vrot.slane %v2461_v33, 4  ;;  %v2487_v21 = vrot.slane %v2485_v10, 6  ;;  %v2490_v37 = vrot.slane %v2488_v41, 7  ;;  %17429 = vst [vmem:[#allocation20_spill] sm:$0xff] %v14773_v56 }
 0x156   : > { %v14765_v51 = vpop.f32.mrb[19].mxu0  ;;  %2820 = vst.msk [vmem:[#allocation2 + $0x18] sm:$0xf] %vm2259_vm5, %v2462_v38  ;;  %v11572_v7 = vpack.c.bf16 %v2233_v28, %v2233_v28  ;;  %v2465_v32 = vshrl.u32 %v11567_v59, 16  ;;  %v2468_v26 = vshll.u32 %v11567_v59, 16  ;;  %v2231_v13 = vmul.f32 %v14675_v50, %v2015_v4  ;;  %v14892_v50 = vld [vmem:[#allocation2 + $0x10] sm:$0xff]  }
 0x157   : > { %v1980_v58 = vadd.f32 %v12935_v36, %v14660_v39  ;;  %v2491_v45 = vor.u32 %v2490_v37, %v2487_v21  ;;  %v2018_v60 = vmax.f32 %v1982_v29, 0.0  ;;  %v12937_v29 = vadd.f32 %v14717_v52, %v982_v11 }
 0x158   : > { %v2515_v22 = vshrl.u32 %v11572_v7, 16  ;;  %v2518_v34 = vshll.u32 %v11572_v7, 16  ;;  %v2467_v23 = vrot.slane %v2465_v32, 6  ;;  %v2470_v61 = vrot.slane %v2468_v26, 7  ;;  %v12146_v40 = vpop.f32.mrb[16].mxu1 }
 0x159   : > { %v11570_v62 = vpack.c.bf16 %v2231_v13, %v2231_v13  ;;  %v2016_v42 = vmax.f32 %v1980_v58, 0.0  ;;  %v2492_v48 = vsel %vm14704_vm11, %v2483_v43, %v2491_v45  ;;  %v2493_v33 = vrot.slane %v2491_v45, 4  ;;  %v998_v36 = vpop.f32.mrb[17].mxu1 }
 0x15a   : > { %v2517_v17 = vrot.slane %v2515_v22, 6  ;;  %v2520_v30 = vrot.slane %v2518_v34, 7  ;;  %2823 = vst.msk [vmem:[#allocation2 + $0x24] sm:$0xf] %vm2259_vm5, %v2492_v48  ;;  %v2471_v41 = vor.u32 %v2470_v61, %v2467_v23  ;;  %v2234_v59 = vmul.f32 %v14737_v35, %v2018_v60  ;;  %v14781_v4 = vpop.f32.mrb[18].mxu1 }
 0x15b   : > { %v14777_v10 = vpop.f32.mrb[20].mxu0  ;;  %v2495_v28 = vshrl.u32 %v11570_v62, 16  ;;  %v2498_v38 = vshll.u32 %v11570_v62, 16  ;;  %v2232_v43 = vmul.f32 %v14692_v55, %v2016_v42  ;;  %v12936_v7 = vadd.f32 %v14712_v27, %v12142_v63  ;;  %v14790_v32 = vpop.f32.mrb[19].mxu1 }
 0x15c   : > { %v14783_v21 = vpop.f32.mrb[21].mxu0  ;;  %v14785_v37 = vor.u32 %v2520_v30, %v2517_v17  ;;  %v2472_v13 = vsel %vm14704_vm11, %v2463_v47, %v2471_v41  ;;  %v2473_v58 = vrot.slane %v2471_v41, 4  ;;  %v11573_v23 = vpack.c.bf16 %v2234_v59, %v2234_v59  ;;  %v14807_v62 = vpop.permute.xlu1 %2120 }
 0x15d   : > { %v14792_v26 = vpop.f32.mrb[22].mxu0  ;;  %v2497_v45 = vrot.slane %v2495_v28, 6  ;;  %v2500_v22 = vrot.slane %v2498_v38, 7  ;;  %2821 = vst.msk [vmem:[#allocation2 + $0x1c] sm:$0xf] %vm2259_vm5, %v2472_v13  ;;  %v11571_v27 = vpack.c.bf16 %v2232_v43, %v2232_v43  ;;  %v1985_v52 = vadd.f32 %v12936_v7, %v14660_v39  ;;  %17430 = vst [vmem:[#allocation21_spill] sm:$0xff] %v14807_v62  ;;  %v14810_v41 = vpop.permute.xlu0 %2125 }
 0x15e   : > { %v14796_v34 = vpop.f32.mrb[23].mxu0  ;;  %v2523_v60 = vrot.slane %v14785_v37, 4  ;;  %v2482_v63 = vsel %vm14704_vm11, %v2473_v58, %v14745_v1  ;;  %v1983_v47 = vadd.f32 %v12937_v29, %v14660_v39  ;;  %v12938_v61 = vadd.f32 %v14724_v20, %v14753_v14  ;;  %17431 = vst [vmem:[#allocation22_spill] sm:$0xff] %v14810_v41 }
 0x15f   : > { %v2501_v11 = vor.u32 %v2500_v22, %v2497_v45  ;;  %2822 = vst.msk [vmem:[#allocation2 + $0x20] sm:$0xf] %vm2259_vm5, %v2482_v63  ;;  %v2525_v42 = vshrl.u32 %v11573_v23, 16  ;;  %v2528_v48 = vshll.u32 %v11573_v23, 16  ;;  %v2505_v17 = vshrl.u32 %v11571_v27, 16 }
 0x160   : > { %v2508_v30 = vshll.u32 %v11571_v27, 16  ;;  %v2021_v38 = vmax.f32 %v1985_v52, 0.0  ;;  %v2019_v59 = vmax.f32 %v1983_v47, 0.0  ;;  %v14814_v43 = vpop.f32.mrb[20].mxu1  ;;  %v12939_v23 = vadd.f32 %v14730_v46, %v14759_v31 }
 0x161   : > { %v2502_v28 = vsel %vm14704_vm11, %v2493_v33, %v2501_v11  ;;  %v2503_v1 = vrot.slane %v2501_v11, 4  ;;  %v2527_v20 = vrot.slane %v2525_v42, 6  ;;  %v2530_v14 = vrot.slane %v2528_v48, 7  ;;  %v14817_v13 = vpop.f32.mrb[21].mxu1 }
 0x162   : > { %2824 = vst.msk [vmem:[#allocation2 + $0x28] sm:$0xf] %vm2259_vm5, %v2502_v28  ;;  %v2507_v7 = vrot.slane %v2505_v17, 6  ;;  %v2510_v29 = vrot.slane %v2508_v30, 7  ;;  %v2237_v45 = vmul.f32 %v14773_v56, %v2021_v38  ;;  %v2235_v22 = vmul.f32 %v14742_v49, %v2019_v59  ;;  %v14826_v27 = vpop.f32.mrb[22].mxu1 }
 0x163   : > { %v14819_v58 = vpop.f32.mrb[24].mxu0  ;;  %v1986_v33 = vadd.f32 %v12938_v61, %v14660_v39  ;;  %v2531_v63 = vor.u32 %v2530_v14, %v2527_v20  ;;  %v12940_v47 = vadd.f32 %v14748_v12, %v12146_v40  ;;  %v12941_v42 = vadd.f32 %v14755_v15, %v998_v36  ;;  %v14832_v48 = vpop.f32.mrb[23].mxu1 }
 0x164   : > { %v14828_v52 = vpop.f32.mrb[25].mxu0  ;;  %v2511_v11 = vor.u32 %v2510_v29, %v2507_v7  ;;  %v11576_v30 = vpack.c.bf16 %v2237_v45, %v2237_v45  ;;  %v11574_v28 = vpack.c.bf16 %v2235_v22, %v2235_v22  ;;  %v1984_v38 = vadd.f32 %v12939_v23, %v14660_v39  ;;  %v14845_v7 = vpop.permute.xlu1 %2130 }
 0x165   : > { %v14834_v17 = vpop.f32.mrb[26].mxu0  ;;  %v2022_v61 = vmax.f32 %v1986_v33, 0.0  ;;  %v2532_v31 = vsel %vm14704_vm11, %v2523_v60, %v2531_v63  ;;  %v2533_v59 = vrot.slane %v2531_v63, 4  ;;  %17432 = vst [vmem:[#allocation23_spill] sm:$0xff] %v14845_v7  ;;  %v14852_v22 = vpop.permute.xlu0 %2135  ;;  %v12944_v19 = vadd.f32 %v14777_v10, %v14814_v43 }
 0x166   : > { %v14837_v46 = vpop.f32.mrb[27].mxu0  ;;  %v2512_v12 = vsel %vm14704_vm11, %v2503_v1, %v2511_v11  ;;  %v2513_v40 = vrot.slane %v2511_v11, 4  ;;  %2827 = vst.msk [vmem:[#allocation2 + $0x34] sm:$0xf] %vm2259_vm5, %v2532_v31  ;;  %v2555_v15 = vshrl.u32 %v11576_v30, 16  ;;  %v2558_v36 = vshll.u32 %v11576_v30, 16 }
 0x167   : > { %2825 = vst.msk [vmem:[#allocation2 + $0x2c] sm:$0xf] %vm2259_vm5, %v2512_v12  ;;  %v2535_v20 = vshrl.u32 %v11574_v28, 16  ;;  %v2538_v14 = vshll.u32 %v11574_v28, 16  ;;  %v2238_v60 = vmul.f32 %v14807_v62, %v2022_v61  ;;  %v2020_v45 = vmax.f32 %v1984_v38, 0.0  ;;  %17433 = vst [vmem:[#allocation24_spill] sm:$0xff] %v14852_v22 }
 0x168   : > { %v2522_v29 = vsel %vm14704_vm11, %v2513_v40, %v14785_v37  ;;  %v1989_v1 = vadd.f32 %v12940_v47, %v14660_v39  ;;  %v2557_v33 = vrot.slane %v2555_v15, 6  ;;  %v2560_v23 = vrot.slane %v2558_v36, 7  ;;  %v14855_v30 = vpop.f32.mrb[24].mxu1  ;;  %v14890_v55 = vpop.permute.xlu1 %2140 }
 0x169   : > { %2826 = vst.msk [vmem:[#allocation2 + $0x30] sm:$0xf] %vm2259_vm5, %v2522_v29  ;;  %v2537_v63 = vrot.slane %v2535_v20, 6  ;;  %v2540_v11 = vrot.slane %v2538_v14, 7  ;;  %v11577_v28 = vpack.c.bf16 %v2238_v60, %v2238_v60  ;;  %v2236_v31 = vmul.f32 %v14771_v0, %v2020_v45  ;;  %v14859_v61 = vpop.f32.mrb[25].mxu1  ;;  %v14869_v20 = vld [vmem:[#allocation2 + $0x8] sm:$0xff]  }
 0x16a   : > { %v2025_v12 = vmax.f32 %v1989_v1, 0.0  ;;  %v1987_v37 = vadd.f32 %v12941_v42, %v14660_v39  ;;  %v14863_v47 = vor.u32 %v2560_v23, %v2557_v33  ;;  %v12942_v15 = vadd.f32 %v14761_v25, %v14781_v4  ;;  %v14871_v14 = vpop.f32.mrb[26].mxu1  ;;  %17434 = vst [vmem:[#allocation25_spill] sm:$0xff] %v14890_v55 }
 0x16b   : > { %v14861_v38 = vpop.f32.mrb[28].mxu0  ;;  %v2541_v40 = vor.u32 %v2540_v11, %v2537_v63  ;;  %v12943_v36 = vadd.f32 %v14765_v51, %v14790_v32  ;;  %v2565_v42 = vshrl.u32 %v11577_v28, 16  ;;  %v2568_v60 = vshll.u32 %v11577_v28, 16  ;;  %v14876_v33 = vpop.f32.mrb[27].mxu1 }
 0x16c   : > { %v14873_v29 = vpop.f32.mrb[29].mxu0  ;;  %v11575_v45 = vpack.c.bf16 %v2236_v31, %v2236_v31  ;;  %v2241_v1 = vmul.f32 %v14852_v22, %v2025_v12  ;;  %v2563_v25 = vrot.slane %v14863_v47, 4  ;;  %v2023_v32 = vmax.f32 %v1987_v37, 0.0 }
 0x16d   : > { %v14878_v23 = vpop.f32.mrb[30].mxu0  ;;  %v2542_v51 = vsel %vm14704_vm11, %v2533_v59, %v2541_v40  ;;  %v2543_v4 = vrot.slane %v2541_v40, 4  ;;  %v2567_v11 = vrot.slane %v2565_v42, 6  ;;  %v2570_v28 = vrot.slane %v2568_v60, 7 }
 0x16e   : > { %v14883_v63 = vpop.f32.mrb[31].mxu0  ;;  %2828 = vst.msk [vmem:[#allocation2 + $0x38] sm:$0xf] %vm2259_vm5, %v2542_v51  ;;  %v2545_v31 = vshrl.u32 %v11575_v45, 16  ;;  %v2548_v12 = vshll.u32 %v11575_v45, 16  ;;  %v11580_v22 = vpack.c.bf16 %v2241_v1, %v2241_v1  ;;  %v2239_v0 = vmul.f32 %v14810_v41, %v2023_v32 }
 0x16f   : > { %v1990_v62 = vadd.f32 %v12942_v15, %v14660_v39  ;;  %v1988_v49 = vadd.f32 %v12943_v36, %v14660_v39  ;;  %v2571_v56 = vor.u32 %v2570_v28, %v2567_v11  ;;  %v3000_v37 = vshll.u32 %v14869_v20, 16 }
 0x170   : > { %v2547_v59 = vrot.slane %v2545_v31, 6  ;;  %v2550_v40 = vrot.slane %v2548_v12, 7  ;;  %v2595_v35 = vshrl.u32 %v11580_v22, 16  ;;  %v2598_v51 = vshll.u32 %v11580_v22, 16  ;;  %v14894_v45 = vpop.f32.mrb[28].mxu1 }
 0x171   : > { %v11578_v42 = vpack.c.bf16 %v2239_v0, %v2239_v0  ;;  %v2026_v60 = vmax.f32 %v1990_v62, 0.0  ;;  %v2572_v15 = vsel %vm14704_vm11, %v2563_v25, %v2571_v56  ;;  %v2573_v1 = vrot.slane %v2571_v56, 4  ;;  %v14898_v11 = vpop.f32.mrb[29].mxu1 }
 0x172   : > { %v2551_v36 = vor.u32 %v2550_v40, %v2547_v59  ;;  %v2024_v32 = vmax.f32 %v1988_v49, 0.0  ;;  %2831 = vst.msk [vmem:[#allocation2 + $0x44] sm:$0xf] %vm2259_vm5, %v2572_v15  ;;  %v2597_v31 = vrot.slane %v2595_v35, 6  ;;  %v2600_v22 = vrot.slane %v2598_v51, 7  ;;  %v14903_v12 = vpop.f32.mrb[30].mxu1 }
 0x173   : > { %v14900_v28 = vpop.f32.mrb[32].mxu0  ;;  %v2575_v0 = vshrl.u32 %v11578_v42, 16  ;;  %v2578_v62 = vshll.u32 %v11578_v42, 16  ;;  %v2242_v49 = vmul.f32 %v14890_v55, %v2026_v60  ;;  %v14911_v40 = vpop.f32.mrb[31].mxu1  ;;  %v3002_v15 = vrot.slane %v3000_v37, 1 }
 0x174   : > { %v14905_v41 = vpop.f32.mrb[33].mxu0  ;;  %v2552_v25 = vsel %vm14704_vm11, %v2543_v4, %v2551_v36  ;;  %v2553_v56 = vrot.slane %v2551_v36, 4  ;;  %v2240_v59 = vmul.f32 %v14845_v7, %v2024_v32  ;;  %v14916_v35 = vor.u32 %v2600_v22, %v2597_v31  ;;  %v14929_v22 = vpop.permute.xlu0 %2145 }
 0x175   : > { %v14913_v3 = vpop.f32.mrb[34].mxu0  ;;  %2829 = vst.msk [vmem:[#allocation2 + $0x3c] sm:$0xf] %vm2259_vm5, %v2552_v25  ;;  %v2577_v51 = vrot.slane %v2575_v0, 6  ;;  %v2580_v42 = vrot.slane %v2578_v62, 7  ;;  %v11581_v60 = vpack.c.bf16 %v2242_v49, %v2242_v49  ;;  %v3004_v32 = vshrl.u32 %v14869_v20, 16 }
 0x176   : > { %v14918_v53 = vpop.f32.mrb[35].mxu0  ;;  %v2562_v4 = vsel %vm14704_vm11, %v2553_v56, %v14863_v47  ;;  %v11579_v36 = vpack.c.bf16 %v2240_v59, %v2240_v59  ;;  %v2603_v7 = vrot.slane %v14916_v35, 4  ;;  %v3003_v31 = vsel %vm476_vm3, %v14684_v2, %v3002_v15  ;;  %17435 = vst [vmem:[#allocation26_spill] sm:$0xff] %v14929_v22  ;;  %v14935_v20 = vld [vmem:[%s17331_s4 + $0x10] sm:$0xff]  }
 0x177   : > { %2830 = vst.msk [vmem:[#allocation2 + $0x40] sm:$0xf] %vm2259_vm5, %v2562_v4  ;;  %v2581_v25 = vor.u32 %v2580_v42, %v2577_v51  ;;  %v3008_v37 = vshll.u32 %v14892_v50, 16  ;;  %v2605_v0 = vshrl.u32 %v11581_v60, 16  ;;  %v2608_v62 = vshll.u32 %v11581_v60, 16  ;;  %12242 = vmatprep.mubr.msk.bf16.mxu1 %vm3146_vm12, %v3003_v31  ;;  %v13669_v51 = vld [vmem:[#allocation2 + $0x18] sm:$0xff]   ;;  %v14941_v4 = vpop.permute.xlu1 %2150 }
 0x178   : > { %v2585_v55 = vshrl.u32 %v11579_v36, 16  ;;  %v2588_v47 = vshll.u32 %v11579_v36, 16  ;;  %v3006_v2 = vor.u32 %v3004_v32, %v3002_v15  ;;  %v14939_v42 = vpop.f32.mrb[32].mxu1  ;;  %17436 = vst [vmem:[#allocation27_spill] sm:$0xff] %v14941_v4  ;;  %v12946_v15 = vadd.f32 %v14792_v26, %v14826_v27 }
 0x179   : > { %v2582_v56 = vsel %vm14704_vm11, %v2573_v1, %v2581_v25  ;;  %v2583_v49 = vrot.slane %v2581_v25, 4  ;;  %v3010_v59 = vrot.slane %v3008_v37, 1  ;;  %v2607_v60 = vrot.slane %v2605_v0, 6  ;;  %v14951_v32 = vpop.f32.mrb[33].mxu1 }
 0x17a   : > { %2832 = vst.msk [vmem:[#allocation2 + $0x48] sm:$0xf] %vm2259_vm5, %v2582_v56  ;;  %v2610_v36 = vrot.slane %v2608_v62, 7  ;;  %v2587_v31 = vrot.slane %v2585_v55, 6  ;;  %v2590_v54 = vrot.slane %v2588_v47, 7  ;;  %v12945_v1 = vadd.f32 %v14783_v21, %v14817_v13  ;;  %v14959_v62 = vpop.f32.mrb[34].mxu1 }
 0x17b   : > { %v3011_v57 = vsel %vm476_vm3, %v3006_v2, %v3010_v59  ;;  %v12947_v55 = vadd.f32 %v14796_v34, %v14832_v48  ;;  %v3012_v0 = vshrl.u32 %v14892_v50, 16  ;;  %v1993_v10 = vadd.f32 %v12944_v19, %v14660_v39  ;;  %v14965_v13 = vpop.f32.mrb[35].mxu1  ;;  %v14975_v19 = vld [vmem:[#allocation2 + $0x20] sm:$0xff]  }
 0x17c   : > { %v14953_v25 = vor.u32 %v2610_v36, %v2607_v60  ;;  %v2591_v37 = vor.u32 %v2590_v54, %v2587_v31  ;;  %12243 = vmatmul.mubr.msk.bf16.vlgmr.msra.gmra.mrb[36].mxu1 %vm3146_vm12, %v3011_v57  ;;  %v1991_v21 = vadd.f32 %v12945_v1, %v14660_v39  ;;  %v1994_v26 = vadd.f32 %v12946_v15, %v14660_v39  ;;  %v14967_v54 = vpop.permute.xlu0 %2155 }
 0x17d   : > { %12279 = vmatpush3.bf16.msra.mxu1 %v14638_v8  ;;  %v3016_v43 = vshll.u32 %v13669_v51, 16  ;;  %17437 = vst [vmem:[#allocation28_spill] sm:$0xff] %v14967_v54  ;;  %v2029_v27 = vmax.f32 %v1993_v10, 0.0  ;;  %v1992_v56 = vadd.f32 %v12947_v55, %v14660_v39  ;;  %v3014_v2 = vor.u32 %v3012_v0, %v3010_v59 }
 0x17e   : > { %v2612_v57 = vsel %vm14704_vm11, %v2603_v7, %v14953_v25  ;;  %v2613_v50 = vrot.slane %v14953_v25, 4  ;;  %v2592_v8 = vsel %vm14704_vm11, %v2583_v49, %v2591_v37  ;;  %v2593_v34 = vrot.slane %v2591_v37, 4  ;;  %12316 = vmatprep.subr.bf16.mxu1 %v14935_v20  ;;  %v14981_v7 = vpop.permute.xlu1 %2160 }
 0x17f   : > { %2835 = vst.msk [vmem:[#allocation2 + $0x54] sm:$0xf] %vm2259_vm5, %v2612_v57  ;;  %2833 = vst.msk [vmem:[#allocation2 + $0x4c] sm:$0xf] %vm2259_vm5, %v2592_v8  ;;  %v2027_v48 = vmax.f32 %v1991_v21, 0.0  ;;  %v2030_v47 = vmax.f32 %v1994_v26, 0.0  ;;  %v2245_v31 = vmul.f32 %v14967_v54, %v2029_v27  ;;  %v12950_v27 = vadd.f32 %v14834_v17, %v14871_v14 }
 0x180   : > { %17438 = vst [vmem:[#allocation29_spill] sm:$0xff] %v14981_v7  ;;  %v2602_v49 = vsel %vm14704_vm11, %v2593_v34, %v14916_v35  ;;  %v3018_v60 = vrot.slane %v3016_v43, 1  ;;  %v3020_v36 = vshrl.u32 %v13669_v51, 16  ;;  %v2028_v37 = vmax.f32 %v1992_v56, 0.0  ;;  %v14996_v43 = vpop.permute.xlu0 %2165 }
 0x181   : > { %2834 = vst.msk [vmem:[#allocation2 + $0x50] sm:$0xf] %vm2259_vm5, %v2602_v49  ;;  %v2243_v1 = vmul.f32 %v14929_v22, %v2027_v48  ;;  %v2246_v15 = vmul.f32 %v14981_v7, %v2030_v47  ;;  %v3024_v21 = vshll.u32 %v14975_v19, 16  ;;  %v12948_v35 = vadd.f32 %v14819_v58, %v14855_v30  ;;  %17439 = vst [vmem:[#allocation30_spill] sm:$0xff] %v14996_v43 }
 0x182   : > { %v3019_v55 = vsel %vm476_vm3, %v3014_v2, %v3018_v60  ;;  %v3022_v10 = vor.u32 %v3020_v36, %v3018_v60  ;;  %v11584_v59 = vpack.c.bf16 %v2245_v31, %v2245_v31  ;;  %v2244_v26 = vmul.f32 %v14941_v4, %v2028_v37  ;;  %v15004_v36 = vpop.permute.xlu1 %2170 }
 0x183   : > { %v11582_v0 = vpack.c.bf16 %v2243_v1, %v2243_v1  ;;  %v11585_v51 = vpack.c.bf16 %v2246_v15, %v2246_v15  ;;  %12246 = vmatprep.mubr.msk.bf16.mxu1 %vm3146_vm12, %v3019_v55  ;;  %v3026_v57 = vrot.slane %v3024_v21, 1  ;;  %v1997_v8 = vadd.f32 %v12948_v35, %v14660_v39  ;;  %17440 = vst [vmem:[#allocation31_spill] sm:$0xff] %v15004_v36 }
 0x184   : > { %v12949_v34 = vadd.f32 %v14828_v52, %v14859_v61  ;;  %v2635_v48 = vshrl.u32 %v11584_v59, 16  ;;  %v2638_v58 = vshll.u32 %v11584_v59, 16  ;;  %v11583_v2 = vpack.c.bf16 %v2244_v26, %v2244_v26 }
 0x185   : > { %v2615_v30 = vshrl.u32 %v11582_v0, 16  ;;  %v2618_v47 = vshll.u32 %v11582_v0, 16  ;;  %v2645_v56 = vshrl.u32 %v11585_v51, 16  ;;  %v2648_v49 = vshll.u32 %v11585_v51, 16  ;;  %v15008_v0 = vpop.permute.xlu0 %2175 }
 0x186   : > { %v3027_v60 = vsel %vm476_vm3, %v3022_v10, %v3026_v57  ;;  %v2637_v31 = vrot.slane %v2635_v48, 6  ;;  %v2640_v1 = vrot.slane %v2638_v58, 7  ;;  %v2625_v17 = vshrl.u32 %v11583_v2, 16  ;;  %17441 = vst [vmem:[#allocation32_spill] sm:$0xff] %v15008_v0 }
 0x187   : > { %v2617_v15 = vrot.slane %v2615_v30, 6  ;;  %v2620_v37 = vrot.slane %v2618_v47, 7  ;;  %12247 = vmatmul.mubr.msk.bf16.gmra.mrb[40].mxu1 %vm3146_vm12, %v3027_v60  ;;  %v2647_v52 = vrot.slane %v2645_v56, 6  ;;  %v2650_v61 = vrot.slane %v2648_v49, 7  ;;  %v15020_v60 = vld [vmem:[#allocation2 + $0x28] sm:$0xff]  }
 0x188   : > { %v2628_v14 = vshll.u32 %v11583_v2, 16  ;;  %v2641_v55 = vor.u32 %v2640_v1, %v2637_v31  ;;  %v2033_v35 = vmax.f32 %v1997_v8, 0.0  ;;  %v1995_v59 = vadd.f32 %v12949_v34, %v14660_v39  ;;  %v15022_v31 = vpop.permute.xlu1 %2180 }
 0x189   : > { %v2621_v21 = vor.u32 %v2620_v37, %v2617_v15  ;;  %v15010_v10 = vor.u32 %v2650_v61, %v2647_v52  ;;  %v2627_v51 = vrot.slane %v2625_v17, 6  ;;  %v1998_v48 = vadd.f32 %v12950_v27, %v14660_v39  ;;  %17442 = vst [vmem:[#allocation33_spill] sm:$0xff] %v15022_v31 }
 0x18a   : > { %v2630_v26 = vrot.slane %v2628_v14, 7  ;;  %v2643_v58 = vrot.slane %v2641_v55, 4  ;;  %v2249_v56 = vmul.f32 %v15008_v0, %v2033_v35  ;;  %v2031_v49 = vmax.f32 %v1995_v59, 0.0 }
 0x18b   : > { %v2622_v30 = vsel %vm14704_vm11, %v2613_v50, %v2621_v21  ;;  %v2623_v47 = vrot.slane %v2621_v21, 4  ;;  %v2653_v8 = vrot.slane %v15010_v10, 4  ;;  %v2034_v2 = vmax.f32 %v1998_v48, 0.0  ;;  %v15042_v21 = vld [vmem:[#allocation2 + $0x30] sm:$0xff]  }
 0x18c   : > { %2836 = vst.msk [vmem:[#allocation2 + $0x58] sm:$0xf] %vm2259_vm5, %v2622_v30  ;;  %v2631_v34 = vor.u32 %v2630_v26, %v2627_v51  ;;  %v2652_v39 = vsel %vm14704_vm11, %v2643_v58, %v15010_v10  ;;  %v11588_v25 = vpack.c.bf16 %v2249_v56, %v2249_v56  ;;  %v12951_v50 = vadd.f32 %v14837_v46, %v14876_v33  ;;  %v15039_v46 = vld [vmem:[%s17330_s3] ss:$0 sm:$0xff] }
 0x18d   : > { %v3028_v27 = vshrl.u32 %v14975_v19, 16  ;;  %2839 = vst.msk [vmem:[#allocation2 + $0x64] sm:$0xf] %vm2259_vm5, %v2652_v39  ;;  %v2247_v37 = vmul.f32 %v14996_v43, %v2031_v49  ;;  %v2250_v52 = vmul.f32 %v15022_v31, %v2034_v2  ;;  %v3032_v51 = vshll.u32 %v15020_v60, 16  ;;  %v15298_v31 = vld [vmem:[#allocation2 + $0x10] sm:$0xff]  }
 0x18e   : > { %v2632_v1 = vsel %vm14704_vm11, %v2623_v47, %v2631_v34  ;;  %v2633_v15 = vrot.slane %v2631_v34, 4  ;;  %v2675_v61 = vshrl.u32 %v11588_v25, 16  ;;  %v2678_v17 = vshll.u32 %v11588_v25, 16 }
 0x18f   : > { %2837 = vst.msk [vmem:[#allocation2 + $0x5c] sm:$0xf] %vm2259_vm5, %v2632_v1  ;;  %v1996_v33 = vadd.f32 %v15039_v46, %v12951_v50  ;;  %v3030_v14 = vor.u32 %v3028_v27, %v3026_v57  ;;  %v11586_v59 = vpack.c.bf16 %v2247_v37, %v2247_v37  ;;  %v11589_v10 = vpack.c.bf16 %v2250_v52, %v2250_v52 }
 0x190   : > { %v2642_v35 = vsel %vm14704_vm11, %v2633_v15, %v2641_v55  ;;  %v2677_v26 = vrot.slane %v2675_v61, 6  ;;  %v2680_v48 = vrot.slane %v2678_v17, 7  ;;  %v3036_v30 = vshrl.u32 %v15020_v60, 16  ;;  %v15052_v17 = vpop.permute.xlu0 %2185 }
 0x191   : > { %2838 = vst.msk [vmem:[#allocation2 + $0x60] sm:$0xf] %vm2259_vm5, %v2642_v35  ;;  %v2032_v58 = vmax.f32 %v1996_v33, 0.0  ;;  %v2655_v47 = vshrl.u32 %v11586_v59, 16  ;;  %v2658_v56 = vshll.u32 %v11586_v59, 16  ;;  %v2685_v34 = vshrl.u32 %v11589_v10, 16 }
 0x192   : > { %v2688_v57 = vshll.u32 %v11589_v10, 16  ;;  %v2681_v49 = vor.u32 %v2680_v48, %v2677_v26  ;;  %v3034_v39 = vrot.slane %v3032_v51, 1  ;;  %v3040_v55 = vshll.u32 %v15042_v21, 16  ;;  %17443 = vst [vmem:[#allocation34_spill] sm:$0xff] %v15052_v17  ;;  %v15059_v51 = vpop.permute.xlu1 %2190 }
 0x193   : > { %v2248_v2 = vmul.f32 %v15004_v36, %v2032_v58  ;;  %v2657_v25 = vrot.slane %v2655_v47, 6  ;;  %v2660_v50 = vrot.slane %v2658_v56, 7  ;;  %v2687_v27 = vrot.slane %v2685_v34, 6  ;;  %17444 = vst [vmem:[#allocation35_spill] sm:$0xff] %v15059_v51 }
 0x194   : > { %v2690_v1 = vrot.slane %v2688_v57, 7  ;;  %v2683_v15 = vrot.slane %v2681_v49, 4  ;;  %v3035_v52 = vsel %vm476_vm3, %v3030_v14, %v3034_v39  ;;  %v3038_v61 = vor.u32 %v3036_v30, %v3034_v39  ;;  %v15065_v30 = vld [vmem:[#allocation2 + $0x38] sm:$0xff]   ;;  %v15083_v39 = vld [vmem:[#allocation2 + $0x40] sm:$0xff]  }
 0x195   : > { %v11587_v37 = vpack.c.bf16 %v2248_v2, %v2248_v2  ;;  %v2661_v33 = vor.u32 %v2660_v50, %v2657_v25  ;;  %12250 = vmatprep.mubr.msk.bf16.mxu1 %vm3146_vm12, %v3035_v52  ;;  %v3042_v59 = vrot.slane %v3040_v55, 1  ;;  %v12952_v10 = vadd.f32 %v14861_v38, %v14894_v45 }
 0x196   : > { %v15054_v35 = vor.u32 %v2690_v1, %v2687_v27  ;;  %v12953_v58 = vadd.f32 %v14873_v29, %v14898_v11  ;;  %v12954_v14 = vadd.f32 %v14878_v23, %v14903_v12  ;;  %v12955_v57 = vadd.f32 %v14883_v63, %v14911_v40  ;;  %v15087_v1 = vpop.permute.xlu0 %2195 }
 0x197   : > { %v2665_v26 = vshrl.u32 %v11587_v37, 16  ;;  %v2668_v48 = vshll.u32 %v11587_v37, 16  ;;  %v2662_v47 = vsel %vm14704_vm11, %v2653_v8, %v2661_v33  ;;  %v2663_v56 = vrot.slane %v2661_v33, 4  ;;  %17445 = vst [vmem:[#allocation36_spill] sm:$0xff] %v15087_v1  ;;  %v15090_v33 = vpop.permute.xlu1 %2200 }
 0x198   : > { %v2692_v38 = vsel %vm14704_vm11, %v2683_v15, %v15054_v35  ;;  %v2693_v45 = vrot.slane %v15054_v35, 4  ;;  %2840 = vst.msk [vmem:[#allocation2 + $0x68] sm:$0xf] %vm2259_vm5, %v2662_v47  ;;  %v3043_v23 = vsel %vm476_vm3, %v3038_v61, %v3042_v59  ;;  %v2001_v12 = vadd.f32 %v15039_v46, %v12952_v10  ;;  %17446 = vst [vmem:[#allocation37_spill] sm:$0xff] %v15090_v33 }
 0x199   : > { %2843 = vst.msk [vmem:[#allocation2 + $0x74] sm:$0xf] %vm2259_vm5, %v2692_v38  ;;  %v2667_v29 = vrot.slane %v2665_v26, 6  ;;  %v2670_v11 = vrot.slane %v2668_v48, 7  ;;  %12251 = vmatmul.mubr.msk.bf16.gmra.mrb[44].mxu1 %vm3146_vm12, %v3043_v23  ;;  %v1999_v8 = vadd.f32 %v15039_v46, %v12953_v58  ;;  %v2002_v34 = vadd.f32 %v15039_v46, %v12954_v14 }
 0x19a   : > { %v3044_v2 = vshrl.u32 %v15042_v21, 16  ;;  %v2037_v25 = vmax.f32 %v2001_v12, 0.0  ;;  %v3048_v50 = vshll.u32 %v15065_v30, 16  ;;  %v3052_v27 = vshrl.u32 %v15065_v30, 16 }
 0x19b   : > { %v2671_v55 = vor.u32 %v2670_v11, %v2667_v29  ;;  %v2035_v15 = vmax.f32 %v1999_v8, 0.0  ;;  %v2038_v37 = vmax.f32 %v2002_v34, 0.0  ;;  %v2000_v52 = vadd.f32 %v15039_v46, %v12955_v57 }
 0x19c   : > { %v3046_v61 = vor.u32 %v3044_v2, %v3042_v59  ;;  %v2253_v10 = vmul.f32 %v15087_v1, %v2037_v25  ;;  %v3050_v26 = vrot.slane %v3048_v50, 1  ;;  %v3056_v47 = vshll.u32 %v15083_v39, 16 }
 0x19d   : > { %v2672_v63 = vsel %vm14704_vm11, %v2663_v56, %v2671_v55  ;;  %v2673_v40 = vrot.slane %v2671_v55, 4  ;;  %v2251_v48 = vmul.f32 %v15052_v17, %v2035_v15  ;;  %v2254_v58 = vmul.f32 %v15090_v33, %v2038_v37  ;;  %v15109_v55 = vpop.permute.xlu0 %2205  ;;  %v15271_v33 = vld [vmem:[#allocation2 + $0x50] sm:$0xff]  }
 0x19e   : > { %2841 = vst.msk [vmem:[#allocation2 + $0x6c] sm:$0xf] %vm2259_vm5, %v2672_v63  ;;  %v2036_v14 = vmax.f32 %v2000_v52, 0.0  ;;  %v11592_v38 = vpack.c.bf16 %v2253_v10, %v2253_v10  ;;  %v3051_v29 = vsel %vm476_vm3, %v3046_v61, %v3050_v26  ;;  %v3054_v56 = vor.u32 %v3052_v27, %v3050_v26  ;;  %17447 = vst [vmem:[#allocation38_spill] sm:$0xff] %v15109_v55 }
 0x19f   : > { %v2682_v59 = vsel %vm14704_vm11, %v2673_v40, %v2681_v49  ;;  %v11590_v11 = vpack.c.bf16 %v2251_v48, %v2251_v48  ;;  %v11593_v23 = vpack.c.bf16 %v2254_v58, %v2254_v58  ;;  %12254 = vmatprep.mubr.msk.bf16.mxu1 %vm3146_vm12, %v3051_v29  ;;  %v3058_v8 = vrot.slane %v3056_v47, 1  ;;  %v15114_v58 = vpop.permute.xlu1 %2210  ;;  %v15121_v29 = vld [vmem:[#allocation2 + $0x48] sm:$0xff]  }
 0x1a0   : > { %2842 = vst.msk [vmem:[#allocation2 + $0x70] sm:$0xf] %vm2259_vm5, %v2682_v59  ;;  %v2252_v12 = vmul.f32 %v15059_v51, %v2036_v14  ;;  %v2715_v34 = vshrl.u32 %v11592_v38, 16  ;;  %v2718_v57 = vshll.u32 %v11592_v38, 16  ;;  %v12956_v2 = vadd.f32 %v14900_v28, %v14939_v42  ;;  %17448 = vst [vmem:[#allocation39_spill] sm:$0xff] %v15114_v58 }
 0x1a1   : > { %v12957_v49 = vadd.f32 %v14905_v41, %v14951_v32  ;;  %v2695_v25 = vshrl.u32 %v11590_v11, 16  ;;  %v2698_v50 = vshll.u32 %v11590_v11, 16  ;;  %v2725_v27 = vshrl.u32 %v11593_v23, 16 }
 0x1a2   : > { %v2728_v15 = vshll.u32 %v11593_v23, 16  ;;  %v2717_v37 = vrot.slane %v2715_v34, 6  ;;  %v2720_v52 = vrot.slane %v2718_v57, 7  ;;  %v11591_v61 = vpack.c.bf16 %v2252_v12, %v2252_v12  ;;  %v15123_v34 = vpop.permute.xlu0 %2215 }
 0x1a3   : > { %v3059_v63 = vsel %vm476_vm3, %v3054_v56, %v3058_v8  ;;  %v2697_v40 = vrot.slane %v2695_v25, 6  ;;  %v2700_v10 = vrot.slane %v2698_v50, 7  ;;  %v2727_v26 = vrot.slane %v2725_v27, 6  ;;  %17449 = vst [vmem:[#allocation40_spill] sm:$0xff] %v15123_v34 }
 0x1a4   : > { %v2730_v48 = vrot.slane %v2728_v15, 7  ;;  %12255 = vmatmul.mubr.msk.bf16.gmra.mrb[48].mxu1 %vm3146_vm12, %v3059_v63  ;;  %v2721_v28 = vor.u32 %v2720_v52, %v2717_v37  ;;  %v2705_v42 = vshrl.u32 %v11591_v61, 16  ;;  %v2708_v41 = vshll.u32 %v11591_v61, 16 }
 0x1a5   : > { %v2005_v32 = vadd.f32 %v15039_v46, %v12956_v2  ;;  %v2701_v14 = vor.u32 %v2700_v10, %v2697_v40  ;;  %v2003_v59 = vadd.f32 %v15039_v46, %v12957_v49  ;;  %v12958_v38 = vadd.f32 %v14913_v3, %v14959_v62  ;;  %v15144_v10 = vpop.permute.xlu1 %2220 }
 0x1a6   : > { %v15116_v47 = vor.u32 %v2730_v48, %v2727_v26  ;;  %v2723_v56 = vrot.slane %v2721_v28, 4  ;;  %v2707_v11 = vrot.slane %v2705_v42, 6  ;;  %v2710_v23 = vrot.slane %v2708_v41, 7  ;;  %17450 = vst [vmem:[#allocation41_spill] sm:$0xff] %v15144_v10 }
 0x1a7   : > { %v2041_v12 = vmax.f32 %v2005_v32, 0.0  ;;  %v2702_v57 = vsel %vm14704_vm11, %v2693_v45, %v2701_v14  ;;  %v2703_v2 = vrot.slane %v2701_v14, 4  ;;  %v2039_v49 = vmax.f32 %v2003_v59, 0.0 }
 0x1a8   : > { %v2733_v25 = vrot.slane %v15116_v47, 4  ;;  %2844 = vst.msk [vmem:[#allocation2 + $0x78] sm:$0xf] %vm2259_vm5, %v2702_v57  ;;  %v2732_v3 = vsel %vm14704_vm11, %v2723_v56, %v15116_v47  ;;  %v2711_v62 = vor.u32 %v2710_v23, %v2707_v11  ;;  %v2006_v27 = vadd.f32 %v15039_v46, %v12958_v38  ;;  %v15157_v57 = vld [vmem:[#allocation2 + $0x58] sm:$0xff]  }
 0x1a9   : > { %v2257_v50 = vmul.f32 %v15123_v34, %v2041_v12  ;;  %2847 = vst.msk [vmem:[#allocation2 + $0x84] sm:$0xf] %vm2259_vm5, %v2732_v3  ;;  %v2255_v35 = vmul.f32 %v15109_v55, %v2039_v49  ;;  %v12959_v45 = vadd.f32 %v14918_v53, %v14965_v13  ;;  %v3060_v15 = vshrl.u32 %v15083_v39, 16  ;;  %v15148_v13 = vld [vmem:[#allocation2 + $0x50] sm:$0xff]  }
 0x1aa   : > { %v3064_v37 = vshll.u32 %v15121_v29, 16  ;;  %v2712_v52 = vsel %vm14704_vm11, %v2703_v2, %v2711_v62  ;;  %v2713_v61 = vrot.slane %v2711_v62, 4  ;;  %v2042_v40 = vmax.f32 %v2006_v27, 0.0  ;;  %v15161_v62 = vld [vmem:[#allocation2 + $0x60] sm:$0xff]  }
 0x1ab   : > { %v11596_v63 = vpack.c.bf16 %v2257_v50, %v2257_v50  ;;  %2845 = vst.msk [vmem:[#allocation2 + $0x7c] sm:$0xf] %vm2259_vm5, %v2712_v52  ;;  %v11594_v26 = vpack.c.bf16 %v2255_v35, %v2255_v35  ;;  %v2004_v48 = vadd.f32 %v15039_v46, %v12959_v45  ;;  %v3062_v42 = vor.u32 %v3060_v15, %v3058_v8 }
 0x1ac   : > { %v3066_v53 = vrot.slane %v3064_v37, 1  ;;  %v2722_v41 = vsel %vm14704_vm11, %v2713_v61, %v2721_v28  ;;  %v2258_v47 = vmul.f32 %v15144_v10, %v2042_v40  ;;  %v3068_v12 = vshrl.u32 %v15121_v29, 16 }
 0x1ad   : > { %v2755_v32 = vshrl.u32 %v11596_v63, 16  ;;  %v2758_v14 = vshll.u32 %v11596_v63, 16  ;;  %2846 = vst.msk [vmem:[#allocation2 + $0x80] sm:$0xf] %vm2259_vm5, %v2722_v41  ;;  %v2735_v59 = vshrl.u32 %v11594_v26, 16  ;;  %v2738_v38 = vshll.u32 %v11594_v26, 16 }
 0x1ae   : > { %v2040_v56 = vmax.f32 %v2004_v48, 0.0  ;;  %v3067_v11 = vsel %vm476_vm3, %v3062_v42, %v3066_v53  ;;  %v11597_v8 = vpack.c.bf16 %v2258_v47, %v2258_v47  ;;  %v3072_v3 = vshll.u32 %v15148_v13, 16  ;;  %v15167_v47 = vld [vmem:[#allocation2 + $0x68] sm:$0xff]  }
 0x1af   : > { %v2757_v23 = vrot.slane %v2755_v32, 6  ;;  %v2760_v46 = vrot.slane %v2758_v14, 7  ;;  %12258 = vmatprep.mubr.msk.bf16.mxu1 %vm3146_vm12, %v3067_v11  ;;  %v2737_v28 = vrot.slane %v2735_v59, 6  ;;  %v2740_v2 = vrot.slane %v2738_v38, 7  ;;  %v2854_v59 = vld [vmem:[#allocation2 + $0x98] sm:$0x3] }
 0x1b0   : > { %v2256_v49 = vmul.f32 %v15114_v58, %v2040_v56  ;;  %v2765_v27 = vshrl.u32 %v11597_v8, 16  ;;  %v2768_v35 = vshll.u32 %v11597_v8, 16  ;;  %v3070_v45 = vor.u32 %v3068_v12, %v3066_v53 }
 0x1b1   : > { %v2761_v50 = vor.u32 %v2760_v46, %v2757_v23  ;;  %v2741_v15 = vor.u32 %v2740_v2, %v2737_v28  ;;  %v3074_v52 = vrot.slane %v3072_v3, 1  ;;  %v3076_v61 = vshrl.u32 %v15148_v13, 16  ;;  %v15171_v23 = vld [vmem:[#allocation2 + $0x70] sm:$0xff]  }
 0x1b2   : > { %v11595_v37 = vpack.c.bf16 %v2256_v49, %v2256_v49  ;;  %v2767_v40 = vrot.slane %v2765_v27, 6  ;;  %v2770_v26 = vrot.slane %v2768_v35, 7  ;;  %v3080_v48 = vshll.u32 %v15157_v57, 16  ;;  %v15185_v27 = vld [vmem:[#allocation2 + $0x78] sm:$0xff]  }
 0x1b3   : > { %v2763_v63 = vrot.slane %v2761_v50, 4  ;;  %v2742_v42 = vsel %vm14704_vm11, %v2733_v25, %v2741_v15  ;;  %v2743_v41 = vrot.slane %v2741_v15, 4  ;;  %v3075_v38 = vsel %vm476_vm3, %v3070_v45, %v3074_v52 }
 0x1b4   : > { %v2745_v32 = vshrl.u32 %v11595_v37, 16  ;;  %v2748_v14 = vshll.u32 %v11595_v37, 16  ;;  %2848 = vst.msk [vmem:[#allocation2 + $0x88] sm:$0xf] %vm2259_vm5, %v2742_v42  ;;  %v2771_v53 = vor.u32 %v2770_v26, %v2767_v40  ;;  %v3078_v56 = vor.u32 %v3076_v61, %v3074_v52  ;;  %12259 = vmatmul.mubr.msk.bf16.gmra.mrb[52].mxu1 %vm3146_vm12, %v3075_v38 }
 0x1b5   : > { %v3082_v11 = vrot.slane %v3080_v48, 1  ;;  %v17451_v46 = vmov 0  ;;  %v3084_v12 = vshrl.u32 %v15157_v57, 16  ;;  %v3088_v28 = vshll.u32 %v15161_v62, 16 }
 0x1b6   : > { %v17452_v46 = vsel %vm15175_vm14, 4294967295, %v17451_v46  ;;  %v2747_v25 = vrot.slane %v2745_v32, 6  ;;  %v2750_v8 = vrot.slane %v2748_v14, 7  ;;  %v2772_v2 = vsel %vm14704_vm11, %v2763_v63, %v2771_v53 }
 0x1b7   : > { %17453 = vst [vmem:[#allocation42_spill] sm:$0xff] %v17452_v46  ;;  %v2773_v49 = vrot.slane %v2771_v53, 4  ;;  %v3083_v3 = vsel %vm476_vm3, %v3078_v56, %v3082_v11  ;;  %2851 = vst.msk [vmem:[#allocation2 + $0x94] sm:$0xf] %vm2259_vm5, %v2772_v2  ;;  %v3086_v45 = vor.u32 %v3084_v12, %v3082_v11  ;;  %v3090_v15 = vrot.slane %v3088_v28, 1  ;;  %v15205_v56 = vld [vmem:[#allocation2 + $0x80] sm:$0xff]  }
 0x1b8   : > { %v2751_v35 = vor.u32 %v2750_v8, %v2747_v25  ;;  %12262 = vmatprep.mubr.msk.bf16.mxu1 %vm3146_vm12, %v3083_v3  ;;  %v3096_v37 = vshll.u32 %v15167_v47, 16  ;;  %v3092_v61 = vshrl.u32 %v15161_v62, 16  ;;  %v3104_v26 = vshll.u32 %v15171_v23, 16 }
 0x1b9   : > { %v2855_v52 = vsel %vm15175_vm14, %v2773_v49, %v2854_v59  ;;  %v3091_v48 = vsel %vm476_vm3, %v3086_v45, %v3090_v15  ;;  %v3112_v53 = vshll.u32 %v15185_v27, 16  ;;  %v3108_v25 = vshrl.u32 %v15171_v23, 16 }
 0x1ba   : > { %2856 = vst [vmem:[#allocation2 + $0x98] sm:$0x3] %v2855_v52  ;;  %v2752_v63 = vsel %vm14704_vm11, %v2743_v41, %v2751_v35  ;;  %v2753_v40 = vrot.slane %v2751_v35, 4  ;;  %v3094_v42 = vor.u32 %v3092_v61, %v3090_v15  ;;  %v3098_v32 = vrot.slane %v3096_v37, 1 }
 0x1bb   : > { %2849 = vst.msk [vmem:[#allocation2 + $0x8c] sm:$0xf] %vm2259_vm5, %v2752_v63  ;;  %v3100_v41 = vshrl.u32 %v15167_v47, 16  ;;  %v3106_v38 = vrot.slane %v3104_v26, 1  ;;  %v3114_v8 = vrot.slane %v3112_v53, 1  ;;  %v3120_v12 = vshll.u32 %v15205_v56, 16 }
 0x1bc   : > { %v2762_v14 = vsel %vm14704_vm11, %v2753_v40, %v2761_v50  ;;  %v3099_v59 = vsel %vm476_vm3, %v3094_v42, %v3098_v32  ;;  %12263 = vmatmul.mubr.msk.bf16.gmra.mrb[56].mxu1 %vm3146_vm12, %v3091_v48  ;;  %v3116_v35 = vshrl.u32 %v15185_v27, 16  ;;  %v3124_v52 = vshrl.u32 %v15205_v56, 16  ;;  %v15224_v42 = vld [vmem:[#allocation2 + $0xc] sm:$0xf] }
 0x1bd   : > { %2850 = vst.msk [vmem:[#allocation2 + $0x90] sm:$0xf] %vm2259_vm5, %v2762_v14  ;;  %12266 = vmatprep.mubr.msk.bf16.mxu1 %vm3146_vm12, %v3099_v59  ;;  %v3102_v11 = vor.u32 %v3100_v41, %v3098_v32  ;;  %v3110_v50 = vor.u32 %v3108_v25, %v3106_v38  ;;  %v3122_v45 = vrot.slane %v3120_v12, 1  ;;  %v3914_v14 = vld [vmem:[#allocation2 + $0x8] sm:$0xe]  ;;  %v15236_v25 = vld [vmem:[#allocation2 + $0x20] sm:$0xff]  }
 0x1be   : > { %v3118_v15 = vor.u32 %v3116_v35, %v3114_v8  ;;  %v15230_v41 = vcombine.low %v3914_v14, %v15224_v42  ;;  %v4391_v14 = vshrl.u32 %v15236_v25, 16 }
 0x1bf   : > { %v3107_v2 = vsel %vm476_vm3, %v3102_v11, %v3106_v38  ;;  %v3115_v49 = vsel %vm476_vm3, %v3110_v50, %v3114_v8  ;;  %v3126_v63 = vor.u32 %v3124_v52, %v3122_v45  ;;  %v15232_v38 = vld [vmem:[#allocation2 + $0x10] sm:$0xff]   ;;  %v15234_v11 = vld [vmem:[#allocation2 + $0x18] sm:$0xff]   ;;  %v15239_v50 = vld [vmem:[#allocation2 + $0x28] sm:$0xff]  }
 0x1c0   : > { %v3123_v40 = vsel %vm476_vm3, %v3118_v15, %v3122_v45  ;;  %v4365_v12 = vshrl.u32 %v15230_v41, 16  ;;  %v4376_v35 = vshll.u32 %v15232_v38, 16  ;;  %v4382_v45 = vshrl.u32 %v15234_v11, 16 }
 0x1c1   : > { %v4385_v15 = vshll.u32 %v15234_v11, 16  ;;  %v4400_v46 = vshrl.u32 %v15239_v50, 16 }
 0x1c2   : > { %v15210_v28 = vld [vmem:[#allocation2 + $0x88] sm:$0xff]   ;;  %v4367_v52 = vrot.slane %v4365_v12, 1  ;;  %v4403_v12 = vshll.u32 %v15239_v50, 16 }
 0x1c3   : > { %v3128_v3 = vshll.u32 %v15210_v28, 16  ;;  %v3132_v32 = vshrl.u32 %v15210_v28, 16  ;;  %v4402_v10 = vrot.slane %v4400_v46, 1  ;;  %v15277_v46 = vld [vmem:[%s17331_s4 + $0x18] sm:$0xff]  }
 0x1c4   : > { %12267 = vmatmul.mubr.msk.bf16.gmra.mrb[60].mxu1 %vm3146_vm12, %v3107_v2  ;;  %v15218_v37 = vld [vmem:[#allocation2 + $0x90] ss:$0 sps:$4 sm:$0x11]   ;;  %v4368_v2 = vshll.u32 %v15230_v41, 16  ;;  %v4405_v55 = vrot.slane %v4403_v12, 2 }
 0x1c5   : > { %12270 = vmatprep.mubr.msk.bf16.mxu1 %vm3146_vm12, %v3115_v49  ;;  %v3130_v61 = vrot.slane %v3128_v3, 1  ;;  %v3136_v26 = vshll.u32 %v15218_v37, 16  ;;  %v4373_v49 = vshrl.u32 %v15232_v38, 16  ;;  %v15244_v3 = vld [vmem:[#allocation2 + $0x30] sm:$0xff]  }
 0x1c7   : > { %v3131_v48 = vsel %vm476_vm3, %v3126_v63, %v3130_v61  ;;  %v3134_v53 = vor.u32 %v3132_v32, %v3130_v61  ;;  %v3138_v59 = vrot.slane %v3136_v26, 1  ;;  %v4370_v61 = vrot.slane %v4368_v2, 2  ;;  %v15258_v2 = vld [vmem:[#allocation2 + $0x40] sm:$0xff]  }
 0x1c8   : > { %v4375_v63 = vrot.slane %v4373_v49, 1  ;;  %v4378_v26 = vrot.slane %v4376_v35, 2  ;;  %v4387_v32 = vrot.slane %v4385_v15, 2  ;;  %v4409_v15 = vshrl.u32 %v15244_v3, 16 }
 0x1c9   : > { %v3139_v8 = vsel %vm476_vm3, %v3134_v53, %v3138_v59  ;;  %v4371_v53 = vor.u32 %v4370_v61, %v4367_v52  ;;  %v4394_v59 = vshll.u32 %v15236_v25, 16  ;;  %v4430_v12 = vshll.u32 %v15258_v2, 16 }
 0x1ca   : > { %v4379_v49 = vor.u32 %v4378_v26, %v4375_v63  ;;  %v4411_v34 = vrot.slane %v4409_v15, 1  ;;  %v4406_v26 = vor.u32 %v4405_v55, %v4402_v10  ;;  %v15284_v15 = vld [vmem:[#allocation2 + $0x60] sm:$0xff]  }
 0x1cb   : > { %v4396_v58 = vrot.slane %v4394_v59, 2  ;;  %v4427_v59 = vshrl.u32 %v15258_v2, 16  ;;  %17456 = vst [vmem:[#allocation45_spill] sm:$0xff] %v15284_v15  ;;  %v4432_v17 = vrot.slane %v4430_v12, 2  ;;  %v4466_v6 = vshll.u32 %v15284_v15, 16 }
 0x1cc   : > { %12271 = vmatmul.mubr.msk.bf16.gmra.mrb[64].mxu1 %vm3146_vm12, %v3123_v40  ;;  %v15250_v40 = vld [vmem:[#allocation2 + $0x38] sm:$0xff]   ;;  %v15265_v52 = vsel %vm1523_vm4, %v4371_v53, %v4379_v49 }
 0x1cd   : > { %12274 = vmatprep.mubr.msk.bf16.mxu1 %vm3146_vm12, %v3131_v48  ;;  %v4384_v48 = vrot.slane %v4382_v45, 1  ;;  %v4393_v45 = vrot.slane %v4391_v14, 1  ;;  %17454 = vst [vmem:[#allocation43_spill] sm:$0xff] %v15265_v52  ;;  %v4418_v51 = vshrl.u32 %v15250_v40, 16  ;;  %v15279_v14 = vld [vmem:[#allocation2 + $0x58] sm:$0xff]  }
 0x1ce   : > { %v4457_v43 = vshll.u32 %v15279_v14, 16 }
 0x1cf   : > { %v4388_v35 = vor.u32 %v4387_v32, %v4384_v48  ;;  %v4397_v63 = vor.u32 %v4396_v58, %v4393_v45  ;;  %v4421_v32 = vshll.u32 %v15250_v40, 16  ;;  %v4420_v53 = vrot.slane %v4418_v51, 1 }
 0x1d0   : > { %v4429_v51 = vrot.slane %v4427_v59, 1  ;;  %v15310_v59 = vld [vmem:[#allocation2 + $0x70] sm:$0xff]  }
 0x1d1   : > { %v15268_v61 = vsel %vm1523_vm4, %v4379_v49, %v4388_v35  ;;  %v15287_v55 = vsel %vm1523_vm4, %v4388_v35, %v4397_v63  ;;  %v15290_v58 = vsel %vm1523_vm4, %v4397_v63, %v4406_v26  ;;  %v4423_v45 = vrot.slane %v4421_v32, 2  ;;  %v15302_v35 = vld [vmem:[#allocation2 + $0x68] sm:$0xff]   ;;  %17461 = vst [vmem:[#allocation50_spill] sm:$0xff] %v15310_v59 }
 0x1d2   : > { %17455 = vst [vmem:[#allocation44_spill] sm:$0xff] %v15268_v61  ;;  %17457 = vst [vmem:[#allocation46_spill] sm:$0xff] %v15287_v55  ;;  %v4448_v32 = vshll.u32 %v15271_v33, 16  ;;  %v15547_v61 = vld [vmem:[#allocation2 + $0x80] sm:$0xff]  }
 0x1d3   : > { %17458 = vst [vmem:[#allocation47_spill] sm:$0xff] %v15290_v58  ;;  %17459 = vst [vmem:[#allocation48_spill] sm:$0xff] %v15302_v35  ;;  %v4424_v63 = vor.u32 %v4423_v45, %v4420_v53  ;;  %v4463_v53 = vshrl.u32 %v15284_v15, 16  ;;  %v15318_v45 = vld [vmem:[#allocation2 + $0x78] sm:$0xff]  }
 0x1d4   : > { %12275 = vmatmul.mubr.msk.bf16.gmra.mrb[68].mxu1 %vm3146_vm12, %v3139_v8  ;;  %v15260_v8 = vld [vmem:[#allocation2 + $0x48] sm:$0xff]   ;;  %v4450_v4 = vrot.slane %v4448_v32, 2  ;;  %17463 = vst [vmem:[#allocation52_spill] sm:$0xff] %v15318_v45  ;;  %v4493_v44 = vshll.u32 %v15318_v45, 16 }
 0x1d5   : > { %12280 = vmatprep.mubr.msk.bf16.mxu1 %vm3146_vm12, %v14651_v16  ;;  %v4412_v16 = vshll.u32 %v15244_v3, 16  ;;  %v4436_v49 = vshrl.u32 %v15260_v8, 16  ;;  %v4439_v36 = vshll.u32 %v15260_v8, 16  ;;  %v4465_v9 = vrot.slane %v4463_v53, 1 }
 0x1d7   : > { %v4414_v48 = vrot.slane %v4412_v16, 2  ;;  %v15292_v16 = vld [vmem:[#allocation2 + $0x8] sm:$0xff]   ;;  %v4438_v1 = vrot.slane %v4436_v49, 1  ;;  %v4441_v12 = vrot.slane %v4439_v36, 2  ;;  %v4454_v49 = vshrl.u32 %v15279_v14, 16  ;;  %v15323_v36 = vld [vmem:[#allocation2 + $0x80] sm:$0xff]  }
 0x1d8   : > { %17465 = vst [vmem:[#allocation54_spill] sm:$0xff] %v15323_v36  ;;  %v4499_v5 = vshrl.u32 %v15323_v36, 16 }
 0x1d9   : > { %v4415_v10 = vor.u32 %v4414_v48, %v4411_v34  ;;  %v4445_v48 = vshrl.u32 %v15271_v33, 16  ;;  %v4442_v22 = vor.u32 %v4441_v12, %v4438_v1  ;;  %v4456_v54 = vrot.slane %v4454_v49, 1 }
 0x1da   : > { %v4481_v1 = vshrl.u32 %v15310_v59, 16  ;;  %v4468_v12 = vrot.slane %v4466_v6, 2  ;;  %v4484_v49 = vshll.u32 %v15310_v59, 16 }
 0x1db   : > { %v15305_v34 = vsel %vm1523_vm4, %v4406_v26, %v4415_v10  ;;  %v15315_v0 = vsel %vm1523_vm4, %v4415_v10, %v4424_v63  ;;  %v4447_v26 = vrot.slane %v4445_v48, 1  ;;  %v4472_v10 = vshrl.u32 %v15302_v35, 16  ;;  %v15327_v48 = vld [vmem:[#allocation2 + $0x88] sm:$0xff]  }
 0x1dc   : > { %12281 = vmatmul.mubr.msk.bf16.vlgmr.msra.gmra.mrb[36].mxu1 %vm3146_vm12, %v15292_v16  ;;  %17460 = vst [vmem:[#allocation49_spill] sm:$0xff] %v15305_v34  ;;  %17462 = vst [vmem:[#allocation51_spill] sm:$0xff] %v15315_v0  ;;  %v4483_v53 = vrot.slane %v4481_v1, 1  ;;  %v4469_v6 = vor.u32 %v4468_v12, %v4465_v9 }
 0x1dd   : > { %12317 = vmatpush3.bf16.msra.mxu1 %v14935_v20  ;;  %12284 = vmatprep.mubr.msk.bf16.mxu1 %vm3146_vm12, %v15298_v31  ;;  %v4433_v20 = vor.u32 %v4432_v17, %v4429_v51  ;;  %v4459_v17 = vrot.slane %v4457_v43, 2  ;;  %v4451_v51 = vor.u32 %v4450_v4, %v4447_v26  ;;  %17466 = vst [vmem:[#allocation55_spill] sm:$0xff] %v15327_v48  ;;  %v4474_v4 = vrot.slane %v4472_v10, 1  ;;  %v15338_v26 = vld [vmem:[#allocation2 + $0x18] sm:$0xff]  }
 0x1de   : > { %12354 = vmatprep.subr.bf16.mxu1 %v15277_v46  ;;  %v4486_v10 = vrot.slane %v4484_v49, 2  ;;  %v4511_v49 = vshll.u32 %v15327_v48, 16 }
 0x1df   : > { %v15321_v7 = vsel %vm1523_vm4, %v4424_v63, %v4433_v20  ;;  %v15330_v32 = vsel %vm1523_vm4, %v4433_v20, %v4442_v22  ;;  %v4460_v24 = vor.u32 %v4459_v17, %v4456_v54  ;;  %v4475_v63 = vshll.u32 %v15302_v35, 16 }
 0x1e0   : > { %17464 = vst [vmem:[#allocation53_spill] sm:$0xff] %v15321_v7  ;;  %17467 = vst [vmem:[#allocation56_spill] sm:$0xff] %v15330_v32  ;;  %v15335_v43 = vsel %vm1523_vm4, %v4442_v22, %v4451_v51  ;;  %v4490_v17 = vshrl.u32 %v15318_v45, 16  ;;  %v15348_v22 = vld [vmem:[#allocation2 + $0x90] sm:$0xff]   ;;  %v4495_v32 = vrot.slane %v4493_v44, 2 }
 0x1e1   : > { %17468 = vst [vmem:[#allocation57_spill] sm:$0xff] %v15335_v43  ;;  %v15343_v20 = vsel %vm1523_vm4, %v4451_v51, %v4460_v24  ;;  %v4477_v54 = vrot.slane %v4475_v63, 2  ;;  %17470 = vst [vmem:[#allocation59_spill] sm:$0xff] %v15348_v22  ;;  %v4502_v51 = vshll.u32 %v15323_v36, 16  ;;  %v4508_v63 = vshrl.u32 %v15327_v48, 16 }
 0x1e2   : > { %17469 = vst [vmem:[#allocation58_spill] sm:$0xff] %v15343_v20  ;;  %v4492_v43 = vrot.slane %v4490_v17, 1  ;;  %v15355_v1 = vsel %vm1523_vm4, %v4460_v24, %v4469_v6  ;;  %v4487_v20 = vor.u32 %v4486_v10, %v4483_v53  ;;  %v4517_v17 = vshrl.u32 %v15348_v22, 16  ;;  %v4807_v53 = vld [vmem:[#allocation2 + $0x8] sm:$0xc] }
 0x1e3   : > { %v4478_v18 = vor.u32 %v4477_v54, %v4474_v4  ;;  %17471 = vst [vmem:[#allocation60_spill] sm:$0xff] %v15355_v1  ;;  %v4504_v9 = vrot.slane %v4502_v51, 2  ;;  %v4510_v12 = vrot.slane %v4508_v63, 1  ;;  %v4520_v0 = vshll.u32 %v15348_v22, 16 }
 0x1e4   : > { %12285 = vmatmul.mubr.msk.bf16.gmra.mrb[40].mxu1 %vm3146_vm12, %v15338_v26  ;;  %v4496_v54 = vor.u32 %v4495_v32, %v4492_v43  ;;  %v4513_v1 = vrot.slane %v4511_v49, 2  ;;  %v4519_v44 = vrot.slane %v4517_v17, 1  ;;  %v11133_v10 = vcombine.low %v4807_v53, %v15224_v42 }
 0x1e5   : > { %12288 = vmatprep.mubr.msk.bf16.mxu1 %vm3146_vm12, %v14975_v19  ;;  %v4501_v19 = vrot.slane %v4499_v5, 1  ;;  %v15358_v7 = vsel %vm1523_vm4, %v4469_v6, %v4478_v18  ;;  %v15362_v4 = vsel %vm1523_vm4, %v4478_v18, %v4487_v20  ;;  %v4522_v6 = vrot.slane %v4520_v0, 2 }
 0x1e6   : > { %17472 = vst [vmem:[#allocation61_spill] sm:$0xff] %v15358_v7  ;;  %17473 = vst [vmem:[#allocation62_spill] sm:$0xff] %v15362_v4  ;;  %v15367_v5 = vsel %vm1523_vm4, %v4487_v20, %v4496_v54  ;;  %v4514_v32 = vor.u32 %v4513_v1, %v4510_v12  ;;  %v4815_v51 = vrot.slane %v11133_v10, 2  ;;  %v4816_v20 = vrot.slane %v15232_v38, 2 }
 0x1e7   : > { %v4505_v24 = vor.u32 %v4504_v9, %v4501_v19  ;;  %17474 = vst [vmem:[#allocation63_spill] sm:$0xff] %v15367_v5  ;;  %v15377_v43 = vor.u32 %v4522_v6, %v4519_v44  ;;  %v4818_v42 = vrot.slane %v15234_v11, 2  ;;  %v4824_v19 = vrot.slane %v15244_v3, 2  ;;  %v15409_v44 = vld [vmem:[#allocation2 + $0x98] ss:$0 sps:$4 sm:$0x33]  }
 0x1e8   : > { %v15390_v1 = vsel %vm4814_vm15, %v4815_v51, %v4816_v20  ;;  %v4826_v49 = vrot.slane %v15250_v40, 2  ;;  %v4830_v53 = vrot.slane %v15260_v8, 2  ;;  %17484 = vst [vmem:[#allocation73_spill] sm:$0xff] %v15409_v44  ;;  %v4832_v10 = vrot.slane %v15271_v33, 2 }
 0x1e9   : > { %v15373_v18 = vsel %vm1523_vm4, %v4496_v54, %v4505_v24  ;;  %17476 = vst [vmem:[#allocation65_spill] sm:$0xff] %v15377_v43  ;;  %v15381_v0 = vsel %vm1523_vm4, %v4505_v24, %v4514_v32  ;;  %v15387_v63 = vsel %vm1523_vm4, %v4514_v32, %v15377_v43  ;;  %17479 = vst [vmem:[#allocation68_spill] sm:$0xff] %v15390_v1  ;;  %v4828_v24 = vrot.slane %v15258_v2, 2 }
 0x1ea   : > { %17475 = vst [vmem:[#allocation64_spill] sm:$0xff] %v15373_v18  ;;  %17477 = vst [vmem:[#allocation66_spill] sm:$0xff] %v15381_v0  ;;  %v15395_v9 = vsel %vm4814_vm15, %v4816_v20, %v4818_v42  ;;  %v15412_v6 = vsel %vm4814_vm15, %v4824_v19, %v4826_v49  ;;  %v4834_v32 = vrot.slane %v15279_v14, 2  ;;  %v4836_v51 = vrot.slane %v15284_v15, 2  ;;  %v6019_v15 = vld [vmem:[#allocation2 + $0x10] sm:$0x8] }
 0x1eb   : > { %17478 = vst [vmem:[#allocation67_spill] sm:$0xff] %v15387_v63  ;;  %17480 = vst [vmem:[#allocation69_spill] sm:$0xff] %v15395_v9  ;;  %v15418_v20 = vsel %vm4814_vm15, %v4826_v49, %v4828_v24  ;;  %v4842_v49 = vrot.slane %v15318_v45, 2 }
 0x1ec   : > { %12289 = vmatmul.mubr.msk.bf16.gmra.mrb[44].mxu1 %vm3146_vm12, %v15020_v60  ;;  %v4820_v60 = vrot.slane %v15236_v25, 2  ;;  %17485 = vst [vmem:[#allocation74_spill] sm:$0xff] %v15412_v6  ;;  %17486 = vst [vmem:[#allocation75_spill] sm:$0xff] %v15418_v20  ;;  %v15431_v6 = vsel %vm4814_vm15, %v4832_v10, %v4834_v32 }
 0x1ed   : > { %12292 = vmatprep.mubr.msk.bf16.mxu1 %vm3146_vm12, %v15042_v21  ;;  %v4822_v21 = vrot.slane %v15239_v50, 2  ;;  %17489 = vst [vmem:[#allocation78_spill] sm:$0xff] %v15431_v6 }
 0x1ee   : > { %v15398_v12 = vsel %vm4814_vm15, %v4818_v42, %v4820_v60  ;;  %v15421_v42 = vsel %vm4814_vm15, %v4828_v24, %v4830_v53 }
 0x1ef   : > { %17481 = vst [vmem:[#allocation70_spill] sm:$0xff] %v15398_v12  ;;  %v15402_v54 = vsel %vm4814_vm15, %v4820_v60, %v4822_v21  ;;  %v15405_v17 = vsel %vm4814_vm15, %v4822_v21, %v4824_v19  ;;  %17487 = vst [vmem:[#allocation76_spill] sm:$0xff] %v15421_v42  ;;  %v4838_v60 = vrot.slane %v15302_v35, 2  ;;  %v4840_v21 = vrot.slane %v15310_v59, 2 }
 0x1f0   : > { %17482 = vst [vmem:[#allocation71_spill] sm:$0xff] %v15402_v54  ;;  %17483 = vst [vmem:[#allocation72_spill] sm:$0xff] %v15405_v17  ;;  %v15428_v19 = vsel %vm4814_vm15, %v4830_v53, %v4832_v10  ;;  %v15434_v17 = vsel %vm4814_vm15, %v4834_v32, %v4836_v51  ;;  %v4846_v53 = vrot.slane %v15327_v48, 2  ;;  %v4848_v32 = vrot.slane %v15348_v22, 2 }
 0x1f1   : > { %17488 = vst [vmem:[#allocation77_spill] sm:$0xff] %v15428_v19  ;;  %17490 = vst [vmem:[#allocation79_spill] sm:$0xff] %v15434_v17  ;;  %v15440_v24 = vsel %vm4814_vm15, %v4836_v51, %v4838_v60  ;;  %v15443_v42 = vsel %vm4814_vm15, %v4838_v60, %v4840_v21  ;;  %v15448_v10 = vsel %vm4814_vm15, %v4840_v21, %v4842_v49  ;;  %v4850_v17 = vrot.slane %v15409_v44, 2  ;;  %v13808_v21 = vld [vmem:[#allocation2 + $0x4] sm:$0xf] }
 0x1f2   : > { %17491 = vst [vmem:[#allocation80_spill] sm:$0xff] %v15440_v24  ;;  %17492 = vst [vmem:[#allocation81_spill] sm:$0xff] %v15443_v42  ;;  %v15459_v51 = vsel %vm4814_vm15, %v4846_v53, %v4848_v32  ;;  %v3597_v42 = vld [vmem:[#allocation2] sm:$0xe]  ;;  %v5125_v24 = vld [vmem:[#allocation2 + $0x10] sm:$0xc] }
 0x1f3   : > { %17493 = vst [vmem:[#allocation82_spill] sm:$0xff] %v15448_v10  ;;  %17496 = vst [vmem:[#allocation85_spill] sm:$0xff] %v15459_v51  ;;  %v15462_v60 = vsel %vm4814_vm15, %v4848_v32, %v4850_v17  ;;  %v11049_v10 = vcombine.low %v3597_v42, %v13808_v21  ;;  %v15466_v19 = vld [vmem:[#allocation2 + $0x14] sm:$0xf]  ;;  %v15477_v17 = vld [vmem:[#allocation2 + $0x28] sm:$0xff]  }
 0x1f4   : > { %12293 = vmatmul.mubr.msk.bf16.gmra.mrb[48].mxu1 %vm3146_vm12, %v15065_v30  ;;  %v4844_v30 = vrot.slane %v15323_v36, 2  ;;  %17497 = vst [vmem:[#allocation86_spill] sm:$0xff] %v15462_v60  ;;  %v15482_v60 = vld [vmem:[#allocation2 + $0x30] sm:$0xff]   ;;  %v5603_v12 = vshrl.u32 %v15477_v17, 16  ;;  %v5606_v43 = vshll.u32 %v15477_v17, 16 }
 0x1f5   : > { %12296 = vmatprep.mubr.msk.bf16.mxu1 %vm3146_vm12, %v15083_v39  ;;  %v15479_v32 = vrot.slane %v11049_v10, 1  ;;  %v5612_v44 = vshrl.u32 %v15482_v60, 16 }
 0x1f6   : > { %v15453_v6 = vsel %vm4814_vm15, %v4842_v49, %v4844_v30  ;;  %v15456_v39 = vsel %vm4814_vm15, %v4844_v30, %v4846_v53  ;;  %v15471_v49 = vcombine.low %v5125_v24, %v15466_v19  ;;  %v15473_v30 = vld [vmem:[#allocation2 + $0x18] sm:$0xff]   ;;  %v15475_v53 = vld [vmem:[#allocation2 + $0x20] sm:$0xff]   ;;  %v5605_v0 = vrot.slane %v5603_v12, 2 }
 0x1f7   : > { %17494 = vst [vmem:[#allocation83_spill] sm:$0xff] %v15453_v6  ;;  %17495 = vst [vmem:[#allocation84_spill] sm:$0xff] %v15456_v39  ;;  %v15487_v24 = vld [vmem:[#allocation2 + $0x38] sm:$0xff]   ;;  %v5588_v51 = vshll.u32 %v15473_v30, 16  ;;  %v5594_v39 = vshrl.u32 %v15475_v53, 16  ;;  %v5597_v10 = vshll.u32 %v15475_v53, 16 }
 0x1f8   : > { %17498 = vst [vmem:[#allocation87_spill] sm:$0xff] %v15471_v49  ;;  %v5577_v42 = vshrl.u32 %v15471_v49, 16  ;;  %v5580_v21 = vshll.u32 %v15471_v49, 16  ;;  %v15492_v6 = vld [vmem:[#allocation2 + $0x40] sm:$0xff]   ;;  %v5624_v7 = vshll.u32 %v15487_v24, 16  ;;  %v15509_v12 = vld [vmem:[#allocation2 + $0x58] sm:$0xff]  }
 0x1f9   : > { %v5590_v49 = vrot.slane %v5588_v51, 3  ;;  %v5596_v9 = vrot.slane %v5594_v39, 2  ;;  %v5599_v1 = vrot.slane %v5597_v10, 3  ;;  %v5608_v51 = vrot.slane %v5606_v43, 3 }
 0x1fa   : > { %v5582_v20 = vrot.slane %v5580_v21, 3  ;;  %v15502_v21 = vld [vmem:[#allocation2 + $0x48] sm:$0xff]   ;;  %v5621_v39 = vshrl.u32 %v15487_v24, 16  ;;  %v5614_v10 = vrot.slane %v5612_v44, 2  ;;  %v5626_v43 = vrot.slane %v5624_v7, 3 }
 0x1fb   : > { %v5600_v5 = vor.u32 %v5599_v1, %v5596_v9  ;;  %v5609_v58 = vor.u32 %v5608_v51, %v5605_v0  ;;  %v5633_v44 = vshll.u32 %v15492_v6, 16  ;;  %v5639_v55 = vshrl.u32 %v15502_v21, 16 }
 0x1fc   : > { %12297 = vmatmul.mubr.msk.bf16.gmra.mrb[52].mxu1 %vm3146_vm12, %v15121_v29  ;;  %v5579_v29 = vrot.slane %v5577_v42, 2  ;;  %v5615_v42 = vshll.u32 %v15482_v60, 16 }
 0x1fd   : > { %12300 = vmatprep.mubr.msk.bf16.mxu1 %vm3146_vm12, %v15148_v13  ;;  %v5585_v13 = vshrl.u32 %v15473_v30, 16 }
 0x1fe   : > { %v5583_v63 = vor.u32 %v5582_v20, %v5579_v29  ;;  %v5617_v4 = vrot.slane %v5615_v42, 3  ;;  %v5630_v20 = vshrl.u32 %v15492_v6, 16  ;;  %v15521_v42 = vsel %vm5575_vm0, %v5600_v5, %v5609_v58 }
 0x1ff   : > { %v5587_v54 = vrot.slane %v5585_v13, 2  ;;  %v15504_v13 = vld [vmem:[#allocation2 + $0x50] sm:$0xff]   ;;  %17501 = vst [vmem:[#allocation90_spill] sm:$0xff] %v15521_v42 }
 0x200   : > { %v5618_v1 = vor.u32 %v5617_v4, %v5614_v10  ;;  %v5632_v9 = vrot.slane %v5630_v20, 2  ;;  %v5635_v4 = vrot.slane %v5633_v44, 3  ;;  %v5651_v51 = vshll.u32 %v15504_v13, 16  ;;  %v15537_v42 = vld [vmem:[#allocation2 + $0x70] sm:$0xff]  }
 0x201   : > { %v5591_v18 = vor.u32 %v5590_v49, %v5587_v54  ;;  %v5623_v54 = vrot.slane %v5621_v39, 2  ;;  %v15518_v49 = vld [vmem:[#allocation2 + $0x60] sm:$0xff]   ;;  %v5657_v20 = vshrl.u32 %v15509_v12, 16  ;;  %v5660_v44 = vshll.u32 %v15509_v12, 16 }
 0x202   : > { %v15529_v0 = vsel %vm5575_vm0, %v5609_v58, %v5618_v1 }
 0x203   : > { %v15512_v29 = vsel %vm5575_vm0, %v5583_v63, %v5591_v18  ;;  %v15515_v34 = vsel %vm5575_vm0, %v5591_v18, %v5600_v5  ;;  %v5642_v63 = vshll.u32 %v15502_v21, 16  ;;  %v15526_v18 = vld [vmem:[#allocation2 + $0x68] sm:$0xff]   ;;  %17502 = vst [vmem:[#allocation91_spill] sm:$0xff] %v15529_v0  ;;  %v5627_v7 = vor.u32 %v5626_v43, %v5623_v54  ;;  %v15543_v0 = vld [vmem:[#allocation2 + $0x78] sm:$0xff]  }
 0x204   : > { %12301 = vmatmul.mubr.msk.bf16.gmra.mrb[56].mxu1 %vm3146_vm12, %v15157_v57  ;;  %17499 = vst [vmem:[#allocation88_spill] sm:$0xff] %v15512_v29  ;;  %17500 = vst [vmem:[#allocation89_spill] sm:$0xff] %v15515_v34  ;;  %v5648_v29 = vshrl.u32 %v15504_v13, 16  ;;  %v5641_v5 = vrot.slane %v5639_v55, 2  ;;  %v5636_v54 = vor.u32 %v5635_v4, %v5632_v9  ;;  %v5653_v43 = vrot.slane %v5651_v51, 3 }
 0x205   : > { %12304 = vmatprep.mubr.msk.bf16.mxu1 %vm3146_vm12, %v15161_v62  ;;  %v5644_v39 = vrot.slane %v5642_v63, 3  ;;  %v15540_v58 = vsel %vm5575_vm0, %v5618_v1, %v5627_v7  ;;  %v5659_v55 = vrot.slane %v5657_v20, 2  ;;  %v5669_v63 = vshll.u32 %v15518_v49, 16 }
 0x206   : > { %v5650_v10 = vrot.slane %v5648_v29, 2  ;;  %17503 = vst [vmem:[#allocation92_spill] sm:$0xff] %v15540_v58  ;;  %v5666_v29 = vshrl.u32 %v15518_v49, 16  ;;  %v15550_v52 = vsel %vm5575_vm0, %v5627_v7, %v5636_v54  ;;  %v5662_v1 = vrot.slane %v5660_v44, 3 }
 0x207   : > { %v5645_v34 = vor.u32 %v5644_v39, %v5641_v5  ;;  %17504 = vst [vmem:[#allocation93_spill] sm:$0xff] %v15550_v52  ;;  %v5675_v9 = vshrl.u32 %v15526_v18, 16  ;;  %v5671_v58 = vrot.slane %v5669_v63, 3  ;;  %v5678_v5 = vshll.u32 %v15526_v18, 16  ;;  %v15557_v39 = vld [vmem:[#allocation2 + $0x88] sm:$0xff]  }
 0x208   : > { %v5654_v22 = vor.u32 %v5653_v43, %v5650_v10  ;;  %v5668_v51 = vrot.slane %v5666_v29, 2  ;;  %v5663_v48 = vor.u32 %v5662_v1, %v5659_v55  ;;  %v5684_v7 = vshrl.u32 %v15537_v42, 16  ;;  %v15563_v10 = vld [vmem:[#allocation2 + $0x90] sm:$0xff]   ;;  %v15574_v55 = vld [vmem:[#allocation2 + $0x98] sm:$0xff]  }
 0x209   : > { %v15554_v4 = vsel %vm5575_vm0, %v5636_v54, %v5645_v34  ;;  %v5677_v36 = vrot.slane %v5675_v9, 2  ;;  %v5680_v44 = vrot.slane %v5678_v5, 3  ;;  %v5687_v54 = vshll.u32 %v15537_v42, 16 }
 0x20a   : > { %17505 = vst [vmem:[#allocation94_spill] sm:$0xff] %v15554_v4  ;;  %v15560_v20 = vsel %vm5575_vm0, %v5645_v34, %v5654_v22  ;;  %v5672_v43 = vor.u32 %v5671_v58, %v5668_v51  ;;  %v5693_v29 = vshrl.u32 %v15543_v0, 16  ;;  %v15568_v63 = vsel %vm5575_vm0, %v5654_v22, %v5663_v48 }
 0x20b   : > { %17506 = vst [vmem:[#allocation95_spill] sm:$0xff] %v15560_v20  ;;  %17507 = vst [vmem:[#allocation96_spill] sm:$0xff] %v15568_v63  ;;  %v5686_v4 = vrot.slane %v5684_v7, 2  ;;  %v5696_v52 = vshll.u32 %v15543_v0, 16  ;;  %v5702_v34 = vshrl.u32 %v15547_v61, 16  ;;  %v5681_v1 = vor.u32 %v5680_v44, %v5677_v36 }
 0x20c   : > { %12305 = vmatmul.mubr.msk.bf16.gmra.mrb[60].mxu1 %vm3146_vm12, %v15167_v47  ;;  %v15577_v58 = vsel %vm5575_vm0, %v5663_v48, %v5672_v43  ;;  %v5689_v9 = vrot.slane %v5687_v54, 3  ;;  %v5695_v51 = vrot.slane %v5693_v29, 2  ;;  %v5705_v7 = vshll.u32 %v15547_v61, 16 }
 0x20d   : > { %12308 = vmatprep.mubr.msk.bf16.mxu1 %vm3146_vm12, %v15171_v23  ;;  %17508 = vst [vmem:[#allocation97_spill] sm:$0xff] %v15577_v58  ;;  %v5698_v22 = vrot.slane %v5696_v52, 3  ;;  %v5704_v5 = vrot.slane %v5702_v34, 2  ;;  %v5711_v63 = vshrl.u32 %v15557_v39, 16  ;;  %v15584_v20 = vsel %vm5575_vm0, %v5672_v43, %v5681_v1 }
 0x20e   : > { %17509 = vst [vmem:[#allocation98_spill] sm:$0xff] %v15584_v20  ;;  %v5690_v45 = vor.u32 %v5689_v9, %v5686_v4  ;;  %v5714_v59 = vshll.u32 %v15557_v39, 16  ;;  %v5720_v48 = vshrl.u32 %v15563_v10, 16  ;;  %v5707_v44 = vrot.slane %v5705_v7, 3 }
 0x20f   : > { %v5699_v36 = vor.u32 %v5698_v22, %v5695_v51  ;;  %v5713_v54 = vrot.slane %v5711_v63, 2  ;;  %v5723_v29 = vshll.u32 %v15563_v10, 16  ;;  %v5729_v35 = vshrl.u32 %v15574_v55, 16 }
 0x210   : > { %v15590_v52 = vsel %vm5575_vm0, %v5681_v1, %v5690_v45  ;;  %v5716_v34 = vrot.slane %v5714_v59, 3  ;;  %v5722_v58 = vrot.slane %v5720_v48, 2  ;;  %v5708_v4 = vor.u32 %v5707_v44, %v5704_v5 }
 0x211   : > { %v15594_v43 = vsel %vm5575_vm0, %v5690_v45, %v5699_v36  ;;  %v5725_v9 = vrot.slane %v5723_v29, 3  ;;  %v5732_v20 = vshll.u32 %v15574_v55, 16  ;;  %v3607_v51 = vrot.slane %v15298_v31, 1 }
 0x212   : > { %v5717_v63 = vor.u32 %v5716_v34, %v5713_v54  ;;  %v5731_v22 = vrot.slane %v5729_v35, 2  ;;  %v15599_v7 = vsel %vm5575_vm0, %v5699_v36, %v5708_v4  ;;  %v11217_v48 = vcombine.low %v6019_v15, %v15466_v19 }
 0x213   : > { %v5726_v1 = vor.u32 %v5725_v9, %v5722_v58  ;;  %v5734_v59 = vrot.slane %v5732_v20, 3  ;;  %v17510_v45 = vrot.slane %v15292_v16, 1  ;;  %v3609_v44 = vrot.slane %v15338_v26, 1 }
 0x214   : > { %12309 = vmatmul.mubr.msk.bf16.gmra.mrb[64].mxu1 %vm3146_vm12, %v15185_v27  ;;  %v15610_v31 = vsel %vm5575_vm0, %v5708_v4, %v5717_v63  ;;  %v6027_v19 = vrot.slane %v11217_v48, 3  ;;  %v6028_v20 = vrot.slane %v15473_v30, 3  ;;  %v6030_v26 = vrot.slane %v15475_v53, 3 }
 0x215   : > { %12312 = vmatprep.mubr.msk.bf16.mxu1 %vm3146_vm12, %v15205_v56  ;;  %v3606_v5 = vsel %vm1209_vm2, %v15479_v32, %v17510_v45  ;;  %v15614_v35 = vsel %vm5575_vm0, %v5717_v63, %v5726_v1  ;;  %v15616_v15 = vor.u32 %v5734_v59, %v5731_v22  ;;  %v17511_v58 = vmov %v17510_v45 }
 0x216   : > { %v3608_v32 = vsel %vm1209_vm2, %v17511_v58, %v3607_v51  ;;  %v6032_v36 = vrot.slane %v15477_v17, 3  ;;  %v6034_v54 = vrot.slane %v15482_v60, 3  ;;  %v15630_v34 = vsel %vm6026_vm1, %v6027_v19, %v6028_v20  ;;  %v15657_v19 = vld [vmem:[%s17331_s4 + $0x20] sm:$0xff]  }
 0x217   : > { %v15627_v29 = vsel %vm5575_vm0, %v5726_v1, %v15616_v15  ;;  %v6036_v4 = vrot.slane %v15487_v24, 3  ;;  %v6038_v9 = vrot.slane %v15492_v6, 3  ;;  %v3610_v16 = vsel %vm1209_vm2, %v3607_v51, %v3609_v44  ;;  %v15644_v1 = vld [vmem:[#allocation2 + $0xa0] ss:$0 sps:$4 sm:$0x77]  }
 0x218   : > { %v15636_v63 = vsel %vm6026_vm1, %v6028_v20, %v6030_v26  ;;  %v15639_v22 = vsel %vm6026_vm1, %v6030_v26, %v6032_v36  ;;  %v15642_v59 = vsel %vm6026_vm1, %v6032_v36, %v6034_v54  ;;  %v6042_v51 = vrot.slane %v15504_v13, 3 }
 0x219   : > { %17512 = vst [vmem:[#allocation99_spill] sm:$0xff] %v15636_v63  ;;  %17513 = vst [vmem:[#allocation100_spill] sm:$0xff] %v15639_v22  ;;  %v15647_v48 = vsel %vm6026_vm1, %v6034_v54, %v6036_v4  ;;  %v15650_v45 = vsel %vm6026_vm1, %v6036_v4, %v6038_v9  ;;  %v6044_v20 = vrot.slane %v15509_v12, 3  ;;  %v6046_v58 = vrot.slane %v15518_v49, 3 }
 0x21a   : > { %17514 = vst [vmem:[#allocation101_spill] sm:$0xff] %v15642_v59  ;;  %17515 = vst [vmem:[#allocation102_spill] sm:$0xff] %v15647_v48  ;;  %v6048_v26 = vrot.slane %v15526_v18, 3  ;;  %v6050_v36 = vrot.slane %v15537_v42, 3  ;;  %v6054_v48 = vrot.slane %v15547_v61, 3 }
 0x21b   : > { %17516 = vst [vmem:[#allocation103_spill] sm:$0xff] %v15650_v45  ;;  %v6052_v45 = vrot.slane %v15543_v0, 3  ;;  %v15673_v59 = vsel %vm6026_vm1, %v6042_v51, %v6044_v20  ;;  %v15676_v22 = vsel %vm6026_vm1, %v6044_v20, %v6046_v58  ;;  %v6058_v20 = vrot.slane %v15563_v10, 3 }
 0x21c   : > { %12313 = vmatmul.mubr.msk.bf16.gmra.mrb[68].mxu1 %vm3146_vm12, %v15210_v28  ;;  %17517 = vst [vmem:[#allocation104_spill] sm:$0xff] %v15676_v22  ;;  %v15679_v63 = vsel %vm6026_vm1, %v6046_v58, %v6048_v26  ;;  %v6060_v58 = vrot.slane %v15574_v55, 3 }
 0x21d   : > { %12318 = vmatprep.mubr.msk.bf16.mxu1 %vm3146_vm12, %v3606_v5  ;;  %v6040_v5 = vrot.slane %v15502_v21, 3  ;;  %17518 = vst [vmem:[#allocation105_spill] sm:$0xff] %v15679_v63 }
 0x21f   : > { %v15664_v54 = vsel %vm6026_vm1, %v6038_v9, %v6040_v5  ;;  %v15667_v4 = vsel %vm6026_vm1, %v6040_v5, %v6042_v51  ;;  %v15682_v9 = vsel %vm6026_vm1, %v6048_v26, %v6050_v36  ;;  %v15687_v5 = vsel %vm6026_vm1, %v6050_v36, %v6052_v45 }
 0x220   : > { %17519 = vst [vmem:[#allocation106_spill] sm:$0xff] %v15682_v9  ;;  %17520 = vst [vmem:[#allocation107_spill] sm:$0xff] %v15687_v5  ;;  %v6056_v51 = vrot.slane %v15557_v39, 3  ;;  %v6062_v26 = vrot.slane %v15644_v1, 3  ;;  %v13809_v9 = vld [vmem:[#allocation2 + $0x20] sm:$0xff]   ;;  %v15704_v5 = vsel %vm6026_vm1, %v6058_v20, %v6060_v58 }
 0x222   : > { %v15701_v36 = vsel %vm6026_vm1, %v6056_v51, %v6058_v20  ;;  %v15707_v63 = vsel %vm6026_vm1, %v6060_v58, %v6062_v26  ;;  %v13813_v58 = vld [vmem:[#allocation2 + $0x40] sm:$0xff]   ;;  %v13814_v26 = vld [vmem:[#allocation2 + $0x48] sm:$0xff]  }
 0x223   : > { %17523 = vst [vmem:[#allocation110_spill] sm:$0xff] %v15701_v36 }
 0x224   : > { %12319 = vmatmul.mubr.msk.bf16.vlgmr.msra.gmra.mrb[36].mxu1 %vm3146_vm12, %v3608_v32  ;;  %v15690_v32 = vsel %vm6026_vm1, %v6052_v45, %v6054_v48  ;;  %v13810_v45 = vld [vmem:[#allocation2 + $0x28] sm:$0xff]  }
 0x225   : > { %12355 = vmatpush3.bf16.msra.mxu1 %v15277_v46  ;;  %12322 = vmatprep.mubr.msk.bf16.mxu1 %vm3146_vm12, %v3610_v16  ;;  %17521 = vst [vmem:[#allocation108_spill] sm:$0xff] %v15690_v32  ;;  %v3611_v46 = vrot.slane %v13809_v9, 1  ;;  %v15698_v16 = vsel %vm6026_vm1, %v6054_v48, %v6056_v51  ;;  %v3613_v32 = vrot.slane %v13810_v45, 1  ;;  %v13811_v48 = vld [vmem:[#allocation2 + $0x30] sm:$0xff]   ;;  %v13812_v51 = vld [vmem:[#allocation2 + $0x38] sm:$0xff]  }
 0x226   : > { %12392 = vmatprep.subr.bf16.mxu1 %v15657_v19  ;;  %17522 = vst [vmem:[#allocation109_spill] sm:$0xff] %v15698_v16  ;;  %v3615_v16 = vrot.slane %v13811_v48, 1  ;;  %v3617_v36 = vrot.slane %v13812_v51, 1  ;;  %v13815_v48 = vld [vmem:[#allocation2 + $0x50] sm:$0xff]   ;;  %v3625_v51 = vrot.slane %v15157_v57, 1  ;;  %v3631_v57 = vrot.slane %v15171_v23, 1 }
 0x227   : > { %v3612_v22 = vsel %vm1209_vm2, %v3609_v44, %v3611_v46  ;;  %v3614_v9 = vsel %vm1209_vm2, %v3611_v46, %v3613_v32  ;;  %v3619_v44 = vrot.slane %v13813_v58, 1 }
 0x228   : > { %v3616_v45 = vsel %vm1209_vm2, %v3613_v32, %v3615_v16  ;;  %v3618_v20 = vsel %vm1209_vm2, %v3615_v16, %v3617_v36  ;;  %v3623_v32 = vrot.slane %v13815_v48, 1  ;;  %v4047_v48 = vrot.slane %v15230_v41, 1 }
 0x229   : > { %v3620_v46 = vsel %vm1209_vm2, %v3617_v36, %v3619_v44  ;;  %v3627_v36 = vrot.slane %v15161_v62, 1 }
 0x22b   : > { %v3628_v58 = vsel %vm1209_vm2, %v3625_v51, %v3627_v36 }
 0x22c   : > { %12323 = vmatmul.mubr.msk.bf16.gmra.mrb[40].mxu1 %vm3146_vm12, %v3612_v22  ;;  %v3621_v22 = vrot.slane %v13814_v26, 1  ;;  %v3633_v26 = vrot.slane %v15185_v27, 1  ;;  %v3639_v27 = vrot.slane %v15218_v37, 1  ;;  %v13707_v37 = vld [vmem:[%s17331_s4 + $0x28] sm:$0xff]  }
 0x22d   : > { %12326 = vmatprep.mubr.msk.bf16.mxu1 %vm3146_vm12, %v3614_v9 }
 0x22e   : > { %v3622_v9 = vsel %vm1209_vm2, %v3619_v44, %v3621_v22  ;;  %v3624_v16 = vsel %vm1209_vm2, %v3621_v22, %v3623_v32  ;;  %v3634_v62 = vsel %vm1209_vm2, %v3631_v57, %v3633_v26 }
 0x234   : > { %12327 = vmatmul.mubr.msk.bf16.gmra.mrb[44].mxu1 %vm3146_vm12, %v3616_v45  ;;  %v3626_v45 = vsel %vm1209_vm2, %v3623_v32, %v3625_v51  ;;  %v4048_v32 = vrot.slane %v15232_v38, 1 }
 0x235   : > { %12330 = vmatprep.mubr.msk.bf16.mxu1 %vm3146_vm12, %v3618_v20  ;;  %v3629_v20 = vrot.slane %v15167_v47, 1  ;;  %v3635_v47 = vrot.slane %v15205_v56, 1 }
 0x236   : > { %v4049_v56 = vsel %vm1209_vm2, %v4047_v48, %v4048_v32 }
 0x237   : > { %v3630_v44 = vsel %vm1209_vm2, %v3627_v36, %v3629_v20  ;;  %v3632_v22 = vsel %vm1209_vm2, %v3629_v20, %v3631_v57  ;;  %v4058_v20 = vrot.slane %v15250_v40, 1 }
 0x23c   : > { %12331 = vmatmul.mubr.msk.bf16.gmra.mrb[48].mxu1 %vm3146_vm12, %v3620_v46  ;;  %v3637_v46 = vrot.slane %v15210_v28, 1  ;;  %v4050_v28 = vrot.slane %v15234_v11, 1  ;;  %v4056_v11 = vrot.slane %v15244_v3, 1  ;;  %v4062_v3 = vrot.slane %v15260_v8, 1 }
 0x23d   : > { %12334 = vmatprep.mubr.msk.bf16.mxu1 %vm3146_vm12, %v3622_v9  ;;  %v3636_v9 = vsel %vm1209_vm2, %v3633_v26, %v3635_v47  ;;  %v17524_v26 = vld [vmem:[#allocation45_spill] sm:$0xff] }
 0x23e   : > { %v3638_v23 = vsel %vm1209_vm2, %v3635_v47, %v3637_v46  ;;  %v3640_v51 = vsel %vm1209_vm2, %v3637_v46, %v3639_v27  ;;  %v4051_v41 = vsel %vm1209_vm2, %v4048_v32, %v4050_v28  ;;  %v17526_v46 = vld [vmem:[#allocation50_spill] sm:$0xff]  ;;  %v17527_v27 = vld [vmem:[#allocation52_spill] sm:$0xff] }
 0x23f   : > { %v4074_v48 = vrot.slane %v17527_v27, 1  ;;  %v17528_v32 = vld [vmem:[#allocation54_spill] sm:$0xff] }
 0x244   : > { %12335 = vmatmul.mubr.msk.bf16.gmra.mrb[52].mxu1 %vm3146_vm12, %v3624_v16  ;;  %v4052_v16 = vrot.slane %v15236_v25, 1 }
 0x245   : > { %12338 = vmatprep.mubr.msk.bf16.mxu1 %vm3146_vm12, %v3626_v45  ;;  %v4054_v45 = vrot.slane %v15239_v50, 1 }
 0x246   : > { %v4053_v38 = vsel %vm1209_vm2, %v4050_v28, %v4052_v16 }
 0x247   : > { %v4055_v25 = vsel %vm1209_vm2, %v4052_v16, %v4054_v45  ;;  %v4057_v36 = vsel %vm1209_vm2, %v4054_v45, %v4056_v11  ;;  %v17529_v16 = vld [vmem:[#allocation55_spill] sm:$0xff] }
 0x24c   : > { %12339 = vmatmul.mubr.msk.bf16.gmra.mrb[56].mxu1 %vm3146_vm12, %v3628_v58  ;;  %v4060_v58 = vrot.slane %v15258_v2, 1  ;;  %v4066_v2 = vrot.slane %v15279_v14, 1 }
 0x24d   : > { %12342 = vmatprep.mubr.msk.bf16.mxu1 %vm3146_vm12, %v3630_v44  ;;  %v4064_v44 = vrot.slane %v15271_v33, 1  ;;  %v17525_v33 = vld [vmem:[#allocation48_spill] sm:$0xff] }
 0x24e   : > { %v4061_v50 = vsel %vm1209_vm2, %v4058_v20, %v4060_v58  ;;  %v4063_v57 = vsel %vm1209_vm2, %v4060_v58, %v4062_v3  ;;  %v4070_v47 = vrot.slane %v17525_v33, 1  ;;  %v17542_v33 = vld [vmem:[#allocation61_spill] sm:$0xff] }
 0x24f   : > { %v4065_v40 = vsel %vm1209_vm2, %v4062_v3, %v4064_v44  ;;  %v17532_v3 = vld [vmem:[#allocation44_spill] sm:$0xff] }
 0x254   : > { %12343 = vmatmul.mubr.msk.bf16.gmra.mrb[60].mxu1 %vm3146_vm12, %v3632_v22  ;;  %v4068_v22 = vrot.slane %v17524_v26, 1  ;;  %v17537_v26 = vld [vmem:[#allocation53_spill] sm:$0xff] }
 0x255   : > { %12346 = vmatprep.mubr.msk.bf16.mxu1 %vm3146_vm12, %v3634_v62  ;;  %v4067_v62 = vsel %vm1209_vm2, %v4064_v44, %v4066_v2  ;;  %v17533_v44 = vld [vmem:[#allocation46_spill] sm:$0xff] }
 0x256   : > { %v4069_v8 = vsel %vm1209_vm2, %v4066_v2, %v4068_v22  ;;  %v17536_v2 = vld [vmem:[#allocation51_spill] sm:$0xff] }
 0x25c   : > { %12347 = vmatmul.mubr.msk.bf16.gmra.mrb[64].mxu1 %vm3146_vm12, %v3636_v9  ;;  %v4072_v9 = vrot.slane %v17526_v46, 1  ;;  %v17544_v46 = vld [vmem:[#allocation63_spill] sm:$0xff] }
 0x25d   : > { %12350 = vmatprep.mubr.msk.bf16.mxu1 %vm3146_vm12, %v3638_v23  ;;  %v4071_v23 = vsel %vm1209_vm2, %v4068_v22, %v4070_v47  ;;  %v17538_v22 = vld [vmem:[#allocation56_spill] sm:$0xff] }
 0x25e   : > { %v4073_v14 = vsel %vm1209_vm2, %v4070_v47, %v4072_v9  ;;  %v17543_v47 = vld [vmem:[#allocation62_spill] sm:$0xff] }
 0x264   : > { %12351 = vmatmul.mubr.msk.bf16.gmra.mrb[68].mxu1 %vm3146_vm12, %v3640_v51  ;;  %v4076_v51 = vrot.slane %v17528_v32, 1 }
 0x265   : > { %12356 = vmatprep.mubr.msk.bf16.mxu1 %vm3146_vm12, %v4049_v56  ;;  %v4075_v56 = vsel %vm1209_vm2, %v4072_v9, %v4074_v48  ;;  %v17545_v9 = vld [vmem:[#allocation64_spill] sm:$0xff] }
 0x266   : > { %v4077_v28 = vsel %vm1209_vm2, %v4074_v48, %v4076_v51 }
 0x26c   : > { %12357 = vmatmul.mubr.msk.bf16.vlgmr.msra.gmra.mrb[36].mxu1 %vm3146_vm12, %v4051_v41  ;;  %v4078_v41 = vrot.slane %v17529_v16, 1  ;;  %v17549_v16 = vld [vmem:[#allocation65_spill] sm:$0xff] }
 0x26d   : > { %12393 = vmatpush3.bf16.msra.mxu1 %v15657_v19  ;;  %12360 = vmatprep.mubr.msk.bf16.mxu1 %vm3146_vm12, %v4053_v38  ;;  %v4059_v19 = vsel %vm1209_vm2, %v4056_v11, %v4058_v20  ;;  %v17530_v38 = vld [vmem:[#allocation59_spill] sm:$0xff] }
 0x26e   : > { %12430 = vmatprep.subr.bf16.mxu1 %v13707_v37  ;;  %v4080_v45 = vrot.slane %v17530_v38, 1  ;;  %v4079_v11 = vsel %vm1209_vm2, %v4076_v51, %v4078_v41  ;;  %v17547_v51 = vld [vmem:[#allocation66_spill] sm:$0xff]  ;;  %v17550_v38 = vld [vmem:[#allocation68_spill] sm:$0xff] }
 0x274   : > { %12361 = vmatmul.mubr.msk.bf16.gmra.mrb[40].mxu1 %vm3146_vm12, %v4055_v25  ;;  %v13706_v25 = vld [vmem:[#allocation2 + $0x98] ss:$0 sps:$4 sm:$0x11]  }
 0x275   : > { %12364 = vmatprep.mubr.msk.bf16.mxu1 %vm3146_vm12, %v4057_v36  ;;  %v4081_v36 = vsel %vm1209_vm2, %v4078_v41, %v4080_v45  ;;  %v4082_v20 = vrot.slane %v13706_v25, 1  ;;  %v17552_v25 = vld [vmem:[#allocation70_spill] sm:$0xff] }
 0x277   : > { %v4083_v58 = vsel %vm1209_vm2, %v4080_v45, %v4082_v20  ;;  %v13713_v45 = vld [vmem:[%s17331_s4 + $0x38] sm:$0xff]  }
 0x278   : > { %v17554_v20 = vld [vmem:[#allocation72_spill] sm:$0xff] }
 0x27c   : > { %12365 = vmatmul.mubr.msk.bf16.gmra.mrb[44].mxu1 %vm3146_vm12, %v4059_v19  ;;  %v17531_v19 = vld [vmem:[#allocation43_spill] sm:$0xff] }
 0x27d   : > { %12368 = vmatprep.mubr.msk.bf16.mxu1 %vm3146_vm12, %v4061_v50  ;;  %v13710_v50 = vld [vmem:[%s17331_s4 + $0x30] sm:$0xff]  }
 0x284   : > { %12369 = vmatmul.mubr.msk.bf16.gmra.mrb[48].mxu1 %vm3146_vm12, %v4063_v57  ;;  %v17534_v57 = vld [vmem:[#allocation47_spill] sm:$0xff] }
 0x285   : > { %12372 = vmatprep.mubr.msk.bf16.mxu1 %vm3146_vm12, %v4065_v40  ;;  %v17535_v40 = vld [vmem:[#allocation49_spill] sm:$0xff] }
 0x28c   : > { %12373 = vmatmul.mubr.msk.bf16.gmra.mrb[52].mxu1 %vm3146_vm12, %v4067_v62  ;;  %v17540_v62 = vld [vmem:[#allocation58_spill] sm:$0xff] }
 0x28d   : > { %12376 = vmatprep.mubr.msk.bf16.mxu1 %vm3146_vm12, %v4069_v8  ;;  %v17541_v8 = vld [vmem:[#allocation60_spill] sm:$0xff] }
 0x294   : > { %12377 = vmatmul.mubr.msk.bf16.gmra.mrb[56].mxu1 %vm3146_vm12, %v4071_v23  ;;  %v17546_v23 = vld [vmem:[#allocation73_spill] sm:$0xff] }
 0x295   : > { %12380 = vmatprep.mubr.msk.bf16.mxu1 %vm3146_vm12, %v4073_v14  ;;  %v4526_v14 = vshrl.u32 %v17546_v23, 16  ;;  %v4529_v27 = vshll.u32 %v17546_v23, 16  ;;  %v5261_v23 = vrot.slane %v15475_v53, 2  ;;  %v5267_v53 = vrot.slane %v15487_v24, 2 }
 0x296   : > { %v5273_v24 = vrot.slane %v15504_v13, 2 }
 0x297   : > { %v4528_v48 = vrot.slane %v4526_v14, 1  ;;  %v4531_v32 = vrot.slane %v4529_v27, 2  ;;  %v5263_v14 = vrot.slane %v15477_v17, 2  ;;  %v13731_v27 = vld [vmem:[%s17331_s4 + $0x40] sm:$0xff]  }
 0x29c   : > { %12381 = vmatmul.mubr.msk.bf16.gmra.mrb[60].mxu1 %vm3146_vm12, %v4075_v56  ;;  %v17548_v56 = vld [vmem:[#allocation67_spill] sm:$0xff] }
 0x29d   : > { %12384 = vmatprep.mubr.msk.bf16.mxu1 %vm3146_vm12, %v4077_v28  ;;  %v4532_v28 = vor.u32 %v4531_v32, %v4528_v48  ;;  %v5265_v32 = vrot.slane %v15482_v60, 2 }
 0x29f   : > { %v4533_v41 = vsel %vm1523_vm4, %v17549_v16, %v4532_v28  ;;  %v5266_v17 = vsel %vm4814_vm15, %v5263_v14, %v5265_v32  ;;  %v5271_v28 = vrot.slane %v15502_v21, 2  ;;  %v5277_v21 = vrot.slane %v15518_v49, 2 }
 0x2a4   : > { %12385 = vmatmul.mubr.msk.bf16.gmra.mrb[64].mxu1 %vm3146_vm12, %v4079_v11  ;;  %v17551_v11 = vld [vmem:[#allocation69_spill] sm:$0xff] }
 0x2a5   : > { %12388 = vmatprep.mubr.msk.bf16.mxu1 %vm3146_vm12, %v4081_v36  ;;  %v17553_v36 = vld [vmem:[#allocation71_spill] sm:$0xff] }
 0x2ac   : > { %12389 = vmatmul.mubr.msk.bf16.gmra.mrb[68].mxu1 %vm3146_vm12, %v4083_v58  ;;  %v17555_v58 = vld [vmem:[#allocation74_spill] sm:$0xff] }
 0x2ad   : > { %12394 = vmatprep.mubr.msk.bf16.mxu1 %vm3146_vm12, %v17531_v19  ;;  %v17556_v19 = vld [vmem:[#allocation75_spill] sm:$0xff] }
 0x2b4   : > { %12395 = vmatmul.mubr.msk.bf16.vlgmr.msra.gmra.mrb[36].mxu1 %vm3146_vm12, %v17532_v3  ;;  %v17557_v3 = vld [vmem:[#allocation76_spill] sm:$0xff] }
 0x2b5   : > { %12431 = vmatpush3.bf16.msra.mxu1 %v13707_v37  ;;  %12398 = vmatprep.mubr.msk.bf16.mxu1 %vm3146_vm12, %v17533_v44  ;;  %v17539_v37 = vld [vmem:[#allocation57_spill] sm:$0xff]  ;;  %v17559_v44 = vld [vmem:[#allocation78_spill] sm:$0xff] }
 0x2b6   : > { %12468 = vmatprep.subr.bf16.mxu1 %v13710_v50 }
 0x2bc   : > { %12399 = vmatmul.mubr.msk.bf16.gmra.mrb[40].mxu1 %vm3146_vm12, %v17534_v57  ;;  %v17560_v57 = vld [vmem:[#allocation79_spill] sm:$0xff] }
 0x2bd   : > { %12402 = vmatprep.mubr.msk.bf16.mxu1 %vm3146_vm12, %v17535_v40  ;;  %v17561_v40 = vld [vmem:[#allocation80_spill] sm:$0xff] }
 0x2c4   : > { %12403 = vmatmul.mubr.msk.bf16.gmra.mrb[44].mxu1 %vm3146_vm12, %v17536_v2  ;;  %v17562_v2 = vld [vmem:[#allocation81_spill] sm:$0xff] }
 0x2c5   : > { %12406 = vmatprep.mubr.msk.bf16.mxu1 %vm3146_vm12, %v17537_v26  ;;  %v17563_v26 = vld [vmem:[#allocation82_spill] sm:$0xff] }
 0x2cc   : > { %12407 = vmatmul.mubr.msk.bf16.gmra.mrb[48].mxu1 %vm3146_vm12, %v17538_v22  ;;  %v17564_v22 = vld [vmem:[#allocation83_spill] sm:$0xff] }
 0x2cd   : > { %12410 = vmatprep.mubr.msk.bf16.mxu1 %vm3146_vm12, %v17539_v37  ;;  %v17565_v37 = vld [vmem:[#allocation84_spill] sm:$0xff] }
 0x2d4   : > { %12411 = vmatmul.mubr.msk.bf16.gmra.mrb[52].mxu1 %vm3146_vm12, %v17540_v62  ;;  %v17566_v62 = vld [vmem:[#allocation85_spill] sm:$0xff] }
 0x2d5   : > { %12414 = vmatprep.mubr.msk.bf16.mxu1 %vm3146_vm12, %v17541_v8  ;;  %v5259_v8 = vrot.slane %v15473_v30, 2  ;;  %v5264_v30 = vsel %vm4814_vm15, %v5261_v23, %v5263_v14 }
 0x2d7   : > { %v5262_v48 = vsel %vm4814_vm15, %v5259_v8, %v5261_v23 }
 0x2dc   : > { %12415 = vmatmul.mubr.msk.bf16.gmra.mrb[56].mxu1 %vm3146_vm12, %v17542_v33  ;;  %v17567_v33 = vld [vmem:[#allocation87_spill] sm:$0xff] }
 0x2dd   : > { %12418 = vmatprep.mubr.msk.bf16.mxu1 %vm3146_vm12, %v17543_v47  ;;  %v5258_v47 = vrot.slane %v17567_v33, 2  ;;  %v17578_v33 = vld [vmem:[#allocation97_spill] sm:$0xff] }
 0x2e4   : > { %12419 = vmatmul.mubr.msk.bf16.gmra.mrb[60].mxu1 %vm3146_vm12, %v17544_v46  ;;  %v17568_v46 = vld [vmem:[#allocation86_spill] sm:$0xff] }
 0x2e5   : > { %12422 = vmatprep.mubr.msk.bf16.mxu1 %vm3146_vm12, %v17545_v9  ;;  %v5260_v9 = vsel %vm4814_vm15, %v5258_v47, %v5259_v8  ;;  %v17577_v8 = vld [vmem:[#allocation96_spill] sm:$0xff]  ;;  %v17579_v47 = vld [vmem:[#allocation98_spill] sm:$0xff] }
 0x2ec   : > { %12423 = vmatmul.mubr.msk.bf16.gmra.mrb[64].mxu1 %vm3146_vm12, %v17547_v51  ;;  %v5268_v51 = vsel %vm4814_vm15, %v5265_v32, %v5267_v53  ;;  %v7040_v32 = vld [vmem:[#allocation3] sm:$0xf] }
 0x2ed   : > { %12426 = vmatprep.mubr.msk.bf16.mxu1 %vm3146_vm12, %v17548_v56  ;;  %v5269_v56 = vrot.slane %v15492_v6, 2 }
 0x2ef   : > { %v5270_v16 = vsel %vm4814_vm15, %v5267_v53, %v5269_v56  ;;  %v5272_v60 = vsel %vm4814_vm15, %v5269_v56, %v5271_v28  ;;  %v7041_v53 = vld [vmem:[#allocation3 + $0x4] sm:$0xf] }
 0x2f4   : > { %12427 = vmatmul.mubr.msk.bf16.gmra.mrb[68].mxu1 %vm3146_vm12, %v4533_v41  ;;  %v5275_v41 = vrot.slane %v15509_v12, 2  ;;  %v5281_v12 = vrot.slane %v15537_v42, 2 }
 0x2f5   : > { %12432 = vmatprep.mubr.msk.bf16.mxu1 %vm3146_vm12, %v17550_v38  ;;  %v5274_v38 = vsel %vm4814_vm15, %v5271_v28, %v5273_v24 }
 0x2f6   : > { %v5276_v6 = vsel %vm4814_vm15, %v5273_v24, %v5275_v41 }
 0x2fc   : > { %12433 = vmatmul.mubr.msk.bf16.vlgmr.msra.gmra.mrb[36].mxu1 %vm3146_vm12, %v17551_v11  ;;  %v5278_v11 = vsel %vm4814_vm15, %v5275_v41, %v5277_v21 }
 0x2fd   : > { %12469 = vmatpush3.bf16.msra.mxu1 %v13710_v50  ;;  %12436 = vmatprep.mubr.msk.bf16.mxu1 %vm3146_vm12, %v17552_v25  ;;  %v17558_v50 = vld [vmem:[#allocation77_spill] sm:$0xff]  ;;  %v5283_v25 = vrot.slane %v15543_v0, 2  ;;  %v5289_v0 = vrot.slane %v15563_v10, 2 }
 0x2fe   : > { %12506 = vmatprep.subr.bf16.mxu1 %v13713_v45  ;;  %v17570_v10 = vld [vmem:[#allocation89_spill] sm:$0xff] }
 0x2ff   : > { %v5284_v49 = vsel %vm4814_vm15, %v5281_v12, %v5283_v25 }
 0x304   : > { %12437 = vmatmul.mubr.msk.bf16.gmra.mrb[40].mxu1 %vm3146_vm12, %v17553_v36 }
 0x305   : > { %12440 = vmatprep.mubr.msk.bf16.mxu1 %vm3146_vm12, %v17554_v20  ;;  %v5287_v20 = vrot.slane %v15557_v39, 2 }
 0x30c   : > { %12441 = vmatmul.mubr.msk.bf16.gmra.mrb[44].mxu1 %vm3146_vm12, %v17555_v58 }
 0x30d   : > { %12444 = vmatprep.mubr.msk.bf16.mxu1 %vm3146_vm12, %v17556_v19  ;;  %v5291_v19 = vrot.slane %v15574_v55, 2  ;;  %v17571_v55 = vld [vmem:[#allocation90_spill] sm:$0xff] }
 0x314   : > { %12445 = vmatmul.mubr.msk.bf16.gmra.mrb[48].mxu1 %vm3146_vm12, %v17557_v3  ;;  %v5290_v3 = vsel %vm4814_vm15, %v5287_v20, %v5289_v0 }
 0x315   : > { %12448 = vmatprep.mubr.msk.bf16.mxu1 %vm3146_vm12, %v17558_v50  ;;  %v13730_v50 = vld [vmem:[#allocation2 + $0xa0] ss:$0 sps:$4 sm:$0x33]  }
 0x316   : > { %v5293_v39 = vrot.slane %v13730_v50, 2 }
 0x31c   : > { %12449 = vmatmul.mubr.msk.bf16.gmra.mrb[52].mxu1 %vm3146_vm12, %v17559_v44  ;;  %v5294_v44 = vsel %vm4814_vm15, %v5291_v19, %v5293_v39 }
 0x31d   : > { %12452 = vmatprep.mubr.msk.bf16.mxu1 %vm3146_vm12, %v17560_v57  ;;  %v17569_v57 = vld [vmem:[#allocation88_spill] sm:$0xff] }
 0x324   : > { %12453 = vmatmul.mubr.msk.bf16.gmra.mrb[56].mxu1 %vm3146_vm12, %v17561_v40  ;;  %v17572_v40 = vld [vmem:[#allocation91_spill] sm:$0xff] }
 0x325   : > { %12456 = vmatprep.mubr.msk.bf16.mxu1 %vm3146_vm12, %v17562_v2  ;;  %v13734_v2 = vld [vmem:[%s17333_s6 + $0x8] sm:$0xff]  }
 0x326   : > { %12582 = vmatprep.subr.bf16.mxu0 %v13734_v2 }
 0x327   : > { %12583 = vmatpush3.bf16.msra.mxu0 %v13734_v2 }
 0x32c   : > { %12457 = vmatmul.mubr.msk.bf16.gmra.mrb[60].mxu1 %vm3146_vm12, %v17563_v26  ;;  %v17573_v26 = vld [vmem:[#allocation92_spill] sm:$0xff] }
 0x32d   : > { %12460 = vmatprep.mubr.msk.bf16.mxu1 %vm3146_vm12, %v17564_v22  ;;  %v17574_v22 = vld [vmem:[#allocation93_spill] sm:$0xff] }
 0x334   : > { %12461 = vmatmul.mubr.msk.bf16.gmra.mrb[64].mxu1 %vm3146_vm12, %v17565_v37  ;;  %v17575_v37 = vld [vmem:[#allocation94_spill] sm:$0xff] }
 0x335   : > { %12464 = vmatprep.mubr.msk.bf16.mxu1 %vm3146_vm12, %v17566_v62  ;;  %v17576_v62 = vld [vmem:[#allocation95_spill] sm:$0xff] }
 0x33c   : > { %12465 = vmatmul.mubr.msk.bf16.gmra.mrb[68].mxu1 %vm3146_vm12, %v17568_v46  ;;  %v5738_v46 = vshrl.u32 %v15644_v1, 16 }
 0x33d   : > { %12470 = vmatprep.mubr.msk.bf16.mxu1 %vm3146_vm12, %v5260_v9  ;;  %v5741_v9 = vshll.u32 %v15644_v1, 16  ;;  %v17582_v1 = vld [vmem:[#allocation101_spill] sm:$0xff] }
 0x33e   : > { %v5740_v23 = vrot.slane %v5738_v46, 2 }
 0x33f   : > { %v5743_v14 = vrot.slane %v5741_v9, 3 }
 0x344   : > { %12471 = vmatmul.mubr.msk.bf16.vlgmr.msra.gmra.mrb[36].mxu1 %vm3146_vm12, %v5262_v48  ;;  %v17588_v48 = vld [vmem:[#allocation107_spill] sm:$0xff] }
 0x345   : > { %12507 = vmatpush3.bf16.msra.mxu1 %v13713_v45  ;;  %12474 = vmatprep.mubr.msk.bf16.mxu1 %vm3146_vm12, %v5264_v30  ;;  %v5279_v45 = vrot.slane %v15526_v18, 2  ;;  %v5285_v18 = vrot.slane %v15547_v61, 2  ;;  %v5292_v61 = vsel %vm4814_vm15, %v5289_v0, %v5291_v19  ;;  %v17589_v30 = vld [vmem:[#allocation108_spill] sm:$0xff]  ;;  %v17595_v19 = vld [vmem:[#allocation6_spill] sm:$0xff] }
 0x346   : > { %12544 = vmatprep.subr.bf16.mxu1 %v13731_v27 }
 0x347   : > { %v5280_v13 = vsel %vm4814_vm15, %v5277_v21, %v5279_v45  ;;  %v5282_v36 = vsel %vm4814_vm15, %v5279_v45, %v5281_v12  ;;  %v5286_v58 = vsel %vm4814_vm15, %v5283_v25, %v5285_v18  ;;  %v5288_v42 = vsel %vm4814_vm15, %v5285_v18, %v5287_v20 }
 0x34c   : > { %12475 = vmatmul.mubr.msk.bf16.gmra.mrb[40].mxu1 %vm3146_vm12, %v5266_v17  ;;  %v16027_v17 = vcombine.low %v7040_v32, %v7041_v53 }
 0x34d   : > { %12478 = vmatprep.mubr.msk.bf16.mxu1 %vm3146_vm12, %v5268_v51  ;;  %v16032_v51 = vld [vmem:[%s17332_s5] ss:$0 sm:$0xff] }
 0x34e   : > { %v7178_v56 = vshll.u32 %v16027_v17, 16  ;;  %v7176_v45 = vshrl.u32 %v16027_v17, 16 }
 0x354   : > { %12479 = vmatmul.mubr.msk.bf16.gmra.mrb[44].mxu1 %vm3146_vm12, %v5270_v16 }
 0x355   : > { %12482 = vmatprep.mubr.msk.bf16.mxu1 %vm3146_vm12, %v5272_v60 }
 0x35c   : > { %12483 = vmatmul.mubr.msk.bf16.gmra.mrb[48].mxu1 %vm3146_vm12, %v5274_v38 }
 0x35d   : > { %12486 = vmatprep.mubr.msk.bf16.mxu1 %vm3146_vm12, %v5276_v6 }
 0x364   : > { %12487 = vmatmul.mubr.msk.bf16.gmra.mrb[52].mxu1 %vm3146_vm12, %v5278_v11  ;;  %v7180_v11 = vrot.slane %v7178_v56, 1 }
 0x365   : > { %12490 = vmatprep.mubr.msk.bf16.mxu1 %vm3146_vm12, %v5280_v13  ;;  %v17592_v13 = vld [vmem:[#allocation5_spill] sm:$0xff] }
 0x36c   : > { %12491 = vmatmul.mubr.msk.bf16.gmra.mrb[56].mxu1 %vm3146_vm12, %v5282_v36  ;;  %v17593_v36 = vld [vmem:[#allocation4_spill] sm:$0xff] }
 0x36d   : > { %12494 = vmatprep.mubr.msk.bf16.mxu1 %vm3146_vm12, %v5284_v49 }
 0x374   : > { %12495 = vmatmul.mubr.msk.bf16.gmra.mrb[60].mxu1 %vm3146_vm12, %v5286_v58  ;;  %v17594_v58 = vld [vmem:[#allocation7_spill] sm:$0xff] }
 0x375   : > { %12498 = vmatprep.mubr.msk.bf16.mxu1 %vm3146_vm12, %v5288_v42 }
 0x37c   : > { %12499 = vmatmul.mubr.msk.bf16.gmra.mrb[64].mxu1 %vm3146_vm12, %v5290_v3 }
 0x37d   : > { %12502 = vmatprep.mubr.msk.bf16.mxu1 %vm3146_vm12, %v5292_v61  ;;  %v16044_v61 = vor.u32 %v7180_v11, %v7176_v45 }
 0x384   : > { %12503 = vmatmul.mubr.msk.bf16.gmra.mrb[68].mxu1 %vm3146_vm12, %v5294_v44 }
 0x385   : > { %12508 = vmatprep.mubr.msk.bf16.mxu1 %vm3146_vm12, %v17569_v57 }
 0x38c   : > { %12509 = vmatmul.mubr.msk.bf16.vlgmr.msra.gmra.mrb[36].mxu1 %vm3146_vm12, %v17570_v10 }
 0x38d   : > { %12545 = vmatpush3.bf16.msra.mxu1 %v13731_v27  ;;  %12512 = vmatprep.mubr.msk.bf16.mxu1 %vm3146_vm12, %v17571_v55  ;;  %v17587_v27 = vld [vmem:[#allocation106_spill] sm:$0xff] }
 0x394   : > { %12513 = vmatmul.mubr.msk.bf16.gmra.mrb[40].mxu1 %vm3146_vm12, %v17572_v40 }
 0x395   : > { %12516 = vmatprep.mubr.msk.bf16.mxu1 %vm3146_vm12, %v17573_v26 }
 0x39c   : > { %12517 = vmatmul.mubr.msk.bf16.gmra.mrb[44].mxu1 %vm3146_vm12, %v17574_v22 }
 0x39d   : > { %12520 = vmatprep.mubr.msk.bf16.mxu1 %vm3146_vm12, %v17575_v37 }
 0x3a4   : > { %12521 = vmatmul.mubr.msk.bf16.gmra.mrb[48].mxu1 %vm3146_vm12, %v17576_v62 }
 0x3a5   : > { %12524 = vmatprep.mubr.msk.bf16.mxu1 %vm3146_vm12, %v17577_v8 }
 0x3ac   : > { %12525 = vmatmul.mubr.msk.bf16.gmra.mrb[52].mxu1 %vm3146_vm12, %v17578_v33 }
 0x3ad   : > { %12528 = vmatprep.mubr.msk.bf16.mxu1 %vm3146_vm12, %v17579_v47 }
 0x3b4   : > { %12529 = vmatmul.mubr.msk.bf16.gmra.mrb[56].mxu1 %vm3146_vm12, %v15590_v52  ;;  %v5744_v52 = vor.u32 %v5743_v14, %v5740_v23 }
 0x3b5   : > { %12532 = vmatprep.mubr.msk.bf16.mxu1 %vm3146_vm12, %v15594_v43 }
 0x3b6   : > { %v5745_v43 = vsel %vm5575_vm0, %v15616_v15, %v5744_v52  ;;  %v17585_v15 = vld [vmem:[#allocation104_spill] sm:$0xff] }
 0x3bc   : > { %12533 = vmatmul.mubr.msk.bf16.gmra.mrb[60].mxu1 %vm3146_vm12, %v15599_v7  ;;  %v17580_v7 = vld [vmem:[#allocation99_spill] sm:$0xff] }
 0x3bd   : > { %12536 = vmatprep.mubr.msk.bf16.mxu1 %vm3146_vm12, %v15610_v31  ;;  %v17581_v31 = vld [vmem:[#allocation100_spill] sm:$0xff] }
 0x3c4   : > { %12537 = vmatmul.mubr.msk.bf16.gmra.mrb[64].mxu1 %vm3146_vm12, %v15614_v35  ;;  %v17583_v35 = vld [vmem:[#allocation102_spill] sm:$0xff] }
 0x3c5   : > { %12540 = vmatprep.mubr.msk.bf16.mxu1 %vm3146_vm12, %v15627_v29  ;;  %v17584_v29 = vld [vmem:[#allocation103_spill] sm:$0xff] }
 0x3cc   : > { %12541 = vmatmul.mubr.msk.bf16.gmra.mrb[68].mxu1 %vm3146_vm12, %v5745_v43 }
 0x3cd   : > { %12546 = vmatprep.mubr.msk.bf16.mxu1 %vm3146_vm12, %v15630_v34  ;;  %v17586_v34 = vld [vmem:[#allocation105_spill] sm:$0xff] }
 0x3d4   : > { %12547 = vmatmul.mubr.msk.bf16.vlgmr.msra.gmra.mrb[36].mxu1 %vm3146_vm12, %v17580_v7  ;;  %v6999_v7 = vld [vmem:[#allocation3 + $0x8] sm:$0xe] }
 0x3d5   : > { %12550 = vmatprep.mubr.msk.bf16.mxu1 %vm3146_vm12, %v17581_v31 }
 0x3dc   : > { %12551 = vmatmul.mubr.msk.bf16.gmra.mrb[40].mxu1 %vm3146_vm12, %v17582_v1 }
 0x3dd   : > { %12554 = vmatprep.mubr.msk.bf16.mxu1 %vm3146_vm12, %v17583_v35 }
 0x3e4   : > { %12555 = vmatmul.mubr.msk.bf16.gmra.mrb[44].mxu1 %vm3146_vm12, %v17584_v29 }
 0x3e5   : > { %12558 = vmatprep.mubr.msk.bf16.mxu1 %vm3146_vm12, %v15664_v54  ;;  %v17590_v54 = vld [vmem:[#allocation109_spill] sm:$0xff] }
 0x3ec   : > { %12559 = vmatmul.mubr.msk.bf16.gmra.mrb[48].mxu1 %vm3146_vm12, %v15667_v4  ;;  %v17591_v4 = vld [vmem:[#allocation110_spill] sm:$0xff] }
 0x3ed   : > { %12562 = vmatprep.mubr.msk.bf16.mxu1 %vm3146_vm12, %v15673_v59  ;;  %v16024_v59 = vld [vmem:[%s17333_s6] sm:$0xff]  }
 0x3ee   : > { %12620 = vmatprep.subr.bf16.mxu0 %v16024_v59 }
 0x3f4   : > { %12563 = vmatmul.mubr.msk.bf16.gmra.mrb[52].mxu1 %vm3146_vm12, %v17585_v15 }
 0x3f5   : > { %12566 = vmatprep.mubr.msk.bf16.mxu1 %vm3146_vm12, %v17586_v34 }
 0x3fc   : > { %12567 = vmatmul.mubr.msk.bf16.gmra.mrb[56].mxu1 %vm3146_vm12, %v17587_v27 }
 0x3fd   : > { %12570 = vmatprep.mubr.msk.bf16.mxu1 %vm3146_vm12, %v17588_v48 }
 0x404   : > { %12571 = vmatmul.mubr.msk.bf16.gmra.mrb[60].mxu1 %vm3146_vm12, %v17589_v30 }
 0x405   : > { %12574 = vmatprep.mubr.msk.bf16.mxu1 %vm3146_vm12, %v17590_v54  ;;  %v17596_v54 = vld [vmem:[#allocation10_spill] sm:$0xff] }
 0x40c   : > { %12575 = vmatmul.mubr.msk.bf16.gmra.mrb[64].mxu1 %vm3146_vm12, %v17591_v4 }
 0x40d   : > { %12578 = vmatprep.mubr.msk.bf16.mxu1 %vm3146_vm12, %v15704_v5 }
 0x414   : > { %12579 = vmatmul.mubr.msk.bf16.gmra.mrb[68].mxu1 %vm3146_vm12, %v15707_v63 }
 0x4a7   : > { %v12548_v5 = vpop.f32.mrb[36].mxu1 }
 0x4a8   : > { %v6346_v63 = vadd.f32 %v12548_v5, %v16032_v51  ;;  %v6158_v28 = vpop.f32.mrb[37].mxu1 }
 0x4a9   : > { %v6344_v16 = vadd.f32 %v16032_v51, %v6158_v28  ;;  %v12549_v60 = vpop.f32.mrb[38].mxu1  ;;  %v17598_v28 = vld [vmem:[#allocation8_spill] sm:$0xff] }
 0x4aa   : > { %v6382_v24 = vmax.f32 %v6346_v63, 0.0  ;;  %v6347_v41 = vadd.f32 %v12549_v60, %v16032_v51  ;;  %v6161_v38 = vpop.f32.mrb[39].mxu1 }
 0x4ab   : > { %v6380_v6 = vmax.f32 %v6344_v16, 0.0  ;;  %v6345_v21 = vadd.f32 %v16032_v51, %v6161_v38 }
 0x4ac   : > { %v6418_v12 = vmul.f32 %v6382_v24, %v17592_v13  ;;  %v6383_v25 = vmax.f32 %v6347_v41, 0.0 }
 0x4ad   : > { %v6416_v49 = vmul.f32 %v6380_v6, %v17593_v36  ;;  %v6381_v18 = vmax.f32 %v6345_v21, 0.0 }
 0x4ae   : > { %v11600_v20 = vpack.c.bf16 %v6418_v12, %v6418_v12  ;;  %v6419_v42 = vmul.f32 %v6383_v25, %v17594_v58 }
 0x4af   : > { %v11598_v0 = vpack.c.bf16 %v6416_v49, %v6416_v49  ;;  %v6417_v3 = vmul.f32 %v6381_v18, %v17595_v19  ;;  %v12552_v50 = vpop.f32.mrb[40].mxu1 }
 0x4b0   : > { %v6623_v39 = vshrl.u32 %v11600_v20, 16  ;;  %v6626_v44 = vshll.u32 %v11600_v20, 16  ;;  %v11601_v57 = vpack.c.bf16 %v6419_v42, %v6419_v42  ;;  %v6350_v10 = vadd.f32 %v12552_v50, %v16032_v51  ;;  %v6174_v55 = vpop.f32.mrb[41].mxu1  ;;  %v17600_v20 = vld [vmem:[#allocation11_spill] sm:$0xff] }
 0x4b1   : > { %v6604_v40 = vshrl.u32 %v11598_v0, 16  ;;  %v6607_v2 = vshll.u32 %v11598_v0, 16  ;;  %v11599_v26 = vpack.c.bf16 %v6417_v3, %v6417_v3  ;;  %v6348_v22 = vadd.f32 %v16032_v51, %v6174_v55  ;;  %v12553_v37 = vpop.f32.mrb[42].mxu1 }
 0x4b2   : > { %v6625_v62 = vrot.slane %v6623_v39, 6  ;;  %v6628_v8 = vrot.slane %v6626_v44, 7  ;;  %v6633_v33 = vshrl.u32 %v11601_v57, 16  ;;  %v6636_v47 = vshll.u32 %v11601_v57, 16  ;;  %v6177_v46 = vpop.f32.mrb[43].mxu1 }
 0x4b3   : > { %v6606_v9 = vrot.slane %v6604_v40, 6  ;;  %v6609_v23 = vrot.slane %v6607_v2, 7  ;;  %v6613_v14 = vshrl.u32 %v11599_v26, 16  ;;  %v6616_v52 = vshll.u32 %v11599_v26, 16  ;;  %v17601_v26 = vld [vmem:[#allocation9_spill] sm:$0xff] }
 0x4b4   : > { %v6629_v43 = vor.u32 %v6628_v8, %v6625_v62  ;;  %v6635_v31 = vrot.slane %v6633_v33, 6  ;;  %v6638_v1 = vrot.slane %v6636_v47, 7  ;;  %v6386_v35 = vmax.f32 %v6350_v10, 0.0  ;;  %v17602_v47 = vld [vmem:[#allocation15_spill] sm:$0xff] }
 0x4b5   : > { %v6610_v29 = vor.u32 %v6609_v23, %v6606_v9  ;;  %v6615_v15 = vrot.slane %v6613_v14, 6  ;;  %v6618_v34 = vrot.slane %v6616_v52, 7  ;;  %v6384_v27 = vmax.f32 %v6348_v22, 0.0 }
 0x4b6   : > { %v6631_v48 = vrot.slane %v6629_v43, 4  ;;  %v6639_v30 = vor.u32 %v6638_v1, %v6635_v31  ;;  %v6422_v4 = vmul.f32 %v6386_v35, %v17596_v54  ;;  %v6351_v32 = vadd.f32 %v12553_v37, %v16032_v51 }
 0x4b7   : > { %v6611_v53 = vrot.slane %v6610_v29, 4  ;;  %v7000_v56 = vsel %vm14696_vm10, %v6610_v29, %v6999_v7  ;;  %v6619_v63 = vor.u32 %v6618_v34, %v6615_v15  ;;  %v6420_v16 = vmul.f32 %v6384_v27, %v17598_v28  ;;  %v12556_v60 = vpop.f32.mrb[44].mxu1 }
 0x4b8   : > { %7001 = vst [vmem:[#allocation3 + $0x8] sm:$0xe] %v7000_v56  ;;  %v6640_v41 = vsel %vm14704_vm11, %v6631_v48, %v6639_v30  ;;  %v6641_v38 = vrot.slane %v6639_v30, 4  ;;  %v11604_v6 = vpack.c.bf16 %v6422_v4, %v6422_v4  ;;  %v6387_v21 = vmax.f32 %v6351_v32, 0.0  ;;  %v6190_v45 = vpop.f32.mrb[45].mxu1 }
 0x4b9   : > { %7004 = vst.msk [vmem:[#allocation3 + $0x14] sm:$0xf] %vm2259_vm5, %v6640_v41  ;;  %v6620_v11 = vsel %vm14704_vm11, %v6611_v53, %v6619_v63  ;;  %v6621_v13 = vrot.slane %v6619_v63, 4  ;;  %v11602_v12 = vpack.c.bf16 %v6420_v16, %v6420_v16  ;;  %v6349_v25 = vadd.f32 %v16032_v51, %v6177_v46  ;;  %v12557_v36 = vpop.f32.mrb[46].mxu1  ;;  %v17603_v53 = vld [vmem:[#allocation12_spill] sm:$0xff] }
 0x4ba   : > { %7002 = vst.msk [vmem:[#allocation3 + $0xc] sm:$0xf] %vm2259_vm5, %v6620_v11  ;;  %v6663_v49 = vshrl.u32 %v11604_v6, 16  ;;  %v6666_v18 = vshll.u32 %v11604_v6, 16  ;;  %v6423_v58 = vmul.f32 %v6387_v21, %v17600_v20  ;;  %v6354_v42 = vadd.f32 %v12556_v60, %v16032_v51  ;;  %v6193_v0 = vpop.f32.mrb[47].mxu1 }
 0x4bb   : > { %v6630_v19 = vsel %vm14704_vm11, %v6621_v13, %v6629_v43  ;;  %v6643_v3 = vshrl.u32 %v11602_v12, 16  ;;  %v6646_v50 = vshll.u32 %v11602_v12, 16  ;;  %v6385_v39 = vmax.f32 %v6349_v25, 0.0  ;;  %v17604_v13 = vld [vmem:[#allocation17_spill] sm:$0xff] }
 0x4bc   : > { %7003 = vst.msk [vmem:[#allocation3 + $0x10] sm:$0xf] %vm2259_vm5, %v6630_v19  ;;  %v6665_v44 = vrot.slane %v6663_v49, 6  ;;  %v6668_v57 = vrot.slane %v6666_v18, 7  ;;  %v11605_v10 = vpack.c.bf16 %v6423_v58, %v6423_v58  ;;  %v6390_v55 = vmax.f32 %v6354_v42, 0.0 }
 0x4bd   : > { %v6645_v40 = vrot.slane %v6643_v3, 6  ;;  %v6648_v2 = vrot.slane %v6646_v50, 7  ;;  %v6421_v22 = vmul.f32 %v6385_v39, %v17601_v26  ;;  %v6352_v37 = vadd.f32 %v16032_v51, %v6190_v45 }
 0x4be   : > { %v6669_v62 = vor.u32 %v6668_v57, %v6665_v44  ;;  %v6673_v8 = vshrl.u32 %v11605_v10, 16  ;;  %v6676_v33 = vshll.u32 %v11605_v10, 16  ;;  %v6426_v46 = vmul.f32 %v6390_v55, %v17602_v47  ;;  %v17605_v44 = vld [vmem:[#allocation13_spill] sm:$0xff] }
 0x4bf   : > { %v6649_v9 = vor.u32 %v6648_v2, %v6645_v40  ;;  %v11603_v23 = vpack.c.bf16 %v6421_v22, %v6421_v22  ;;  %v6388_v14 = vmax.f32 %v6352_v37, 0.0  ;;  %v6355_v52 = vadd.f32 %v12557_v36, %v16032_v51  ;;  %v12560_v43 = vpop.f32.mrb[48].mxu1 }
 0x4c0   : > { %v6671_v7 = vrot.slane %v6669_v62, 4  ;;  %v6675_v31 = vrot.slane %v6673_v8, 6  ;;  %v6678_v1 = vrot.slane %v6676_v33, 7  ;;  %v11608_v35 = vpack.c.bf16 %v6426_v46, %v6426_v46  ;;  %v6206_v29 = vpop.f32.mrb[49].mxu1  ;;  %v17606_v46 = vld [vmem:[#allocation20_spill] sm:$0xff] }
 0x4c1   : > { %v6650_v15 = vsel %vm14704_vm11, %v6641_v38, %v6649_v9  ;;  %v6651_v34 = vrot.slane %v6649_v9, 4  ;;  %v6653_v27 = vshrl.u32 %v11603_v23, 16  ;;  %v6656_v48 = vshll.u32 %v11603_v23, 16  ;;  %v12561_v30 = vpop.f32.mrb[50].mxu1 }
 0x4c2   : > { %7005 = vst.msk [vmem:[#allocation3 + $0x18] sm:$0xf] %vm2259_vm5, %v6650_v15  ;;  %v6679_v54 = vor.u32 %v6678_v1, %v6675_v31  ;;  %v6703_v4 = vshrl.u32 %v11608_v35, 16  ;;  %v6706_v32 = vshll.u32 %v11608_v35, 16  ;;  %v6424_v5 = vmul.f32 %v6388_v14, %v17603_v53  ;;  %v6209_v56 = vpop.f32.mrb[51].mxu1 }
 0x4c3   : > { %v6655_v63 = vrot.slane %v6653_v27, 6  ;;  %v6658_v28 = vrot.slane %v6656_v48, 7  ;;  %v6391_v16 = vmax.f32 %v6355_v52, 0.0  ;;  %v6353_v60 = vadd.f32 %v16032_v51, %v6193_v0  ;;  %v17607_v52 = vld [vmem:[#allocation18_spill] sm:$0xff] }
 0x4c4   : > { %v6680_v41 = vsel %vm14704_vm11, %v6671_v7, %v6679_v54  ;;  %v6681_v38 = vrot.slane %v6679_v54, 4  ;;  %v6705_v6 = vrot.slane %v6703_v4, 6  ;;  %v6708_v21 = vrot.slane %v6706_v32, 7  ;;  %v17608_v32 = vld [vmem:[#allocation21_spill] sm:$0xff] }
 0x4c5   : > { %7008 = vst.msk [vmem:[#allocation3 + $0x24] sm:$0xf] %vm2259_vm5, %v6680_v41  ;;  %v6659_v45 = vor.u32 %v6658_v28, %v6655_v63  ;;  %v11606_v11 = vpack.c.bf16 %v6424_v5, %v6424_v5  ;;  %v6427_v12 = vmul.f32 %v6391_v16, %v17604_v13  ;;  %v6389_v25 = vmax.f32 %v6353_v60, 0.0 }
 0x4c6   : > { %v16078_v36 = vor.u32 %v6708_v21, %v6705_v6  ;;  %v6358_v49 = vadd.f32 %v12560_v43, %v16032_v51  ;;  %v6356_v18 = vadd.f32 %v16032_v51, %v6206_v29  ;;  %v6359_v20 = vadd.f32 %v12561_v30, %v16032_v51 }
 0x4c7   : > { %v6660_v58 = vsel %vm14704_vm11, %v6651_v34, %v6659_v45  ;;  %v6661_v42 = vrot.slane %v6659_v45, 4  ;;  %v6683_v0 = vshrl.u32 %v11606_v11, 16  ;;  %v6686_v19 = vshll.u32 %v11606_v11, 16  ;;  %v12564_v3 = vpop.f32.mrb[52].mxu1 }
 0x4c8   : > { %7006 = vst.msk [vmem:[#allocation3 + $0x1c] sm:$0xf] %vm2259_vm5, %v6660_v58  ;;  %v6711_v50 = vrot.slane %v16078_v36, 4  ;;  %v11609_v39 = vpack.c.bf16 %v6427_v12, %v6427_v12  ;;  %v6425_v57 = vmul.f32 %v6389_v25, %v17605_v44  ;;  %v6394_v10 = vmax.f32 %v6358_v49, 0.0  ;;  %v6222_v55 = vpop.f32.mrb[53].mxu1  ;;  %v13736_v44 = vld [vmem:[#allocation3 + $0x8] sm:$0xff]  }
 0x4c9   : > { %v6670_v40 = vsel %vm14704_vm11, %v6661_v42, %v6669_v62  ;;  %v6685_v2 = vrot.slane %v6683_v0, 6  ;;  %v6688_v26 = vrot.slane %v6686_v19, 7  ;;  %v6392_v22 = vmax.f32 %v6356_v18, 0.0  ;;  %v16090_v37 = vpop.f32.mrb[54].mxu1 }
 0x4ca   : > { %7007 = vst.msk [vmem:[#allocation3 + $0x20] sm:$0xf] %vm2259_vm5, %v6670_v40  ;;  %v6713_v8 = vshrl.u32 %v11609_v39, 16  ;;  %v6716_v33 = vshll.u32 %v11609_v39, 16  ;;  %v11607_v47 = vpack.c.bf16 %v6425_v57, %v6425_v57  ;;  %v6430_v9 = vmul.f32 %v6394_v10, %v17606_v46  ;;  %v16094_v23 = vpop.f32.mrb[55].mxu1 }
 0x4cb   : > { %v6689_v14 = vor.u32 %v6688_v26, %v6685_v2  ;;  %v6428_v43 = vmul.f32 %v6392_v22, %v17607_v52  ;;  %v6395_v7 = vmax.f32 %v6359_v20, 0.0  ;;  %v6357_v62 = vadd.f32 %v16032_v51, %v6209_v56 }
 0x4cc   : > { %v6715_v31 = vrot.slane %v6713_v8, 6  ;;  %v6718_v1 = vrot.slane %v6716_v33, 7  ;;  %v6693_v35 = vshrl.u32 %v11607_v47, 16  ;;  %v6696_v29 = vshll.u32 %v11607_v47, 16  ;;  %v17609_v33 = vld [vmem:[#allocation19_spill] sm:$0xff] }
 0x4cd   : > { %v6690_v15 = vsel %vm14704_vm11, %v6681_v38, %v6689_v14  ;;  %v6691_v34 = vrot.slane %v6689_v14, 4  ;;  %v11612_v27 = vpack.c.bf16 %v6430_v9, %v6430_v9  ;;  %v11610_v48 = vpack.c.bf16 %v6428_v43, %v6428_v43 }
 0x4ce   : > { %7009 = vst.msk [vmem:[#allocation3 + $0x28] sm:$0xf] %vm2259_vm5, %v6690_v15  ;;  %v6719_v30 = vor.u32 %v6718_v1, %v6715_v31  ;;  %v6695_v54 = vrot.slane %v6693_v35, 6  ;;  %v6698_v4 = vrot.slane %v6696_v29, 7  ;;  %v6431_v53 = vmul.f32 %v6395_v7, %v17608_v32  ;;  %v17610_v35 = vld [vmem:[#allocation24_spill] sm:$0xff]  ;;  %v17611_v15 = vld [vmem:[#allocation22_spill] sm:$0xff] }
 0x4cf   : > { %v6743_v5 = vshrl.u32 %v11612_v27, 16  ;;  %v6746_v63 = vshll.u32 %v11612_v27, 16  ;;  %v6723_v56 = vshrl.u32 %v11610_v48, 16  ;;  %v6726_v28 = vshll.u32 %v11610_v48, 16  ;;  %v16102_v16 = vpop.f32.mrb[56].mxu1 }
 0x4d0   : > { %v6720_v60 = vsel %vm14704_vm11, %v6711_v50, %v6719_v30  ;;  %v6721_v41 = vrot.slane %v6719_v30, 4  ;;  %v6699_v38 = vor.u32 %v6698_v4, %v6695_v54  ;;  %v11613_v6 = vpack.c.bf16 %v6431_v53, %v6431_v53  ;;  %v16106_v21 = vpop.f32.mrb[57].mxu1 }
 0x4d1   : > { %7012 = vst.msk [vmem:[#allocation3 + $0x34] sm:$0xf] %vm2259_vm5, %v6720_v60  ;;  %v6745_v45 = vrot.slane %v6743_v5, 6  ;;  %v6748_v11 = vrot.slane %v6746_v63, 7  ;;  %v6725_v13 = vrot.slane %v6723_v56, 6  ;;  %v6728_v12 = vrot.slane %v6726_v28, 7 }
 0x4d2   : > { %v16109_v25 = vpop.f32.mrb[58].mxu1  ;;  %v6700_v49 = vsel %vm14704_vm11, %v6691_v34, %v6699_v38  ;;  %v6701_v18 = vrot.slane %v6699_v38, 4  ;;  %v6753_v20 = vshrl.u32 %v11613_v6, 16  ;;  %v6756_v58 = vshll.u32 %v11613_v6, 16  ;;  %v17612_v60 = vld [vmem:[#allocation25_spill] sm:$0xff] }
 0x4d3   : > { %v16113_v42 = vpop.f32.mrb[59].mxu1  ;;  %7010 = vst.msk [vmem:[#allocation3 + $0x2c] sm:$0xf] %vm2259_vm5, %v6700_v49  ;;  %v16116_v0 = vor.u32 %v6748_v11, %v6745_v45  ;;  %v6729_v19 = vor.u32 %v6728_v12, %v6725_v13  ;;  %v6393_v50 = vmax.f32 %v6357_v62, 0.0  ;;  %v6362_v39 = vadd.f32 %v12564_v3, %v16032_v51 }
 0x4d4   : > { %v6710_v57 = vsel %vm14704_vm11, %v6701_v18, %v16078_v36  ;;  %v6755_v10 = vrot.slane %v6753_v20, 6  ;;  %v6758_v40 = vrot.slane %v6756_v58, 7  ;;  %v6360_v2 = vadd.f32 %v16032_v51, %v6222_v55  ;;  %v16133_v55 = vld [vmem:[#allocation3 + $0x10] sm:$0xff]   ;;  %v17613_v20 = vld [vmem:[#allocation23_spill] sm:$0xff] }
 0x4d5   : > { %7011 = vst.msk [vmem:[#allocation3 + $0x30] sm:$0xf] %vm2259_vm5, %v6710_v57  ;;  %v6751_v26 = vrot.slane %v16116_v0, 4  ;;  %v6730_v22 = vsel %vm14704_vm11, %v6721_v41, %v6729_v19  ;;  %v6731_v8 = vrot.slane %v6729_v19, 4  ;;  %v6429_v47 = vmul.f32 %v6393_v50, %v17609_v33 }
 0x4d6   : > { %7013 = vst.msk [vmem:[#allocation3 + $0x38] sm:$0xf] %vm2259_vm5, %v6730_v22  ;;  %v16129_v3 = vor.u32 %v6758_v40, %v6755_v10  ;;  %v6398_v46 = vmax.f32 %v6362_v39, 0.0  ;;  %v6396_v36 = vmax.f32 %v6360_v2, 0.0  ;;  %v6363_v9 = vadd.f32 %v16090_v37, %v16032_v51 }
 0x4d7   : > { %v11611_v14 = vpack.c.bf16 %v6429_v47, %v6429_v47  ;;  %v7183_v52 = vshll.u32 %v13736_v44, 16  ;;  %v7187_v43 = vshrl.u32 %v13736_v44, 16  ;;  %v6361_v7 = vadd.f32 %v16032_v51, %v16094_v23  ;;  %v16137_v62 = vpop.f32.mrb[60].mxu1 }
 0x4d8   : > { %v6760_v31 = vsel %vm14704_vm11, %v6751_v26, %v16129_v3  ;;  %v6761_v1 = vrot.slane %v16129_v3, 4  ;;  %v6434_v29 = vmul.f32 %v6398_v46, %v17610_v35  ;;  %v6432_v37 = vmul.f32 %v6396_v36, %v17611_v15  ;;  %v16145_v34 = vpop.f32.mrb[61].mxu1  ;;  %v16175_v35 = vld [vmem:[#allocation3 + $0x18] sm:$0xff]  }
 0x4d9   : > { %7016 = vst.msk [vmem:[#allocation3 + $0x44] sm:$0xf] %vm2259_vm5, %v6760_v31  ;;  %v6733_v27 = vshrl.u32 %v11611_v14, 16  ;;  %v6736_v48 = vshll.u32 %v11611_v14, 16  ;;  %v6399_v30 = vmax.f32 %v6363_v9, 0.0  ;;  %v7185_v23 = vrot.slane %v7183_v52, 1 }
 0x4da   : > { %v16148_v54 = vpop.f32.mrb[62].mxu1  ;;  %v11616_v4 = vpack.c.bf16 %v6434_v29, %v6434_v29  ;;  %v11614_v32 = vpack.c.bf16 %v6432_v37, %v6432_v37  ;;  %v6397_v53 = vmax.f32 %v6361_v7, 0.0  ;;  %v7191_v5 = vshll.u32 %v16133_v55, 16 }
 0x4db   : > { %v16151_v63 = vpop.f32.mrb[63].mxu1  ;;  %v6735_v56 = vrot.slane %v6733_v27, 6  ;;  %v6738_v28 = vrot.slane %v6736_v48, 7  ;;  %v6435_v41 = vmul.f32 %v6399_v30, %v17612_v60  ;;  %v7186_v38 = vsel %vm476_vm3, %v16044_v61, %v7185_v23 }
 0x4dc   : > { %v6783_v6 = vshrl.u32 %v11616_v4, 16  ;;  %v6786_v45 = vshll.u32 %v11616_v4, 16  ;;  %v6763_v11 = vshrl.u32 %v11614_v32, 16  ;;  %v6766_v13 = vshll.u32 %v11614_v32, 16  ;;  %12584 = vmatprep.mubr.msk.bf16.mxu0 %vm3146_vm12, %v7186_v38  ;;  %v16194_v4 = vld [vmem:[#allocation3 + $0x20] sm:$0xff]  }
 0x4dd   : > { %v6739_v12 = vor.u32 %v6738_v28, %v6735_v56  ;;  %v11617_v49 = vpack.c.bf16 %v6435_v41, %v6435_v41  ;;  %v7189_v18 = vor.u32 %v7187_v43, %v7185_v23  ;;  %v6433_v58 = vmul.f32 %v6397_v53, %v17613_v20  ;;  %v17614_v56 = vld [vmem:[#allocation28_spill] sm:$0xff] }
 0x4de   : > { %v6785_v19 = vrot.slane %v6783_v6, 6  ;;  %v6788_v50 = vrot.slane %v6786_v45, 7  ;;  %v6765_v39 = vrot.slane %v6763_v11, 6  ;;  %v6768_v44 = vrot.slane %v6766_v13, 7 }
 0x4df   : > { %v6740_v57 = vsel %vm14704_vm11, %v6731_v8, %v6739_v12  ;;  %v6741_v10 = vrot.slane %v6739_v12, 4  ;;  %v6793_v61 = vshrl.u32 %v11617_v49, 16  ;;  %v6796_v40 = vshll.u32 %v11617_v49, 16  ;;  %v16160_v2 = vpop.f32.mrb[64].mxu1  ;;  %v17616_v12 = vld [vmem:[#allocation29_spill] sm:$0xff] }
 0x4e0   : > { %7014 = vst.msk [vmem:[#allocation3 + $0x3c] sm:$0xf] %vm2259_vm5, %v6740_v57  ;;  %v6789_v26 = vor.u32 %v6788_v50, %v6785_v19  ;;  %v6769_v22 = vor.u32 %v6768_v44, %v6765_v39  ;;  %v11615_v33 = vpack.c.bf16 %v6433_v58, %v6433_v58  ;;  %v7193_v47 = vrot.slane %v7191_v5, 1  ;;  %v16163_v3 = vpop.f32.mrb[65].mxu1 }
 0x4e1   : > { %v6750_v46 = vsel %vm14704_vm11, %v6741_v10, %v16116_v0  ;;  %v6795_v36 = vrot.slane %v6793_v61, 6  ;;  %v6798_v9 = vrot.slane %v6796_v40, 7  ;;  %v6366_v8 = vadd.f32 %v16102_v16, %v16032_v51  ;;  %v16170_v14 = vpop.f32.mrb[66].mxu1  ;;  %v16182_v0 = vld [vmem:[%s17333_s6 + $0x10] sm:$0xff]  }
 0x4e2   : > { %7015 = vst.msk [vmem:[#allocation3 + $0x40] sm:$0xf] %vm2259_vm5, %v6750_v46  ;;  %v6791_v52 = vrot.slane %v6789_v26, 4  ;;  %v6770_v43 = vsel %vm14704_vm11, %v6761_v1, %v6769_v22  ;;  %v6771_v7 = vrot.slane %v6769_v22, 4  ;;  %v6773_v31 = vshrl.u32 %v11615_v33, 16  ;;  %v16177_v29 = vpop.f32.mrb[67].mxu1 }
 0x4e3   : > { %7017 = vst.msk [vmem:[#allocation3 + $0x48] sm:$0xf] %vm2259_vm5, %v6770_v43  ;;  %v16185_v16 = vor.u32 %v6798_v9, %v6795_v36  ;;  %v6776_v15 = vshll.u32 %v11615_v33, 16  ;;  %v7194_v37 = vsel %vm476_vm3, %v7189_v18, %v7193_v47  ;;  %v6402_v27 = vmax.f32 %v6366_v8, 0.0 }
 0x4e4   : > { %v6775_v1 = vrot.slane %v6773_v31, 6  ;;  %12585 = vmatmul.mubr.msk.bf16.vlgmr.msra.gmra.mrb[36].mxu0 %vm3146_vm12, %v7194_v37  ;;  %v6364_v48 = vadd.f32 %v16032_v51, %v16106_v21  ;;  %v6367_v30 = vadd.f32 %v16109_v25, %v16032_v51  ;;  %v7195_v23 = vshrl.u32 %v16133_v55, 16  ;;  %v17617_v31 = vld [vmem:[#allocation27_spill] sm:$0xff] }
 0x4e5   : > { %v6800_v32 = vsel %vm14704_vm11, %v6791_v52, %v16185_v16  ;;  %v6801_v53 = vrot.slane %v16185_v16, 4  ;;  %v6778_v5 = vrot.slane %v6776_v15, 7  ;;  %12621 = vmatpush3.bf16.msra.mxu0 %v16024_v59  ;;  %v6438_v28 = vmul.f32 %v6402_v27, %v17614_v56  ;;  %v17615_v59 = vld [vmem:[#allocation26_spill] sm:$0xff] }
 0x4e6   : > { %7020 = vst.msk [vmem:[#allocation3 + $0x54] sm:$0xf] %vm2259_vm5, %v6800_v32  ;;  %v6400_v21 = vmax.f32 %v6364_v48, 0.0  ;;  %v6403_v60 = vmax.f32 %v6367_v30, 0.0  ;;  %v7197_v25 = vor.u32 %v7195_v23, %v7193_v47  ;;  %v7199_v55 = vshll.u32 %v16175_v35, 16  ;;  %12658 = vmatprep.subr.bf16.mxu0 %v16182_v0  ;;  %v16230_v23 = vld [vmem:[#allocation3 + $0x28] sm:$0xff]  }
 0x4e7   : > { %v6779_v41 = vor.u32 %v6778_v5, %v6775_v1  ;;  %v11620_v38 = vpack.c.bf16 %v6438_v28, %v6438_v28  ;;  %v6365_v6 = vadd.f32 %v16032_v51, %v16113_v42  ;;  %v7203_v45 = vshrl.u32 %v16175_v35, 16  ;;  %v16208_v11 = vpop.f32.mrb[68].mxu1 }
 0x4e8   : > { %v6436_v13 = vmul.f32 %v6400_v21, %v17615_v59  ;;  %v6439_v49 = vmul.f32 %v6403_v60, %v17616_v12  ;;  %v7201_v18 = vrot.slane %v7199_v55, 1  ;;  %v7207_v20 = vshll.u32 %v16194_v4, 16  ;;  %v16213_v58 = vpop.f32.mrb[69].mxu1 }
 0x4e9   : > { %v6780_v19 = vsel %vm14704_vm11, %v6771_v7, %v6779_v41  ;;  %v6781_v50 = vrot.slane %v6779_v41, 4  ;;  %v6823_v39 = vshrl.u32 %v11620_v38, 16  ;;  %v6826_v44 = vshll.u32 %v11620_v38, 16  ;;  %v16219_v40 = vpop.f32.mrb[70].mxu1  ;;  %v17618_v38 = vld [vmem:[#allocation32_spill] sm:$0xff] }
 0x4ea   : > { %7018 = vst.msk [vmem:[#allocation3 + $0x4c] sm:$0xf] %vm2259_vm5, %v6780_v19  ;;  %v11618_v42 = vpack.c.bf16 %v6436_v13, %v6436_v13  ;;  %v11621_v57 = vpack.c.bf16 %v6439_v49, %v6439_v49  ;;  %v7202_v10 = vsel %vm476_vm3, %v7197_v25, %v7201_v18  ;;  %v6401_v61 = vmax.f32 %v6365_v6, 0.0  ;;  %v16224_v36 = vpop.f32.mrb[71].mxu1 }
 0x4eb   : > { %v6790_v22 = vsel %vm14704_vm11, %v6781_v50, %v6789_v26  ;;  %v6825_v33 = vrot.slane %v6823_v39, 6  ;;  %v6828_v47 = vrot.slane %v6826_v44, 7  ;;  %12588 = vmatprep.mubr.msk.bf16.mxu0 %vm3146_vm12, %v7202_v10  ;;  %v7205_v46 = vor.u32 %v7203_v45, %v7201_v18  ;;  %v16255_v39 = vld [vmem:[#allocation3 + $0x30] sm:$0xff]   ;;  %v17619_v10 = vld [vmem:[#allocation30_spill] sm:$0xff] }
 0x4ec   : > { %7019 = vst.msk [vmem:[#allocation3 + $0x50] sm:$0xf] %vm2259_vm5, %v6790_v22  ;;  %v6803_v9 = vshrl.u32 %v11618_v42, 16  ;;  %v6806_v8 = vshll.u32 %v11618_v42, 16  ;;  %v6833_v52 = vshrl.u32 %v11621_v57, 16  ;;  %v6836_v43 = vshll.u32 %v11621_v57, 16 }
 0x4ed   : > { %v6829_v7 = vor.u32 %v6828_v47, %v6825_v33  ;;  %v6437_v15 = vmul.f32 %v6401_v61, %v17617_v31  ;;  %v7209_v37 = vrot.slane %v7207_v20, 1  ;;  %v6370_v26 = vadd.f32 %v16137_v62, %v16032_v51  ;;  %v17620_v22 = vld [vmem:[#allocation33_spill] sm:$0xff] }
 0x4ee   : > { %v6805_v27 = vrot.slane %v6803_v9, 6  ;;  %v6808_v1 = vrot.slane %v6806_v8, 7  ;;  %v6835_v48 = vrot.slane %v6833_v52, 6  ;;  %v6838_v30 = vrot.slane %v6836_v43, 7 }
 0x4ef   : > { %v6831_v32 = vrot.slane %v6829_v7, 4  ;;  %v11619_v5 = vpack.c.bf16 %v6437_v15, %v6437_v15  ;;  %v7210_v56 = vsel %vm476_vm3, %v7205_v46, %v7209_v37  ;;  %v6406_v28 = vmax.f32 %v6370_v26, 0.0  ;;  %v17621_v26 = vld [vmem:[#allocation31_spill] sm:$0xff] }
 0x4f0   : > { %v6809_v21 = vor.u32 %v6808_v1, %v6805_v27  ;;  %v16233_v60 = vor.u32 %v6838_v30, %v6835_v48  ;;  %12589 = vmatmul.mubr.msk.bf16.gmra.mrb[40].mxu0 %vm3146_vm12, %v7210_v56  ;;  %v6368_v25 = vadd.f32 %v16032_v51, %v16145_v34  ;;  %v6371_v62 = vadd.f32 %v16148_v54, %v16032_v51 }
 0x4f1   : > { %v6813_v55 = vshrl.u32 %v11619_v5, 16  ;;  %v6816_v41 = vshll.u32 %v11619_v5, 16  ;;  %v6442_v6 = vmul.f32 %v6406_v28, %v17618_v38  ;;  %v7211_v45 = vshrl.u32 %v16194_v4, 16 }
 0x4f2   : > { %v6810_v59 = vsel %vm14704_vm11, %v6801_v53, %v6809_v21  ;;  %v6811_v13 = vrot.slane %v6809_v21, 4  ;;  %v6840_v12 = vsel %vm14704_vm11, %v6831_v32, %v16233_v60  ;;  %v6841_v34 = vrot.slane %v16233_v60, 4 }
 0x4f3   : > { %7021 = vst.msk [vmem:[#allocation3 + $0x58] sm:$0xf] %vm2259_vm5, %v6810_v59  ;;  %7024 = vst.msk [vmem:[#allocation3 + $0x64] sm:$0xf] %vm2259_vm5, %v6840_v12  ;;  %v6815_v54 = vrot.slane %v6813_v55, 6  ;;  %v6818_v49 = vrot.slane %v6816_v41, 7  ;;  %v11624_v18 = vpack.c.bf16 %v6442_v6, %v6442_v6  ;;  %v7213_v16 = vor.u32 %v7211_v45, %v7209_v37 }
 0x4f4   : > { %v6404_v20 = vmax.f32 %v6368_v25, 0.0  ;;  %v6407_v19 = vmax.f32 %v6371_v62, 0.0  ;;  %v7215_v50 = vshll.u32 %v16230_v23, 16  ;;  %v6369_v53 = vadd.f32 %v16032_v51, %v16151_v63 }
 0x4f5   : > { %v6819_v44 = vor.u32 %v6818_v49, %v6815_v54  ;;  %v6863_v42 = vshrl.u32 %v11624_v18, 16  ;;  %v6866_v57 = vshll.u32 %v11624_v18, 16  ;;  %v7219_v9 = vshrl.u32 %v16230_v23, 16 }
 0x4f6   : > { %v6440_v61 = vmul.f32 %v6404_v20, %v17619_v10  ;;  %v6443_v33 = vmul.f32 %v6407_v19, %v17620_v22  ;;  %v7217_v47 = vrot.slane %v7215_v50, 1  ;;  %v6405_v46 = vmax.f32 %v6369_v53, 0.0  ;;  %v16280_v20 = vld [vmem:[#allocation3 + $0x38] sm:$0xff]   ;;  %v17622_v50 = vld [vmem:[#allocation36_spill] sm:$0xff] }
 0x4f7   : > { %v6820_v8 = vsel %vm14704_vm11, %v6811_v13, %v6819_v44  ;;  %v6821_v52 = vrot.slane %v6819_v44, 4  ;;  %v6865_v43 = vrot.slane %v6863_v42, 6  ;;  %v6868_v31 = vrot.slane %v6866_v57, 7 }
 0x4f8   : > { %7022 = vst.msk [vmem:[#allocation3 + $0x5c] sm:$0xf] %vm2259_vm5, %v6820_v8  ;;  %v11622_v63 = vpack.c.bf16 %v6440_v61, %v6440_v61  ;;  %v11625_v15 = vpack.c.bf16 %v6443_v33, %v6443_v33  ;;  %v7218_v37 = vsel %vm476_vm3, %v7213_v16, %v7217_v47  ;;  %v6441_v27 = vmul.f32 %v6405_v46, %v17621_v26  ;;  %v17624_v26 = vld [vmem:[#allocation37_spill] sm:$0xff] }
 0x4f9   : > { %v6830_v1 = vsel %vm14704_vm11, %v6821_v52, %v6829_v7  ;;  %v6869_v48 = vor.u32 %v6868_v31, %v6865_v43  ;;  %12592 = vmatprep.mubr.msk.bf16.mxu0 %vm3146_vm12, %v7218_v37  ;;  %v7221_v30 = vor.u32 %v7219_v9, %v7217_v47  ;;  %v7223_v32 = vshll.u32 %v16255_v39, 16  ;;  %v16292_v47 = vld [vmem:[#allocation3 + $0x40] sm:$0xff]  }
 0x4fa   : > { %7023 = vst.msk [vmem:[#allocation3 + $0x60] sm:$0xf] %vm2259_vm5, %v6830_v1  ;;  %v6843_v5 = vshrl.u32 %v11622_v63, 16  ;;  %v6846_v56 = vshll.u32 %v11622_v63, 16  ;;  %v6873_v28 = vshrl.u32 %v11625_v15, 16  ;;  %v6876_v21 = vshll.u32 %v11625_v15, 16 }
 0x4fb   : > { %v6871_v60 = vrot.slane %v6869_v48, 4  ;;  %v11623_v25 = vpack.c.bf16 %v6441_v27, %v6441_v27  ;;  %v7225_v62 = vrot.slane %v7223_v32, 1  ;;  %v6374_v55 = vadd.f32 %v16160_v2, %v16032_v51  ;;  %v17623_v15 = vld [vmem:[#allocation34_spill] sm:$0xff] }
 0x4fc   : > { %v6845_v41 = vrot.slane %v6843_v5, 6  ;;  %v6848_v7 = vrot.slane %v6846_v56, 7  ;;  %v6875_v38 = vrot.slane %v6873_v28, 6  ;;  %v6878_v6 = vrot.slane %v6876_v21, 7 }
 0x4fd   : > { %v6853_v45 = vshrl.u32 %v11623_v25, 16  ;;  %v6856_v59 = vshll.u32 %v11623_v25, 16  ;;  %v7226_v13 = vsel %vm476_vm3, %v7221_v30, %v7225_v62  ;;  %v6410_v12 = vmax.f32 %v6374_v55, 0.0 }
 0x4fe   : > { %v6849_v54 = vor.u32 %v6848_v7, %v6845_v41  ;;  %v16273_v49 = vor.u32 %v6878_v6, %v6875_v38  ;;  %12593 = vmatmul.mubr.msk.bf16.gmra.mrb[44].mxu0 %vm3146_vm12, %v7226_v13  ;;  %v6372_v18 = vadd.f32 %v16032_v51, %v16163_v3  ;;  %v6375_v2 = vadd.f32 %v16170_v14, %v16032_v51 }
 0x4ff   : > { %v6855_v19 = vrot.slane %v6853_v45, 6  ;;  %v6858_v16 = vrot.slane %v6856_v59, 7  ;;  %v6446_v53 = vmul.f32 %v6410_v12, %v17622_v50  ;;  %v7227_v44 = vshrl.u32 %v16255_v39, 16 }
 0x500   : > { %v6850_v42 = vsel %vm14704_vm11, %v6841_v34, %v6849_v54  ;;  %v6851_v57 = vrot.slane %v6849_v54, 4  ;;  %v6880_v10 = vsel %vm14704_vm11, %v6871_v60, %v16273_v49  ;;  %v6881_v3 = vrot.slane %v16273_v49, 4  ;;  %v17625_v60 = vld [vmem:[#allocation35_spill] sm:$0xff]  ;;  %v17627_v49 = vld [vmem:[#allocation38_spill] sm:$0xff] }
 0x501   : > { %7025 = vst.msk [vmem:[#allocation3 + $0x68] sm:$0xf] %vm2259_vm5, %v6850_v42  ;;  %7028 = vst.msk [vmem:[#allocation3 + $0x74] sm:$0xf] %vm2259_vm5, %v6880_v10  ;;  %v6859_v14 = vor.u32 %v6858_v16, %v6855_v19  ;;  %v11628_v61 = vpack.c.bf16 %v6446_v53, %v6446_v53  ;;  %v6408_v22 = vmax.f32 %v6372_v18, 0.0  ;;  %v6411_v33 = vmax.f32 %v6375_v2, 0.0 }
 0x502   : > { %v7229_v46 = vor.u32 %v7227_v44, %v7225_v62  ;;  %v7231_v34 = vshll.u32 %v16280_v20, 16  ;;  %v6373_v9 = vadd.f32 %v16032_v51, %v16177_v29  ;;  %v7235_v8 = vshrl.u32 %v16280_v20, 16  ;;  %v17626_v42 = vld [vmem:[#allocation40_spill] sm:$0xff] }
 0x503   : > { %v6860_v52 = vsel %vm14704_vm11, %v6851_v57, %v6859_v14  ;;  %v6861_v43 = vrot.slane %v6859_v14, 4  ;;  %v6903_v31 = vshrl.u32 %v11628_v61, 16  ;;  %v6906_v63 = vshll.u32 %v11628_v61, 16 }
 0x504   : > { %7026 = vst.msk [vmem:[#allocation3 + $0x6c] sm:$0xf] %vm2259_vm5, %v6860_v52  ;;  %v6444_v37 = vmul.f32 %v6408_v22, %v17623_v15  ;;  %v6447_v27 = vmul.f32 %v6411_v33, %v17624_v26  ;;  %v7233_v1 = vrot.slane %v7231_v34, 1  ;;  %v6409_v30 = vmax.f32 %v6373_v9, 0.0  ;;  %v16321_v22 = vld [vmem:[#allocation3 + $0x48] sm:$0xff]  }
 0x505   : > { %v6870_v32 = vsel %vm14704_vm11, %v6861_v43, %v6869_v48  ;;  %v6905_v51 = vrot.slane %v6903_v31, 6  ;;  %v6908_v29 = vrot.slane %v6906_v63, 7  ;;  %v7239_v5 = vshll.u32 %v16292_v47, 16  ;;  %v13816_v48 = vld [vmem:[%s17332_s5] ss:$0 sm:$0xff] }
 0x506   : > { %7027 = vst.msk [vmem:[#allocation3 + $0x70] sm:$0xf] %vm2259_vm5, %v6870_v32  ;;  %v11626_v56 = vpack.c.bf16 %v6444_v37, %v6444_v37  ;;  %v11629_v28 = vpack.c.bf16 %v6447_v27, %v6447_v27  ;;  %v7234_v21 = vsel %vm476_vm3, %v7229_v46, %v7233_v1  ;;  %v6445_v25 = vmul.f32 %v6409_v30, %v17625_v60  ;;  %v16332_v31 = vld [vmem:[#allocation3 + $0x50] sm:$0xff]  }
 0x507   : > { %v6909_v62 = vor.u32 %v6908_v29, %v6905_v51  ;;  %12596 = vmatprep.mubr.msk.bf16.mxu0 %vm3146_vm12, %v7234_v21  ;;  %v7237_v55 = vor.u32 %v7235_v8, %v7233_v1  ;;  %v7241_v41 = vrot.slane %v7239_v5, 1  ;;  %v6378_v7 = vadd.f32 %v13816_v48, %v16208_v11 }
 0x508   : > { %v6883_v38 = vshrl.u32 %v11626_v56, 16  ;;  %v6886_v6 = vshll.u32 %v11626_v56, 16  ;;  %v6913_v45 = vshrl.u32 %v11629_v28, 16  ;;  %v6916_v59 = vshll.u32 %v11629_v28, 16  ;;  %v17628_v28 = vld [vmem:[#allocation41_spill] sm:$0xff] }
 0x509   : > { %v6911_v13 = vrot.slane %v6909_v62, 4  ;;  %v11627_v12 = vpack.c.bf16 %v6445_v25, %v6445_v25  ;;  %v7242_v54 = vsel %vm476_vm3, %v7237_v55, %v7241_v41  ;;  %v6414_v18 = vmax.f32 %v6378_v7, 0.0  ;;  %v16349_v7 = vld [vmem:[#allocation3 + $0x58] sm:$0xff]  }
 0x50a   : > { %v6885_v2 = vrot.slane %v6883_v38, 6  ;;  %v6888_v19 = vrot.slane %v6886_v6, 7  ;;  %v6915_v16 = vrot.slane %v6913_v45, 6  ;;  %v6918_v50 = vrot.slane %v6916_v59, 7  ;;  %12597 = vmatmul.mubr.msk.bf16.gmra.mrb[48].mxu0 %vm3146_vm12, %v7242_v54 }
 0x50b   : > { %v6893_v53 = vshrl.u32 %v11627_v12, 16  ;;  %v6896_v44 = vshll.u32 %v11627_v12, 16  ;;  %v6450_v57 = vmul.f32 %v6414_v18, %v17626_v42  ;;  %v6376_v11 = vadd.f32 %v13816_v48, %v16213_v58 }
 0x50c   : > { %v6889_v10 = vor.u32 %v6888_v19, %v6885_v2  ;;  %v16318_v14 = vor.u32 %v6918_v50, %v6915_v16  ;;  %v6379_v61 = vadd.f32 %v13816_v48, %v16219_v40  ;;  %v7243_v33 = vshrl.u32 %v16292_v47, 16  ;;  %v16356_v2 = vld [vmem:[#allocation3 + $0x60] sm:$0xff]  }
 0x50d   : > { %v6895_v46 = vrot.slane %v6893_v53, 6  ;;  %v6898_v34 = vrot.slane %v6896_v44, 7  ;;  %v11632_v9 = vpack.c.bf16 %v6450_v57, %v6450_v57  ;;  %v6412_v8 = vmax.f32 %v6376_v11, 0.0 }
 0x50e   : > { %v6890_v52 = vsel %vm14704_vm11, %v6881_v3, %v6889_v10  ;;  %v6891_v43 = vrot.slane %v6889_v10, 4  ;;  %v6920_v58 = vsel %vm14704_vm11, %v6911_v13, %v16318_v14  ;;  %v6921_v40 = vrot.slane %v16318_v14, 4 }
 0x50f   : > { %7029 = vst.msk [vmem:[#allocation3 + $0x78] sm:$0xf] %vm2259_vm5, %v6890_v52  ;;  %7032 = vst.msk [vmem:[#allocation3 + $0x84] sm:$0xf] %vm2259_vm5, %v6920_v58  ;;  %v6899_v63 = vor.u32 %v6898_v34, %v6895_v46  ;;  %v6943_v15 = vshrl.u32 %v11632_v9, 16  ;;  %v6946_v37 = vshll.u32 %v11632_v9, 16  ;;  %v6448_v26 = vmul.f32 %v6412_v8, %v17627_v49 }
 0x510   : > { %v6415_v27 = vmax.f32 %v6379_v61, 0.0  ;;  %v7245_v3 = vor.u32 %v7243_v33, %v7241_v41  ;;  %v7247_v1 = vshll.u32 %v16321_v22, 16  ;;  %v6377_v30 = vadd.f32 %v13816_v48, %v16224_v36  ;;  %v16363_v46 = vld [vmem:[#allocation3 + $0x68] sm:$0xff]   ;;  %v7037_v49 = vld [vmem:[#allocation3 + $0x98] sm:$0x3] }
 0x511   : > { %v6900_v32 = vsel %vm14704_vm11, %v6891_v43, %v6899_v63  ;;  %v6901_v51 = vrot.slane %v6899_v63, 4  ;;  %v6945_v29 = vrot.slane %v6943_v15, 6  ;;  %v6948_v5 = vrot.slane %v6946_v37, 7  ;;  %v16365_v43 = vld [vmem:[#allocation3 + $0x70] sm:$0xff]  }
 0x512   : > { %7030 = vst.msk [vmem:[#allocation3 + $0x7c] sm:$0xf] %vm2259_vm5, %v6900_v32  ;;  %v11630_v56 = vpack.c.bf16 %v6448_v26, %v6448_v26  ;;  %v6451_v21 = vmul.f32 %v6415_v27, %v17628_v28  ;;  %v7249_v60 = vrot.slane %v7247_v1, 1  ;;  %v6413_v25 = vmax.f32 %v6377_v30, 0.0 }
 0x513   : > { %v6910_v55 = vsel %vm14704_vm11, %v6901_v51, %v6909_v62  ;;  %v16345_v41 = vor.u32 %v6948_v5, %v6945_v29  ;;  %v7251_v36 = vshrl.u32 %v16321_v22, 16  ;;  %v7255_v48 = vshll.u32 %v16332_v31, 16  ;;  %v17629_v62 = vld [vmem:[#allocation39_spill] sm:$0xff] }
 0x514   : > { %7031 = vst.msk [vmem:[#allocation3 + $0x80] sm:$0xf] %vm2259_vm5, %v6910_v55  ;;  %v6923_v38 = vshrl.u32 %v11630_v56, 16  ;;  %v6926_v6 = vshll.u32 %v11630_v56, 16  ;;  %v11633_v45 = vpack.c.bf16 %v6451_v21, %v6451_v21  ;;  %v7250_v59 = vsel %vm476_vm3, %v7245_v3, %v7249_v60 }
 0x515   : > { %v6951_v13 = vrot.slane %v16345_v41, 4  ;;  %12600 = vmatprep.mubr.msk.bf16.mxu0 %vm3146_vm12, %v7250_v59  ;;  %v6449_v12 = vmul.f32 %v6413_v25, %v17629_v62  ;;  %v7253_v54 = vor.u32 %v7251_v36, %v7249_v60  ;;  %v7257_v18 = vrot.slane %v7255_v48, 1 }
 0x516   : > { %v6925_v19 = vrot.slane %v6923_v38, 6  ;;  %v6928_v16 = vrot.slane %v6926_v6, 7  ;;  %v6953_v50 = vshrl.u32 %v11633_v45, 16  ;;  %v6956_v53 = vshll.u32 %v11633_v45, 16 }
 0x517   : > { %v11631_v44 = vpack.c.bf16 %v6449_v12, %v6449_v12  ;;  %v7258_v42 = vsel %vm476_vm3, %v7253_v54, %v7257_v18  ;;  %v7259_v57 = vshrl.u32 %v16332_v31, 16  ;;  %v7263_v11 = vshll.u32 %v16349_v7, 16 }
 0x518   : > { %v6929_v10 = vor.u32 %v6928_v16, %v6925_v19  ;;  %v6955_v14 = vrot.slane %v6953_v50, 6  ;;  %v6958_v61 = vrot.slane %v6956_v53, 7  ;;  %12601 = vmatmul.mubr.msk.bf16.gmra.mrb[52].mxu0 %vm3146_vm12, %v7258_v42  ;;  %v7267_v33 = vshrl.u32 %v16349_v7, 16 }
 0x519   : > { %v6933_v34 = vshrl.u32 %v11631_v44, 16  ;;  %v6936_v9 = vshll.u32 %v11631_v44, 16  ;;  %v7261_v8 = vor.u32 %v7259_v57, %v7257_v18  ;;  %v7265_v52 = vrot.slane %v7263_v11, 1 }
 0x51a   : > { %v6930_v58 = vsel %vm14704_vm11, %v6921_v40, %v6929_v10  ;;  %v6931_v63 = vrot.slane %v6929_v10, 4  ;;  %v6959_v15 = vor.u32 %v6958_v61, %v6955_v14  ;;  %v7271_v37 = vshll.u32 %v16356_v2, 16  ;;  %v16375_v40 = vld [vmem:[#allocation3 + $0x78] sm:$0xff]  }
 0x51b   : > { %7033 = vst.msk [vmem:[#allocation3 + $0x88] sm:$0xf] %vm2259_vm5, %v6930_v58  ;;  %v6935_v26 = vrot.slane %v6933_v34, 6  ;;  %v6938_v27 = vrot.slane %v6936_v9, 7  ;;  %v7266_v3 = vsel %vm476_vm3, %v7261_v8, %v7265_v52  ;;  %v7269_v1 = vor.u32 %v7267_v33, %v7265_v52 }
 0x51c   : > { %v6960_v30 = vsel %vm14704_vm11, %v6951_v13, %v6959_v15  ;;  %v6961_v32 = vrot.slane %v6959_v15, 4  ;;  %12604 = vmatprep.mubr.msk.bf16.mxu0 %vm3146_vm12, %v7266_v3  ;;  %v7273_v51 = vrot.slane %v7271_v37, 1  ;;  %v7275_v5 = vshrl.u32 %v16356_v2, 16  ;;  %v16390_v13 = vld [vmem:[#allocation3 + $0x80] sm:$0xff]   ;;  %v16417_v15 = vld [vmem:[#allocation3 + $0xc] sm:$0xf] }
 0x51d   : > { %7036 = vst.msk [vmem:[#allocation3 + $0x94] sm:$0xf] %vm2259_vm5, %v6960_v30  ;;  %v6939_v29 = vor.u32 %v6938_v27, %v6935_v26  ;;  %v7279_v56 = vshll.u32 %v16363_v46, 16  ;;  %v7287_v28 = vshll.u32 %v16365_v43, 16  ;;  %v7283_v55 = vshrl.u32 %v16363_v46, 16  ;;  %v16422_v26 = vld [vmem:[#allocation3 + $0x10] sm:$0xff]  }
 0x51e   : > { %v7038_v60 = vsel %vm15175_vm14, %v6961_v32, %v7037_v49  ;;  %v7274_v25 = vsel %vm476_vm3, %v7269_v1, %v7273_v51  ;;  %v7277_v38 = vor.u32 %v7275_v5, %v7273_v51  ;;  %v7295_v59 = vshll.u32 %v16375_v40, 16  ;;  %v8096_v37 = vld [vmem:[#allocation3 + $0x8] sm:$0xe]  ;;  %v16425_v3 = vld [vmem:[#allocation3 + $0x18] sm:$0xff]   ;;  %v16427_v1 = vld [vmem:[#allocation3 + $0x20] sm:$0xff]  }
 0x51f   : > { %7039 = vst [vmem:[#allocation3 + $0x98] sm:$0x3] %v7038_v60  ;;  %v6940_v36 = vsel %vm14704_vm11, %v6931_v63, %v6939_v29  ;;  %v6941_v48 = vrot.slane %v6939_v29, 4  ;;  %v7281_v6 = vrot.slane %v7279_v56, 1  ;;  %v7289_v45 = vrot.slane %v7287_v28, 1  ;;  %v16430_v30 = vld [vmem:[#allocation3 + $0x28] sm:$0xff]  }
 0x520   : > { %7034 = vst.msk [vmem:[#allocation3 + $0x8c] sm:$0xf] %vm2259_vm5, %v6940_v36  ;;  %12605 = vmatmul.mubr.msk.bf16.gmra.mrb[56].mxu0 %vm3146_vm12, %v7274_v25  ;;  %v7291_v18 = vshrl.u32 %v16365_v43, 16  ;;  %v7297_v19 = vrot.slane %v7295_v59, 1  ;;  %v7303_v50 = vshll.u32 %v16390_v13, 16  ;;  %v7299_v24 = vshrl.u32 %v16375_v40, 16 }
 0x521   : > { %v6950_v62 = vsel %vm14704_vm11, %v6941_v48, %v16345_v41  ;;  %v7282_v12 = vsel %vm476_vm3, %v7277_v38, %v7281_v6  ;;  %v7285_v54 = vor.u32 %v7283_v55, %v7281_v6  ;;  %v7307_v14 = vshrl.u32 %v16390_v13, 16  ;;  %v16437_v5 = vld [vmem:[#allocation3 + $0x30] sm:$0xff]   ;;  %v16442_v36 = vld [vmem:[#allocation3 + $0x38] sm:$0xff]  }
 0x522   : > { %7035 = vst.msk [vmem:[#allocation3 + $0x90] sm:$0xf] %vm2259_vm5, %v6950_v62  ;;  %12608 = vmatprep.mubr.msk.bf16.mxu0 %vm3146_vm12, %v7282_v12  ;;  %v7293_v16 = vor.u32 %v7291_v18, %v7289_v45  ;;  %v7305_v42 = vrot.slane %v7303_v50, 1  ;;  %v7301_v57 = vor.u32 %v7299_v24, %v7297_v19  ;;  %v16420_v49 = vcombine.low %v8096_v37, %v16417_v15  ;;  %v16450_v18 = vld [vmem:[#allocation3 + $0x48] sm:$0xff]  }
 0x523   : > { %v7290_v53 = vsel %vm476_vm3, %v7285_v54, %v7289_v45  ;;  %v8555_v29 = vshrl.u32 %v16422_v26, 16  ;;  %v8558_v56 = vshll.u32 %v16422_v26, 16  ;;  %v8564_v28 = vshrl.u32 %v16425_v3, 16  ;;  %v16448_v54 = vld [vmem:[#allocation3 + $0x40] sm:$0xff]  }
 0x524   : > { %v7298_v44 = vsel %vm476_vm3, %v7293_v16, %v7297_v19  ;;  %v7309_v33 = vor.u32 %v7307_v14, %v7305_v42  ;;  %v7306_v34 = vsel %vm476_vm3, %v7301_v57, %v7305_v42  ;;  %v8547_v32 = vshrl.u32 %v16420_v49, 16 }
 0x525   : > { %v8550_v51 = vshll.u32 %v16420_v49, 16  ;;  %v8567_v21 = vshll.u32 %v16425_v3, 16  ;;  %v8557_v55 = vrot.slane %v8555_v29, 1  ;;  %v8560_v48 = vrot.slane %v8558_v56, 2 }
 0x526   : > { %v8549_v60 = vrot.slane %v8547_v32, 1  ;;  %v8566_v38 = vrot.slane %v8564_v28, 1  ;;  %v8573_v45 = vshrl.u32 %v16427_v1, 16  ;;  %v8582_v62 = vshrl.u32 %v16430_v30, 16  ;;  %v16478_v32 = vld [vmem:[#allocation3 + $0x58] sm:$0xff]  }
 0x527   : > { %v16403_v41 = vld [vmem:[#allocation3 + $0x88] sm:$0xff]   ;;  %v8552_v25 = vrot.slane %v8550_v51, 2  ;;  %v8569_v6 = vrot.slane %v8567_v21, 2  ;;  %v8585_v12 = vshll.u32 %v16430_v30, 16  ;;  %v8561_v19 = vor.u32 %v8560_v48, %v8557_v55  ;;  %v16484_v21 = vld [vmem:[#allocation3 + $0x60] sm:$0xff]  }
 0x528   : > { %12609 = vmatmul.mubr.msk.bf16.gmra.mrb[60].mxu0 %vm3146_vm12, %v7290_v53  ;;  %v7311_v11 = vshll.u32 %v16403_v41, 16  ;;  %v7315_v52 = vshrl.u32 %v16403_v41, 16  ;;  %v8575_v50 = vrot.slane %v8573_v45, 1  ;;  %v8591_v53 = vshrl.u32 %v16437_v5, 16 }
 0x529   : > { %12612 = vmatprep.mubr.msk.bf16.mxu0 %vm3146_vm12, %v7298_v44  ;;  %v16408_v10 = vld [vmem:[#allocation3 + $0x90] ss:$0 sps:$4 sm:$0x11]   ;;  %v8553_v59 = vor.u32 %v8552_v25, %v8549_v60  ;;  %v8570_v16 = vor.u32 %v8569_v6, %v8566_v38  ;;  %v8584_v42 = vrot.slane %v8582_v62, 1  ;;  %v8587_v57 = vrot.slane %v8585_v12, 2 }
 0x52a   : > { %v7313_v61 = vrot.slane %v7311_v11, 1  ;;  %v7319_v9 = vshll.u32 %v16408_v10, 16  ;;  %v16456_v44 = vld [vmem:[%s17333_s6 + $0x18] sm:$0xff]   ;;  %v8594_v11 = vshll.u32 %v16437_v5, 16  ;;  %v8603_v37 = vshll.u32 %v16442_v36, 16 }
 0x52b   : > { %v16460_v14 = vsel %vm1523_vm4, %v8553_v59, %v8561_v19  ;;  %v8609_v29 = vshrl.u32 %v16448_v54, 16  ;;  %v8612_v56 = vshll.u32 %v16448_v54, 16  ;;  %v8618_v28 = vshrl.u32 %v16450_v18, 16  ;;  %v16493_v59 = vld [vmem:[#allocation3 + $0x68] sm:$0xff]  }
 0x52c   : > { %v7314_v8 = vsel %vm476_vm3, %v7309_v33, %v7313_v61  ;;  %v7317_v58 = vor.u32 %v7315_v52, %v7313_v61  ;;  %v7321_v63 = vrot.slane %v7319_v9, 1  ;;  %17631 = vst [vmem:[#allocation45_spill] sm:$0xff] %v16460_v14  ;;  %v16463_v61 = vsel %vm1523_vm4, %v8561_v19, %v8570_v16  ;;  %v16466_v9 = vld [vmem:[#allocation3 + $0x8] sm:$0xff]  }
 0x52d   : > { %17632 = vst [vmem:[#allocation48_spill] sm:$0xff] %v16463_v61  ;;  %v8593_v33 = vrot.slane %v8591_v53, 1  ;;  %v8605_v55 = vrot.slane %v8603_v37, 2  ;;  %v8611_v48 = vrot.slane %v8609_v29, 1  ;;  %v8614_v38 = vrot.slane %v8612_v56, 2  ;;  %v16515_v29 = vld [vmem:[#allocation3 + $0x80] sm:$0xff]  }
 0x52e   : > { %v7322_v27 = vsel %vm476_vm3, %v7317_v58, %v7321_v63  ;;  %v8588_v58 = vor.u32 %v8587_v57, %v8584_v42  ;;  %v8596_v63 = vrot.slane %v8594_v11, 2  ;;  %v8620_v6 = vrot.slane %v8618_v28, 1  ;;  %17640 = vst [vmem:[#allocation46_spill] sm:$0xff] %v16515_v29 }
 0x52f   : > { %v8621_v45 = vshll.u32 %v16450_v18, 16  ;;  %v8639_v42 = vshll.u32 %v16478_v32, 16 }
 0x530   : > { %12613 = vmatmul.mubr.msk.bf16.gmra.mrb[64].mxu0 %vm3146_vm12, %v7306_v34  ;;  %v8600_v34 = vshrl.u32 %v16442_v36, 16  ;;  %v8597_v25 = vor.u32 %v8596_v63, %v8593_v33 }
 0x531   : > { %12616 = vmatprep.mubr.msk.bf16.mxu0 %vm3146_vm12, %v7314_v8  ;;  %v16470_v8 = vld [vmem:[#allocation3 + $0x50] sm:$0xff]   ;;  %v8623_v53 = vrot.slane %v8621_v45, 2  ;;  %v8657_v45 = vshll.u32 %v16493_v59, 16 }
 0x532   : > { %v8602_v51 = vrot.slane %v8600_v34, 1  ;;  %v8627_v12 = vshrl.u32 %v16470_v8, 16  ;;  %v8630_v19 = vshll.u32 %v16470_v8, 16  ;;  %v8645_v34 = vshrl.u32 %v16484_v21, 16 }
 0x533   : > { %v8624_v63 = vor.u32 %v8623_v53, %v8620_v6 }
 0x534   : > { %v8606_v62 = vor.u32 %v8605_v55, %v8602_v51  ;;  %v8629_v11 = vrot.slane %v8627_v12, 1  ;;  %v8632_v33 = vrot.slane %v8630_v19, 2  ;;  %v8641_v51 = vrot.slane %v8639_v42, 2 }
 0x535   : > { %v8647_v28 = vrot.slane %v8645_v34, 1  ;;  %v8654_v55 = vshrl.u32 %v16493_v59, 16 }
 0x536   : > { %v16505_v57 = vsel %vm1523_vm4, %v8597_v25, %v8606_v62  ;;  %v8633_v56 = vor.u32 %v8632_v33, %v8629_v11  ;;  %v16536_v11 = vld [vmem:[#allocation3 + $0x90] sm:$0xff]  }
 0x537   : > { %17637 = vst [vmem:[#allocation59_spill] sm:$0xff] %v16505_v57  ;;  %v8656_v19 = vrot.slane %v8654_v55, 1  ;;  %17645 = vst [vmem:[#allocation56_spill] sm:$0xff] %v16536_v11  ;;  %v8684_v55 = vshll.u32 %v16515_v29, 16 }
 0x538   : > { %12617 = vmatmul.mubr.msk.bf16.gmra.mrb[68].mxu0 %vm3146_vm12, %v7322_v27  ;;  %v16474_v27 = vld [vmem:[#allocation3 + $0x10] sm:$0xff]  }
 0x539   : > { %12622 = vmatprep.mubr.msk.bf16.mxu0 %vm3146_vm12, %v16027_v17  ;;  %v8576_v17 = vshll.u32 %v16427_v1, 16 }
 0x53b   : > { %v8578_v24 = vrot.slane %v8576_v17, 2  ;;  %v16496_v17 = vsel %vm1523_vm4, %v8588_v58, %v8597_v25  ;;  %v8648_v25 = vshll.u32 %v16484_v21, 16 }
 0x53c   : > { %17635 = vst [vmem:[#allocation54_spill] sm:$0xff] %v16496_v17 }
 0x53d   : > { %v8579_v52 = vor.u32 %v8578_v24, %v8575_v50  ;;  %v8615_v50 = vor.u32 %v8614_v38, %v8611_v48  ;;  %v8636_v24 = vshrl.u32 %v16478_v32, 16  ;;  %v16521_v48 = vld [vmem:[#allocation3 + $0x88] sm:$0xff]   ;;  %v8650_v12 = vrot.slane %v8648_v25, 2 }
 0x53e   : > { %17641 = vst [vmem:[#allocation47_spill] sm:$0xff] %v16521_v48 }
 0x53f   : > { %v16490_v60 = vsel %vm1523_vm4, %v8579_v52, %v8588_v58  ;;  %v16511_v58 = vsel %vm1523_vm4, %v8606_v62, %v8615_v50  ;;  %v8638_v37 = vrot.slane %v8636_v24, 1  ;;  %v16524_v38 = vsel %vm1523_vm4, %v8615_v50, %v8624_v63 }
 0x540   : > { %12623 = vmatmul.mubr.msk.bf16.vlgmr.msra.gmra.mrb[36].mxu0 %vm3146_vm12, %v16466_v9  ;;  %17634 = vst [vmem:[#allocation52_spill] sm:$0xff] %v16490_v60  ;;  %17639 = vst [vmem:[#allocation44_spill] sm:$0xff] %v16511_v58  ;;  %v16529_v62 = vsel %vm1523_vm4, %v8624_v63, %v8633_v56  ;;  %v8651_v33 = vor.u32 %v8650_v12, %v8647_v28  ;;  %v8681_v63 = vshrl.u32 %v16515_v29, 16  ;;  %v8686_v28 = vrot.slane %v8684_v55, 2 }
 0x541   : > { %12659 = vmatpush3.bf16.msra.mxu0 %v16182_v0  ;;  %12626 = vmatprep.mubr.msk.bf16.mxu0 %vm3146_vm12, %v16474_v27  ;;  %v16487_v0 = vsel %vm1523_vm4, %v8570_v16, %v8579_v52  ;;  %v16500_v16 = vld [vmem:[#allocation3 + $0x70] sm:$0xff]   ;;  %v16508_v52 = vld [vmem:[#allocation3 + $0x78] sm:$0xff]   ;;  %17642 = vst [vmem:[#allocation49_spill] sm:$0xff] %v16524_v38  ;;  %v8642_v6 = vor.u32 %v8641_v51, %v8638_v37  ;;  %17643 = vst [vmem:[#allocation51_spill] sm:$0xff] %v16529_v62  ;;  %v8690_v62 = vshrl.u32 %v16521_v48, 16 }
 0x542   : > { %12696 = vmatprep.subr.bf16.mxu0 %v16456_v44  ;;  %17633 = vst [vmem:[#allocation50_spill] sm:$0xff] %v16487_v0  ;;  %17636 = vst [vmem:[#allocation55_spill] sm:$0xff] %v16500_v16  ;;  %v8666_v53 = vshll.u32 %v16500_v16, 16  ;;  %v8672_v50 = vshrl.u32 %v16508_v52, 16  ;;  %v8675_v37 = vshll.u32 %v16508_v52, 16 }
 0x543   : > { %17638 = vst [vmem:[#allocation43_spill] sm:$0xff] %v16508_v52  ;;  %v16533_v24 = vsel %vm1523_vm4, %v8633_v56, %v8642_v6  ;;  %v16543_v56 = vsel %vm1523_vm4, %v8642_v6, %v8651_v33  ;;  %v8692_v12 = vrot.slane %v8690_v62, 1  ;;  %v8699_v6 = vshrl.u32 %v16536_v11, 16 }
 0x544   : > { %17644 = vst [vmem:[#allocation53_spill] sm:$0xff] %v16533_v24  ;;  %v8668_v34 = vrot.slane %v8666_v53, 2  ;;  %v8674_v25 = vrot.slane %v8672_v50, 1  ;;  %17646 = vst [vmem:[#allocation57_spill] sm:$0xff] %v16543_v56  ;;  %v8683_v24 = vrot.slane %v8681_v63, 1  ;;  %v8693_v53 = vshll.u32 %v16521_v48, 16 }
 0x545   : > { %v16693_v56 = vld [vmem:[#allocation3 + $0x50] sm:$0xff]  }
 0x546   : > { %v8687_v50 = vor.u32 %v8686_v28, %v8683_v24  ;;  %v9003_v28 = vrot.slane %v16430_v30, 2 }
 0x548   : > { %12627 = vmatmul.mubr.msk.bf16.gmra.mrb[40].mxu0 %vm3146_vm12, %v16175_v35  ;;  %v8663_v35 = vshrl.u32 %v16500_v16, 16 }
 0x549   : > { %12630 = vmatprep.mubr.msk.bf16.mxu0 %vm3146_vm12, %v16194_v4  ;;  %v8659_v4 = vrot.slane %v8657_v45, 2 }
 0x54a   : > { %v8665_v42 = vrot.slane %v8663_v35, 1  ;;  %v8677_v35 = vrot.slane %v8675_v37, 2  ;;  %v8701_v37 = vrot.slane %v8699_v6, 1 }
 0x54b   : > { %v8660_v51 = vor.u32 %v8659_v4, %v8656_v19 }
 0x54c   : > { %v8669_v45 = vor.u32 %v8668_v34, %v8665_v42  ;;  %v8678_v4 = vor.u32 %v8677_v35, %v8674_v25  ;;  %v8702_v42 = vshll.u32 %v16536_v11, 16  ;;  %v8989_v34 = vld [vmem:[#allocation3 + $0x8] sm:$0xc] }
 0x54d   : > { %v16546_v38 = vsel %vm1523_vm4, %v8651_v33, %v8660_v51  ;;  %v8695_v33 = vrot.slane %v8693_v53, 2 }
 0x54e   : > { %17647 = vst [vmem:[#allocation58_spill] sm:$0xff] %v16546_v38  ;;  %v16552_v19 = vsel %vm1523_vm4, %v8660_v51, %v8669_v45  ;;  %v16559_v62 = vsel %vm1523_vm4, %v8669_v45, %v8678_v4  ;;  %v8704_v63 = vrot.slane %v8702_v42, 2  ;;  %v16563_v51 = vsel %vm1523_vm4, %v8678_v4, %v8687_v50 }
 0x54f   : > { %17648 = vst [vmem:[#allocation60_spill] sm:$0xff] %v16552_v19  ;;  %17649 = vst [vmem:[#allocation61_spill] sm:$0xff] %v16559_v62  ;;  %v8696_v25 = vor.u32 %v8695_v33, %v8692_v12  ;;  %v8997_v19 = vrot.slane %v16422_v26, 2  ;;  %v9001_v45 = vrot.slane %v16427_v1, 2  ;;  %v9005_v4 = vrot.slane %v16437_v5, 2  ;;  %v16689_v62 = vld [vmem:[#allocation3 + $0x48] sm:$0xff]  }
 0x550   : > { %12631 = vmatmul.mubr.msk.bf16.gmra.mrb[44].mxu0 %vm3146_vm12, %v16230_v23  ;;  %v11419_v23 = vcombine.low %v8989_v34, %v16417_v15  ;;  %17650 = vst [vmem:[#allocation62_spill] sm:$0xff] %v16563_v51  ;;  %v16565_v55 = vor.u32 %v8704_v63, %v8701_v37  ;;  %v9009_v34 = vrot.slane %v16448_v54, 2  ;;  %v9013_v37 = vrot.slane %v16470_v8, 2  ;;  %v16602_v63 = vld [vmem:[#allocation3 + $0x98] ss:$0 sps:$4 sm:$0x33]  }
 0x551   : > { %12634 = vmatprep.mubr.msk.bf16.mxu0 %vm3146_vm12, %v16255_v39  ;;  %v8999_v39 = vrot.slane %v16425_v3, 2  ;;  %v16570_v24 = vsel %vm1523_vm4, %v8687_v50, %v8696_v25  ;;  %v16589_v42 = vsel %vm4814_vm15, %v9001_v45, %v9003_v28  ;;  %v9007_v50 = vrot.slane %v16442_v36, 2  ;;  %17659 = vst [vmem:[#allocation70_spill] sm:$0xff] %v16602_v63 }
 0x552   : > { %17651 = vst [vmem:[#allocation63_spill] sm:$0xff] %v16565_v55  ;;  %v8996_v35 = vrot.slane %v11419_v23, 2  ;;  %17652 = vst [vmem:[#allocation64_spill] sm:$0xff] %v16570_v24  ;;  %v16576_v15 = vsel %vm1523_vm4, %v8696_v25, %v16565_v55  ;;  %v16595_v33 = vsel %vm4814_vm15, %v9003_v28, %v9005_v4  ;;  %v9015_v25 = vrot.slane %v16478_v32, 2 }
 0x553   : > { %17653 = vst [vmem:[#allocation73_spill] sm:$0xff] %v16576_v15  ;;  %v16582_v53 = vsel %vm4814_vm15, %v8997_v19, %v8999_v39  ;;  %v16586_v6 = vsel %vm4814_vm15, %v8999_v39, %v9001_v45  ;;  %17657 = vst [vmem:[#allocation68_spill] sm:$0xff] %v16589_v42  ;;  %v16605_v23 = vsel %vm4814_vm15, %v9005_v4, %v9007_v50 }
 0x554   : > { %v16579_v12 = vsel %vm4814_vm15, %v8996_v35, %v8997_v19  ;;  %17655 = vst [vmem:[#allocation67_spill] sm:$0xff] %v16582_v53  ;;  %17656 = vst [vmem:[#allocation65_spill] sm:$0xff] %v16586_v6  ;;  %v9011_v19 = vrot.slane %v16450_v18, 2  ;;  %v9019_v35 = vrot.slane %v16493_v59, 2  ;;  %v16611_v39 = vsel %vm4814_vm15, %v9007_v50, %v9009_v34  ;;  %v16684_v6 = vld [vmem:[#allocation3 + $0x40] sm:$0xff]  }
 0x555   : > { %17654 = vst [vmem:[#allocation66_spill] sm:$0xff] %v16579_v12  ;;  %17658 = vst [vmem:[#allocation69_spill] sm:$0xff] %v16595_v33  ;;  %v16621_v4 = vsel %vm4814_vm15, %v9013_v37, %v9015_v25  ;;  %v9023_v50 = vrot.slane %v16508_v52, 2  ;;  %v9810_v57 = vshrl.u32 %v16684_v6, 16 }
 0x556   : > { %17660 = vst [vmem:[#allocation71_spill] sm:$0xff] %v16605_v23  ;;  %17661 = vst [vmem:[#allocation72_spill] sm:$0xff] %v16611_v39  ;;  %v16614_v45 = vsel %vm4814_vm15, %v9009_v34, %v9011_v19  ;;  %v16617_v28 = vsel %vm4814_vm15, %v9011_v19, %v9013_v37  ;;  %v9025_v34 = vrot.slane %v16515_v29, 2  ;;  %v9027_v19 = vrot.slane %v16521_v48, 2 }
 0x557   : > { %17662 = vst [vmem:[#allocation74_spill] sm:$0xff] %v16614_v45  ;;  %17663 = vst [vmem:[#allocation75_spill] sm:$0xff] %v16617_v28  ;;  %v9029_v28 = vrot.slane %v16536_v11, 2 }
 0x558   : > { %12635 = vmatmul.mubr.msk.bf16.gmra.mrb[48].mxu0 %vm3146_vm12, %v16280_v20  ;;  %v9017_v20 = vrot.slane %v16484_v21, 2  ;;  %17664 = vst [vmem:[#allocation76_spill] sm:$0xff] %v16621_v4 }
 0x559   : > { %12638 = vmatprep.mubr.msk.bf16.mxu0 %vm3146_vm12, %v16292_v47  ;;  %v9021_v47 = vrot.slane %v16500_v16, 2 }
 0x55a   : > { %v16624_v23 = vsel %vm4814_vm15, %v9015_v25, %v9017_v20  ;;  %v16627_v33 = vsel %vm4814_vm15, %v9017_v20, %v9019_v35  ;;  %v9031_v25 = vrot.slane %v16602_v63, 2  ;;  %v16644_v20 = vsel %vm4814_vm15, %v9025_v34, %v9027_v19 }
 0x55b   : > { %17665 = vst [vmem:[#allocation77_spill] sm:$0xff] %v16624_v23  ;;  %17666 = vst [vmem:[#allocation78_spill] sm:$0xff] %v16627_v33  ;;  %v16631_v39 = vsel %vm4814_vm15, %v9019_v35, %v9021_v47  ;;  %v16637_v37 = vsel %vm4814_vm15, %v9021_v47, %v9023_v50  ;;  %v16641_v23 = vsel %vm4814_vm15, %v9023_v50, %v9025_v34  ;;  %v9306_v33 = vld [vmem:[#allocation3 + $0x10] sm:$0xc]  ;;  %v7779_v47 = vld [vmem:[#allocation3] sm:$0xe] }
 0x55c   : > { %17667 = vst [vmem:[#allocation79_spill] sm:$0xff] %v16631_v39  ;;  %17668 = vst [vmem:[#allocation80_spill] sm:$0xff] %v16637_v37  ;;  %v16647_v35 = vsel %vm4814_vm15, %v9027_v19, %v9029_v28  ;;  %v16650_v39 = vsel %vm4814_vm15, %v9029_v28, %v9031_v25  ;;  %v16656_v37 = vld [vmem:[#allocation3 + $0x14] sm:$0xf]  ;;  %v16661_v34 = vld [vmem:[#allocation3 + $0x18] sm:$0xff]  }
 0x55d   : > { %17669 = vst [vmem:[#allocation81_spill] sm:$0xff] %v16641_v23  ;;  %17670 = vst [vmem:[#allocation82_spill] sm:$0xff] %v16644_v20  ;;  %v16659_v50 = vcombine.low %v9306_v33, %v16656_v37  ;;  %v16663_v19 = vld [vmem:[#allocation3 + $0x20] sm:$0xff]   ;;  %v16665_v25 = vld [vmem:[#allocation3 + $0x28] sm:$0xff]   ;;  %v9765_v23 = vshrl.u32 %v16661_v34, 16  ;;  %v9768_v4 = vshll.u32 %v16661_v34, 16 }
 0x55e   : > { %17671 = vst [vmem:[#allocation83_spill] sm:$0xff] %v16647_v35  ;;  %17672 = vst [vmem:[#allocation84_spill] sm:$0xff] %v16650_v39  ;;  %v13819_v35 = vld [vmem:[#allocation3 + $0x4] sm:$0xf]  ;;  %v16667_v39 = vld [vmem:[#allocation3 + $0x30] sm:$0xff]   ;;  %v9777_v42 = vshll.u32 %v16663_v19, 16 }
 0x55f   : > { %17673 = vst [vmem:[#allocation85_spill] sm:$0xff] %v16659_v50  ;;  %v11335_v28 = vcombine.low %v7779_v47, %v13819_v35  ;;  %v16674_v20 = vld [vmem:[#allocation3 + $0x38] sm:$0xff]   ;;  %v9774_v35 = vshrl.u32 %v16663_v19, 16  ;;  %v9767_v33 = vrot.slane %v9765_v23, 2  ;;  %v9770_v53 = vrot.slane %v9768_v4, 3 }
 0x560   : > { %12639 = vmatmul.mubr.msk.bf16.gmra.mrb[52].mxu0 %vm3146_vm12, %v16321_v22  ;;  %v9757_v22 = vshrl.u32 %v16659_v50, 16  ;;  %v9783_v55 = vshrl.u32 %v16665_v25, 16  ;;  %v9779_v24 = vrot.slane %v9777_v42, 3  ;;  %v9786_v63 = vshll.u32 %v16665_v25, 16 }
 0x561   : > { %12642 = vmatprep.mubr.msk.bf16.mxu0 %vm3146_vm12, %v16332_v31  ;;  %v9760_v31 = vshll.u32 %v16659_v50, 16  ;;  %v16681_v47 = vrot.slane %v11335_v28, 1  ;;  %v9776_v12 = vrot.slane %v9774_v35, 2  ;;  %v9792_v51 = vshrl.u32 %v16667_v39, 16 }
 0x562   : > { %v9759_v45 = vrot.slane %v9757_v22, 2  ;;  %v9771_v28 = vor.u32 %v9770_v53, %v9767_v33  ;;  %v9785_v22 = vrot.slane %v9783_v55, 2  ;;  %v9801_v38 = vshrl.u32 %v16674_v20, 16  ;;  %v16700_v53 = vld [vmem:[#allocation3 + $0x58] sm:$0xff]  }
 0x563   : > { %v9762_v50 = vrot.slane %v9760_v31, 3  ;;  %v9795_v31 = vshll.u32 %v16667_v39, 16  ;;  %v9780_v23 = vor.u32 %v9779_v24, %v9776_v12  ;;  %v9788_v4 = vrot.slane %v9786_v63, 3 }
 0x564   : > { %v9794_v35 = vrot.slane %v9792_v51, 2  ;;  %v9803_v58 = vrot.slane %v9801_v38, 2  ;;  %v9813_v24 = vshll.u32 %v16684_v6, 16  ;;  %v16708_v51 = vld [vmem:[#allocation3 + $0x60] sm:$0xff]   ;;  %v9812_v12 = vrot.slane %v9810_v57, 2 }
 0x565   : > { %v9763_v15 = vor.u32 %v9762_v50, %v9759_v45  ;;  %v9804_v45 = vshll.u32 %v16674_v20, 16  ;;  %v9797_v50 = vrot.slane %v9795_v31, 3  ;;  %v16703_v55 = vsel %vm5575_vm0, %v9771_v28, %v9780_v23 }
 0x566   : > { %17675 = vst [vmem:[#allocation86_spill] sm:$0xff] %v16703_v55  ;;  %v9789_v33 = vor.u32 %v9788_v4, %v9785_v22  ;;  %v9819_v38 = vshrl.u32 %v16689_v62, 16  ;;  %v9822_v63 = vshll.u32 %v16689_v62, 16  ;;  %v9815_v4 = vrot.slane %v9813_v24, 3 }
 0x567   : > { %v16697_v42 = vsel %vm5575_vm0, %v9763_v15, %v9771_v28  ;;  %v9806_v17 = vrot.slane %v9804_v45, 3  ;;  %v9798_v15 = vor.u32 %v9797_v50, %v9794_v35  ;;  %v16714_v28 = vld [vmem:[#allocation3 + $0x68] sm:$0xff]   ;;  %v9828_v45 = vshrl.u32 %v16693_v56, 16 }
 0x568   : > { %12643 = vmatmul.mubr.msk.bf16.gmra.mrb[56].mxu0 %vm3146_vm12, %v16349_v7  ;;  %17674 = vst [vmem:[#allocation87_spill] sm:$0xff] %v16697_v42  ;;  %v16717_v22 = vsel %vm5575_vm0, %v9780_v23, %v9789_v33  ;;  %v9821_v57 = vrot.slane %v9819_v38, 2  ;;  %v9824_v35 = vrot.slane %v9822_v63, 3  ;;  %v9831_v50 = vshll.u32 %v16693_v56, 16  ;;  %v16724_v42 = vld [vmem:[#allocation3 + $0x70] sm:$0xff]  }
 0x569   : > { %12646 = vmatprep.mubr.msk.bf16.mxu0 %vm3146_vm12, %v16356_v2  ;;  %17676 = vst [vmem:[#allocation88_spill] sm:$0xff] %v16717_v22  ;;  %v9807_v31 = vor.u32 %v9806_v17, %v9803_v58  ;;  %v16721_v55 = vsel %vm5575_vm0, %v9789_v33, %v9798_v15  ;;  %v9816_v0 = vor.u32 %v9815_v4, %v9812_v12  ;;  %v9830_v61 = vrot.slane %v9828_v45, 2  ;;  %v16730_v17 = vld [vmem:[#allocation3 + $0x78] sm:$0xff]   ;;  %v16739_v12 = vld [vmem:[#allocation3 + $0x80] sm:$0xff]  }
 0x56a   : > { %17677 = vst [vmem:[#allocation89_spill] sm:$0xff] %v16721_v55  ;;  %v9837_v23 = vshrl.u32 %v16700_v53, 16  ;;  %v9825_v58 = vor.u32 %v9824_v35, %v9821_v57  ;;  %v9833_v24 = vrot.slane %v9831_v50, 3  ;;  %v9840_v33 = vshll.u32 %v16700_v53, 16 }
 0x56b   : > { %v16727_v60 = vsel %vm5575_vm0, %v9798_v15, %v9807_v31  ;;  %v9846_v38 = vshrl.u32 %v16708_v51, 16  ;;  %v16735_v63 = vsel %vm5575_vm0, %v9807_v31, %v9816_v0  ;;  %v9849_v22 = vshll.u32 %v16708_v51, 16 }
 0x56c   : > { %17678 = vst [vmem:[#allocation90_spill] sm:$0xff] %v16727_v60  ;;  %17679 = vst [vmem:[#allocation91_spill] sm:$0xff] %v16735_v63  ;;  %v9839_v55 = vrot.slane %v9837_v23, 2  ;;  %v9855_v15 = vshrl.u32 %v16714_v28, 16  ;;  %v16742_v4 = vsel %vm5575_vm0, %v9816_v0, %v9825_v58  ;;  %v9834_v45 = vor.u32 %v9833_v24, %v9830_v61  ;;  %v16748_v23 = vld [vmem:[#allocation3 + $0x88] sm:$0xff]  }
 0x56d   : > { %17680 = vst [vmem:[#allocation92_spill] sm:$0xff] %v16742_v4  ;;  %v9842_v57 = vrot.slane %v9840_v33, 3  ;;  %v9848_v35 = vrot.slane %v9846_v38, 2  ;;  %v9851_v50 = vrot.slane %v9849_v22, 3  ;;  %v9858_v14 = vshll.u32 %v16714_v28, 16  ;;  %v16757_v22 = vld [vmem:[#allocation3 + $0x90] sm:$0xff]  }
 0x56e   : > { %v9857_v60 = vrot.slane %v9855_v15, 2  ;;  %v9864_v31 = vshrl.u32 %v16724_v42, 16  ;;  %v16751_v63 = vsel %vm5575_vm0, %v9825_v58, %v9834_v45  ;;  %v9867_v0 = vshll.u32 %v16724_v42, 16 }
 0x56f   : > { %17681 = vst [vmem:[#allocation93_spill] sm:$0xff] %v16751_v63  ;;  %v9843_v11 = vor.u32 %v9842_v57, %v9839_v55  ;;  %v9873_v61 = vshrl.u32 %v16730_v17, 16  ;;  %v9852_v24 = vor.u32 %v9851_v50, %v9848_v35  ;;  %v9860_v33 = vrot.slane %v9858_v14, 3  ;;  %v16764_v57 = vld [vmem:[#allocation3 + $0x98] sm:$0xff]  }
 0x570   : > { %12647 = vmatmul.mubr.msk.bf16.gmra.mrb[60].mxu0 %vm3146_vm12, %v16363_v46  ;;  %v9866_v38 = vrot.slane %v9864_v31, 2  ;;  %v9876_v15 = vshll.u32 %v16730_v17, 16  ;;  %v9869_v58 = vrot.slane %v9867_v0, 3  ;;  %v9882_v55 = vshrl.u32 %v16739_v12, 16 }
 0x571   : > { %12650 = vmatprep.mubr.msk.bf16.mxu0 %vm3146_vm12, %v16365_v43  ;;  %v16761_v4 = vsel %vm5575_vm0, %v9834_v45, %v9843_v11  ;;  %v9875_v63 = vrot.slane %v9873_v61, 2  ;;  %v16767_v48 = vsel %vm5575_vm0, %v9843_v11, %v9852_v24  ;;  %v9861_v29 = vor.u32 %v9860_v33, %v9857_v60 }
 0x572   : > { %17682 = vst [vmem:[#allocation94_spill] sm:$0xff] %v16761_v4  ;;  %17683 = vst [vmem:[#allocation95_spill] sm:$0xff] %v16767_v48  ;;  %v9878_v52 = vrot.slane %v9876_v15, 3  ;;  %v9885_v35 = vshll.u32 %v16739_v12, 16  ;;  %v9870_v14 = vor.u32 %v9869_v58, %v9866_v38  ;;  %v9884_v50 = vrot.slane %v9882_v55, 2 }
 0x573   : > { %v9891_v31 = vshrl.u32 %v16748_v23, 16  ;;  %v9894_v45 = vshll.u32 %v16748_v23, 16  ;;  %v16773_v0 = vsel %vm5575_vm0, %v9852_v24, %v9861_v29  ;;  %v9900_v16 = vshrl.u32 %v16757_v22, 16  ;;  %v10199_v38 = vld [vmem:[#allocation3 + $0x10] sm:$0x8] }
 0x574   : > { %v9879_v61 = vor.u32 %v9878_v52, %v9875_v63  ;;  %v9887_v4 = vrot.slane %v9885_v35, 3  ;;  %v16777_v11 = vsel %vm5575_vm0, %v9861_v29, %v9870_v14  ;;  %v9903_v15 = vshll.u32 %v16757_v22, 16 }
 0x575   : > { %17684 = vst [vmem:[#allocation96_spill] sm:$0xff] %v16777_v11  ;;  %v9893_v60 = vrot.slane %v9891_v31, 2  ;;  %v9896_v33 = vrot.slane %v9894_v45, 3  ;;  %v9902_v48 = vrot.slane %v9900_v16, 2  ;;  %v9909_v24 = vshrl.u32 %v16764_v57, 16  ;;  %v13820_v45 = vld [vmem:[#allocation3 + $0x18] sm:$0xff]  }
 0x576   : > { %v16781_v58 = vsel %vm5575_vm0, %v9870_v14, %v9879_v61  ;;  %v9888_v55 = vor.u32 %v9887_v4, %v9884_v50  ;;  %v17686_v52 = vrot.slane %v16466_v9, 1  ;;  %v9905_v35 = vrot.slane %v9903_v15, 3 }
 0x577   : > { %17685 = vst [vmem:[#allocation97_spill] sm:$0xff] %v16781_v58  ;;  %v9897_v63 = vor.u32 %v9896_v33, %v9893_v60  ;;  %v9912_v31 = vshll.u32 %v16764_v57, 16  ;;  %v7789_v14 = vrot.slane %v16474_v27, 1  ;;  %v9911_v4 = vrot.slane %v9909_v24, 2  ;;  %v13821_v33 = vld [vmem:[#allocation3 + $0x20] sm:$0xff]  }
 0x578   : > { %12651 = vmatmul.mubr.msk.bf16.gmra.mrb[64].mxu0 %vm3146_vm12, %v16375_v40  ;;  %v7788_v29 = vsel %vm1209_vm2, %v16681_v47, %v17686_v52  ;;  %v16794_v16 = vsel %vm5575_vm0, %v9879_v61, %v9888_v55  ;;  %v11503_v50 = vcombine.low %v10199_v38, %v16656_v37  ;;  %v7791_v58 = vrot.slane %v13820_v45, 1 }
 0x579   : > { %12654 = vmatprep.mubr.msk.bf16.mxu0 %vm3146_vm12, %v16390_v13  ;;  %v16798_v11 = vsel %vm5575_vm0, %v9888_v55, %v9897_v63  ;;  %v9906_v47 = vor.u32 %v9905_v35, %v9902_v48  ;;  %v9914_v60 = vrot.slane %v9912_v31, 3  ;;  %v7793_v15 = vrot.slane %v13821_v33, 1 }
 0x57a   : > { %v10206_v52 = vrot.slane %v11503_v50, 3  ;;  %v10209_v27 = vrot.slane %v16663_v19, 3  ;;  %v10211_v37 = vrot.slane %v16665_v25, 3  ;;  %v10213_v38 = vrot.slane %v16667_v39, 3 }
 0x57b   : > { %v16803_v61 = vsel %vm5575_vm0, %v9897_v63, %v9906_v47  ;;  %v16805_v24 = vor.u32 %v9914_v60, %v9911_v4  ;;  %v17687_v55 = vrot.slane %v16466_v9, 1  ;;  %v10215_v50 = vrot.slane %v16674_v20, 3  ;;  %v16822_v63 = vld [vmem:[%s17333_s6 + $0x20] sm:$0xff]  }
 0x57c   : > { %v16829_v9 = vsel %vm6026_vm1, %v10209_v27, %v10211_v37  ;;  %v16832_v45 = vsel %vm6026_vm1, %v10211_v37, %v10213_v38  ;;  %v10217_v60 = vrot.slane %v16684_v6, 3  ;;  %v7792_v33 = vsel %vm1209_vm2, %v7789_v14, %v7791_v58 }
 0x57d   : > { %v7790_v48 = vsel %vm1209_vm2, %v17687_v55, %v7789_v14  ;;  %v16826_v4 = vsel %vm5575_vm0, %v9906_v47, %v16805_v24  ;;  %17688 = vst [vmem:[#allocation98_spill] sm:$0xff] %v16829_v9  ;;  %17689 = vst [vmem:[#allocation99_spill] sm:$0xff] %v16832_v45  ;;  %v10221_v55 = vrot.slane %v16693_v56, 3  ;;  %v16842_v47 = vld [vmem:[#allocation3 + $0xa0] ss:$0 sps:$4 sm:$0x77]  }
 0x57e   : > { %v10223_v37 = vrot.slane %v16700_v53, 3  ;;  %v10225_v45 = vrot.slane %v16708_v51, 3  ;;  %v10227_v14 = vrot.slane %v16714_v28, 3 }
 0x580   : > { %12655 = vmatmul.mubr.msk.bf16.gmra.mrb[68].mxu0 %vm3146_vm12, %v16403_v41  ;;  %v16865_v9 = vsel %vm6026_vm1, %v10223_v37, %v10225_v45 }
 0x581   : > { %12660 = vmatprep.mubr.msk.bf16.mxu0 %vm3146_vm12, %v7788_v29  ;;  %v10207_v29 = vrot.slane %v16661_v34, 3  ;;  %17695 = vst [vmem:[#allocation105_spill] sm:$0xff] %v16865_v9 }
 0x583   : > { %v16813_v35 = vsel %vm6026_vm1, %v10206_v52, %v10207_v29  ;;  %v16816_v31 = vsel %vm6026_vm1, %v10207_v29, %v10209_v27  ;;  %v16837_v52 = vsel %vm6026_vm1, %v10213_v38, %v10215_v50  ;;  %v10219_v29 = vrot.slane %v16689_v62, 3 }
 0x584   : > { %17690 = vst [vmem:[#allocation100_spill] sm:$0xff] %v16837_v52  ;;  %v16845_v27 = vsel %vm6026_vm1, %v10215_v50, %v10217_v60  ;;  %v10229_v52 = vrot.slane %v16724_v42, 3  ;;  %v10231_v50 = vrot.slane %v16730_v17, 3 }
 0x585   : > { %17691 = vst [vmem:[#allocation101_spill] sm:$0xff] %v16845_v27  ;;  %v16853_v38 = vsel %vm6026_vm1, %v10217_v60, %v10219_v29  ;;  %v16862_v27 = vsel %vm6026_vm1, %v10221_v55, %v10223_v37  ;;  %v10233_v60 = vrot.slane %v16739_v12, 3 }
 0x586   : > { %17692 = vst [vmem:[#allocation102_spill] sm:$0xff] %v16853_v38  ;;  %17694 = vst [vmem:[#allocation104_spill] sm:$0xff] %v16862_v27  ;;  %v10237_v38 = vrot.slane %v16757_v22, 3 }
 0x587   : > { %v16880_v37 = vsel %vm6026_vm1, %v10231_v50, %v10233_v60 }
 0x588   : > { %12661 = vmatmul.mubr.msk.bf16.vlgmr.msra.gmra.mrb[36].mxu0 %vm3146_vm12, %v7790_v48  ;;  %v16856_v48 = vsel %vm6026_vm1, %v10219_v29, %v10221_v55  ;;  %v16875_v29 = vsel %vm6026_vm1, %v10229_v52, %v10231_v50  ;;  %v13822_v55 = vld [vmem:[#allocation3 + $0x28] sm:$0xff]   ;;  %17699 = vst [vmem:[#allocation109_spill] sm:$0xff] %v16880_v37  ;;  %v13823_v37 = vld [vmem:[#allocation3 + $0x30] sm:$0xff]  }
 0x589   : > { %12697 = vmatpush3.bf16.msra.mxu0 %v16456_v44  ;;  %12664 = vmatprep.mubr.msk.bf16.mxu0 %vm3146_vm12, %v7792_v33  ;;  %17693 = vst [vmem:[#allocation103_spill] sm:$0xff] %v16856_v48  ;;  %v16868_v44 = vsel %vm6026_vm1, %v10225_v45, %v10227_v14  ;;  %v16872_v33 = vsel %vm6026_vm1, %v10227_v14, %v10229_v52  ;;  %17698 = vst [vmem:[#allocation108_spill] sm:$0xff] %v16875_v29  ;;  %v10235_v48 = vrot.slane %v16748_v23, 3 }
 0x58a   : > { %12734 = vmatprep.subr.bf16.mxu0 %v16822_v63  ;;  %17696 = vst [vmem:[#allocation106_spill] sm:$0xff] %v16868_v44  ;;  %17697 = vst [vmem:[#allocation107_spill] sm:$0xff] %v16872_v33  ;;  %v7795_v27 = vrot.slane %v13822_v55, 1  ;;  %v10239_v45 = vrot.slane %v16764_v57, 3  ;;  %v10241_v44 = vrot.slane %v16842_v47, 3  ;;  %v7794_v55 = vsel %vm1209_vm2, %v7791_v58, %v7793_v15 }
 0x58b   : > { %v16885_v9 = vsel %vm6026_vm1, %v10233_v60, %v10235_v48  ;;  %v16888_v14 = vsel %vm6026_vm1, %v10235_v48, %v10237_v38  ;;  %v7797_v60 = vrot.slane %v13823_v37, 1 }
 0x58c   : > { %17700 = vst [vmem:[#allocation110_spill] sm:$0xff] %v16885_v9  ;;  %v16891_v52 = vsel %vm6026_vm1, %v10237_v38, %v10239_v45  ;;  %v16894_v29 = vsel %vm6026_vm1, %v10239_v45, %v10241_v44  ;;  %v7796_v50 = vsel %vm1209_vm2, %v7793_v15, %v7795_v27  ;;  %v13824_v9 = vld [vmem:[#allocation3 + $0x38] sm:$0xff]   ;;  %v13825_v44 = vld [vmem:[#allocation3 + $0x40] sm:$0xff]   ;;  %v13826_v45 = vld [vmem:[#allocation3 + $0x48] sm:$0xff]  }
 0x58d   : > { %v7799_v33 = vrot.slane %v13824_v9, 1  ;;  %v7798_v48 = vsel %vm1209_vm2, %v7795_v27, %v7797_v60  ;;  %v7801_v58 = vrot.slane %v13825_v44, 1  ;;  %v13827_v9 = vld [vmem:[#allocation3 + $0x50] sm:$0xff]  }
 0x58e   : > { %v7805_v27 = vrot.slane %v13827_v9, 1  ;;  %v8229_v9 = vrot.slane %v16420_v49, 1 }
 0x58f   : > { %v7800_v38 = vsel %vm1209_vm2, %v7797_v60, %v7799_v33  ;;  %v7802_v15 = vsel %vm1209_vm2, %v7799_v33, %v7801_v58  ;;  %v7809_v33 = vrot.slane %v16356_v2, 1 }
 0x590   : > { %12665 = vmatmul.mubr.msk.bf16.gmra.mrb[40].mxu0 %vm3146_vm12, %v7794_v55  ;;  %v7803_v55 = vrot.slane %v13826_v45, 1  ;;  %v7815_v45 = vrot.slane %v16375_v40, 1  ;;  %v7821_v40 = vrot.slane %v16408_v10, 1  ;;  %v13777_v10 = vld [vmem:[%s17333_s6 + $0x28] sm:$0xff]  }
 0x591   : > { %12668 = vmatprep.mubr.msk.bf16.mxu0 %vm3146_vm12, %v7796_v50  ;;  %v7807_v50 = vrot.slane %v16349_v7, 1  ;;  %v7813_v7 = vrot.slane %v16365_v43, 1 }
 0x592   : > { %v7804_v37 = vsel %vm1209_vm2, %v7801_v58, %v7803_v55  ;;  %v7806_v60 = vsel %vm1209_vm2, %v7803_v55, %v7805_v27 }
 0x593   : > { %v7810_v44 = vsel %vm1209_vm2, %v7807_v50, %v7809_v33  ;;  %v7816_v2 = vsel %vm1209_vm2, %v7813_v7, %v7815_v45 }
 0x598   : > { %12669 = vmatmul.mubr.msk.bf16.gmra.mrb[44].mxu0 %vm3146_vm12, %v7798_v48  ;;  %v7808_v48 = vsel %vm1209_vm2, %v7805_v27, %v7807_v50  ;;  %v8230_v27 = vrot.slane %v16422_v26, 1 }
 0x599   : > { %12672 = vmatprep.mubr.msk.bf16.mxu0 %vm3146_vm12, %v7800_v38  ;;  %v7811_v38 = vrot.slane %v16363_v46, 1  ;;  %v7817_v46 = vrot.slane %v16390_v13, 1 }
 0x59a   : > { %v8231_v13 = vsel %vm1209_vm2, %v8229_v9, %v8230_v27 }
 0x59b   : > { %v7812_v58 = vsel %vm1209_vm2, %v7809_v33, %v7811_v38  ;;  %v7814_v55 = vsel %vm1209_vm2, %v7811_v38, %v7813_v7  ;;  %v8240_v38 = vrot.slane %v16442_v36, 1 }
 0x5a0   : > { %12673 = vmatmul.mubr.msk.bf16.gmra.mrb[48].mxu0 %vm3146_vm12, %v7802_v15  ;;  %v7819_v15 = vrot.slane %v16403_v41, 1  ;;  %v8232_v41 = vrot.slane %v16425_v3, 1  ;;  %v8238_v3 = vrot.slane %v16437_v5, 1  ;;  %v8244_v5 = vrot.slane %v16450_v18, 1 }
 0x5a1   : > { %12676 = vmatprep.mubr.msk.bf16.mxu0 %vm3146_vm12, %v7804_v37  ;;  %v7818_v37 = vsel %vm1209_vm2, %v7815_v45, %v7817_v46  ;;  %v8250_v45 = vrot.slane %v16484_v21, 1  ;;  %v17702_v21 = vld [vmem:[#allocation43_spill] sm:$0xff] }
 0x5a2   : > { %v7820_v43 = vsel %vm1209_vm2, %v7817_v46, %v7819_v15  ;;  %v7822_v50 = vsel %vm1209_vm2, %v7819_v15, %v7821_v40  ;;  %v8233_v49 = vsel %vm1209_vm2, %v8230_v27, %v8232_v41  ;;  %v17704_v27 = vld [vmem:[#allocation47_spill] sm:$0xff] }
 0x5a8   : > { %12677 = vmatmul.mubr.msk.bf16.gmra.mrb[52].mxu0 %vm3146_vm12, %v7806_v60  ;;  %v8234_v60 = vrot.slane %v16427_v1, 1 }
 0x5a9   : > { %12680 = vmatprep.mubr.msk.bf16.mxu0 %vm3146_vm12, %v7808_v48  ;;  %v8236_v48 = vrot.slane %v16430_v30, 1 }
 0x5aa   : > { %v8235_v26 = vsel %vm1209_vm2, %v8232_v41, %v8234_v60 }
 0x5ab   : > { %v8237_v1 = vsel %vm1209_vm2, %v8234_v60, %v8236_v48  ;;  %v8239_v33 = vsel %vm1209_vm2, %v8236_v48, %v8238_v3 }
 0x5b0   : > { %12681 = vmatmul.mubr.msk.bf16.gmra.mrb[56].mxu0 %vm3146_vm12, %v7810_v44  ;;  %v8242_v44 = vrot.slane %v16448_v54, 1  ;;  %v8248_v54 = vrot.slane %v16478_v32, 1 }
 0x5b1   : > { %12684 = vmatprep.mubr.msk.bf16.mxu0 %vm3146_vm12, %v7812_v58  ;;  %v8246_v58 = vrot.slane %v16470_v8, 1  ;;  %v8252_v8 = vrot.slane %v16493_v59, 1 }
 0x5b2   : > { %v8243_v30 = vsel %vm1209_vm2, %v8240_v38, %v8242_v44  ;;  %v8245_v7 = vsel %vm1209_vm2, %v8242_v44, %v8244_v5  ;;  %v8251_v18 = vsel %vm1209_vm2, %v8248_v54, %v8250_v45  ;;  %v17708_v44 = vld [vmem:[#allocation50_spill] sm:$0xff] }
 0x5b3   : > { %v8247_v36 = vsel %vm1209_vm2, %v8244_v5, %v8246_v58  ;;  %v8253_v15 = vsel %vm1209_vm2, %v8250_v45, %v8252_v8  ;;  %v17711_v5 = vld [vmem:[#allocation59_spill] sm:$0xff]  ;;  %v17717_v45 = vld [vmem:[#allocation58_spill] sm:$0xff] }
 0x5b8   : > { %12685 = vmatmul.mubr.msk.bf16.gmra.mrb[60].mxu0 %vm3146_vm12, %v7814_v55  ;;  %v8249_v55 = vsel %vm1209_vm2, %v8246_v58, %v8248_v54  ;;  %v17712_v58 = vld [vmem:[#allocation44_spill] sm:$0xff]  ;;  %v17716_v54 = vld [vmem:[#allocation57_spill] sm:$0xff] }
 0x5b9   : > { %12688 = vmatprep.mubr.msk.bf16.mxu0 %vm3146_vm12, %v7816_v2  ;;  %v17701_v2 = vld [vmem:[#allocation55_spill] sm:$0xff] }
 0x5ba   : > { %v8254_v46 = vrot.slane %v17701_v2, 1  ;;  %v17721_v2 = vld [vmem:[#allocation70_spill] sm:$0xff] }
 0x5bc   : > { %v8255_v32 = vsel %vm1209_vm2, %v8252_v8, %v8254_v46  ;;  %v17720_v8 = vld [vmem:[#allocation62_spill] sm:$0xff] }
 0x5c0   : > { %12689 = vmatmul.mubr.msk.bf16.gmra.mrb[64].mxu0 %vm3146_vm12, %v7818_v37  ;;  %v8256_v37 = vrot.slane %v17702_v21, 1 }
 0x5c1   : > { %12692 = vmatprep.mubr.msk.bf16.mxu0 %vm3146_vm12, %v7820_v43  ;;  %v17703_v43 = vld [vmem:[#allocation46_spill] sm:$0xff] }
 0x5c2   : > { %v8258_v40 = vrot.slane %v17703_v43, 1  ;;  %v8257_v9 = vsel %vm1209_vm2, %v8254_v46, %v8256_v37  ;;  %v8708_v46 = vshrl.u32 %v17721_v2, 16  ;;  %v17723_v43 = vld [vmem:[#allocation73_spill] sm:$0xff] }
 0x5c4   : > { %v8259_v59 = vsel %vm1209_vm2, %v8256_v37, %v8258_v40  ;;  %v17722_v37 = vld [vmem:[#allocation64_spill] sm:$0xff] }
 0x5c8   : > { %12693 = vmatmul.mubr.msk.bf16.gmra.mrb[68].mxu0 %vm3146_vm12, %v7822_v50  ;;  %v8260_v50 = vrot.slane %v17704_v27, 1  ;;  %v17725_v27 = vld [vmem:[#allocation66_spill] sm:$0xff] }
 0x5c9   : > { %12698 = vmatprep.mubr.msk.bf16.mxu0 %vm3146_vm12, %v8231_v13  ;;  %v17705_v13 = vld [vmem:[#allocation56_spill] sm:$0xff] }
 0x5ca   : > { %v8262_v41 = vrot.slane %v17705_v13, 1  ;;  %v8261_v60 = vsel %vm1209_vm2, %v8258_v40, %v8260_v50  ;;  %v17726_v13 = vld [vmem:[#allocation67_spill] sm:$0xff] }
 0x5d0   : > { %12699 = vmatmul.mubr.msk.bf16.vlgmr.msra.gmra.mrb[36].mxu0 %vm3146_vm12, %v8233_v49  ;;  %v13776_v49 = vld [vmem:[#allocation3 + $0x98] ss:$0 sps:$4 sm:$0x11]  }
 0x5d1   : > { %12735 = vmatpush3.bf16.msra.mxu0 %v16822_v63  ;;  %12702 = vmatprep.mubr.msk.bf16.mxu0 %vm3146_vm12, %v8235_v26  ;;  %v8241_v63 = vsel %vm1209_vm2, %v8238_v3, %v8240_v38  ;;  %v8263_v26 = vsel %vm1209_vm2, %v8260_v50, %v8262_v41  ;;  %v8264_v48 = vrot.slane %v13776_v49, 1  ;;  %v17707_v38 = vld [vmem:[#allocation48_spill] sm:$0xff]  ;;  %v17729_v49 = vld [vmem:[#allocation69_spill] sm:$0xff] }
 0x5d2   : > { %12772 = vmatprep.subr.bf16.mxu0 %v13777_v10  ;;  %v13783_v50 = vld [vmem:[%s17333_s6 + $0x38] sm:$0xff]  }
 0x5d3   : > { %v8265_v3 = vsel %vm1209_vm2, %v8262_v41, %v8264_v48  ;;  %v17727_v41 = vld [vmem:[#allocation65_spill] sm:$0xff]  ;;  %v17731_v48 = vld [vmem:[#allocation72_spill] sm:$0xff] }
 0x5d8   : > { %12703 = vmatmul.mubr.msk.bf16.gmra.mrb[40].mxu0 %vm3146_vm12, %v8237_v1  ;;  %v17706_v1 = vld [vmem:[#allocation45_spill] sm:$0xff] }
 0x5d9   : > { %12706 = vmatprep.mubr.msk.bf16.mxu0 %vm3146_vm12, %v8239_v33  ;;  %v13780_v33 = vld [vmem:[%s17333_s6 + $0x30] sm:$0xff]  }
 0x5e0   : > { %12707 = vmatmul.mubr.msk.bf16.gmra.mrb[44].mxu0 %vm3146_vm12, %v8241_v63  ;;  %v17709_v63 = vld [vmem:[#allocation52_spill] sm:$0xff] }
 0x5e1   : > { %12710 = vmatprep.mubr.msk.bf16.mxu0 %vm3146_vm12, %v8243_v30  ;;  %v17710_v30 = vld [vmem:[#allocation54_spill] sm:$0xff] }
 0x5e8   : > { %12711 = vmatmul.mubr.msk.bf16.gmra.mrb[48].mxu0 %vm3146_vm12, %v8245_v7  ;;  %v17713_v7 = vld [vmem:[#allocation49_spill] sm:$0xff] }
 0x5e9   : > { %12714 = vmatprep.mubr.msk.bf16.mxu0 %vm3146_vm12, %v8247_v36  ;;  %v17715_v36 = vld [vmem:[#allocation53_spill] sm:$0xff] }
 0x5f0   : > { %12715 = vmatmul.mubr.msk.bf16.gmra.mrb[52].mxu0 %vm3146_vm12, %v8249_v55  ;;  %v17718_v55 = vld [vmem:[#allocation60_spill] sm:$0xff] }
 0x5f1   : > { %12718 = vmatprep.mubr.msk.bf16.mxu0 %vm3146_vm12, %v8251_v18  ;;  %v17719_v18 = vld [vmem:[#allocation61_spill] sm:$0xff] }
 0x5f8   : > { %12719 = vmatmul.mubr.msk.bf16.gmra.mrb[56].mxu0 %vm3146_vm12, %v8253_v15  ;;  %v8711_v15 = vshll.u32 %v17721_v2, 16  ;;  %v13801_v2 = vld [vmem:[%s17333_s6 + $0x40] sm:$0xff]  }
 0x5f9   : > { %12722 = vmatprep.mubr.msk.bf16.mxu0 %vm3146_vm12, %v8255_v32  ;;  %v8710_v32 = vrot.slane %v8708_v46, 1 }
 0x5fa   : > { %v8713_v21 = vrot.slane %v8711_v15, 2  ;;  %v9446_v15 = vrot.slane %v16667_v39, 2 }
 0x5fc   : > { %v8714_v40 = vor.u32 %v8713_v21, %v8710_v32  ;;  %v9450_v21 = vrot.slane %v16684_v6, 2 }
 0x600   : > { %12723 = vmatmul.mubr.msk.bf16.gmra.mrb[60].mxu0 %vm3146_vm12, %v8257_v9  ;;  %v17724_v9 = vld [vmem:[#allocation63_spill] sm:$0xff] }
 0x601   : > { %12726 = vmatprep.mubr.msk.bf16.mxu0 %vm3146_vm12, %v8259_v59  ;;  %v8715_v59 = vsel %vm1523_vm4, %v17724_v9, %v8714_v40  ;;  %v9456_v40 = vrot.slane %v16700_v53, 2  ;;  %v9462_v53 = vrot.slane %v16724_v42, 2 }
 0x608   : > { %12727 = vmatmul.mubr.msk.bf16.gmra.mrb[64].mxu0 %vm3146_vm12, %v8261_v60  ;;  %v17728_v60 = vld [vmem:[#allocation68_spill] sm:$0xff] }
 0x609   : > { %12730 = vmatprep.mubr.msk.bf16.mxu0 %vm3146_vm12, %v8263_v26  ;;  %v17730_v26 = vld [vmem:[#allocation71_spill] sm:$0xff] }
 0x610   : > { %12731 = vmatmul.mubr.msk.bf16.gmra.mrb[68].mxu0 %vm3146_vm12, %v8265_v3  ;;  %v17732_v3 = vld [vmem:[#allocation74_spill] sm:$0xff] }
 0x611   : > { %12736 = vmatprep.mubr.msk.bf16.mxu0 %vm3146_vm12, %v17706_v1  ;;  %v17733_v1 = vld [vmem:[#allocation75_spill] sm:$0xff] }
 0x618   : > { %12737 = vmatmul.mubr.msk.bf16.vlgmr.msra.gmra.mrb[36].mxu0 %vm3146_vm12, %v17707_v38  ;;  %v17735_v38 = vld [vmem:[#allocation77_spill] sm:$0xff] }
 0x619   : > { %12773 = vmatpush3.bf16.msra.mxu0 %v13777_v10  ;;  %12740 = vmatprep.mubr.msk.bf16.mxu0 %vm3146_vm12, %v17708_v44  ;;  %v17714_v10 = vld [vmem:[#allocation51_spill] sm:$0xff]  ;;  %v17736_v44 = vld [vmem:[#allocation78_spill] sm:$0xff] }
 0x61a   : > { %12810 = vmatprep.subr.bf16.mxu0 %v13780_v33 }
 0x620   : > { %12741 = vmatmul.mubr.msk.bf16.gmra.mrb[40].mxu0 %vm3146_vm12, %v17709_v63  ;;  %v17737_v63 = vld [vmem:[#allocation79_spill] sm:$0xff] }
 0x621   : > { %12744 = vmatprep.mubr.msk.bf16.mxu0 %vm3146_vm12, %v17710_v30  ;;  %v17738_v30 = vld [vmem:[#allocation80_spill] sm:$0xff] }
 0x628   : > { %12745 = vmatmul.mubr.msk.bf16.gmra.mrb[44].mxu0 %vm3146_vm12, %v17711_v5  ;;  %v17739_v5 = vld [vmem:[#allocation81_spill] sm:$0xff] }
 0x629   : > { %12748 = vmatprep.mubr.msk.bf16.mxu0 %vm3146_vm12, %v17712_v58  ;;  %v17740_v58 = vld [vmem:[#allocation82_spill] sm:$0xff] }
 0x630   : > { %12749 = vmatmul.mubr.msk.bf16.gmra.mrb[48].mxu0 %vm3146_vm12, %v17713_v7  ;;  %v17741_v7 = vld [vmem:[#allocation83_spill] sm:$0xff] }
 0x631   : > { %12752 = vmatprep.mubr.msk.bf16.mxu0 %vm3146_vm12, %v17714_v10  ;;  %v9440_v10 = vrot.slane %v16661_v34, 2 }
 0x638   : > { %12753 = vmatmul.mubr.msk.bf16.gmra.mrb[52].mxu0 %vm3146_vm12, %v17715_v36  ;;  %v17742_v36 = vld [vmem:[#allocation85_spill] sm:$0xff] }
 0x639   : > { %12756 = vmatprep.mubr.msk.bf16.mxu0 %vm3146_vm12, %v17716_v54  ;;  %v9439_v54 = vrot.slane %v17742_v36, 2  ;;  %v9918_v36 = vshrl.u32 %v16842_v47, 16 }
 0x640   : > { %12757 = vmatmul.mubr.msk.bf16.gmra.mrb[56].mxu0 %vm3146_vm12, %v17717_v45  ;;  %v17743_v45 = vld [vmem:[#allocation84_spill] sm:$0xff] }
 0x641   : > { %12760 = vmatprep.mubr.msk.bf16.mxu0 %vm3146_vm12, %v17718_v55  ;;  %v9441_v55 = vsel %vm4814_vm15, %v9439_v54, %v9440_v10  ;;  %v9921_v54 = vshll.u32 %v16842_v47, 16  ;;  %v17763_v47 = vld [vmem:[#allocation105_spill] sm:$0xff] }
 0x648   : > { %12761 = vmatmul.mubr.msk.bf16.gmra.mrb[60].mxu0 %vm3146_vm12, %v17719_v18  ;;  %v9442_v18 = vrot.slane %v16663_v19, 2  ;;  %v9448_v19 = vrot.slane %v16674_v20, 2  ;;  %v9454_v20 = vrot.slane %v16693_v56, 2 }
 0x649   : > { %12764 = vmatprep.mubr.msk.bf16.mxu0 %vm3146_vm12, %v17720_v8  ;;  %v9444_v8 = vrot.slane %v16665_v25, 2 }
 0x64a   : > { %v9443_v46 = vsel %vm4814_vm15, %v9440_v10, %v9442_v18  ;;  %v9449_v32 = vsel %vm4814_vm15, %v9446_v15, %v9448_v19  ;;  %v9457_v6 = vsel %vm4814_vm15, %v9454_v20, %v9456_v40  ;;  %v17755_v10 = vld [vmem:[#allocation97_spill] sm:$0xff] }
 0x64b   : > { %v9445_v34 = vsel %vm4814_vm15, %v9442_v18, %v9444_v8  ;;  %v9447_v25 = vsel %vm4814_vm15, %v9444_v8, %v9446_v15  ;;  %v17764_v8 = vld [vmem:[#allocation106_spill] sm:$0xff] }
 0x64c   : > { %v17768_v15 = vld [vmem:[#allocation110_spill] sm:$0xff] }
 0x650   : > { %12765 = vmatmul.mubr.msk.bf16.gmra.mrb[64].mxu0 %vm3146_vm12, %v17722_v37  ;;  %v9452_v37 = vrot.slane %v16689_v62, 2  ;;  %v9458_v62 = vrot.slane %v16708_v51, 2 }
 0x651   : > { %12768 = vmatprep.mubr.msk.bf16.mxu0 %vm3146_vm12, %v17723_v43  ;;  %v9451_v43 = vsel %vm4814_vm15, %v9448_v19, %v9450_v21  ;;  %v17208_v19 = vld [vmem:[%s17334_s7] ss:$0 sm:$0xff] }
 0x652   : > { %v9453_v39 = vsel %vm4814_vm15, %v9450_v21, %v9452_v37  ;;  %v9455_v9 = vsel %vm4814_vm15, %v9452_v37, %v9454_v20 }
 0x658   : > { %12769 = vmatmul.mubr.msk.bf16.gmra.mrb[68].mxu0 %vm3146_vm12, %v8715_v59  ;;  %v9460_v59 = vrot.slane %v16714_v28, 2  ;;  %v9466_v28 = vrot.slane %v16739_v12, 2 }
 0x659   : > { %12774 = vmatprep.mubr.msk.bf16.mxu0 %vm3146_vm12, %v17725_v27  ;;  %v9459_v27 = vsel %vm4814_vm15, %v9456_v40, %v9458_v62 }
 0x65a   : > { %v9461_v56 = vsel %vm4814_vm15, %v9458_v62, %v9460_v59 }
 0x660   : > { %12775 = vmatmul.mubr.msk.bf16.vlgmr.msra.gmra.mrb[36].mxu0 %vm3146_vm12, %v17726_v13  ;;  %v9463_v13 = vsel %vm4814_vm15, %v9460_v59, %v9462_v53 }
 0x661   : > { %12811 = vmatpush3.bf16.msra.mxu0 %v13780_v33  ;;  %12778 = vmatprep.mubr.msk.bf16.mxu0 %vm3146_vm12, %v17727_v41  ;;  %v17734_v33 = vld [vmem:[#allocation76_spill] sm:$0xff]  ;;  %v9468_v41 = vrot.slane %v16748_v23, 2 }
 0x662   : > { %12848 = vmatprep.subr.bf16.mxu0 %v13783_v50 }
 0x663   : > { %v9469_v42 = vsel %vm4814_vm15, %v9466_v28, %v9468_v41 }
 0x668   : > { %12779 = vmatmul.mubr.msk.bf16.gmra.mrb[40].mxu0 %vm3146_vm12, %v17728_v60 }
 0x669   : > { %12782 = vmatprep.mubr.msk.bf16.mxu0 %vm3146_vm12, %v17729_v49  ;;  %v9472_v49 = vrot.slane %v16764_v57, 2  ;;  %v17746_v57 = vld [vmem:[#allocation88_spill] sm:$0xff] }
 0x670   : > { %12783 = vmatmul.mubr.msk.bf16.gmra.mrb[44].mxu0 %vm3146_vm12, %v17730_v26 }
 0x671   : > { %12786 = vmatprep.mubr.msk.bf16.mxu0 %vm3146_vm12, %v17731_v48  ;;  %v13800_v48 = vld [vmem:[#allocation3 + $0xa0] ss:$0 sps:$4 sm:$0x33]  }
 0x672   : > { %v9474_v23 = vrot.slane %v13800_v48, 2 }
 0x678   : > { %12787 = vmatmul.mubr.msk.bf16.gmra.mrb[48].mxu0 %vm3146_vm12, %v17732_v3  ;;  %v9475_v3 = vsel %vm4814_vm15, %v9472_v49, %v9474_v23 }
 0x679   : > { %12790 = vmatprep.mubr.msk.bf16.mxu0 %vm3146_vm12, %v17733_v1  ;;  %v17744_v1 = vld [vmem:[#allocation87_spill] sm:$0xff] }
 0x680   : > { %12791 = vmatmul.mubr.msk.bf16.gmra.mrb[52].mxu0 %vm3146_vm12, %v17734_v33  ;;  %v17747_v33 = vld [vmem:[#allocation89_spill] sm:$0xff] }
 0x681   : > { %12794 = vmatprep.mubr.msk.bf16.mxu0 %vm3146_vm12, %v17735_v38  ;;  %v17748_v38 = vld [vmem:[#allocation90_spill] sm:$0xff] }
 0x688   : > { %12795 = vmatmul.mubr.msk.bf16.gmra.mrb[56].mxu0 %vm3146_vm12, %v17736_v44  ;;  %v17749_v44 = vld [vmem:[#allocation91_spill] sm:$0xff] }
 0x689   : > { %12798 = vmatprep.mubr.msk.bf16.mxu0 %vm3146_vm12, %v17737_v63  ;;  %v17750_v63 = vld [vmem:[#allocation92_spill] sm:$0xff] }
 0x690   : > { %12799 = vmatmul.mubr.msk.bf16.gmra.mrb[60].mxu0 %vm3146_vm12, %v17738_v30  ;;  %v17751_v30 = vld [vmem:[#allocation93_spill] sm:$0xff] }
 0x691   : > { %12802 = vmatprep.mubr.msk.bf16.mxu0 %vm3146_vm12, %v17739_v5  ;;  %v17752_v5 = vld [vmem:[#allocation94_spill] sm:$0xff] }
 0x698   : > { %12803 = vmatmul.mubr.msk.bf16.gmra.mrb[64].mxu0 %vm3146_vm12, %v17740_v58  ;;  %v17753_v58 = vld [vmem:[#allocation95_spill] sm:$0xff] }
 0x699   : > { %12806 = vmatprep.mubr.msk.bf16.mxu0 %vm3146_vm12, %v17741_v7  ;;  %v17754_v7 = vld [vmem:[#allocation96_spill] sm:$0xff] }
 0x6a0   : > { %12807 = vmatmul.mubr.msk.bf16.gmra.mrb[68].mxu0 %vm3146_vm12, %v17743_v45  ;;  %v9920_v45 = vrot.slane %v9918_v36, 2 }
 0x6a1   : > { %12812 = vmatprep.mubr.msk.bf16.mxu0 %vm3146_vm12, %v9441_v55  ;;  %v9923_v55 = vrot.slane %v9921_v54, 3 }
 0x6a8   : > { %12813 = vmatmul.mubr.msk.bf16.vlgmr.msra.gmra.mrb[36].mxu0 %vm3146_vm12, %v9443_v46  ;;  %v17766_v46 = vld [vmem:[#allocation108_spill] sm:$0xff] }
 0x6a9   : > { %12849 = vmatpush3.bf16.msra.mxu0 %v13783_v50  ;;  %12816 = vmatprep.mubr.msk.bf16.mxu0 %vm3146_vm12, %v9445_v34  ;;  %v9464_v50 = vrot.slane %v16730_v17, 2  ;;  %v9470_v17 = vrot.slane %v16757_v22, 2  ;;  %v17745_v22 = vld [vmem:[#allocation86_spill] sm:$0xff]  ;;  %v17767_v34 = vld [vmem:[#allocation109_spill] sm:$0xff] }
 0x6aa   : > { %12886 = vmatprep.subr.bf16.mxu0 %v13801_v2 }
 0x6ab   : > { %v9465_v51 = vsel %vm4814_vm15, %v9462_v53, %v9464_v50  ;;  %v9467_v60 = vsel %vm4814_vm15, %v9464_v50, %v9466_v28  ;;  %v9471_v26 = vsel %vm4814_vm15, %v9468_v41, %v9470_v17  ;;  %v9473_v12 = vsel %vm4814_vm15, %v9470_v17, %v9472_v49 }
 0x6b0   : > { %12817 = vmatmul.mubr.msk.bf16.gmra.mrb[40].mxu0 %vm3146_vm12, %v9447_v25 }
 0x6b1   : > { %12820 = vmatprep.mubr.msk.bf16.mxu0 %vm3146_vm12, %v9449_v32 }
 0x6b8   : > { %12821 = vmatmul.mubr.msk.bf16.gmra.mrb[44].mxu0 %vm3146_vm12, %v9451_v43 }
 0x6b9   : > { %12824 = vmatprep.mubr.msk.bf16.mxu0 %vm3146_vm12, %v9453_v39 }
 0x6c0   : > { %12825 = vmatmul.mubr.msk.bf16.gmra.mrb[48].mxu0 %vm3146_vm12, %v9455_v9 }
 0x6c1   : > { %12828 = vmatprep.mubr.msk.bf16.mxu0 %vm3146_vm12, %v9457_v6 }
 0x6c8   : > { %12829 = vmatmul.mubr.msk.bf16.gmra.mrb[52].mxu0 %vm3146_vm12, %v9459_v27 }
 0x6c9   : > { %12832 = vmatprep.mubr.msk.bf16.mxu0 %vm3146_vm12, %v9461_v56 }
 0x6d0   : > { %12833 = vmatmul.mubr.msk.bf16.gmra.mrb[56].mxu0 %vm3146_vm12, %v9463_v13 }
 0x6d1   : > { %12836 = vmatprep.mubr.msk.bf16.mxu0 %vm3146_vm12, %v9465_v51 }
 0x6d8   : > { %12837 = vmatmul.mubr.msk.bf16.gmra.mrb[60].mxu0 %vm3146_vm12, %v9467_v60 }
 0x6d9   : > { %12840 = vmatprep.mubr.msk.bf16.mxu0 %vm3146_vm12, %v9469_v42 }
 0x6e0   : > { %12841 = vmatmul.mubr.msk.bf16.gmra.mrb[64].mxu0 %vm3146_vm12, %v9471_v26 }
 0x6e1   : > { %12844 = vmatprep.mubr.msk.bf16.mxu0 %vm3146_vm12, %v9473_v12 }
 0x6e8   : > { %12845 = vmatmul.mubr.msk.bf16.gmra.mrb[68].mxu0 %vm3146_vm12, %v9475_v3 }
 0x6e9   : > { %12850 = vmatprep.mubr.msk.bf16.mxu0 %vm3146_vm12, %v17744_v1 }
 0x6f0   : > { %12851 = vmatmul.mubr.msk.bf16.vlgmr.msra.gmra.mrb[36].mxu0 %vm3146_vm12, %v17745_v22 }
 0x6f1   : > { %12887 = vmatpush3.bf16.msra.mxu0 %v13801_v2  ;;  %12854 = vmatprep.mubr.msk.bf16.mxu0 %vm3146_vm12, %v17746_v57  ;;  %v17765_v2 = vld [vmem:[#allocation107_spill] sm:$0xff] }
 0x6f8   : > { %12855 = vmatmul.mubr.msk.bf16.gmra.mrb[40].mxu0 %vm3146_vm12, %v17747_v33 }
 0x6f9   : > { %12858 = vmatprep.mubr.msk.bf16.mxu0 %vm3146_vm12, %v17748_v38 }
 0x700   : > { %12859 = vmatmul.mubr.msk.bf16.gmra.mrb[44].mxu0 %vm3146_vm12, %v17749_v44 }
 0x701   : > { %12862 = vmatprep.mubr.msk.bf16.mxu0 %vm3146_vm12, %v17750_v63 }
 0x708   : > { %12863 = vmatmul.mubr.msk.bf16.gmra.mrb[48].mxu0 %vm3146_vm12, %v17751_v30 }
 0x709   : > { %12866 = vmatprep.mubr.msk.bf16.mxu0 %vm3146_vm12, %v17752_v5 }
 0x710   : > { %12867 = vmatmul.mubr.msk.bf16.gmra.mrb[52].mxu0 %vm3146_vm12, %v17753_v58 }
 0x711   : > { %12870 = vmatprep.mubr.msk.bf16.mxu0 %vm3146_vm12, %v16773_v0  ;;  %v9924_v0 = vor.u32 %v9923_v55, %v9920_v45 }
 0x713   : > { %v9925_v18 = vsel %vm5575_vm0, %v16805_v24, %v9924_v0  ;;  %v17760_v24 = vld [vmem:[#allocation102_spill] sm:$0xff] }
 0x718   : > { %12871 = vmatmul.mubr.msk.bf16.gmra.mrb[56].mxu0 %vm3146_vm12, %v17754_v7 }
 0x719   : > { %12874 = vmatprep.mubr.msk.bf16.mxu0 %vm3146_vm12, %v17755_v10 }
 0x720   : > { %12875 = vmatmul.mubr.msk.bf16.gmra.mrb[60].mxu0 %vm3146_vm12, %v16794_v16  ;;  %v17757_v16 = vld [vmem:[#allocation99_spill] sm:$0xff] }
 0x721   : > { %12878 = vmatprep.mubr.msk.bf16.mxu0 %vm3146_vm12, %v16798_v11  ;;  %v17756_v11 = vld [vmem:[#allocation98_spill] sm:$0xff] }
 0x728   : > { %12879 = vmatmul.mubr.msk.bf16.gmra.mrb[64].mxu0 %vm3146_vm12, %v16803_v61  ;;  %v17758_v61 = vld [vmem:[#allocation100_spill] sm:$0xff] }
 0x729   : > { %12882 = vmatprep.mubr.msk.bf16.mxu0 %vm3146_vm12, %v16826_v4  ;;  %v17759_v4 = vld [vmem:[#allocation101_spill] sm:$0xff] }
 0x730   : > { %12883 = vmatmul.mubr.msk.bf16.gmra.mrb[68].mxu0 %vm3146_vm12, %v9925_v18 }
 0x731   : > { %12888 = vmatprep.mubr.msk.bf16.mxu0 %vm3146_vm12, %v16813_v35  ;;  %v17761_v35 = vld [vmem:[#allocation103_spill] sm:$0xff] }
 0x738   : > { %12889 = vmatmul.mubr.msk.bf16.vlgmr.msra.gmra.mrb[36].mxu0 %vm3146_vm12, %v16816_v31  ;;  %v17762_v31 = vld [vmem:[#allocation104_spill] sm:$0xff] }
 0x739   : > { %12892 = vmatprep.mubr.msk.bf16.mxu0 %vm3146_vm12, %v17756_v11 }
 0x740   : > { %12893 = vmatmul.mubr.msk.bf16.gmra.mrb[40].mxu0 %vm3146_vm12, %v17757_v16 }
 0x741   : > { %12896 = vmatprep.mubr.msk.bf16.mxu0 %vm3146_vm12, %v17758_v61 }
 0x748   : > { %12897 = vmatmul.mubr.msk.bf16.gmra.mrb[44].mxu0 %vm3146_vm12, %v17759_v4 }
 0x749   : > { %12900 = vmatprep.mubr.msk.bf16.mxu0 %vm3146_vm12, %v17760_v24 }
 0x750   : > { %12901 = vmatmul.mubr.msk.bf16.gmra.mrb[48].mxu0 %vm3146_vm12, %v17761_v35 }
 0x751   : > { %12904 = vmatprep.mubr.msk.bf16.mxu0 %vm3146_vm12, %v17762_v31 }
 0x758   : > { %12905 = vmatmul.mubr.msk.bf16.gmra.mrb[52].mxu0 %vm3146_vm12, %v17763_v47 }
 0x759   : > { %12908 = vmatprep.mubr.msk.bf16.mxu0 %vm3146_vm12, %v17764_v8 }
 0x760   : > { %12909 = vmatmul.mubr.msk.bf16.gmra.mrb[56].mxu0 %vm3146_vm12, %v17765_v2 }
 0x761   : > { %12912 = vmatprep.mubr.msk.bf16.mxu0 %vm3146_vm12, %v17766_v46 }
 0x768   : > { %12913 = vmatmul.mubr.msk.bf16.gmra.mrb[60].mxu0 %vm3146_vm12, %v17767_v34 }
 0x769   : > { %12916 = vmatprep.mubr.msk.bf16.mxu0 %vm3146_vm12, %v17768_v15 }
 0x770   : > { %12917 = vmatmul.mubr.msk.bf16.gmra.mrb[64].mxu0 %vm3146_vm12, %v16888_v14 }
 0x771   : > { %12920 = vmatprep.mubr.msk.bf16.mxu0 %vm3146_vm12, %v16891_v52 }
 0x778   : > { %12921 = vmatmul.mubr.msk.bf16.gmra.mrb[68].mxu0 %vm3146_vm12, %v16894_v29 }
 0x80b   : > { %v12890_v25 = vpop.f32.mrb[36].mxu0 }
 0x80c   : > { %v10525_v32 = vadd.f32 %v12890_v25, %v17208_v19  ;;  %v10337_v21 = vpop.f32.mrb[37].mxu0 }
 0x80d   : > { %v10523_v37 = vadd.f32 %v17208_v19, %v10337_v21  ;;  %v12891_v43 = vpop.f32.mrb[38].mxu0 }
 0x80e   : > { %v10561_v14 = vmax.f32 %v10525_v32, 0.0  ;;  %v10526_v39 = vadd.f32 %v12891_v43, %v17208_v19  ;;  %v10340_v52 = vpop.f32.mrb[39].mxu0 }
 0x80f   : > { %v10559_v29 = vmax.f32 %v10523_v37, 0.0  ;;  %v10524_v20 = vadd.f32 %v17208_v19, %v10340_v52 }
 0x810   : > { %v11636_v40 = vpack.c.bf16 %v10561_v14, %v10561_v14  ;;  %v10562_v9 = vmax.f32 %v10526_v39, 0.0 }
 0x811   : > { %v11634_v6 = vpack.c.bf16 %v10559_v29, %v10559_v29  ;;  %v10560_v62 = vmax.f32 %v10524_v20, 0.0 }
 0x812   : > { %10741 = vst.msk [vmem:[%s17217_s21 + $0x8] sm:$0xf] %vm2259_vm5, %v11636_v40  ;;  %v11637_v59 = vpack.c.bf16 %v10562_v9, %v10562_v9 }
 0x813   : > { %10739 = vst.msk [vmem:[%s17217_s21] sm:$0xf] %vm2259_vm5, %v11634_v6  ;;  %v11635_v27 = vpack.c.bf16 %v10560_v62, %v10560_v62  ;;  %v12894_v56 = vpop.f32.mrb[40].mxu0 }
 0x814   : > { %10742 = vst.msk [vmem:[%s17217_s21 + $0xc] sm:$0xf] %vm2259_vm5, %v11637_v59  ;;  %v10529_v53 = vadd.f32 %v12894_v56, %v17208_v19  ;;  %v10353_v50 = vpop.f32.mrb[41].mxu0 }
 0x815   : > { %10740 = vst.msk [vmem:[%s17217_s21 + $0x4] sm:$0xf] %vm2259_vm5, %v11635_v27  ;;  %v10527_v13 = vadd.f32 %v17208_v19, %v10353_v50  ;;  %v12895_v51 = vpop.f32.mrb[42].mxu0 }
 0x816   : > { %v10565_v28 = vmax.f32 %v10529_v53, 0.0  ;;  %v10530_v41 = vadd.f32 %v12895_v51, %v17208_v19  ;;  %v10356_v60 = vpop.f32.mrb[43].mxu0 }
 0x817   : > { %v10563_v42 = vmax.f32 %v10527_v13, 0.0  ;;  %v10528_v17 = vadd.f32 %v17208_v19, %v10356_v60 }
 0x818   : > { %v11640_v49 = vpack.c.bf16 %v10565_v28, %v10565_v28  ;;  %v10566_v26 = vmax.f32 %v10530_v41, 0.0 }
 0x819   : > { %v11638_v48 = vpack.c.bf16 %v10563_v42, %v10563_v42  ;;  %v10564_v12 = vmax.f32 %v10528_v17, 0.0 }
 0x81a   : > { %10745 = vst.msk [vmem:[%s17217_s21 + $0x18] sm:$0xf] %vm2259_vm5, %v11640_v49  ;;  %v11641_v23 = vpack.c.bf16 %v10566_v26, %v10566_v26 }
 0x81b   : > { %10743 = vst.msk [vmem:[%s17217_s21 + $0x10] sm:$0xf] %vm2259_vm5, %v11638_v48  ;;  %v11639_v3 = vpack.c.bf16 %v10564_v12, %v10564_v12  ;;  %v12898_v1 = vpop.f32.mrb[44].mxu0 }
 0x81c   : > { %10746 = vst.msk [vmem:[%s17217_s21 + $0x1c] sm:$0xf] %vm2259_vm5, %v11641_v23  ;;  %v10533_v22 = vadd.f32 %v12898_v1, %v17208_v19  ;;  %v10369_v57 = vpop.f32.mrb[45].mxu0 }
 0x81d   : > { %10744 = vst.msk [vmem:[%s17217_s21 + $0x14] sm:$0xf] %vm2259_vm5, %v11639_v3  ;;  %v10531_v33 = vadd.f32 %v17208_v19, %v10369_v57  ;;  %v12899_v38 = vpop.f32.mrb[46].mxu0 }
 0x81e   : > { %v10569_v44 = vmax.f32 %v10533_v22, 0.0  ;;  %v10534_v63 = vadd.f32 %v12899_v38, %v17208_v19  ;;  %v10372_v30 = vpop.f32.mrb[47].mxu0 }
 0x81f   : > { %v10567_v5 = vmax.f32 %v10531_v33, 0.0  ;;  %v10532_v58 = vadd.f32 %v17208_v19, %v10372_v30 }
 0x820   : > { %v11644_v7 = vpack.c.bf16 %v10569_v44, %v10569_v44  ;;  %v10570_v10 = vmax.f32 %v10534_v63, 0.0 }
 0x821   : > { %v11642_v36 = vpack.c.bf16 %v10567_v5, %v10567_v5  ;;  %v10568_v54 = vmax.f32 %v10532_v58, 0.0 }
 0x822   : > { %10749 = vst.msk [vmem:[%s17217_s21 + $0x28] sm:$0xf] %vm2259_vm5, %v11644_v7  ;;  %v11645_v45 = vpack.c.bf16 %v10570_v10, %v10570_v10 }
 0x823   : > { %10747 = vst.msk [vmem:[%s17217_s21 + $0x20] sm:$0xf] %vm2259_vm5, %v11642_v36  ;;  %v11643_v55 = vpack.c.bf16 %v10568_v54, %v10568_v54  ;;  %v12902_v0 = vpop.f32.mrb[48].mxu0 }
 0x824   : > { %10750 = vst.msk [vmem:[%s17217_s21 + $0x2c] sm:$0xf] %vm2259_vm5, %v11645_v45  ;;  %v10537_v18 = vadd.f32 %v12902_v0, %v17208_v19  ;;  %v10385_v11 = vpop.f32.mrb[49].mxu0 }
 0x825   : > { %10748 = vst.msk [vmem:[%s17217_s21 + $0x24] sm:$0xf] %vm2259_vm5, %v11643_v55  ;;  %v10535_v16 = vadd.f32 %v17208_v19, %v10385_v11  ;;  %v12903_v61 = vpop.f32.mrb[50].mxu0 }
 0x826   : > { %v10573_v4 = vmax.f32 %v10537_v18, 0.0  ;;  %v10538_v24 = vadd.f32 %v12903_v61, %v17208_v19  ;;  %v10388_v35 = vpop.f32.mrb[51].mxu0 }
 0x827   : > { %v10571_v31 = vmax.f32 %v10535_v16, 0.0  ;;  %v10536_v47 = vadd.f32 %v17208_v19, %v10388_v35 }
 0x828   : > { %v11648_v8 = vpack.c.bf16 %v10573_v4, %v10573_v4  ;;  %v10574_v2 = vmax.f32 %v10538_v24, 0.0 }
 0x829   : > { %v11646_v46 = vpack.c.bf16 %v10571_v31, %v10571_v31  ;;  %v10572_v34 = vmax.f32 %v10536_v47, 0.0 }
 0x82a   : > { %10753 = vst.msk [vmem:[%s17217_s21 + $0x38] sm:$0xf] %vm2259_vm5, %v11648_v8  ;;  %v11649_v15 = vpack.c.bf16 %v10574_v2, %v10574_v2 }
 0x82b   : > { %10751 = vst.msk [vmem:[%s17217_s21 + $0x30] sm:$0xf] %vm2259_vm5, %v11646_v46  ;;  %v11647_v25 = vpack.c.bf16 %v10572_v34, %v10572_v34  ;;  %v12906_v32 = vpop.f32.mrb[52].mxu0 }
 0x82c   : > { %10754 = vst.msk [vmem:[%s17217_s21 + $0x3c] sm:$0xf] %vm2259_vm5, %v11649_v15  ;;  %v10541_v21 = vadd.f32 %v12906_v32, %v17208_v19  ;;  %v10401_v37 = vpop.f32.mrb[53].mxu0 }
 0x82d   : > { %10752 = vst.msk [vmem:[%s17217_s21 + $0x34] sm:$0xf] %vm2259_vm5, %v11647_v25  ;;  %v10539_v43 = vadd.f32 %v17208_v19, %v10401_v37  ;;  %v12907_v14 = vpop.f32.mrb[54].mxu0 }
 0x82e   : > { %v10577_v39 = vmax.f32 %v10541_v21, 0.0  ;;  %v10542_v52 = vadd.f32 %v12907_v14, %v17208_v19  ;;  %v10404_v29 = vpop.f32.mrb[55].mxu0 }
 0x82f   : > { %v10575_v20 = vmax.f32 %v10539_v43, 0.0  ;;  %v10540_v40 = vadd.f32 %v17208_v19, %v10404_v29 }
 0x830   : > { %v11652_v9 = vpack.c.bf16 %v10577_v39, %v10577_v39  ;;  %v10578_v6 = vmax.f32 %v10542_v52, 0.0 }
 0x831   : > { %v11650_v62 = vpack.c.bf16 %v10575_v20, %v10575_v20  ;;  %v10576_v59 = vmax.f32 %v10540_v40, 0.0 }
 0x832   : > { %10757 = vst.msk [vmem:[%s17217_s21 + $0x48] sm:$0xf] %vm2259_vm5, %v11652_v9  ;;  %v11653_v27 = vpack.c.bf16 %v10578_v6, %v10578_v6 }
 0x833   : > { %10755 = vst.msk [vmem:[%s17217_s21 + $0x40] sm:$0xf] %vm2259_vm5, %v11650_v62  ;;  %v11651_v56 = vpack.c.bf16 %v10576_v59, %v10576_v59  ;;  %v12910_v53 = vpop.f32.mrb[56].mxu0 }
 0x834   : > { %10758 = vst.msk [vmem:[%s17217_s21 + $0x4c] sm:$0xf] %vm2259_vm5, %v11653_v27  ;;  %v10545_v50 = vadd.f32 %v12910_v53, %v17208_v19  ;;  %v10417_v13 = vpop.f32.mrb[57].mxu0 }
 0x835   : > { %10756 = vst.msk [vmem:[%s17217_s21 + $0x44] sm:$0xf] %vm2259_vm5, %v11651_v56  ;;  %v10543_v51 = vadd.f32 %v17208_v19, %v10417_v13  ;;  %v12911_v28 = vpop.f32.mrb[58].mxu0 }
 0x836   : > { %v10581_v41 = vmax.f32 %v10545_v50, 0.0  ;;  %v10546_v60 = vadd.f32 %v12911_v28, %v17208_v19  ;;  %v10420_v42 = vpop.f32.mrb[59].mxu0 }
 0x837   : > { %v10579_v17 = vmax.f32 %v10543_v51, 0.0  ;;  %v10544_v49 = vadd.f32 %v17208_v19, %v10420_v42 }
 0x838   : > { %v11656_v26 = vpack.c.bf16 %v10581_v41, %v10581_v41  ;;  %v10582_v48 = vmax.f32 %v10546_v60, 0.0 }
 0x839   : > { %v11654_v12 = vpack.c.bf16 %v10579_v17, %v10579_v17  ;;  %v10580_v23 = vmax.f32 %v10544_v49, 0.0 }
 0x83a   : > { %10761 = vst.msk [vmem:[%s17217_s21 + $0x58] sm:$0xf] %vm2259_vm5, %v11656_v26  ;;  %v11657_v3 = vpack.c.bf16 %v10582_v48, %v10582_v48 }
 0x83b   : > { %10759 = vst.msk [vmem:[%s17217_s21 + $0x50] sm:$0xf] %vm2259_vm5, %v11654_v12  ;;  %v11655_v1 = vpack.c.bf16 %v10580_v23, %v10580_v23  ;;  %v12914_v22 = vpop.f32.mrb[60].mxu0 }
 0x83c   : > { %10762 = vst.msk [vmem:[%s17217_s21 + $0x5c] sm:$0xf] %vm2259_vm5, %v11657_v3  ;;  %v10549_v57 = vadd.f32 %v12914_v22, %v17208_v19  ;;  %v10433_v33 = vpop.f32.mrb[61].mxu0 }
 0x83d   : > { %10760 = vst.msk [vmem:[%s17217_s21 + $0x54] sm:$0xf] %vm2259_vm5, %v11655_v1  ;;  %v10547_v38 = vadd.f32 %v17208_v19, %v10433_v33  ;;  %v12915_v44 = vpop.f32.mrb[62].mxu0 }
 0x83e   : > { %v10585_v63 = vmax.f32 %v10549_v57, 0.0  ;;  %v10550_v30 = vadd.f32 %v12915_v44, %v17208_v19  ;;  %v10436_v5 = vpop.f32.mrb[63].mxu0 }
 0x83f   : > { %v10583_v58 = vmax.f32 %v10547_v38, 0.0  ;;  %v10548_v7 = vadd.f32 %v17208_v19, %v10436_v5 }
 0x840   : > { %v11660_v10 = vpack.c.bf16 %v10585_v63, %v10585_v63  ;;  %v10586_v36 = vmax.f32 %v10550_v30, 0.0 }
 0x841   : > { %v11658_v54 = vpack.c.bf16 %v10583_v58, %v10583_v58  ;;  %v10584_v45 = vmax.f32 %v10548_v7, 0.0 }
 0x842   : > { %10765 = vst.msk [vmem:[%s17217_s21 + $0x68] sm:$0xf] %vm2259_vm5, %v11660_v10  ;;  %v11661_v55 = vpack.c.bf16 %v10586_v36, %v10586_v36 }
 0x843   : > { %10763 = vst.msk [vmem:[%s17217_s21 + $0x60] sm:$0xf] %vm2259_vm5, %v11658_v54  ;;  %v11659_v0 = vpack.c.bf16 %v10584_v45, %v10584_v45  ;;  %v12918_v18 = vpop.f32.mrb[64].mxu0 }
 0x844   : > { %10766 = vst.msk [vmem:[%s17217_s21 + $0x6c] sm:$0xf] %vm2259_vm5, %v11661_v55  ;;  %v10553_v11 = vadd.f32 %v12918_v18, %v17208_v19  ;;  %v10449_v16 = vpop.f32.mrb[65].mxu0 }
 0x845   : > { %10764 = vst.msk [vmem:[%s17217_s21 + $0x64] sm:$0xf] %vm2259_vm5, %v11659_v0  ;;  %v10551_v61 = vadd.f32 %v17208_v19, %v10449_v16  ;;  %v12919_v4 = vpop.f32.mrb[66].mxu0 }
 0x846   : > { %v10589_v24 = vmax.f32 %v10553_v11, 0.0  ;;  %v10554_v35 = vadd.f32 %v12919_v4, %v17208_v19  ;;  %v10452_v31 = vpop.f32.mrb[67].mxu0 }
 0x847   : > { %v10587_v47 = vmax.f32 %v10551_v61, 0.0  ;;  %v10552_v8 = vadd.f32 %v17208_v19, %v10452_v31 }
 0x848   : > { %v11664_v2 = vpack.c.bf16 %v10589_v24, %v10589_v24  ;;  %v10590_v46 = vmax.f32 %v10554_v35, 0.0 }
 0x849   : > { %v11662_v34 = vpack.c.bf16 %v10587_v47, %v10587_v47  ;;  %v10588_v15 = vmax.f32 %v10552_v8, 0.0 }
 0x84a   : > { %10769 = vst.msk [vmem:[%s17217_s21 + $0x78] sm:$0xf] %vm2259_vm5, %v11664_v2  ;;  %v11665_v25 = vpack.c.bf16 %v10590_v46, %v10590_v46 }
 0x84b   : > { %10767 = vst.msk [vmem:[%s17217_s21 + $0x70] sm:$0xf] %vm2259_vm5, %v11662_v34  ;;  %v11663_v32 = vpack.c.bf16 %v10588_v15, %v10588_v15  ;;  %v12922_v21 = vpop.f32.mrb[68].mxu0 }
 0x84c   : > { %10770 = vst.msk [vmem:[%s17217_s21 + $0x7c] sm:$0xf] %vm2259_vm5, %v11665_v25  ;;  %v10557_v37 = vadd.f32 %v12922_v21, %v17208_v19  ;;  %v10465_v43 = vpop.f32.mrb[69].mxu0 }
 0x84d   : > { %10768 = vst.msk [vmem:[%s17217_s21 + $0x74] sm:$0xf] %vm2259_vm5, %v11663_v32  ;;  %v10555_v14 = vadd.f32 %v17208_v19, %v10465_v43  ;;  %v12923_v39 = vpop.f32.mrb[70].mxu0 }
 0x84e   : > { %v10593_v52 = vmax.f32 %v10557_v37, 0.0  ;;  %v10558_v29 = vadd.f32 %v12923_v39, %v17208_v19  ;;  %v10468_v20 = vpop.f32.mrb[71].mxu0 }
 0x84f   : > { %v10591_v40 = vmax.f32 %v10555_v14, 0.0  ;;  %v10556_v9 = vadd.f32 %v17208_v19, %v10468_v20 }
 0x850   : > { %v11668_v6 = vpack.c.bf16 %v10593_v52, %v10593_v52  ;;  %v10594_v62 = vmax.f32 %v10558_v29, 0.0 }
 0x851   : > { %v11666_v59 = vpack.c.bf16 %v10591_v40, %v10591_v40  ;;  %v10592_v27 = vmax.f32 %v10556_v9, 0.0 }
 0x852   : > { %10773 = vst.msk [vmem:[%s17217_s21 + $0x88] sm:$0xf] %vm2259_vm5, %v11668_v6  ;;  %v11669_v56 = vpack.c.bf16 %v10594_v62, %v10594_v62 }
 0x853   : > { %10771 = vst.msk [vmem:[%s17217_s21 + $0x80] sm:$0xf] %vm2259_vm5, %v11666_v59  ;;  %v11667_v53 = vpack.c.bf16 %v10592_v27, %v10592_v27 }
 0x854   : > { %10774 = vst.msk [vmem:[%s17217_s21 + $0x8c] sm:$0xf] %vm2259_vm5, %v11669_v56 }
 0x855   : > { %10772 = vst.msk [vmem:[%s17217_s21 + $0x84] sm:$0xf] %vm2259_vm5, %v11667_v53 }
 0x856 PF: > { %s18_s27 = sadd.s32 1, %s13834_s27  }
 0x857   : > { %p15_p4 = scmp.ge.s32.totalorder %s18_s27, 4  }
 0x859   :  { %17 = sbr.rel (!%p15_p4) target bundleno = 1 (0x1), region = 101 }

</bundles_post_ra>
